<compile_context>
chip_gen: v6e
topology: v6e:2x2x1
jax: 0.10.0
libtpu: 0.0.40
codegen_flags: <defaults>
</compile_context>

<pallas_src>
import math

import jax
import jax.numpy as jnp
import numpy as np
from jax import lax
from jax.experimental import pallas as pl
from jax.experimental.pallas import tpu as pltpu


# ----------------------------------------------------------------------------
# Recurrent kernel: both LSTM layers, one chunk of TC timesteps per grid step.
# ----------------------------------------------------------------------------
def lstm2_recurrent_kernel(x_ref, wih1_ref, b1_ref, whh1_ref, w2_ref, b2_ref,
                           out_ref, g1_buf, h12, c1, c2):
    Bp, Hp = c1.shape
    TC = out_ref.shape[0]
    mm_dtype = whh1_ref.dtype

    @pl.when(pl.program_id(0) == 0)
    def _init():
        h12[...] = jnp.zeros_like(h12)   # [h1 | h2], stored in matmul dtype
        c1[...] = jnp.zeros_like(c1)
        c2[...] = jnp.zeros_like(c2)

    # ---- Chunk-parallel layer-0 input projection: one big matmul with
    # M = TC*Bp (uses the MXU well), bias added once per chunk.  Result lives
    # in VMEM scratch; no HBM roundtrip of the 4Hp-wide gate preactivations.
    g1_buf[...] = (
        jnp.dot(x_ref[...].astype(mm_dtype), wih1_ref[...],
                preferred_element_type=jnp.float32)
        + b1_ref[...])

    # Hoisted bias broadcast for layer 1 (not CSE'd if left inside the loop).
    b2_full = jnp.broadcast_to(b2_ref[...], (Bp, 4 * Hp))

    def gates_to_hc(gates, c_prev):
        # PyTorch gate order [i, f, g, o]; Hp is a multiple of 128 so these
        # lane slices are vreg-aligned (no relayout on the serial path).
        i = jax.nn.sigmoid(gates[:, 0 * Hp:1 * Hp])
        f = jax.nn.sigmoid(gates[:, 1 * Hp:2 * Hp])
        g = jnp.tanh(gates[:, 2 * Hp:3 * Hp])
        o = jax.nn.sigmoid(gates[:, 3 * Hp:4 * Hp])
        c_new = f * c_prev + i * g
        h_new = o * jnp.tanh(c_new)
        return h_new, c_new

    def step(tt, carry):
        # ---- layer 0: only h1 @ W_hh1 is serial (input term precomputed).
        row = pl.multiple_of(tt * Bp, Bp)
        gates1 = (g1_buf[pl.ds(row, Bp), :]
                  + jnp.dot(h12[:, :Hp], whh1_ref[...],
                            preferred_element_type=jnp.float32))
        h1_new, c1_new = gates_to_hc(gates1, c1[...])
        c1[...] = c1_new
        h12[:, :Hp] = h1_new.astype(mm_dtype)      # in-place: no concat copy

        # ---- layer 1: single fused matmul over [h1_new, h2_prev] (= h12).
        gates2 = (jnp.dot(h12[...], w2_ref[...],
                          preferred_element_type=jnp.float32)
                  + b2_full)
        h2_new, c2_new = gates_to_hc(gates2, c2[...])
        c2[...] = c2_new
        out_ref[tt] = h2_new.astype(out_ref.dtype)
        h12[:, Hp:] = h2_new.astype(mm_dtype)
        return carry

    # Full unroll only for small Hp; partial unroll at production sizes.
    unroll = True if Hp <= 512 else 8
    lax.fori_loop(0, TC, step, 0, unroll=unroll)


# ----------------------------------------------------------------------------
# Padding helpers (gate-blocked layout: columns are [i | f | g | o], each Hp wide)
# ----------------------------------------------------------------------------
def _round_up(n, m):
    return (n + m - 1) // m * m


def _pad_gate_cols(w, H, Hp):
    """(in_dim, 4*H) -> (in_dim, 4*Hp): zero-pad each gate block separately."""
    in_dim = w.shape[0]
    w4 = w.reshape(in_dim, 4, H)
    w4 = jnp.pad(w4, ((0, 0), (0, 0), (0, Hp - H)))
    return w4.reshape(in_dim, 4 * Hp)


def _pad_rows(w, rows_p):
    return jnp.pad(w, ((0, rows_p - w.shape[0]), (0, 0)))


def prepare_padded_params(params, H, Hp, matmul_dtype):
    wih1, whh1, b1, wih2, whh2, b2 = params
    wih1_p = _pad_gate_cols(wih1, H, Hp).astype(matmul_dtype)                  # (E, 4Hp)
    whh1_p = _pad_rows(_pad_gate_cols(whh1, H, Hp), Hp).astype(matmul_dtype)   # (Hp, 4Hp)
    b1_p = _pad_gate_cols(b1, H, Hp)                                           # (1, 4Hp) f32
    w2_p = jnp.concatenate(                                                    # (2Hp, 4Hp)
        [_pad_rows(_pad_gate_cols(wih2, H, Hp), Hp),
         _pad_rows(_pad_gate_cols(whh2, H, Hp), Hp)], axis=0).astype(matmul_dtype)
    b2_p = _pad_gate_cols(b2, H, Hp)                                           # (1, 4Hp) f32
    return wih1_p, whh1_p, b1_p, w2_p, b2_p


def _derive_vmem_limit(E, Hp, Bp, TC, mm_itemsize):
    """VMEM budget from the actual footprint, capped below physical VMEM."""
    f32 = 4
    weights = ((E * 4 * Hp + Hp * 4 * Hp + 2 * Hp * 4 * Hp) * mm_itemsize  # single-buffered
               + 2 * (4 * Hp) * f32)                                       # biases (f32)
    x_blk = 2 * (TC * Bp * E) * f32          # streamed x chunk, double-buffered
    out_blk = 2 * (TC * Bp * Hp) * f32       # streamed output chunk, double-buffered
    scratch = ((TC * Bp * 4 * Hp) * f32      # g1_buf
               + (Bp * 2 * Hp) * mm_itemsize # h12
               + 2 * (Bp * Hp) * f32)        # c1, c2
    need = (weights + x_blk + out_blk + scratch) * 3 // 2 + (4 << 20)  # headroom
    try:
        phys = pltpu.get_tpu_info().vmem_capacity_bytes   # 128 MiB v5e/v6e, 64 MiB v7x
    except Exception:
        phys = 128 << 20
    return int(min(max(need, 32 << 20), phys - (8 << 20)))


# ----------------------------------------------------------------------------
# Forward wrapper
# ----------------------------------------------------------------------------
def backbone_net_forward(x_btE, params, *, time_chunk=32,
                         matmul_dtype=jnp.bfloat16):
    """x_btE: (B, T, E) float32, batch_first.  Returns out_lstm (B, T, H)."""
    B, T, E = x_btE.shape
    H = params[1].shape[0]

    Hp = _round_up(H, 128)   # lane-aligned hidden size
    Bp = _round_up(B, 8)     # sublane-aligned batch (pack more sequences here
                             # for throughput -- MXU M-dim is nearly free)
    TC = min(time_chunk, T)  # timesteps per grid step
    Tp = _round_up(T, TC)

    wih1_p, whh1_p, b1_p, w2_p, b2_p = prepare_padded_params(
        params, H, Hp, matmul_dtype)

    # Zero-pad batch / time, go time-major, flatten (t, b) so the kernel's
    # chunk projection is one 2-D matmul (no in-kernel reshape needed).
    x_p = jnp.pad(x_btE, ((0, Bp - B), (0, Tp - T), (0, 0)))   # (Bp, Tp, E)
    x_tbe = jnp.transpose(x_p, (1, 0, 2))                       # (Tp, Bp, E)
    x2d = x_tbe.reshape(Tp * Bp, E)                             # rows: t-major

    vmem_limit = _derive_vmem_limit(E, Hp, Bp, TC,
                                    jnp.dtype(matmul_dtype).itemsize)

    const = pl.Buffered(1)   # constant-index operands: single-buffer in VMEM

    out_p = pl.pallas_call(
        lstm2_recurrent_kernel,
        out_shape=jax.ShapeDtypeStruct((Tp, Bp, Hp), jnp.float32),
        grid_spec=pltpu.PrefetchScalarGridSpec(
            num_scalar_prefetch=0,
            grid=(Tp // TC,),
            in_specs=[
                pl.BlockSpec((TC * Bp, E), lambda c: (c, 0)),          # x chunk (streamed)
                pl.BlockSpec((E, 4 * Hp), lambda c: (0, 0),
                             pipeline_mode=const),                     # W_ih layer 0
                pl.BlockSpec((1, 4 * Hp), lambda c: (0, 0),
                             pipeline_mode=const),                     # b1 (b_ih+b_hh)
                pl.BlockSpec((Hp, 4 * Hp), lambda c: (0, 0),
                             pipeline_mode=const),                     # W_hh layer 0
                pl.BlockSpec((2 * Hp, 4 * Hp), lambda c: (0, 0),
                             pipeline_mode=const),                     # [W_ih2; W_hh2]
                pl.BlockSpec((1, 4 * Hp), lambda c: (0, 0),
                             pipeline_mode=const),                     # b2 (b_ih+b_hh)
            ],
            out_specs=pl.BlockSpec((TC, Bp, Hp), lambda c: (c, 0, 0)),
            scratch_shapes=[
                pltpu.VMEM((TC * Bp, 4 * Hp), jnp.float32),  # g1_buf (chunk preacts)
                pltpu.VMEM((Bp, 2 * Hp), matmul_dtype),      # h12 = [h1 | h2]
                pltpu.VMEM((Bp, Hp), jnp.float32),           # c1
                pltpu.VMEM((Bp, Hp), jnp.float32),           # c2
            ],
        ),
        compiler_params=pltpu.CompilerParams(
            dimension_semantics=("arbitrary",),   # time recurrence is sequential
            vmem_limit_bytes=vmem_limit,
        ),
    )(x2d, wih1_p, b1_p, whh1_p, w2_p, b2_p)

    # Drop padding, return batch_first like nn.LSTM(batch_first=True).
    return jnp.transpose(out_p[:T, :B, :H], (1, 0, 2))


# ----------------------------------------------------------------------------
# Parameter init (mirrors nn.LSTM: U(-1/sqrt(H), 1/sqrt(H))) and pure-JAX ref
# ----------------------------------------------------------------------------
def init_lstm_params(key, E, H):
    """Weights stored transposed for x @ W; biases b_ih + b_hh combined (1, 4H)."""
    k = 1.0 / math.sqrt(H)
    keys = jax.random.split(key, 8)
    u = lambda kk, shape: jax.random.uniform(kk, shape, jnp.float32, -k, k)
    wih1 = u(keys[0], (E, 4 * H))
    whh1 = u(keys[1], (H, 4 * H))
    b1 = u(keys[2], (1, 4 * H)) + u(keys[3], (1, 4 * H))
    wih2 = u(keys[4], (H, 4 * H))
    whh2 = u(keys[5], (H, 4 * H))
    b2 = u(keys[6], (1, 4 * H)) + u(keys[7], (1, 4 * H))
    return (wih1, whh1, b1, wih2, whh2, b2)


def reference_forward(x_btE, params):
    """Pure-JAX reference (lax.scan) for the same 2-layer LSTM."""
    wih1, whh1, b1, wih2, whh2, b2 = params
    B, T, E = x_btE.shape
    H = whh1.shape[0]

    def run_layer(xs_tbe, wih, whh, b):
        def step(carry, x_t):
            h, c = carry
            gates = x_t @ wih + h @ whh + b
            i = jax.nn.sigmoid(gates[:, 0 * H:1 * H])
            f = jax.nn.sigmoid(gates[:, 1 * H:2 * H])
            g = jnp.tanh(gates[:, 2 * H:3 * H])
            o = jax.nn.sigmoid(gates[:, 3 * H:4 * H])
            c_new = f * c + i * g
            h_new = o * jnp.tanh(c_new)
            return (h_new, c_new), h_new
        init = (jnp.zeros((B, H), jnp.float32), jnp.zeros((B, H), jnp.float32))
        _, hs = lax.scan(step, init, xs_tbe)
        return hs  # (T, B, H)

    x_tbe = jnp.transpose(x_btE, (1, 0, 2))
    h1s = run_layer(x_tbe, wih1, whh1, b1)
    h2s = run_layer(h1s, wih2, whh2, b2)
    return jnp.transpose(h2s, (1, 0, 2))


if __name__ == "__main__":
    # Shapes consistent with BackboneNet(batch_size=2, hidden=32, embedding=32), seq=8.
    B, T, E, H = 2, 8, 32, 32

    key = jax.random.PRNGKey(0)
    k_x, k_p = jax.random.split(key)
    x = jax.random.normal(k_x, (B, T, E), jnp.float32)
    params = init_lstm_params(k_p, E, H)

    ref = jax.block_until_ready(reference_forward(x, params))

    # f32-MXU path: strict check.
    out_f32 = jax.block_until_ready(
        backbone_net_forward(x, params, matmul_dtype=jnp.float32))
    assert out_f32.shape == (B, T, H)
    np.testing.assert_allclose(np.asarray(out_f32), np.asarray(ref),
                               rtol=1e-3, atol=1e-5)

    # Default bf16-MXU path (f32 state, f32 accumulation): relaxed tolerance.
    out_bf16 = jax.block_until_ready(backbone_net_forward(x, params))
    assert out_bf16.shape == (B, T, H)
    np.testing.assert_allclose(np.asarray(out_bf16), np.asarray(ref),
                               rtol=5e-2, atol=5e-2)

    print("KERNEL_OK")
</pallas_src>

<mosaic_0001>
module attributes {stable_mosaic.version = 11 : i64} {
  func.func @lstm2_recurrent_kernel(%arg0: i32, %arg1: memref<64x32xf32, #tpu.memory_space<vmem>>, %arg2: memref<32x512xf32, #tpu.memory_space<vmem>>, %arg3: memref<1x512xf32, #tpu.memory_space<vmem>>, %arg4: memref<128x512xf32, #tpu.memory_space<vmem>>, %arg5: memref<256x512xf32, #tpu.memory_space<vmem>>, %arg6: memref<1x512xf32, #tpu.memory_space<vmem>>, %arg7: memref<8x8x128xf32, #tpu.memory_space<vmem>>, %arg8: memref<64x512xf32, #tpu.memory_space<vmem>>, %arg9: memref<8x256xf32, #tpu.memory_space<vmem>>, %arg10: memref<8x128xf32, #tpu.memory_space<vmem>>, %arg11: memref<8x128xf32, #tpu.memory_space<vmem>>) attributes {dimension_semantics = [#tpu.dimension_semantics<arbitrary>], iteration_bounds = array<i64: 1>, scalar_prefetch = 0 : i64, scratch_operands = 4 : i64, tpu.core_type = #tpu.core_type<tc>, window_params = [{transform_indices = @transform_0, window_bounds = array<i64: 64, 32>}, {pipeline_mode = #tpu.pipeline_mode<synchronous>, transform_indices = @transform_1, window_bounds = array<i64: 32, 512>}, {pipeline_mode = #tpu.pipeline_mode<synchronous>, transform_indices = @transform_2, window_bounds = array<i64: 1, 512>}, {pipeline_mode = #tpu.pipeline_mode<synchronous>, transform_indices = @transform_3, window_bounds = array<i64: 128, 512>}, {pipeline_mode = #tpu.pipeline_mode<synchronous>, transform_indices = @transform_4, window_bounds = array<i64: 256, 512>}, {pipeline_mode = #tpu.pipeline_mode<synchronous>, transform_indices = @transform_5, window_bounds = array<i64: 1, 512>}, {transform_indices = @transform_6, window_bounds = array<i64: 8, 8, 128>}]} {
    %c0_i32 = arith.constant 0 : i32
    %0 = arith.cmpi eq, %arg0, %c0_i32 : i32
    %1 = arith.extui %0 : i1 to i32
    %c0_i32_0 = arith.constant 0 : i32
    %2 = arith.cmpi ne, %1, %c0_i32_0 : i32
    scf.if %2 {
      %cst_266 = arith.constant 0.000000e+00 : f32
      %589 = vector.broadcast %cst_266 : f32 to vector<8x256xf32>
      %c0_267 = arith.constant 0 : index
      %c0_268 = arith.constant 0 : index
      %590 = vector.load %arg9[%c0_267, %c0_268] : memref<8x256xf32, #tpu.memory_space<vmem>>, vector<8x256xf32>
      tpu.vector_store %arg9[%c0_267, %c0_268], %589 {strides = array<i32>} : memref<8x256xf32, #tpu.memory_space<vmem>>, vector<8x256xf32>,
      %cst_269 = arith.constant 0.000000e+00 : f32
      %591 = vector.broadcast %cst_269 : f32 to vector<8x128xf32>
      %c0_270 = arith.constant 0 : index
      %c0_271 = arith.constant 0 : index
      %592 = vector.load %arg10[%c0_270, %c0_271] : memref<8x128xf32, #tpu.memory_space<vmem>>, vector<8x128xf32>
      tpu.vector_store %arg10[%c0_270, %c0_271], %591 {strides = array<i32>} : memref<8x128xf32, #tpu.memory_space<vmem>>, vector<8x128xf32>,
      %cst_272 = arith.constant 0.000000e+00 : f32
      %593 = vector.broadcast %cst_272 : f32 to vector<8x128xf32>
      %c0_273 = arith.constant 0 : index
      %c0_274 = arith.constant 0 : index
      %594 = vector.load %arg11[%c0_273, %c0_274] : memref<8x128xf32, #tpu.memory_space<vmem>>, vector<8x128xf32>
      tpu.vector_store %arg11[%c0_273, %c0_274], %593 {strides = array<i32>} : memref<8x128xf32, #tpu.memory_space<vmem>>, vector<8x128xf32>,
    } else {
    }
    %c0 = arith.constant 0 : index
    %c0_1 = arith.constant 0 : index
    %3 = vector.load %arg1[%c0, %c0_1] : memref<64x32xf32, #tpu.memory_space<vmem>>, vector<64x32xf32>
    %c0_2 = arith.constant 0 : index
    %c0_3 = arith.constant 0 : index
    %4 = vector.load %arg2[%c0_2, %c0_3] : memref<32x512xf32, #tpu.memory_space<vmem>>, vector<32x512xf32>
    %cst = arith.constant dense<0.000000e+00> : vector<64x512xf32>
    %5 = tpu.matmul %3, %4, %cst {dimension_numbers = #tpu.dot_dimension_numbers<[1], [0], [0], [1], [0, 0, 1, 1], [], []>} : vector<64x32xf32>, vector<32x512xf32>, vector<64x512xf32> -> vector<64x512xf32>
    %c0_4 = arith.constant 0 : index
    %c0_5 = arith.constant 0 : index
    %6 = vector.load %arg3[%c0_4, %c0_5] : memref<1x512xf32, #tpu.memory_space<vmem>>, vector<1x512xf32>
    %7 = vector.broadcast %6 : vector<1x512xf32> to vector<64x512xf32>
    %8 = arith.addf %5, %7 : vector<64x512xf32>
    %c0_6 = arith.constant 0 : index
    %c0_7 = arith.constant 0 : index
    %9 = vector.load %arg8[%c0_6, %c0_7] : memref<64x512xf32, #tpu.memory_space<vmem>>, vector<64x512xf32>
    tpu.vector_store %arg8[%c0_6, %c0_7], %8 {strides = array<i32>} : memref<64x512xf32, #tpu.memory_space<vmem>>, vector<64x512xf32>,
    %c0_8 = arith.constant 0 : index
    %c0_9 = arith.constant 0 : index
    %10 = vector.load %arg6[%c0_8, %c0_9] : memref<1x512xf32, #tpu.memory_space<vmem>>, vector<1x512xf32>
    %11 = vector.shape_cast %10 : vector<1x512xf32> to vector<1x512xf32>
    %12 = vector.broadcast %11 : vector<1x512xf32> to vector<8x512xf32>
    %c0_i32_10 = arith.constant 0 : i32
    %c8_i32 = arith.constant 8 : i32
    %13 = arith.muli %c0_i32_10, %c8_i32 : i32
    %14 = tpu.assume_multiple %13, 8 : i32
    %15 = arith.index_cast %14 : i32 to index
    %c0_11 = arith.constant 0 : index
    %16 = vector.load %arg8[%15, %c0_11] : memref<64x512xf32, #tpu.memory_space<vmem>>, vector<8x512xf32>
    %c0_12 = arith.constant 0 : index
    %c0_13 = arith.constant 0 : index
    %17 = vector.load %arg9[%c0_12, %c0_13] : memref<8x256xf32, #tpu.memory_space<vmem>>, vector<8x128xf32>
    %c0_14 = arith.constant 0 : index
    %c0_15 = arith.constant 0 : index
    %18 = vector.load %arg4[%c0_14, %c0_15] : memref<128x512xf32, #tpu.memory_space<vmem>>, vector<128x512xf32>
    %cst_16 = arith.constant dense<0.000000e+00> : vector<8x512xf32>
    %19 = tpu.matmul %17, %18, %cst_16 {dimension_numbers = #tpu.dot_dimension_numbers<[1], [0], [0], [1], [0, 0, 1, 1], [], []>} : vector<8x128xf32>, vector<128x512xf32>, vector<8x512xf32> -> vector<8x512xf32>
    %20 = arith.addf %16, %19 : vector<8x512xf32>
    %c0_17 = arith.constant 0 : index
    %c0_18 = arith.constant 0 : index
    %21 = vector.load %arg10[%c0_17, %c0_18] : memref<8x128xf32, #tpu.memory_space<vmem>>, vector<8x128xf32>
    %22 = vector.extract_strided_slice %20 {offsets = [0, 0], sizes = [8, 128], strides = [1, 1]} : vector<8x512xf32> to vector<8x128xf32>
    %23 = arith.negf %22 : vector<8x128xf32>
    %24 = math.exp %23 : vector<8x128xf32>
    %cst_19 = arith.constant 1.000000e+00 : f32
    %25 = vector.broadcast %cst_19 : f32 to vector<8x128xf32>
    %26 = arith.addf %25, %24 : vector<8x128xf32>
    %27 = arith.divf %25, %26 : vector<8x128xf32>
    %28 = vector.extract_strided_slice %20 {offsets = [0, 128], sizes = [8, 128], strides = [1, 1]} : vector<8x512xf32> to vector<8x128xf32>
    %29 = arith.negf %28 : vector<8x128xf32>
    %30 = math.exp %29 : vector<8x128xf32>
    %cst_20 = arith.constant 1.000000e+00 : f32
    %31 = vector.broadcast %cst_20 : f32 to vector<8x128xf32>
    %32 = arith.addf %31, %30 : vector<8x128xf32>
    %33 = arith.divf %31, %32 : vector<8x128xf32>
    %34 = vector.extract_strided_slice %20 {offsets = [0, 256], sizes = [8, 128], strides = [1, 1]} : vector<8x512xf32> to vector<8x128xf32>
    %35 = math.tanh %34 : vector<8x128xf32>
    %36 = vector.extract_strided_slice %20 {offsets = [0, 384], sizes = [8, 128], strides = [1, 1]} : vector<8x512xf32> to vector<8x128xf32>
    %37 = arith.negf %36 : vector<8x128xf32>
    %38 = math.exp %37 : vector<8x128xf32>
    %cst_21 = arith.constant 1.000000e+00 : f32
    %39 = vector.broadcast %cst_21 : f32 to vector<8x128xf32>
    %40 = arith.addf %39, %38 : vector<8x128xf32>
    %41 = arith.divf %39, %40 : vector<8x128xf32>
    %42 = arith.mulf %33, %21 : vector<8x128xf32>
    %43 = arith.mulf %27, %35 : vector<8x128xf32>
    %44 = arith.addf %42, %43 : vector<8x128xf32>
    %45 = math.tanh %44 : vector<8x128xf32>
    %46 = arith.mulf %41, %45 : vector<8x128xf32>
    %c0_22 = arith.constant 0 : index
    %c0_23 = arith.constant 0 : index
    %47 = vector.load %arg10[%c0_22, %c0_23] : memref<8x128xf32, #tpu.memory_space<vmem>>, vector<8x128xf32>
    tpu.vector_store %arg10[%c0_22, %c0_23], %44 {strides = array<i32>} : memref<8x128xf32, #tpu.memory_space<vmem>>, vector<8x128xf32>,
    %c0_24 = arith.constant 0 : index
    %c0_25 = arith.constant 0 : index
    %48 = vector.load %arg9[%c0_24, %c0_25] : memref<8x256xf32, #tpu.memory_space<vmem>>, vector<8x128xf32>
    tpu.vector_store %arg9[%c0_24, %c0_25], %46 {strides = array<i32>} : memref<8x256xf32, #tpu.memory_space<vmem>>, vector<8x128xf32>,
    %c0_26 = arith.constant 0 : index
    %c0_27 = arith.constant 0 : index
    %49 = vector.load %arg9[%c0_26, %c0_27] : memref<8x256xf32, #tpu.memory_space<vmem>>, vector<8x256xf32>
    %c0_28 = arith.constant 0 : index
    %c0_29 = arith.constant 0 : index
    %50 = vector.load %arg5[%c0_28, %c0_29] : memref<256x512xf32, #tpu.memory_space<vmem>>, vector<256x512xf32>
    %cst_30 = arith.constant dense<0.000000e+00> : vector<8x512xf32>
    %51 = tpu.matmul %49, %50, %cst_30 {dimension_numbers = #tpu.dot_dimension_numbers<[1], [0], [0], [1], [0, 0, 1, 1], [], []>} : vector<8x256xf32>, vector<256x512xf32>, vector<8x512xf32> -> vector<8x512xf32>
    %52 = arith.addf %51, %12 : vector<8x512xf32>
    %c0_31 = arith.constant 0 : index
    %c0_32 = arith.constant 0 : index
    %53 = vector.load %arg11[%c0_31, %c0_32] : memref<8x128xf32, #tpu.memory_space<vmem>>, vector<8x128xf32>
    %54 = vector.extract_strided_slice %52 {offsets = [0, 0], sizes = [8, 128], strides = [1, 1]} : vector<8x512xf32> to vector<8x128xf32>
    %55 = arith.negf %54 : vector<8x128xf32>
    %56 = math.exp %55 : vector<8x128xf32>
    %cst_33 = arith.constant 1.000000e+00 : f32
    %57 = vector.broadcast %cst_33 : f32 to vector<8x128xf32>
    %58 = arith.addf %57, %56 : vector<8x128xf32>
    %59 = arith.divf %57, %58 : vector<8x128xf32>
    %60 = vector.extract_strided_slice %52 {offsets = [0, 128], sizes = [8, 128], strides = [1, 1]} : vector<8x512xf32> to vector<8x128xf32>
    %61 = arith.negf %60 : vector<8x128xf32>
    %62 = math.exp %61 : vector<8x128xf32>
    %cst_34 = arith.constant 1.000000e+00 : f32
    %63 = vector.broadcast %cst_34 : f32 to vector<8x128xf32>
    %64 = arith.addf %63, %62 : vector<8x128xf32>
    %65 = arith.divf %63, %64 : vector<8x128xf32>
    %66 = vector.extract_strided_slice %52 {offsets = [0, 256], sizes = [8, 128], strides = [1, 1]} : vector<8x512xf32> to vector<8x128xf32>
    %67 = math.tanh %66 : vector<8x128xf32>
    %68 = vector.extract_strided_slice %52 {offsets = [0, 384], sizes = [8, 128], strides = [1, 1]} : vector<8x512xf32> to vector<8x128xf32>
    %69 = arith.negf %68 : vector<8x128xf32>
    %70 = math.exp %69 : vector<8x128xf32>
    %cst_35 = arith.constant 1.000000e+00 : f32
    %71 = vector.broadcast %cst_35 : f32 to vector<8x128xf32>
    %72 = arith.addf %71, %70 : vector<8x128xf32>
    %73 = arith.divf %71, %72 : vector<8x128xf32>
    %74 = arith.mulf %65, %53 : vector<8x128xf32>
    %75 = arith.mulf %59, %67 : vector<8x128xf32>
    %76 = arith.addf %74, %75 : vector<8x128xf32>
    %77 = math.tanh %76 : vector<8x128xf32>
    %78 = arith.mulf %73, %77 : vector<8x128xf32>
    %c0_36 = arith.constant 0 : index
    %c0_37 = arith.constant 0 : index
    %79 = vector.load %arg11[%c0_36, %c0_37] : memref<8x128xf32, #tpu.memory_space<vmem>>, vector<8x128xf32>
    tpu.vector_store %arg11[%c0_36, %c0_37], %76 {strides = array<i32>} : memref<8x128xf32, #tpu.memory_space<vmem>>, vector<8x128xf32>,
    %80 = arith.index_cast %c0_i32_10 : i32 to index
    %c0_38 = arith.constant 0 : index
    %c0_39 = arith.constant 0 : index
    %81 = vector.load %arg7[%80, %c0_38, %c0_39] : memref<8x8x128xf32, #tpu.memory_space<vmem>>, vector<1x8x128xf32>
    %82 = vector.shape_cast %81 : vector<1x8x128xf32> to vector<8x128xf32>
    %83 = vector.shape_cast %78 : vector<8x128xf32> to vector<1x8x128xf32>
    tpu.vector_store %arg7[%80, %c0_38, %c0_39], %83 {strides = array<i32>} : memref<8x8x128xf32, #tpu.memory_space<vmem>>, vector<1x8x128xf32>,
    %c0_40 = arith.constant 0 : index
    %c128 = arith.constant 128 : index
    %84 = vector.load %arg9[%c0_40, %c128] : memref<8x256xf32, #tpu.memory_space<vmem>>, vector<8x128xf32>
    tpu.vector_store %arg9[%c0_40, %c128], %78 {strides = array<i32>} : memref<8x256xf32, #tpu.memory_space<vmem>>, vector<8x128xf32>,
    %c1_i32 = arith.constant 1 : i32
    %c8_i32_41 = arith.constant 8 : i32
    %85 = arith.muli %c1_i32, %c8_i32_41 : i32
    %86 = tpu.assume_multiple %85, 8 : i32
    %87 = arith.index_cast %86 : i32 to index
    %c0_42 = arith.constant 0 : index
    %88 = vector.load %arg8[%87, %c0_42] : memref<64x512xf32, #tpu.memory_space<vmem>>, vector<8x512xf32>
    %c0_43 = arith.constant 0 : index
    %c0_44 = arith.constant 0 : index
    %89 = vector.load %arg9[%c0_43, %c0_44] : memref<8x256xf32, #tpu.memory_space<vmem>>, vector<8x128xf32>
    %c0_45 = arith.constant 0 : index
    %c0_46 = arith.constant 0 : index
    %90 = vector.load %arg4[%c0_45, %c0_46] : memref<128x512xf32, #tpu.memory_space<vmem>>, vector<128x512xf32>
    %cst_47 = arith.constant dense<0.000000e+00> : vector<8x512xf32>
    %91 = tpu.matmul %89, %90, %cst_47 {dimension_numbers = #tpu.dot_dimension_numbers<[1], [0], [0], [1], [0, 0, 1, 1], [], []>} : vector<8x128xf32>, vector<128x512xf32>, vector<8x512xf32> -> vector<8x512xf32>
    %92 = arith.addf %88, %91 : vector<8x512xf32>
    %c0_48 = arith.constant 0 : index
    %c0_49 = arith.constant 0 : index
    %93 = vector.load %arg10[%c0_48, %c0_49] : memref<8x128xf32, #tpu.memory_space<vmem>>, vector<8x128xf32>
    %94 = vector.extract_strided_slice %92 {offsets = [0, 0], sizes = [8, 128], strides = [1, 1]} : vector<8x512xf32> to vector<8x128xf32>
    %95 = arith.negf %94 : vector<8x128xf32>
    %96 = math.exp %95 : vector<8x128xf32>
    %cst_50 = arith.constant 1.000000e+00 : f32
    %97 = vector.broadcast %cst_50 : f32 to vector<8x128xf32>
    %98 = arith.addf %97, %96 : vector<8x128xf32>
    %99 = arith.divf %97, %98 : vector<8x128xf32>
    %100 = vector.extract_strided_slice %92 {offsets = [0, 128], sizes = [8, 128], strides = [1, 1]} : vector<8x512xf32> to vector<8x128xf32>
    %101 = arith.negf %100 : vector<8x128xf32>
    %102 = math.exp %101 : vector<8x128xf32>
    %cst_51 = arith.constant 1.000000e+00 : f32
    %103 = vector.broadcast %cst_51 : f32 to vector<8x128xf32>
    %104 = arith.addf %103, %102 : vector<8x128xf32>
    %105 = arith.divf %103, %104 : vector<8x128xf32>
    %106 = vector.extract_strided_slice %92 {offsets = [0, 256], sizes = [8, 128], strides = [1, 1]} : vector<8x512xf32> to vector<8x128xf32>
    %107 = math.tanh %106 : vector<8x128xf32>
    %108 = vector.extract_strided_slice %92 {offsets = [0, 384], sizes = [8, 128], strides = [1, 1]} : vector<8x512xf32> to vector<8x128xf32>
    %109 = arith.negf %108 : vector<8x128xf32>
    %110 = math.exp %109 : vector<8x128xf32>
    %cst_52 = arith.constant 1.000000e+00 : f32
    %111 = vector.broadcast %cst_52 : f32 to vector<8x128xf32>
    %112 = arith.addf %111, %110 : vector<8x128xf32>
    %113 = arith.divf %111, %112 : vector<8x128xf32>
    %114 = arith.mulf %105, %93 : vector<8x128xf32>
    %115 = arith.mulf %99, %107 : vector<8x128xf32>
    %116 = arith.addf %114, %115 : vector<8x128xf32>
    %117 = math.tanh %116 : vector<8x128xf32>
    %118 = arith.mulf %113, %117 : vector<8x128xf32>
    %c0_53 = arith.constant 0 : index
    %c0_54 = arith.constant 0 : index
    %119 = vector.load %arg10[%c0_53, %c0_54] : memref<8x128xf32, #tpu.memory_space<vmem>>, vector<8x128xf32>
    tpu.vector_store %arg10[%c0_53, %c0_54], %116 {strides = array<i32>} : memref<8x128xf32, #tpu.memory_space<vmem>>, vector<8x128xf32>,
    %c0_55 = arith.constant 0 : index
    %c0_56 = arith.constant 0 : index
    %120 = vector.load %arg9[%c0_55, %c0_56] : memref<8x256xf32, #tpu.memory_space<vmem>>, vector<8x128xf32>
    tpu.vector_store %arg9[%c0_55, %c0_56], %118 {strides = array<i32>} : memref<8x256xf32, #tpu.memory_space<vmem>>, vector<8x128xf32>,
    %c0_57 = arith.constant 0 : index
    %c0_58 = arith.constant 0 : index
    %121 = vector.load %arg9[%c0_57, %c0_58] : memref<8x256xf32, #tpu.memory_space<vmem>>, vector<8x256xf32>
    %c0_59 = arith.constant 0 : index
    %c0_60 = arith.constant 0 : index
    %122 = vector.load %arg5[%c0_59, %c0_60] : memref<256x512xf32, #tpu.memory_space<vmem>>, vector<256x512xf32>
    %cst_61 = arith.constant dense<0.000000e+00> : vector<8x512xf32>
    %123 = tpu.matmul %121, %122, %cst_61 {dimension_numbers = #tpu.dot_dimension_numbers<[1], [0], [0], [1], [0, 0, 1, 1], [], []>} : vector<8x256xf32>, vector<256x512xf32>, vector<8x512xf32> -> vector<8x512xf32>
    %124 = arith.addf %123, %12 : vector<8x512xf32>
    %c0_62 = arith.constant 0 : index
    %c0_63 = arith.constant 0 : index
    %125 = vector.load %arg11[%c0_62, %c0_63] : memref<8x128xf32, #tpu.memory_space<vmem>>, vector<8x128xf32>
    %126 = vector.extract_strided_slice %124 {offsets = [0, 0], sizes = [8, 128], strides = [1, 1]} : vector<8x512xf32> to vector<8x128xf32>
    %127 = arith.negf %126 : vector<8x128xf32>
    %128 = math.exp %127 : vector<8x128xf32>
    %cst_64 = arith.constant 1.000000e+00 : f32
    %129 = vector.broadcast %cst_64 : f32 to vector<8x128xf32>
    %130 = arith.addf %129, %128 : vector<8x128xf32>
    %131 = arith.divf %129, %130 : vector<8x128xf32>
    %132 = vector.extract_strided_slice %124 {offsets = [0, 128], sizes = [8, 128], strides = [1, 1]} : vector<8x512xf32> to vector<8x128xf32>
    %133 = arith.negf %132 : vector<8x128xf32>
    %134 = math.exp %133 : vector<8x128xf32>
    %cst_65 = arith.constant 1.000000e+00 : f32
    %135 = vector.broadcast %cst_65 : f32 to vector<8x128xf32>
    %136 = arith.addf %135, %134 : vector<8x128xf32>
    %137 = arith.divf %135, %136 : vector<8x128xf32>
    %138 = vector.extract_strided_slice %124 {offsets = [0, 256], sizes = [8, 128], strides = [1, 1]} : vector<8x512xf32> to vector<8x128xf32>
    %139 = math.tanh %138 : vector<8x128xf32>
    %140 = vector.extract_strided_slice %124 {offsets = [0, 384], sizes = [8, 128], strides = [1, 1]} : vector<8x512xf32> to vector<8x128xf32>
    %141 = arith.negf %140 : vector<8x128xf32>
    %142 = math.exp %141 : vector<8x128xf32>
    %cst_66 = arith.constant 1.000000e+00 : f32
    %143 = vector.broadcast %cst_66 : f32 to vector<8x128xf32>
    %144 = arith.addf %143, %142 : vector<8x128xf32>
    %145 = arith.divf %143, %144 : vector<8x128xf32>
    %146 = arith.mulf %137, %125 : vector<8x128xf32>
    %147 = arith.mulf %131, %139 : vector<8x128xf32>
    %148 = arith.addf %146, %147 : vector<8x128xf32>
    %149 = math.tanh %148 : vector<8x128xf32>
    %150 = arith.mulf %145, %149 : vector<8x128xf32>
    %c0_67 = arith.constant 0 : index
    %c0_68 = arith.constant 0 : index
    %151 = vector.load %arg11[%c0_67, %c0_68] : memref<8x128xf32, #tpu.memory_space<vmem>>, vector<8x128xf32>
    tpu.vector_store %arg11[%c0_67, %c0_68], %148 {strides = array<i32>} : memref<8x128xf32, #tpu.memory_space<vmem>>, vector<8x128xf32>,
    %152 = arith.index_cast %c1_i32 : i32 to index
    %c0_69 = arith.constant 0 : index
    %c0_70 = arith.constant 0 : index
    %153 = vector.load %arg7[%152, %c0_69, %c0_70] : memref<8x8x128xf32, #tpu.memory_space<vmem>>, vector<1x8x128xf32>
    %154 = vector.shape_cast %153 : vector<1x8x128xf32> to vector<8x128xf32>
    %155 = vector.shape_cast %150 : vector<8x128xf32> to vector<1x8x128xf32>
    tpu.vector_store %arg7[%152, %c0_69, %c0_70], %155 {strides = array<i32>} : memref<8x8x128xf32, #tpu.memory_space<vmem>>, vector<1x8x128xf32>,
    %c0_71 = arith.constant 0 : index
    %c128_72 = arith.constant 128 : index
    %156 = vector.load %arg9[%c0_71, %c128_72] : memref<8x256xf32, #tpu.memory_space<vmem>>, vector<8x128xf32>
    tpu.vector_store %arg9[%c0_71, %c128_72], %150 {strides = array<i32>} : memref<8x256xf32, #tpu.memory_space<vmem>>, vector<8x128xf32>,
    %c2_i32 = arith.constant 2 : i32
    %c8_i32_73 = arith.constant 8 : i32
    %157 = arith.muli %c2_i32, %c8_i32_73 : i32
    %158 = tpu.assume_multiple %157, 8 : i32
    %159 = arith.index_cast %158 : i32 to index
    %c0_74 = arith.constant 0 : index
    %160 = vector.load %arg8[%159, %c0_74] : memref<64x512xf32, #tpu.memory_space<vmem>>, vector<8x512xf32>
    %c0_75 = arith.constant 0 : index
    %c0_76 = arith.constant 0 : index
    %161 = vector.load %arg9[%c0_75, %c0_76] : memref<8x256xf32, #tpu.memory_space<vmem>>, vector<8x128xf32>
    %c0_77 = arith.constant 0 : index
    %c0_78 = arith.constant 0 : index
    %162 = vector.load %arg4[%c0_77, %c0_78] : memref<128x512xf32, #tpu.memory_space<vmem>>, vector<128x512xf32>
    %cst_79 = arith.constant dense<0.000000e+00> : vector<8x512xf32>
    %163 = tpu.matmul %161, %162, %cst_79 {dimension_numbers = #tpu.dot_dimension_numbers<[1], [0], [0], [1], [0, 0, 1, 1], [], []>} : vector<8x128xf32>, vector<128x512xf32>, vector<8x512xf32> -> vector<8x512xf32>
    %164 = arith.addf %160, %163 : vector<8x512xf32>
    %c0_80 = arith.constant 0 : index
    %c0_81 = arith.constant 0 : index
    %165 = vector.load %arg10[%c0_80, %c0_81] : memref<8x128xf32, #tpu.memory_space<vmem>>, vector<8x128xf32>
    %166 = vector.extract_strided_slice %164 {offsets = [0, 0], sizes = [8, 128], strides = [1, 1]} : vector<8x512xf32> to vector<8x128xf32>
    %167 = arith.negf %166 : vector<8x128xf32>
    %168 = math.exp %167 : vector<8x128xf32>
    %cst_82 = arith.constant 1.000000e+00 : f32
    %169 = vector.broadcast %cst_82 : f32 to vector<8x128xf32>
    %170 = arith.addf %169, %168 : vector<8x128xf32>
    %171 = arith.divf %169, %170 : vector<8x128xf32>
    %172 = vector.extract_strided_slice %164 {offsets = [0, 128], sizes = [8, 128], strides = [1, 1]} : vector<8x512xf32> to vector<8x128xf32>
    %173 = arith.negf %172 : vector<8x128xf32>
    %174 = math.exp %173 : vector<8x128xf32>
    %cst_83 = arith.constant 1.000000e+00 : f32
    %175 = vector.broadcast %cst_83 : f32 to vector<8x128xf32>
    %176 = arith.addf %175, %174 : vector<8x128xf32>
    %177 = arith.divf %175, %176 : vector<8x128xf32>
    %178 = vector.extract_strided_slice %164 {offsets = [0, 256], sizes = [8, 128], strides = [1, 1]} : vector<8x512xf32> to vector<8x128xf32>
    %179 = math.tanh %178 : vector<8x128xf32>
    %180 = vector.extract_strided_slice %164 {offsets = [0, 384], sizes = [8, 128], strides = [1, 1]} : vector<8x512xf32> to vector<8x128xf32>
    %181 = arith.negf %180 : vector<8x128xf32>
    %182 = math.exp %181 : vector<8x128xf32>
    %cst_84 = arith.constant 1.000000e+00 : f32
    %183 = vector.broadcast %cst_84 : f32 to vector<8x128xf32>
    %184 = arith.addf %183, %182 : vector<8x128xf32>
    %185 = arith.divf %183, %184 : vector<8x128xf32>
    %186 = arith.mulf %177, %165 : vector<8x128xf32>
    %187 = arith.mulf %171, %179 : vector<8x128xf32>
    %188 = arith.addf %186, %187 : vector<8x128xf32>
    %189 = math.tanh %188 : vector<8x128xf32>
    %190 = arith.mulf %185, %189 : vector<8x128xf32>
    %c0_85 = arith.constant 0 : index
    %c0_86 = arith.constant 0 : index
    %191 = vector.load %arg10[%c0_85, %c0_86] : memref<8x128xf32, #tpu.memory_space<vmem>>, vector<8x128xf32>
    tpu.vector_store %arg10[%c0_85, %c0_86], %188 {strides = array<i32>} : memref<8x128xf32, #tpu.memory_space<vmem>>, vector<8x128xf32>,
    %c0_87 = arith.constant 0 : index
    %c0_88 = arith.constant 0 : index
    %192 = vector.load %arg9[%c0_87, %c0_88] : memref<8x256xf32, #tpu.memory_space<vmem>>, vector<8x128xf32>
    tpu.vector_store %arg9[%c0_87, %c0_88], %190 {strides = array<i32>} : memref<8x256xf32, #tpu.memory_space<vmem>>, vector<8x128xf32>,
    %c0_89 = arith.constant 0 : index
    %c0_90 = arith.constant 0 : index
    %193 = vector.load %arg9[%c0_89, %c0_90] : memref<8x256xf32, #tpu.memory_space<vmem>>, vector<8x256xf32>
    %c0_91 = arith.constant 0 : index
    %c0_92 = arith.constant 0 : index
    %194 = vector.load %arg5[%c0_91, %c0_92] : memref<256x512xf32, #tpu.memory_space<vmem>>, vector<256x512xf32>
    %cst_93 = arith.constant dense<0.000000e+00> : vector<8x512xf32>
    %195 = tpu.matmul %193, %194, %cst_93 {dimension_numbers = #tpu.dot_dimension_numbers<[1], [0], [0], [1], [0, 0, 1, 1], [], []>} : vector<8x256xf32>, vector<256x512xf32>, vector<8x512xf32> -> vector<8x512xf32>
    %196 = arith.addf %195, %12 : vector<8x512xf32>
    %c0_94 = arith.constant 0 : index
    %c0_95 = arith.constant 0 : index
    %197 = vector.load %arg11[%c0_94, %c0_95] : memref<8x128xf32, #tpu.memory_space<vmem>>, vector<8x128xf32>
    %198 = vector.extract_strided_slice %196 {offsets = [0, 0], sizes = [8, 128], strides = [1, 1]} : vector<8x512xf32> to vector<8x128xf32>
    %199 = arith.negf %198 : vector<8x128xf32>
    %200 = math.exp %199 : vector<8x128xf32>
    %cst_96 = arith.constant 1.000000e+00 : f32
    %201 = vector.broadcast %cst_96 : f32 to vector<8x128xf32>
    %202 = arith.addf %201, %200 : vector<8x128xf32>
    %203 = arith.divf %201, %202 : vector<8x128xf32>
    %204 = vector.extract_strided_slice %196 {offsets = [0, 128], sizes = [8, 128], strides = [1, 1]} : vector<8x512xf32> to vector<8x128xf32>
    %205 = arith.negf %204 : vector<8x128xf32>
    %206 = math.exp %205 : vector<8x128xf32>
    %cst_97 = arith.constant 1.000000e+00 : f32
    %207 = vector.broadcast %cst_97 : f32 to vector<8x128xf32>
    %208 = arith.addf %207, %206 : vector<8x128xf32>
    %209 = arith.divf %207, %208 : vector<8x128xf32>
    %210 = vector.extract_strided_slice %196 {offsets = [0, 256], sizes = [8, 128], strides = [1, 1]} : vector<8x512xf32> to vector<8x128xf32>
    %211 = math.tanh %210 : vector<8x128xf32>
    %212 = vector.extract_strided_slice %196 {offsets = [0, 384], sizes = [8, 128], strides = [1, 1]} : vector<8x512xf32> to vector<8x128xf32>
    %213 = arith.negf %212 : vector<8x128xf32>
    %214 = math.exp %213 : vector<8x128xf32>
    %cst_98 = arith.constant 1.000000e+00 : f32
    %215 = vector.broadcast %cst_98 : f32 to vector<8x128xf32>
    %216 = arith.addf %215, %214 : vector<8x128xf32>
    %217 = arith.divf %215, %216 : vector<8x128xf32>
    %218 = arith.mulf %209, %197 : vector<8x128xf32>
    %219 = arith.mulf %203, %211 : vector<8x128xf32>
    %220 = arith.addf %218, %219 : vector<8x128xf32>
    %221 = math.tanh %220 : vector<8x128xf32>
    %222 = arith.mulf %217, %221 : vector<8x128xf32>
    %c0_99 = arith.constant 0 : index
    %c0_100 = arith.constant 0 : index
    %223 = vector.load %arg11[%c0_99, %c0_100] : memref<8x128xf32, #tpu.memory_space<vmem>>, vector<8x128xf32>
    tpu.vector_store %arg11[%c0_99, %c0_100], %220 {strides = array<i32>} : memref<8x128xf32, #tpu.memory_space<vmem>>, vector<8x128xf32>,
    %224 = arith.index_cast %c2_i32 : i32 to index
    %c0_101 = arith.constant 0 : index
    %c0_102 = arith.constant 0 : index
    %225 = vector.load %arg7[%224, %c0_101, %c0_102] : memref<8x8x128xf32, #tpu.memory_space<vmem>>, vector<1x8x128xf32>
    %226 = vector.shape_cast %225 : vector<1x8x128xf32> to vector<8x128xf32>
    %227 = vector.shape_cast %222 : vector<8x128xf32> to vector<1x8x128xf32>
    tpu.vector_store %arg7[%224, %c0_101, %c0_102], %227 {strides = array<i32>} : memref<8x8x128xf32, #tpu.memory_space<vmem>>, vector<1x8x128xf32>,
    %c0_103 = arith.constant 0 : index
    %c128_104 = arith.constant 128 : index
    %228 = vector.load %arg9[%c0_103, %c128_104] : memref<8x256xf32, #tpu.memory_space<vmem>>, vector<8x128xf32>
    tpu.vector_store %arg9[%c0_103, %c128_104], %222 {strides = array<i32>} : memref<8x256xf32, #tpu.memory_space<vmem>>, vector<8x128xf32>,
    %c3_i32 = arith.constant 3 : i32
    %c8_i32_105 = arith.constant 8 : i32
    %229 = arith.muli %c3_i32, %c8_i32_105 : i32
    %230 = tpu.assume_multiple %229, 8 : i32
    %231 = arith.index_cast %230 : i32 to index
    %c0_106 = arith.constant 0 : index
    %232 = vector.load %arg8[%231, %c0_106] : memref<64x512xf32, #tpu.memory_space<vmem>>, vector<8x512xf32>
    %c0_107 = arith.constant 0 : index
    %c0_108 = arith.constant 0 : index
    %233 = vector.load %arg9[%c0_107, %c0_108] : memref<8x256xf32, #tpu.memory_space<vmem>>, vector<8x128xf32>
    %c0_109 = arith.constant 0 : index
    %c0_110 = arith.constant 0 : index
    %234 = vector.load %arg4[%c0_109, %c0_110] : memref<128x512xf32, #tpu.memory_space<vmem>>, vector<128x512xf32>
    %cst_111 = arith.constant dense<0.000000e+00> : vector<8x512xf32>
    %235 = tpu.matmul %233, %234, %cst_111 {dimension_numbers = #tpu.dot_dimension_numbers<[1], [0], [0], [1], [0, 0, 1, 1], [], []>} : vector<8x128xf32>, vector<128x512xf32>, vector<8x512xf32> -> vector<8x512xf32>
    %236 = arith.addf %232, %235 : vector<8x512xf32>
    %c0_112 = arith.constant 0 : index
    %c0_113 = arith.constant 0 : index
    %237 = vector.load %arg10[%c0_112, %c0_113] : memref<8x128xf32, #tpu.memory_space<vmem>>, vector<8x128xf32>
    %238 = vector.extract_strided_slice %236 {offsets = [0, 0], sizes = [8, 128], strides = [1, 1]} : vector<8x512xf32> to vector<8x128xf32>
    %239 = arith.negf %238 : vector<8x128xf32>
    %240 = math.exp %239 : vector<8x128xf32>
    %cst_114 = arith.constant 1.000000e+00 : f32
    %241 = vector.broadcast %cst_114 : f32 to vector<8x128xf32>
    %242 = arith.addf %241, %240 : vector<8x128xf32>
    %243 = arith.divf %241, %242 : vector<8x128xf32>
    %244 = vector.extract_strided_slice %236 {offsets = [0, 128], sizes = [8, 128], strides = [1, 1]} : vector<8x512xf32> to vector<8x128xf32>
    %245 = arith.negf %244 : vector<8x128xf32>
    %246 = math.exp %245 : vector<8x128xf32>
    %cst_115 = arith.constant 1.000000e+00 : f32
    %247 = vector.broadcast %cst_115 : f32 to vector<8x128xf32>
    %248 = arith.addf %247, %246 : vector<8x128xf32>
    %249 = arith.divf %247, %248 : vector<8x128xf32>
    %250 = vector.extract_strided_slice %236 {offsets = [0, 256], sizes = [8, 128], strides = [1, 1]} : vector<8x512xf32> to vector<8x128xf32>
    %251 = math.tanh %250 : vector<8x128xf32>
    %252 = vector.extract_strided_slice %236 {offsets = [0, 384], sizes = [8, 128], strides = [1, 1]} : vector<8x512xf32> to vector<8x128xf32>
    %253 = arith.negf %252 : vector<8x128xf32>
    %254 = math.exp %253 : vector<8x128xf32>
    %cst_116 = arith.constant 1.000000e+00 : f32
    %255 = vector.broadcast %cst_116 : f32 to vector<8x128xf32>
    %256 = arith.addf %255, %254 : vector<8x128xf32>
    %257 = arith.divf %255, %256 : vector<8x128xf32>
    %258 = arith.mulf %249, %237 : vector<8x128xf32>
    %259 = arith.mulf %243, %251 : vector<8x128xf32>
    %260 = arith.addf %258, %259 : vector<8x128xf32>
    %261 = math.tanh %260 : vector<8x128xf32>
    %262 = arith.mulf %257, %261 : vector<8x128xf32>
    %c0_117 = arith.constant 0 : index
    %c0_118 = arith.constant 0 : index
    %263 = vector.load %arg10[%c0_117, %c0_118] : memref<8x128xf32, #tpu.memory_space<vmem>>, vector<8x128xf32>
    tpu.vector_store %arg10[%c0_117, %c0_118], %260 {strides = array<i32>} : memref<8x128xf32, #tpu.memory_space<vmem>>, vector<8x128xf32>,
    %c0_119 = arith.constant 0 : index
    %c0_120 = arith.constant 0 : index
    %264 = vector.load %arg9[%c0_119, %c0_120] : memref<8x256xf32, #tpu.memory_space<vmem>>, vector<8x128xf32>
    tpu.vector_store %arg9[%c0_119, %c0_120], %262 {strides = array<i32>} : memref<8x256xf32, #tpu.memory_space<vmem>>, vector<8x128xf32>,
    %c0_121 = arith.constant 0 : index
    %c0_122 = arith.constant 0 : index
    %265 = vector.load %arg9[%c0_121, %c0_122] : memref<8x256xf32, #tpu.memory_space<vmem>>, vector<8x256xf32>
    %c0_123 = arith.constant 0 : index
    %c0_124 = arith.constant 0 : index
    %266 = vector.load %arg5[%c0_123, %c0_124] : memref<256x512xf32, #tpu.memory_space<vmem>>, vector<256x512xf32>
    %cst_125 = arith.constant dense<0.000000e+00> : vector<8x512xf32>
    %267 = tpu.matmul %265, %266, %cst_125 {dimension_numbers = #tpu.dot_dimension_numbers<[1], [0], [0], [1], [0, 0, 1, 1], [], []>} : vector<8x256xf32>, vector<256x512xf32>, vector<8x512xf32> -> vector<8x512xf32>
    %268 = arith.addf %267, %12 : vector<8x512xf32>
    %c0_126 = arith.constant 0 : index
    %c0_127 = arith.constant 0 : index
    %269 = vector.load %arg11[%c0_126, %c0_127] : memref<8x128xf32, #tpu.memory_space<vmem>>, vector<8x128xf32>
    %270 = vector.extract_strided_slice %268 {offsets = [0, 0], sizes = [8, 128], strides = [1, 1]} : vector<8x512xf32> to vector<8x128xf32>
    %271 = arith.negf %270 : vector<8x128xf32>
    %272 = math.exp %271 : vector<8x128xf32>
    %cst_128 = arith.constant 1.000000e+00 : f32
    %273 = vector.broadcast %cst_128 : f32 to vector<8x128xf32>
    %274 = arith.addf %273, %272 : vector<8x128xf32>
    %275 = arith.divf %273, %274 : vector<8x128xf32>
    %276 = vector.extract_strided_slice %268 {offsets = [0, 128], sizes = [8, 128], strides = [1, 1]} : vector<8x512xf32> to vector<8x128xf32>
    %277 = arith.negf %276 : vector<8x128xf32>
    %278 = math.exp %277 : vector<8x128xf32>
    %cst_129 = arith.constant 1.000000e+00 : f32
    %279 = vector.broadcast %cst_129 : f32 to vector<8x128xf32>
    %280 = arith.addf %279, %278 : vector<8x128xf32>
    %281 = arith.divf %279, %280 : vector<8x128xf32>
    %282 = vector.extract_strided_slice %268 {offsets = [0, 256], sizes = [8, 128], strides = [1, 1]} : vector<8x512xf32> to vector<8x128xf32>
    %283 = math.tanh %282 : vector<8x128xf32>
    %284 = vector.extract_strided_slice %268 {offsets = [0, 384], sizes = [8, 128], strides = [1, 1]} : vector<8x512xf32> to vector<8x128xf32>
    %285 = arith.negf %284 : vector<8x128xf32>
    %286 = math.exp %285 : vector<8x128xf32>
    %cst_130 = arith.constant 1.000000e+00 : f32
    %287 = vector.broadcast %cst_130 : f32 to vector<8x128xf32>
    %288 = arith.addf %287, %286 : vector<8x128xf32>
    %289 = arith.divf %287, %288 : vector<8x128xf32>
    %290 = arith.mulf %281, %269 : vector<8x128xf32>
    %291 = arith.mulf %275, %283 : vector<8x128xf32>
    %292 = arith.addf %290, %291 : vector<8x128xf32>
    %293 = math.tanh %292 : vector<8x128xf32>
    %294 = arith.mulf %289, %293 : vector<8x128xf32>
    %c0_131 = arith.constant 0 : index
    %c0_132 = arith.constant 0 : index
    %295 = vector.load %arg11[%c0_131, %c0_132] : memref<8x128xf32, #tpu.memory_space<vmem>>, vector<8x128xf32>
    tpu.vector_store %arg11[%c0_131, %c0_132], %292 {strides = array<i32>} : memref<8x128xf32, #tpu.memory_space<vmem>>, vector<8x128xf32>,
    %296 = arith.index_cast %c3_i32 : i32 to index
    %c0_133 = arith.constant 0 : index
    %c0_134 = arith.constant 0 : index
    %297 = vector.load %arg7[%296, %c0_133, %c0_134] : memref<8x8x128xf32, #tpu.memory_space<vmem>>, vector<1x8x128xf32>
    %298 = vector.shape_cast %297 : vector<1x8x128xf32> to vector<8x128xf32>
    %299 = vector.shape_cast %294 : vector<8x128xf32> to vector<1x8x128xf32>
    tpu.vector_store %arg7[%296, %c0_133, %c0_134], %299 {strides = array<i32>} : memref<8x8x128xf32, #tpu.memory_space<vmem>>, vector<1x8x128xf32>,
    %c0_135 = arith.constant 0 : index
    %c128_136 = arith.constant 128 : index
    %300 = vector.load %arg9[%c0_135, %c128_136] : memref<8x256xf32, #tpu.memory_space<vmem>>, vector<8x128xf32>
    tpu.vector_store %arg9[%c0_135, %c128_136], %294 {strides = array<i32>} : memref<8x256xf32, #tpu.memory_space<vmem>>, vector<8x128xf32>,
    %c4_i32 = arith.constant 4 : i32
    %c8_i32_137 = arith.constant 8 : i32
    %301 = arith.muli %c4_i32, %c8_i32_137 : i32
    %302 = tpu.assume_multiple %301, 8 : i32
    %303 = arith.index_cast %302 : i32 to index
    %c0_138 = arith.constant 0 : index
    %304 = vector.load %arg8[%303, %c0_138] : memref<64x512xf32, #tpu.memory_space<vmem>>, vector<8x512xf32>
    %c0_139 = arith.constant 0 : index
    %c0_140 = arith.constant 0 : index
    %305 = vector.load %arg9[%c0_139, %c0_140] : memref<8x256xf32, #tpu.memory_space<vmem>>, vector<8x128xf32>
    %c0_141 = arith.constant 0 : index
    %c0_142 = arith.constant 0 : index
    %306 = vector.load %arg4[%c0_141, %c0_142] : memref<128x512xf32, #tpu.memory_space<vmem>>, vector<128x512xf32>
    %cst_143 = arith.constant dense<0.000000e+00> : vector<8x512xf32>
    %307 = tpu.matmul %305, %306, %cst_143 {dimension_numbers = #tpu.dot_dimension_numbers<[1], [0], [0], [1], [0, 0, 1, 1], [], []>} : vector<8x128xf32>, vector<128x512xf32>, vector<8x512xf32> -> vector<8x512xf32>
    %308 = arith.addf %304, %307 : vector<8x512xf32>
    %c0_144 = arith.constant 0 : index
    %c0_145 = arith.constant 0 : index
    %309 = vector.load %arg10[%c0_144, %c0_145] : memref<8x128xf32, #tpu.memory_space<vmem>>, vector<8x128xf32>
    %310 = vector.extract_strided_slice %308 {offsets = [0, 0], sizes = [8, 128], strides = [1, 1]} : vector<8x512xf32> to vector<8x128xf32>
    %311 = arith.negf %310 : vector<8x128xf32>
    %312 = math.exp %311 : vector<8x128xf32>
    %cst_146 = arith.constant 1.000000e+00 : f32
    %313 = vector.broadcast %cst_146 : f32 to vector<8x128xf32>
    %314 = arith.addf %313, %312 : vector<8x128xf32>
    %315 = arith.divf %313, %314 : vector<8x128xf32>
    %316 = vector.extract_strided_slice %308 {offsets = [0, 128], sizes = [8, 128], strides = [1, 1]} : vector<8x512xf32> to vector<8x128xf32>
    %317 = arith.negf %316 : vector<8x128xf32>
    %318 = math.exp %317 : vector<8x128xf32>
    %cst_147 = arith.constant 1.000000e+00 : f32
    %319 = vector.broadcast %cst_147 : f32 to vector<8x128xf32>
    %320 = arith.addf %319, %318 : vector<8x128xf32>
    %321 = arith.divf %319, %320 : vector<8x128xf32>
    %322 = vector.extract_strided_slice %308 {offsets = [0, 256], sizes = [8, 128], strides = [1, 1]} : vector<8x512xf32> to vector<8x128xf32>
    %323 = math.tanh %322 : vector<8x128xf32>
    %324 = vector.extract_strided_slice %308 {offsets = [0, 384], sizes = [8, 128], strides = [1, 1]} : vector<8x512xf32> to vector<8x128xf32>
    %325 = arith.negf %324 : vector<8x128xf32>
    %326 = math.exp %325 : vector<8x128xf32>
    %cst_148 = arith.constant 1.000000e+00 : f32
    %327 = vector.broadcast %cst_148 : f32 to vector<8x128xf32>
    %328 = arith.addf %327, %326 : vector<8x128xf32>
    %329 = arith.divf %327, %328 : vector<8x128xf32>
    %330 = arith.mulf %321, %309 : vector<8x128xf32>
    %331 = arith.mulf %315, %323 : vector<8x128xf32>
    %332 = arith.addf %330, %331 : vector<8x128xf32>
    %333 = math.tanh %332 : vector<8x128xf32>
    %334 = arith.mulf %329, %333 : vector<8x128xf32>
    %c0_149 = arith.constant 0 : index
    %c0_150 = arith.constant 0 : index
    %335 = vector.load %arg10[%c0_149, %c0_150] : memref<8x128xf32, #tpu.memory_space<vmem>>, vector<8x128xf32>
    tpu.vector_store %arg10[%c0_149, %c0_150], %332 {strides = array<i32>} : memref<8x128xf32, #tpu.memory_space<vmem>>, vector<8x128xf32>,
    %c0_151 = arith.constant 0 : index
    %c0_152 = arith.constant 0 : index
    %336 = vector.load %arg9[%c0_151, %c0_152] : memref<8x256xf32, #tpu.memory_space<vmem>>, vector<8x128xf32>
    tpu.vector_store %arg9[%c0_151, %c0_152], %334 {strides = array<i32>} : memref<8x256xf32, #tpu.memory_space<vmem>>, vector<8x128xf32>,
    %c0_153 = arith.constant 0 : index
    %c0_154 = arith.constant 0 : index
    %337 = vector.load %arg9[%c0_153, %c0_154] : memref<8x256xf32, #tpu.memory_space<vmem>>, vector<8x256xf32>
    %c0_155 = arith.constant 0 : index
    %c0_156 = arith.constant 0 : index
    %338 = vector.load %arg5[%c0_155, %c0_156] : memref<256x512xf32, #tpu.memory_space<vmem>>, vector<256x512xf32>
    %cst_157 = arith.constant dense<0.000000e+00> : vector<8x512xf32>
    %339 = tpu.matmul %337, %338, %cst_157 {dimension_numbers = #tpu.dot_dimension_numbers<[1], [0], [0], [1], [0, 0, 1, 1], [], []>} : vector<8x256xf32>, vector<256x512xf32>, vector<8x512xf32> -> vector<8x512xf32>
    %340 = arith.addf %339, %12 : vector<8x512xf32>
    %c0_158 = arith.constant 0 : index
    %c0_159 = arith.constant 0 : index
    %341 = vector.load %arg11[%c0_158, %c0_159] : memref<8x128xf32, #tpu.memory_space<vmem>>, vector<8x128xf32>
    %342 = vector.extract_strided_slice %340 {offsets = [0, 0], sizes = [8, 128], strides = [1, 1]} : vector<8x512xf32> to vector<8x128xf32>
    %343 = arith.negf %342 : vector<8x128xf32>
    %344 = math.exp %343 : vector<8x128xf32>
    %cst_160 = arith.constant 1.000000e+00 : f32
    %345 = vector.broadcast %cst_160 : f32 to vector<8x128xf32>
    %346 = arith.addf %345, %344 : vector<8x128xf32>
    %347 = arith.divf %345, %346 : vector<8x128xf32>
    %348 = vector.extract_strided_slice %340 {offsets = [0, 128], sizes = [8, 128], strides = [1, 1]} : vector<8x512xf32> to vector<8x128xf32>
    %349 = arith.negf %348 : vector<8x128xf32>
    %350 = math.exp %349 : vector<8x128xf32>
    %cst_161 = arith.constant 1.000000e+00 : f32
    %351 = vector.broadcast %cst_161 : f32 to vector<8x128xf32>
    %352 = arith.addf %351, %350 : vector<8x128xf32>
    %353 = arith.divf %351, %352 : vector<8x128xf32>
    %354 = vector.extract_strided_slice %340 {offsets = [0, 256], sizes = [8, 128], strides = [1, 1]} : vector<8x512xf32> to vector<8x128xf32>
    %355 = math.tanh %354 : vector<8x128xf32>
    %356 = vector.extract_strided_slice %340 {offsets = [0, 384], sizes = [8, 128], strides = [1, 1]} : vector<8x512xf32> to vector<8x128xf32>
    %357 = arith.negf %356 : vector<8x128xf32>
    %358 = math.exp %357 : vector<8x128xf32>
    %cst_162 = arith.constant 1.000000e+00 : f32
    %359 = vector.broadcast %cst_162 : f32 to vector<8x128xf32>
    %360 = arith.addf %359, %358 : vector<8x128xf32>
    %361 = arith.divf %359, %360 : vector<8x128xf32>
    %362 = arith.mulf %353, %341 : vector<8x128xf32>
    %363 = arith.mulf %347, %355 : vector<8x128xf32>
    %364 = arith.addf %362, %363 : vector<8x128xf32>
    %365 = math.tanh %364 : vector<8x128xf32>
    %366 = arith.mulf %361, %365 : vector<8x128xf32>
    %c0_163 = arith.constant 0 : index
    %c0_164 = arith.constant 0 : index
    %367 = vector.load %arg11[%c0_163, %c0_164] : memref<8x128xf32, #tpu.memory_space<vmem>>, vector<8x128xf32>
    tpu.vector_store %arg11[%c0_163, %c0_164], %364 {strides = array<i32>} : memref<8x128xf32, #tpu.memory_space<vmem>>, vector<8x128xf32>,
    %368 = arith.index_cast %c4_i32 : i32 to index
    %c0_165 = arith.constant 0 : index
    %c0_166 = arith.constant 0 : index
    %369 = vector.load %arg7[%368, %c0_165, %c0_166] : memref<8x8x128xf32, #tpu.memory_space<vmem>>, vector<1x8x128xf32>
    %370 = vector.shape_cast %369 : vector<1x8x128xf32> to vector<8x128xf32>
    %371 = vector.shape_cast %366 : vector<8x128xf32> to vector<1x8x128xf32>
    tpu.vector_store %arg7[%368, %c0_165, %c0_166], %371 {strides = array<i32>} : memref<8x8x128xf32, #tpu.memory_space<vmem>>, vector<1x8x128xf32>,
    %c0_167 = arith.constant 0 : index
    %c128_168 = arith.constant 128 : index
    %372 = vector.load %arg9[%c0_167, %c128_168] : memref<8x256xf32, #tpu.memory_space<vmem>>, vector<8x128xf32>
    tpu.vector_store %arg9[%c0_167, %c128_168], %366 {strides = array<i32>} : memref<8x256xf32, #tpu.memory_space<vmem>>, vector<8x128xf32>,
    %c5_i32 = arith.constant 5 : i32
    %c8_i32_169 = arith.constant 8 : i32
    %373 = arith.muli %c5_i32, %c8_i32_169 : i32
    %374 = tpu.assume_multiple %373, 8 : i32
    %375 = arith.index_cast %374 : i32 to index
    %c0_170 = arith.constant 0 : index
    %376 = vector.load %arg8[%375, %c0_170] : memref<64x512xf32, #tpu.memory_space<vmem>>, vector<8x512xf32>
    %c0_171 = arith.constant 0 : index
    %c0_172 = arith.constant 0 : index
    %377 = vector.load %arg9[%c0_171, %c0_172] : memref<8x256xf32, #tpu.memory_space<vmem>>, vector<8x128xf32>
    %c0_173 = arith.constant 0 : index
    %c0_174 = arith.constant 0 : index
    %378 = vector.load %arg4[%c0_173, %c0_174] : memref<128x512xf32, #tpu.memory_space<vmem>>, vector<128x512xf32>
    %cst_175 = arith.constant dense<0.000000e+00> : vector<8x512xf32>
    %379 = tpu.matmul %377, %378, %cst_175 {dimension_numbers = #tpu.dot_dimension_numbers<[1], [0], [0], [1], [0, 0, 1, 1], [], []>} : vector<8x128xf32>, vector<128x512xf32>, vector<8x512xf32> -> vector<8x512xf32>
    %380 = arith.addf %376, %379 : vector<8x512xf32>
    %c0_176 = arith.constant 0 : index
    %c0_177 = arith.constant 0 : index
    %381 = vector.load %arg10[%c0_176, %c0_177] : memref<8x128xf32, #tpu.memory_space<vmem>>, vector<8x128xf32>
    %382 = vector.extract_strided_slice %380 {offsets = [0, 0], sizes = [8, 128], strides = [1, 1]} : vector<8x512xf32> to vector<8x128xf32>
    %383 = arith.negf %382 : vector<8x128xf32>
    %384 = math.exp %383 : vector<8x128xf32>
    %cst_178 = arith.constant 1.000000e+00 : f32
    %385 = vector.broadcast %cst_178 : f32 to vector<8x128xf32>
    %386 = arith.addf %385, %384 : vector<8x128xf32>
    %387 = arith.divf %385, %386 : vector<8x128xf32>
    %388 = vector.extract_strided_slice %380 {offsets = [0, 128], sizes = [8, 128], strides = [1, 1]} : vector<8x512xf32> to vector<8x128xf32>
    %389 = arith.negf %388 : vector<8x128xf32>
    %390 = math.exp %389 : vector<8x128xf32>
    %cst_179 = arith.constant 1.000000e+00 : f32
    %391 = vector.broadcast %cst_179 : f32 to vector<8x128xf32>
    %392 = arith.addf %391, %390 : vector<8x128xf32>
    %393 = arith.divf %391, %392 : vector<8x128xf32>
    %394 = vector.extract_strided_slice %380 {offsets = [0, 256], sizes = [8, 128], strides = [1, 1]} : vector<8x512xf32> to vector<8x128xf32>
    %395 = math.tanh %394 : vector<8x128xf32>
    %396 = vector.extract_strided_slice %380 {offsets = [0, 384], sizes = [8, 128], strides = [1, 1]} : vector<8x512xf32> to vector<8x128xf32>
    %397 = arith.negf %396 : vector<8x128xf32>
    %398 = math.exp %397 : vector<8x128xf32>
    %cst_180 = arith.constant 1.000000e+00 : f32
    %399 = vector.broadcast %cst_180 : f32 to vector<8x128xf32>
    %400 = arith.addf %399, %398 : vector<8x128xf32>
    %401 = arith.divf %399, %400 : vector<8x128xf32>
    %402 = arith.mulf %393, %381 : vector<8x128xf32>
    %403 = arith.mulf %387, %395 : vector<8x128xf32>
    %404 = arith.addf %402, %403 : vector<8x128xf32>
    %405 = math.tanh %404 : vector<8x128xf32>
    %406 = arith.mulf %401, %405 : vector<8x128xf32>
    %c0_181 = arith.constant 0 : index
    %c0_182 = arith.constant 0 : index
    %407 = vector.load %arg10[%c0_181, %c0_182] : memref<8x128xf32, #tpu.memory_space<vmem>>, vector<8x128xf32>
    tpu.vector_store %arg10[%c0_181, %c0_182], %404 {strides = array<i32>} : memref<8x128xf32, #tpu.memory_space<vmem>>, vector<8x128xf32>,
    %c0_183 = arith.constant 0 : index
    %c0_184 = arith.constant 0 : index
    %408 = vector.load %arg9[%c0_183, %c0_184] : memref<8x256xf32, #tpu.memory_space<vmem>>, vector<8x128xf32>
    tpu.vector_store %arg9[%c0_183, %c0_184], %406 {strides = array<i32>} : memref<8x256xf32, #tpu.memory_space<vmem>>, vector<8x128xf32>,
    %c0_185 = arith.constant 0 : index
    %c0_186 = arith.constant 0 : index
    %409 = vector.load %arg9[%c0_185, %c0_186] : memref<8x256xf32, #tpu.memory_space<vmem>>, vector<8x256xf32>
    %c0_187 = arith.constant 0 : index
    %c0_188 = arith.constant 0 : index
    %410 = vector.load %arg5[%c0_187, %c0_188] : memref<256x512xf32, #tpu.memory_space<vmem>>, vector<256x512xf32>
    %cst_189 = arith.constant dense<0.000000e+00> : vector<8x512xf32>
    %411 = tpu.matmul %409, %410, %cst_189 {dimension_numbers = #tpu.dot_dimension_numbers<[1], [0], [0], [1], [0, 0, 1, 1], [], []>} : vector<8x256xf32>, vector<256x512xf32>, vector<8x512xf32> -> vector<8x512xf32>
    %412 = arith.addf %411, %12 : vector<8x512xf32>
    %c0_190 = arith.constant 0 : index
    %c0_191 = arith.constant 0 : index
    %413 = vector.load %arg11[%c0_190, %c0_191] : memref<8x128xf32, #tpu.memory_space<vmem>>, vector<8x128xf32>
    %414 = vector.extract_strided_slice %412 {offsets = [0, 0], sizes = [8, 128], strides = [1, 1]} : vector<8x512xf32> to vector<8x128xf32>
    %415 = arith.negf %414 : vector<8x128xf32>
    %416 = math.exp %415 : vector<8x128xf32>
    %cst_192 = arith.constant 1.000000e+00 : f32
    %417 = vector.broadcast %cst_192 : f32 to vector<8x128xf32>
    %418 = arith.addf %417, %416 : vector<8x128xf32>
    %419 = arith.divf %417, %418 : vector<8x128xf32>
    %420 = vector.extract_strided_slice %412 {offsets = [0, 128], sizes = [8, 128], strides = [1, 1]} : vector<8x512xf32> to vector<8x128xf32>
    %421 = arith.negf %420 : vector<8x128xf32>
    %422 = math.exp %421 : vector<8x128xf32>
    %cst_193 = arith.constant 1.000000e+00 : f32
    %423 = vector.broadcast %cst_193 : f32 to vector<8x128xf32>
    %424 = arith.addf %423, %422 : vector<8x128xf32>
    %425 = arith.divf %423, %424 : vector<8x128xf32>
    %426 = vector.extract_strided_slice %412 {offsets = [0, 256], sizes = [8, 128], strides = [1, 1]} : vector<8x512xf32> to vector<8x128xf32>
    %427 = math.tanh %426 : vector<8x128xf32>
    %428 = vector.extract_strided_slice %412 {offsets = [0, 384], sizes = [8, 128], strides = [1, 1]} : vector<8x512xf32> to vector<8x128xf32>
    %429 = arith.negf %428 : vector<8x128xf32>
    %430 = math.exp %429 : vector<8x128xf32>
    %cst_194 = arith.constant 1.000000e+00 : f32
    %431 = vector.broadcast %cst_194 : f32 to vector<8x128xf32>
    %432 = arith.addf %431, %430 : vector<8x128xf32>
    %433 = arith.divf %431, %432 : vector<8x128xf32>
    %434 = arith.mulf %425, %413 : vector<8x128xf32>
    %435 = arith.mulf %419, %427 : vector<8x128xf32>
    %436 = arith.addf %434, %435 : vector<8x128xf32>
    %437 = math.tanh %436 : vector<8x128xf32>
    %438 = arith.mulf %433, %437 : vector<8x128xf32>
    %c0_195 = arith.constant 0 : index
    %c0_196 = arith.constant 0 : index
    %439 = vector.load %arg11[%c0_195, %c0_196] : memref<8x128xf32, #tpu.memory_space<vmem>>, vector<8x128xf32>
    tpu.vector_store %arg11[%c0_195, %c0_196], %436 {strides = array<i32>} : memref<8x128xf32, #tpu.memory_space<vmem>>, vector<8x128xf32>,
    %440 = arith.index_cast %c5_i32 : i32 to index
    %c0_197 = arith.constant 0 : index
    %c0_198 = arith.constant 0 : index
    %441 = vector.load %arg7[%440, %c0_197, %c0_198] : memref<8x8x128xf32, #tpu.memory_space<vmem>>, vector<1x8x128xf32>
    %442 = vector.shape_cast %441 : vector<1x8x128xf32> to vector<8x128xf32>
    %443 = vector.shape_cast %438 : vector<8x128xf32> to vector<1x8x128xf32>
    tpu.vector_store %arg7[%440, %c0_197, %c0_198], %443 {strides = array<i32>} : memref<8x8x128xf32, #tpu.memory_space<vmem>>, vector<1x8x128xf32>,
    %c0_199 = arith.constant 0 : index
    %c128_200 = arith.constant 128 : index
    %444 = vector.load %arg9[%c0_199, %c128_200] : memref<8x256xf32, #tpu.memory_space<vmem>>, vector<8x128xf32>
    tpu.vector_store %arg9[%c0_199, %c128_200], %438 {strides = array<i32>} : memref<8x256xf32, #tpu.memory_space<vmem>>, vector<8x128xf32>,
    %c6_i32 = arith.constant 6 : i32
    %c8_i32_201 = arith.constant 8 : i32
    %445 = arith.muli %c6_i32, %c8_i32_201 : i32
    %446 = tpu.assume_multiple %445, 8 : i32
    %447 = arith.index_cast %446 : i32 to index
    %c0_202 = arith.constant 0 : index
    %448 = vector.load %arg8[%447, %c0_202] : memref<64x512xf32, #tpu.memory_space<vmem>>, vector<8x512xf32>
    %c0_203 = arith.constant 0 : index
    %c0_204 = arith.constant 0 : index
    %449 = vector.load %arg9[%c0_203, %c0_204] : memref<8x256xf32, #tpu.memory_space<vmem>>, vector<8x128xf32>
    %c0_205 = arith.constant 0 : index
    %c0_206 = arith.constant 0 : index
    %450 = vector.load %arg4[%c0_205, %c0_206] : memref<128x512xf32, #tpu.memory_space<vmem>>, vector<128x512xf32>
    %cst_207 = arith.constant dense<0.000000e+00> : vector<8x512xf32>
    %451 = tpu.matmul %449, %450, %cst_207 {dimension_numbers = #tpu.dot_dimension_numbers<[1], [0], [0], [1], [0, 0, 1, 1], [], []>} : vector<8x128xf32>, vector<128x512xf32>, vector<8x512xf32> -> vector<8x512xf32>
    %452 = arith.addf %448, %451 : vector<8x512xf32>
    %c0_208 = arith.constant 0 : index
    %c0_209 = arith.constant 0 : index
    %453 = vector.load %arg10[%c0_208, %c0_209] : memref<8x128xf32, #tpu.memory_space<vmem>>, vector<8x128xf32>
    %454 = vector.extract_strided_slice %452 {offsets = [0, 0], sizes = [8, 128], strides = [1, 1]} : vector<8x512xf32> to vector<8x128xf32>
    %455 = arith.negf %454 : vector<8x128xf32>
    %456 = math.exp %455 : vector<8x128xf32>
    %cst_210 = arith.constant 1.000000e+00 : f32
    %457 = vector.broadcast %cst_210 : f32 to vector<8x128xf32>
    %458 = arith.addf %457, %456 : vector<8x128xf32>
    %459 = arith.divf %457, %458 : vector<8x128xf32>
    %460 = vector.extract_strided_slice %452 {offsets = [0, 128], sizes = [8, 128], strides = [1, 1]} : vector<8x512xf32> to vector<8x128xf32>
    %461 = arith.negf %460 : vector<8x128xf32>
    %462 = math.exp %461 : vector<8x128xf32>
    %cst_211 = arith.constant 1.000000e+00 : f32
    %463 = vector.broadcast %cst_211 : f32 to vector<8x128xf32>
    %464 = arith.addf %463, %462 : vector<8x128xf32>
    %465 = arith.divf %463, %464 : vector<8x128xf32>
    %466 = vector.extract_strided_slice %452 {offsets = [0, 256], sizes = [8, 128], strides = [1, 1]} : vector<8x512xf32> to vector<8x128xf32>
    %467 = math.tanh %466 : vector<8x128xf32>
    %468 = vector.extract_strided_slice %452 {offsets = [0, 384], sizes = [8, 128], strides = [1, 1]} : vector<8x512xf32> to vector<8x128xf32>
    %469 = arith.negf %468 : vector<8x128xf32>
    %470 = math.exp %469 : vector<8x128xf32>
    %cst_212 = arith.constant 1.000000e+00 : f32
    %471 = vector.broadcast %cst_212 : f32 to vector<8x128xf32>
    %472 = arith.addf %471, %470 : vector<8x128xf32>
    %473 = arith.divf %471, %472 : vector<8x128xf32>
    %474 = arith.mulf %465, %453 : vector<8x128xf32>
    %475 = arith.mulf %459, %467 : vector<8x128xf32>
    %476 = arith.addf %474, %475 : vector<8x128xf32>
    %477 = math.tanh %476 : vector<8x128xf32>
    %478 = arith.mulf %473, %477 : vector<8x128xf32>
    %c0_213 = arith.constant 0 : index
    %c0_214 = arith.constant 0 : index
    %479 = vector.load %arg10[%c0_213, %c0_214] : memref<8x128xf32, #tpu.memory_space<vmem>>, vector<8x128xf32>
    tpu.vector_store %arg10[%c0_213, %c0_214], %476 {strides = array<i32>} : memref<8x128xf32, #tpu.memory_space<vmem>>, vector<8x128xf32>,
    %c0_215 = arith.constant 0 : index
    %c0_216 = arith.constant 0 : index
    %480 = vector.load %arg9[%c0_215, %c0_216] : memref<8x256xf32, #tpu.memory_space<vmem>>, vector<8x128xf32>
    tpu.vector_store %arg9[%c0_215, %c0_216], %478 {strides = array<i32>} : memref<8x256xf32, #tpu.memory_space<vmem>>, vector<8x128xf32>,
    %c0_217 = arith.constant 0 : index
    %c0_218 = arith.constant 0 : index
    %481 = vector.load %arg9[%c0_217, %c0_218] : memref<8x256xf32, #tpu.memory_space<vmem>>, vector<8x256xf32>
    %c0_219 = arith.constant 0 : index
    %c0_220 = arith.constant 0 : index
    %482 = vector.load %arg5[%c0_219, %c0_220] : memref<256x512xf32, #tpu.memory_space<vmem>>, vector<256x512xf32>
    %cst_221 = arith.constant dense<0.000000e+00> : vector<8x512xf32>
    %483 = tpu.matmul %481, %482, %cst_221 {dimension_numbers = #tpu.dot_dimension_numbers<[1], [0], [0], [1], [0, 0, 1, 1], [], []>} : vector<8x256xf32>, vector<256x512xf32>, vector<8x512xf32> -> vector<8x512xf32>
    %484 = arith.addf %483, %12 : vector<8x512xf32>
    %c0_222 = arith.constant 0 : index
    %c0_223 = arith.constant 0 : index
    %485 = vector.load %arg11[%c0_222, %c0_223] : memref<8x128xf32, #tpu.memory_space<vmem>>, vector<8x128xf32>
    %486 = vector.extract_strided_slice %484 {offsets = [0, 0], sizes = [8, 128], strides = [1, 1]} : vector<8x512xf32> to vector<8x128xf32>
    %487 = arith.negf %486 : vector<8x128xf32>
    %488 = math.exp %487 : vector<8x128xf32>
    %cst_224 = arith.constant 1.000000e+00 : f32
    %489 = vector.broadcast %cst_224 : f32 to vector<8x128xf32>
    %490 = arith.addf %489, %488 : vector<8x128xf32>
    %491 = arith.divf %489, %490 : vector<8x128xf32>
    %492 = vector.extract_strided_slice %484 {offsets = [0, 128], sizes = [8, 128], strides = [1, 1]} : vector<8x512xf32> to vector<8x128xf32>
    %493 = arith.negf %492 : vector<8x128xf32>
    %494 = math.exp %493 : vector<8x128xf32>
    %cst_225 = arith.constant 1.000000e+00 : f32
    %495 = vector.broadcast %cst_225 : f32 to vector<8x128xf32>
    %496 = arith.addf %495, %494 : vector<8x128xf32>
    %497 = arith.divf %495, %496 : vector<8x128xf32>
    %498 = vector.extract_strided_slice %484 {offsets = [0, 256], sizes = [8, 128], strides = [1, 1]} : vector<8x512xf32> to vector<8x128xf32>
    %499 = math.tanh %498 : vector<8x128xf32>
    %500 = vector.extract_strided_slice %484 {offsets = [0, 384], sizes = [8, 128], strides = [1, 1]} : vector<8x512xf32> to vector<8x128xf32>
    %501 = arith.negf %500 : vector<8x128xf32>
    %502 = math.exp %501 : vector<8x128xf32>
    %cst_226 = arith.constant 1.000000e+00 : f32
    %503 = vector.broadcast %cst_226 : f32 to vector<8x128xf32>
    %504 = arith.addf %503, %502 : vector<8x128xf32>
    %505 = arith.divf %503, %504 : vector<8x128xf32>
    %506 = arith.mulf %497, %485 : vector<8x128xf32>
    %507 = arith.mulf %491, %499 : vector<8x128xf32>
    %508 = arith.addf %506, %507 : vector<8x128xf32>
    %509 = math.tanh %508 : vector<8x128xf32>
    %510 = arith.mulf %505, %509 : vector<8x128xf32>
    %c0_227 = arith.constant 0 : index
    %c0_228 = arith.constant 0 : index
    %511 = vector.load %arg11[%c0_227, %c0_228] : memref<8x128xf32, #tpu.memory_space<vmem>>, vector<8x128xf32>
    tpu.vector_store %arg11[%c0_227, %c0_228], %508 {strides = array<i32>} : memref<8x128xf32, #tpu.memory_space<vmem>>, vector<8x128xf32>,
    %512 = arith.index_cast %c6_i32 : i32 to index
    %c0_229 = arith.constant 0 : index
    %c0_230 = arith.constant 0 : index
    %513 = vector.load %arg7[%512, %c0_229, %c0_230] : memref<8x8x128xf32, #tpu.memory_space<vmem>>, vector<1x8x128xf32>
    %514 = vector.shape_cast %513 : vector<1x8x128xf32> to vector<8x128xf32>
    %515 = vector.shape_cast %510 : vector<8x128xf32> to vector<1x8x128xf32>
    tpu.vector_store %arg7[%512, %c0_229, %c0_230], %515 {strides = array<i32>} : memref<8x8x128xf32, #tpu.memory_space<vmem>>, vector<1x8x128xf32>,
    %c0_231 = arith.constant 0 : index
    %c128_232 = arith.constant 128 : index
    %516 = vector.load %arg9[%c0_231, %c128_232] : memref<8x256xf32, #tpu.memory_space<vmem>>, vector<8x128xf32>
    tpu.vector_store %arg9[%c0_231, %c128_232], %510 {strides = array<i32>} : memref<8x256xf32, #tpu.memory_space<vmem>>, vector<8x128xf32>,
    %c7_i32 = arith.constant 7 : i32
    %c8_i32_233 = arith.constant 8 : i32
    %517 = arith.muli %c7_i32, %c8_i32_233 : i32
    %518 = tpu.assume_multiple %517, 8 : i32
    %519 = arith.index_cast %518 : i32 to index
    %c0_234 = arith.constant 0 : index
    %520 = vector.load %arg8[%519, %c0_234] : memref<64x512xf32, #tpu.memory_space<vmem>>, vector<8x512xf32>
    %c0_235 = arith.constant 0 : index
    %c0_236 = arith.constant 0 : index
    %521 = vector.load %arg9[%c0_235, %c0_236] : memref<8x256xf32, #tpu.memory_space<vmem>>, vector<8x128xf32>
    %c0_237 = arith.constant 0 : index
    %c0_238 = arith.constant 0 : index
    %522 = vector.load %arg4[%c0_237, %c0_238] : memref<128x512xf32, #tpu.memory_space<vmem>>, vector<128x512xf32>
    %cst_239 = arith.constant dense<0.000000e+00> : vector<8x512xf32>
    %523 = tpu.matmul %521, %522, %cst_239 {dimension_numbers = #tpu.dot_dimension_numbers<[1], [0], [0], [1], [0, 0, 1, 1], [], []>} : vector<8x128xf32>, vector<128x512xf32>, vector<8x512xf32> -> vector<8x512xf32>
    %524 = arith.addf %520, %523 : vector<8x512xf32>
    %c0_240 = arith.constant 0 : index
    %c0_241 = arith.constant 0 : index
    %525 = vector.load %arg10[%c0_240, %c0_241] : memref<8x128xf32, #tpu.memory_space<vmem>>, vector<8x128xf32>
    %526 = vector.extract_strided_slice %524 {offsets = [0, 0], sizes = [8, 128], strides = [1, 1]} : vector<8x512xf32> to vector<8x128xf32>
    %527 = arith.negf %526 : vector<8x128xf32>
    %528 = math.exp %527 : vector<8x128xf32>
    %cst_242 = arith.constant 1.000000e+00 : f32
    %529 = vector.broadcast %cst_242 : f32 to vector<8x128xf32>
    %530 = arith.addf %529, %528 : vector<8x128xf32>
    %531 = arith.divf %529, %530 : vector<8x128xf32>
    %532 = vector.extract_strided_slice %524 {offsets = [0, 128], sizes = [8, 128], strides = [1, 1]} : vector<8x512xf32> to vector<8x128xf32>
    %533 = arith.negf %532 : vector<8x128xf32>
    %534 = math.exp %533 : vector<8x128xf32>
    %cst_243 = arith.constant 1.000000e+00 : f32
    %535 = vector.broadcast %cst_243 : f32 to vector<8x128xf32>
    %536 = arith.addf %535, %534 : vector<8x128xf32>
    %537 = arith.divf %535, %536 : vector<8x128xf32>
    %538 = vector.extract_strided_slice %524 {offsets = [0, 256], sizes = [8, 128], strides = [1, 1]} : vector<8x512xf32> to vector<8x128xf32>
    %539 = math.tanh %538 : vector<8x128xf32>
    %540 = vector.extract_strided_slice %524 {offsets = [0, 384], sizes = [8, 128], strides = [1, 1]} : vector<8x512xf32> to vector<8x128xf32>
    %541 = arith.negf %540 : vector<8x128xf32>
    %542 = math.exp %541 : vector<8x128xf32>
    %cst_244 = arith.constant 1.000000e+00 : f32
    %543 = vector.broadcast %cst_244 : f32 to vector<8x128xf32>
    %544 = arith.addf %543, %542 : vector<8x128xf32>
    %545 = arith.divf %543, %544 : vector<8x128xf32>
    %546 = arith.mulf %537, %525 : vector<8x128xf32>
    %547 = arith.mulf %531, %539 : vector<8x128xf32>
    %548 = arith.addf %546, %547 : vector<8x128xf32>
    %549 = math.tanh %548 : vector<8x128xf32>
    %550 = arith.mulf %545, %549 : vector<8x128xf32>
    %c0_245 = arith.constant 0 : index
    %c0_246 = arith.constant 0 : index
    %551 = vector.load %arg10[%c0_245, %c0_246] : memref<8x128xf32, #tpu.memory_space<vmem>>, vector<8x128xf32>
    tpu.vector_store %arg10[%c0_245, %c0_246], %548 {strides = array<i32>} : memref<8x128xf32, #tpu.memory_space<vmem>>, vector<8x128xf32>,
    %c0_247 = arith.constant 0 : index
    %c0_248 = arith.constant 0 : index
    %552 = vector.load %arg9[%c0_247, %c0_248] : memref<8x256xf32, #tpu.memory_space<vmem>>, vector<8x128xf32>
    tpu.vector_store %arg9[%c0_247, %c0_248], %550 {strides = array<i32>} : memref<8x256xf32, #tpu.memory_space<vmem>>, vector<8x128xf32>,
    %c0_249 = arith.constant 0 : index
    %c0_250 = arith.constant 0 : index
    %553 = vector.load %arg9[%c0_249, %c0_250] : memref<8x256xf32, #tpu.memory_space<vmem>>, vector<8x256xf32>
    %c0_251 = arith.constant 0 : index
    %c0_252 = arith.constant 0 : index
    %554 = vector.load %arg5[%c0_251, %c0_252] : memref<256x512xf32, #tpu.memory_space<vmem>>, vector<256x512xf32>
    %cst_253 = arith.constant dense<0.000000e+00> : vector<8x512xf32>
    %555 = tpu.matmul %553, %554, %cst_253 {dimension_numbers = #tpu.dot_dimension_numbers<[1], [0], [0], [1], [0, 0, 1, 1], [], []>} : vector<8x256xf32>, vector<256x512xf32>, vector<8x512xf32> -> vector<8x512xf32>
    %556 = arith.addf %555, %12 : vector<8x512xf32>
    %c0_254 = arith.constant 0 : index
    %c0_255 = arith.constant 0 : index
    %557 = vector.load %arg11[%c0_254, %c0_255] : memref<8x128xf32, #tpu.memory_space<vmem>>, vector<8x128xf32>
    %558 = vector.extract_strided_slice %556 {offsets = [0, 0], sizes = [8, 128], strides = [1, 1]} : vector<8x512xf32> to vector<8x128xf32>
    %559 = arith.negf %558 : vector<8x128xf32>
    %560 = math.exp %559 : vector<8x128xf32>
    %cst_256 = arith.constant 1.000000e+00 : f32
    %561 = vector.broadcast %cst_256 : f32 to vector<8x128xf32>
    %562 = arith.addf %561, %560 : vector<8x128xf32>
    %563 = arith.divf %561, %562 : vector<8x128xf32>
    %564 = vector.extract_strided_slice %556 {offsets = [0, 128], sizes = [8, 128], strides = [1, 1]} : vector<8x512xf32> to vector<8x128xf32>
    %565 = arith.negf %564 : vector<8x128xf32>
    %566 = math.exp %565 : vector<8x128xf32>
    %cst_257 = arith.constant 1.000000e+00 : f32
    %567 = vector.broadcast %cst_257 : f32 to vector<8x128xf32>
    %568 = arith.addf %567, %566 : vector<8x128xf32>
    %569 = arith.divf %567, %568 : vector<8x128xf32>
    %570 = vector.extract_strided_slice %556 {offsets = [0, 256], sizes = [8, 128], strides = [1, 1]} : vector<8x512xf32> to vector<8x128xf32>
    %571 = math.tanh %570 : vector<8x128xf32>
    %572 = vector.extract_strided_slice %556 {offsets = [0, 384], sizes = [8, 128], strides = [1, 1]} : vector<8x512xf32> to vector<8x128xf32>
    %573 = arith.negf %572 : vector<8x128xf32>
    %574 = math.exp %573 : vector<8x128xf32>
    %cst_258 = arith.constant 1.000000e+00 : f32
    %575 = vector.broadcast %cst_258 : f32 to vector<8x128xf32>
    %576 = arith.addf %575, %574 : vector<8x128xf32>
    %577 = arith.divf %575, %576 : vector<8x128xf32>
    %578 = arith.mulf %569, %557 : vector<8x128xf32>
    %579 = arith.mulf %563, %571 : vector<8x128xf32>
    %580 = arith.addf %578, %579 : vector<8x128xf32>
    %581 = math.tanh %580 : vector<8x128xf32>
    %582 = arith.mulf %577, %581 : vector<8x128xf32>
    %c0_259 = arith.constant 0 : index
    %c0_260 = arith.constant 0 : index
    %583 = vector.load %arg11[%c0_259, %c0_260] : memref<8x128xf32, #tpu.memory_space<vmem>>, vector<8x128xf32>
    tpu.vector_store %arg11[%c0_259, %c0_260], %580 {strides = array<i32>} : memref<8x128xf32, #tpu.memory_space<vmem>>, vector<8x128xf32>,
    %584 = arith.index_cast %c7_i32 : i32 to index
    %c0_261 = arith.constant 0 : index
    %c0_262 = arith.constant 0 : index
    %585 = vector.load %arg7[%584, %c0_261, %c0_262] : memref<8x8x128xf32, #tpu.memory_space<vmem>>, vector<1x8x128xf32>
    %586 = vector.shape_cast %585 : vector<1x8x128xf32> to vector<8x128xf32>
    %587 = vector.shape_cast %582 : vector<8x128xf32> to vector<1x8x128xf32>
    tpu.vector_store %arg7[%584, %c0_261, %c0_262], %587 {strides = array<i32>} : memref<8x8x128xf32, #tpu.memory_space<vmem>>, vector<1x8x128xf32>,
    %c0_263 = arith.constant 0 : index
    %c128_264 = arith.constant 128 : index
    %588 = vector.load %arg9[%c0_263, %c128_264] : memref<8x256xf32, #tpu.memory_space<vmem>>, vector<8x128xf32>
    tpu.vector_store %arg9[%c0_263, %c128_264], %582 {strides = array<i32>} : memref<8x256xf32, #tpu.memory_space<vmem>>, vector<8x128xf32>,
    %c8_i32_265 = arith.constant 8 : i32
    return
  }
  func.func @transform_0(%arg0: i32) -> (i32, i32) {
    %c0_i32 = arith.constant 0 : i32
    %c0_i32_0 = arith.constant 0 : i32
    return %arg0, %c0_i32 : i32, i32
  }
  func.func @transform_1(%arg0: i32) -> (i32, i32) {
    %c0_i32 = arith.constant 0 : i32
    %c0_i32_0 = arith.constant 0 : i32
    %c0_i32_1 = arith.constant 0 : i32
    return %c0_i32, %c0_i32_0 : i32, i32
  }
  func.func @transform_2(%arg0: i32) -> (i32, i32) {
    %c0_i32 = arith.constant 0 : i32
    %c0_i32_0 = arith.constant 0 : i32
    %c0_i32_1 = arith.constant 0 : i32
    return %c0_i32, %c0_i32_0 : i32, i32
  }
  func.func @transform_3(%arg0: i32) -> (i32, i32) {
    %c0_i32 = arith.constant 0 : i32
    %c0_i32_0 = arith.constant 0 : i32
    %c0_i32_1 = arith.constant 0 : i32
    return %c0_i32, %c0_i32_0 : i32, i32
  }
  func.func @transform_4(%arg0: i32) -> (i32, i32) {
    %c0_i32 = arith.constant 0 : i32
    %c0_i32_0 = arith.constant 0 : i32
    %c0_i32_1 = arith.constant 0 : i32
    return %c0_i32, %c0_i32_0 : i32, i32
  }
  func.func @transform_5(%arg0: i32) -> (i32, i32) {
    %c0_i32 = arith.constant 0 : i32
    %c0_i32_0 = arith.constant 0 : i32
    %c0_i32_1 = arith.constant 0 : i32
    return %c0_i32, %c0_i32_0 : i32, i32
  }
  func.func @transform_6(%arg0: i32) -> (i32, i32, i32) {
    %c0_i32 = arith.constant 0 : i32
    %c0_i32_0 = arith.constant 0 : i32
    %c0_i32_1 = arith.constant 0 : i32
    return %arg0, %c0_i32, %c0_i32_0 : i32, i32, i32
  }
}

</mosaic_0001>

<bundles_post_ra>
// kernel: tpu_custom_call.1
= control target key start
LH: loop header
LB: loop body
LE: loop exit
PB: predicated region body
PF: predicated region fallthrough
CT: control target
= control target key end

     0   :  { %11 = vsyncpa [#allocation7], 0  ;;  %s8573_s0 = inlined_call_operand.vmem [shape: f32[64,32], index: 0, kind: input, shape index: {}]   ;;  %s8574_s1 = inlined_call_operand.hbm [shape: f32[32,512], index: 1, kind: input, shape index: {}]   ;;  %s8575_s2 = inlined_call_operand.vmem [shape: f32[1,512], index: 2, kind: input, shape index: {}]   ;;  %s8576_s3 = inlined_call_operand.hbm [shape: f32[128,512], index: 3, kind: input, shape index: {}]   ;;  %s8577_s4 = inlined_call_operand.hbm [shape: f32[256,512], index: 4, kind: input, shape index: {}]   ;;  %s8578_s5 = inlined_call_operand.vmem [shape: f32[1,512], index: 5, kind: input, shape index: {}]   ;;  %s8579_s6 = inlined_call_operand.hbm [shape: f32[8,8,128], index: 6, kind: output, shape index: {}]  }
   0x1   :  { %12 = vsyncpa [#allocation10], 0 }
   0x2   :  { %13 = vsyncpa [#allocation8], 0  ;;  %s5239_s21 = smov [#allocation9]   ;;  %s5240_s23 = smov [#allocation6]  }
   0x3   :  { %s35_s22 = sshll.u32 %s5239_s21, 4  ;;  %s21_s24 = sshll.u32 %s5240_s23, 4  ;;  %s36_s22 = int_to_ptr.vmem [resolvable:$true] %s35_s22  ;;  %s22_s24 = int_to_ptr.vmem [resolvable:$true] %s21_s24 }
   0x4   :  { %s5161_s25 = scalar_lea.vmem %s36_s22, 8192  ;;  %p5166_p1 = scmp.lt.s32.totalorder %s36_s22, %s36_s22 }
   0x5   :  { %p5162_p0 = scmp.ne.s32.totalorder %s36_s22, %s5161_s25  ;;  %p5167_p2 = scmp.lt.s32.totalorder %s5161_s25, %s5161_s25 }
   0x7   :  { %p5168_p3 = por %p5167_p2, %p5166_p1 }
   0x9   :  { %p5169_p4 = pnand %p5168_p3, %p5162_p0 }
   0xb   :  { %5172 = shalt.err (!%p5169_p4)
}
   0xc   :  { %s5241_s26 = smov 512   ;;  %s5242_s27 = smov 32  }
   0xd   :  { %41 = dma.hbm_to_vmem [thread:$0]  %s8576_s3, 8192, %s36_s22, [#allocation10], %s5241_s26, %s5241_s26, %s5242_s27  }
   0xe   :  { %s5181_s30 = scalar_lea.vmem %s22_s24, 2048  ;;  %p5186_p6 = scmp.lt.s32.totalorder %s22_s24, %s22_s24 }
   0xf   :  { %p5182_p5 = scmp.ne.s32.totalorder %s22_s24, %s5181_s30  ;;  %p5187_p7 = scmp.lt.s32.totalorder %s5181_s30, %s5181_s30 }
  0x11   :  { %p5188_p8 = por %p5187_p7, %p5186_p6 }
  0x13   :  { %p5189_p9 = pnand %p5188_p8, %p5182_p5 }
  0x15   :  { %5192 = shalt.err (!%p5189_p9)
}
  0x16   :  { %27 = dma.hbm_to_vmem [thread:$0]  %s8574_s1, 2048, %s22_s24, [#allocation7], %s5241_s26, %s5241_s26, %s5242_s27  }
  0x17   :  { %s5243_s9 = smov [#allocation11]  }
  0x18   :  { %s47_s10 = sshll.u32 %s5243_s9, 4  ;;  %s48_s10 = int_to_ptr.vmem [resolvable:$true] %s47_s10 }
  0x19   :  { %s5201_s11 = scalar_lea.vmem %s48_s10, 16384  ;;  %p5206_p11 = scmp.lt.s32.totalorder %s48_s10, %s48_s10 }
  0x1a   :  { %p5202_p10 = scmp.ne.s32.totalorder %s48_s10, %s5201_s11  ;;  %p5207_p12 = scmp.lt.s32.totalorder %s5201_s11, %s5201_s11 }
  0x1c   :  { %p5208_p13 = por %p5207_p12, %p5206_p11 }
  0x1e   :  { %p5209_p0 = pnand %p5208_p13, %p5202_p10 }
  0x20   :  { %5212 = shalt.err (!%p5209_p0)
}
  0x21   :  { %53 = dma.hbm_to_vmem [thread:$0]  %s8577_s4, 16384, %s48_s10, [#allocation10], %s5241_s26, %s5241_s26, %s5242_s27  }
  0x22   :  { %5233 = dma.done.wait [#allocation7], 2048  }
  0x23   :  { %5234 = vsyncadd [#allocation7], 4294965248 }
  0x24   :  { %5235 = dma.done.wait [#allocation10], 24576  }
  0x25   :  { %5236 = vsyncadd [#allocation10], 4294942720  ;;  %v8580_v0 = vmov 0.0   ;;  %v94_v1 = vld [vmem:[#allocation6 + $0x68] sm:$0xff]  ;;  %v96_v2 = vld [vmem:[#allocation6 + $0x78] sm:$0xff]  ;;  %vm119_vm0 = vcmask 261120  }
  0x26   :  { %208 = vmatprep.mubr.f32.mxu0 %v8580_v0  ;;  %321 = vmatprep.mubr.f32.mxu1 %v8580_v0  ;;  %v93_v3 = vld [vmem:[#allocation6 + $0x60] sm:$0xff]  ;;  %v95_v4 = vld [vmem:[#allocation6 + $0x70] sm:$0xff]  ;;  %v90_v5 = vld [vmem:[#allocation6 + $0x48] sm:$0xff] }
  0x27   :  { %168 = vmatprep.subr.mxu0 %v94_v1  ;;  %281 = vmatprep.subr.mxu1 %v96_v2  ;;  %v92_v6 = vld [vmem:[#allocation6 + $0x58] sm:$0xff]  ;;  %v89_v7 = vld [vmem:[#allocation6 + $0x40] sm:$0xff]  ;;  %v91_v8 = vld [vmem:[#allocation6 + $0x50] sm:$0xff] }
  0x28   :  { %169 = vmatpush1.msra.mxu0 %v93_v3  ;;  %282 = vmatpush1.msra.mxu1 %v95_v4  ;;  %v86_v9 = vld [vmem:[#allocation6 + $0x28] sm:$0xff]  ;;  %v88_v10 = vld [vmem:[#allocation6 + $0x38] sm:$0xff]  ;;  %v85_v11 = vld [vmem:[#allocation6 + $0x20] sm:$0xff] }
  0x29   :  { %170 = vmatprep.subr.mxu0 %v90_v5  ;;  %283 = vmatprep.subr.mxu1 %v92_v6  ;;  %v87_v12 = vld [vmem:[#allocation6 + $0x30] sm:$0xff]  ;;  %v82_v13 = vld [vmem:[#allocation6 + $0x8] sm:$0xff]  ;;  %v84_v14 = vld [vmem:[#allocation6 + $0x18] sm:$0xff] }
  0x2a   :  { %171 = vmatpush1.msra.mxu0 %v89_v7  ;;  %284 = vmatpush1.msra.mxu1 %v91_v8  ;;  %v81_v15 = vld [vmem:[#allocation6] sm:$0xff]  ;;  %v83_v16 = vld [vmem:[#allocation6 + $0x10] sm:$0xff]  ;;  %v493_v18 = vld [vmem:[#allocation9 + $0x1e8] sm:$0xff] }
  0x2b   :  { %172 = vmatprep.subr.mxu0 %v86_v9  ;;  %285 = vmatprep.subr.mxu1 %v88_v10  ;;  %v73_v17 = vld [vmem:[%s8573_s0] sm:$0xff]  ;;  %v495_v19 = vld [vmem:[#allocation9 + $0x1f8] sm:$0xff]  ;;  %v494_v21 = vld [vmem:[#allocation9 + $0x1f0] sm:$0xff] }
  0x2c   :  { %173 = vmatpush1.msra.mxu0 %v85_v11  ;;  %286 = vmatpush1.msra.mxu1 %v87_v12  ;;  %v492_v20 = vld [vmem:[#allocation9 + $0x1e0] sm:$0xff]  ;;  %v489_v22 = vld [vmem:[#allocation9 + $0x1c8] sm:$0xff]  ;;  %v491_v23 = vld [vmem:[#allocation9 + $0x1d8] sm:$0xff] }
  0x2d   :  { %174 = vmatprep.subr.mxu0 %v82_v13  ;;  %287 = vmatprep.subr.mxu1 %v84_v14  ;;  %v488_v24 = vld [vmem:[#allocation9 + $0x1c0] sm:$0xff]  ;;  %v490_v25 = vld [vmem:[#allocation9 + $0x1d0] sm:$0xff]  ;;  %v74_v26 = vld [vmem:[%s8573_s0 + $0x8] sm:$0xff] }
  0x2e   :  { %175 = vmatpush1.msra.mxu0 %v81_v15  ;;  %288 = vmatpush1.msra.mxu1 %v83_v16  ;;  %v485_v27 = vld [vmem:[#allocation9 + $0x1a8] sm:$0xff]  ;;  %v487_v28 = vld [vmem:[#allocation9 + $0x1b8] sm:$0xff]  ;;  %v484_v29 = vld [vmem:[#allocation9 + $0x1a0] sm:$0xff] }
  0x2f   :  { %4816 = vmatmul.mubr.msk.f32.vlgmr.msra.gmra.mxu0 %vm119_vm0, %v73_v17  ;;  %4824 = vmatmul.mubr.msk.f32.vlgmr.msra.gmra.mxu1 %vm119_vm0, %v73_v17  ;;  %v486_v30 = vld [vmem:[#allocation9 + $0x1b0] sm:$0xff]  ;;  %v481_v31 = vld [vmem:[#allocation9 + $0x188] sm:$0xff]  ;;  %v483_v32 = vld [vmem:[#allocation9 + $0x198] sm:$0xff] }
  0x30   :  { %496 = vmatprep.subr.mxu0 %v493_v18  ;;  %567 = vmatprep.subr.mxu1 %v495_v19  ;;  %v480_v33 = vld [vmem:[#allocation9 + $0x180] sm:$0xff]  ;;  %v482_v34 = vld [vmem:[#allocation9 + $0x190] sm:$0xff]  ;;  %v477_v36 = vld [vmem:[#allocation9 + $0x168] sm:$0xff] }
  0x31   :  { %497 = vmatpush1.msra.mxu0 %v492_v20  ;;  %568 = vmatpush1.msra.mxu1 %v494_v21  ;;  %v75_v35 = vld [vmem:[%s8573_s0 + $0x10] sm:$0xff]  ;;  %v479_v37 = vld [vmem:[#allocation9 + $0x178] sm:$0xff]  ;;  %v476_v38 = vld [vmem:[#allocation9 + $0x160] sm:$0xff] }
  0x32   :  { %498 = vmatprep.subr.mxu0 %v489_v22  ;;  %569 = vmatprep.subr.mxu1 %v491_v23  ;;  %v478_v39 = vld [vmem:[#allocation9 + $0x170] sm:$0xff]  ;;  %v473_v40 = vld [vmem:[#allocation9 + $0x148] sm:$0xff]  ;;  %v475_v41 = vld [vmem:[#allocation9 + $0x158] sm:$0xff] }
  0x33   :  { %214 = vmatprep.mubr.f32.mxu0 %v8580_v0  ;;  %327 = vmatprep.mubr.f32.mxu1 %v8580_v0  ;;  %v472_v42 = vld [vmem:[#allocation9 + $0x140] sm:$0xff]  ;;  %v474_v43 = vld [vmem:[#allocation9 + $0x150] sm:$0xff]  ;;  %v76_v44 = vld [vmem:[%s8573_s0 + $0x18] sm:$0xff] }
  0x34   :  { %499 = vmatpush1.msra.mxu0 %v488_v24  ;;  %570 = vmatpush1.msra.mxu1 %v490_v25  ;;  %v469_v45 = vld [vmem:[#allocation9 + $0x128] sm:$0xff]  ;;  %v471_v46 = vld [vmem:[#allocation9 + $0x138] sm:$0xff]  ;;  %v468_v47 = vld [vmem:[#allocation9 + $0x120] sm:$0xff] }
  0x35   :  { %4817 = vmatmul.mubr.msk.f32.gmra.mxu0 %vm119_vm0, %v74_v26  ;;  %4825 = vmatmul.mubr.msk.f32.gmra.mxu1 %vm119_vm0, %v74_v26  ;;  %v470_v48 = vld [vmem:[#allocation9 + $0x130] sm:$0xff]  ;;  %v465_v49 = vld [vmem:[#allocation9 + $0x108] sm:$0xff]  ;;  %v467_v50 = vld [vmem:[#allocation9 + $0x118] sm:$0xff] }
  0x36   :  { %500 = vmatprep.subr.mxu0 %v485_v27  ;;  %571 = vmatprep.subr.mxu1 %v487_v28  ;;  %v464_v51 = vld [vmem:[#allocation9 + $0x100] sm:$0xff]  ;;  %v466_v52 = vld [vmem:[#allocation9 + $0x110] sm:$0xff]  ;;  %v461_v54 = vld [vmem:[#allocation9 + $0xe8] sm:$0xff] }
  0x37   :  { %501 = vmatpush1.msra.mxu0 %v484_v29  ;;  %572 = vmatpush1.msra.mxu1 %v486_v30  ;;  %v77_v53 = vld [vmem:[%s8573_s0 + $0x20] sm:$0xff]  ;;  %v463_v55 = vld [vmem:[#allocation9 + $0xf8] sm:$0xff]  ;;  %v462_v57 = vld [vmem:[#allocation9 + $0xf0] sm:$0xff] }
  0x38   :  { %502 = vmatprep.subr.mxu0 %v481_v31  ;;  %573 = vmatprep.subr.mxu1 %v483_v32  ;;  %v460_v56 = vld [vmem:[#allocation9 + $0xe0] sm:$0xff]  ;;  %v457_v58 = vld [vmem:[#allocation9 + $0xc8] sm:$0xff]  ;;  %v459_v59 = vld [vmem:[#allocation9 + $0xd8] sm:$0xff] }
  0x39   :  { %220 = vmatprep.mubr.f32.mxu0 %v8580_v0  ;;  %333 = vmatprep.mubr.f32.mxu1 %v8580_v0  ;;  %v5327_v60 = vld [vmem:[#allocation9 + $0xc0] sm:$0xff]  ;;  %v5329_v61 = vld [vmem:[#allocation9 + $0xd0] sm:$0xff]  ;;  %v78_v62 = vld [vmem:[%s8573_s0 + $0x28] sm:$0xff] }
  0x3a   :  { %503 = vmatpush1.msra.mxu0 %v480_v33  ;;  %574 = vmatpush1.msra.mxu1 %v482_v34  ;;  %v5336_v63 = vld [vmem:[#allocation9 + $0xa8] sm:$0xff]  ;;  %v5338_v1 = vld [vmem:[#allocation9 + $0xb8] sm:$0xff]  ;;  %v5342_v2 = vld [vmem:[#allocation9 + $0xa0] sm:$0xff] }
  0x3b   :  { %4818 = vmatmul.mubr.msk.f32.gmra.mxu0 %vm119_vm0, %v75_v35  ;;  %4826 = vmatmul.mubr.msk.f32.gmra.mxu1 %vm119_vm0, %v75_v35  ;;  %v5344_v3 = vld [vmem:[#allocation9 + $0xb0] sm:$0xff]  ;;  %v5348_v4 = vld [vmem:[#allocation9 + $0x88] sm:$0xff]  ;;  %v5350_v5 = vld [vmem:[#allocation9 + $0x98] sm:$0xff] }
  0x3c   :  { %504 = vmatprep.subr.mxu0 %v477_v36  ;;  %575 = vmatprep.subr.mxu1 %v479_v37  ;;  %v5356_v6 = vld [vmem:[#allocation9 + $0x80] sm:$0xff]  ;;  %v5358_v7 = vld [vmem:[#allocation9 + $0x90] sm:$0xff]  ;;  %v5367_v9 = vld [vmem:[#allocation9 + $0x68] sm:$0xff] }
  0x3d   :  { %505 = vmatpush1.msra.mxu0 %v476_v38  ;;  %576 = vmatpush1.msra.mxu1 %v478_v39  ;;  %v79_v8 = vld [vmem:[%s8573_s0 + $0x30] sm:$0xff]  ;;  %v5369_v10 = vld [vmem:[#allocation9 + $0x78] sm:$0xff]  ;;  %v5373_v11 = vld [vmem:[#allocation9 + $0x60] sm:$0xff] }
  0x3e   :  { %506 = vmatprep.subr.mxu0 %v473_v40  ;;  %577 = vmatprep.subr.mxu1 %v475_v41  ;;  %v5375_v12 = vld [vmem:[#allocation9 + $0x70] sm:$0xff]  ;;  %v5379_v13 = vld [vmem:[#allocation9 + $0x48] sm:$0xff]  ;;  %v5381_v14 = vld [vmem:[#allocation9 + $0x58] sm:$0xff] }
  0x3f   :  { %226 = vmatprep.mubr.f32.mxu0 %v8580_v0  ;;  %339 = vmatprep.mubr.f32.mxu1 %v8580_v0  ;;  %v5387_v15 = vld [vmem:[#allocation9 + $0x40] sm:$0xff]  ;;  %v5389_v16 = vld [vmem:[#allocation9 + $0x50] sm:$0xff]  ;;  %v80_v17 = vld [vmem:[%s8573_s0 + $0x38] sm:$0xff] }
  0x40   :  { %507 = vmatpush1.msra.mxu0 %v472_v42  ;;  %578 = vmatpush1.msra.mxu1 %v474_v43  ;;  %v5398_v18 = vld [vmem:[#allocation9 + $0x28] sm:$0xff]  ;;  %v5400_v19 = vld [vmem:[#allocation9 + $0x38] sm:$0xff]  ;;  %v5404_v20 = vld [vmem:[#allocation9 + $0x20] sm:$0xff] }
  0x41   :  { %4819 = vmatmul.mubr.msk.f32.gmra.mxu0 %vm119_vm0, %v76_v44  ;;  %4827 = vmatmul.mubr.msk.f32.gmra.mxu1 %vm119_vm0, %v76_v44  ;;  %v5406_v21 = vld [vmem:[#allocation9 + $0x30] sm:$0xff]  ;;  %v5410_v22 = vld [vmem:[#allocation9 + $0x8] sm:$0xff]  ;;  %v5412_v23 = vld [vmem:[#allocation9 + $0x18] sm:$0xff] }
  0x42   :  { %508 = vmatprep.subr.mxu0 %v469_v45  ;;  %579 = vmatprep.subr.mxu1 %v471_v46  ;;  %v5416_v24 = vld [vmem:[#allocation9] sm:$0xff]  ;;  %v5420_v25 = vld [vmem:[#allocation9 + $0x10] sm:$0xff]  ;;  %v5432_v26 = vld [vmem:[#allocation11 + $0x1e8] sm:$0xff] }
  0x43   :  { %509 = vmatpush1.msra.mxu0 %v468_v47  ;;  %580 = vmatpush1.msra.mxu1 %v470_v48  ;;  %v5434_v27 = vld [vmem:[#allocation11 + $0x1f8] sm:$0xff]  ;;  %v5436_v28 = vld [vmem:[#allocation11 + $0x1e0] sm:$0xff]  ;;  %v5440_v29 = vld [vmem:[#allocation11 + $0x1f0] sm:$0xff] }
  0x44   :  { %510 = vmatprep.subr.mxu0 %v465_v49  ;;  %581 = vmatprep.subr.mxu1 %v467_v50  ;;  %v5444_v30 = vld [vmem:[#allocation11 + $0x1c8] sm:$0xff]  ;;  %v5446_v31 = vld [vmem:[#allocation11 + $0x1d8] sm:$0xff]  ;;  %v5448_v32 = vld [vmem:[#allocation11 + $0x1c0] sm:$0xff] }
  0x45   :  { %232 = vmatprep.mubr.f32.mxu0 %v8580_v0  ;;  %345 = vmatprep.mubr.f32.mxu1 %v8580_v0  ;;  %v5452_v33 = vld [vmem:[#allocation11 + $0x1d0] sm:$0xff]  ;;  %v5456_v34 = vld [vmem:[#allocation11 + $0x1a8] sm:$0xff]  ;;  %v5458_v35 = vld [vmem:[#allocation11 + $0x1b8] sm:$0xff] }
  0x46   :  { %511 = vmatpush1.msra.mxu0 %v464_v51  ;;  %582 = vmatpush1.msra.mxu1 %v466_v52  ;;  %v5460_v36 = vld [vmem:[#allocation11 + $0x1a0] sm:$0xff]  ;;  %v5464_v37 = vld [vmem:[#allocation11 + $0x1b0] sm:$0xff]  ;;  %v5468_v38 = vld [vmem:[#allocation11 + $0x188] sm:$0xff] }
  0x47   :  { %4820 = vmatmul.mubr.msk.f32.gmra.mxu0 %vm119_vm0, %v77_v53  ;;  %4828 = vmatmul.mubr.msk.f32.gmra.mxu1 %vm119_vm0, %v77_v53  ;;  %v5470_v39 = vld [vmem:[#allocation11 + $0x198] sm:$0xff]  ;;  %v5472_v40 = vld [vmem:[#allocation11 + $0x180] sm:$0xff]  ;;  %v5476_v41 = vld [vmem:[#allocation11 + $0x190] sm:$0xff] }
  0x48   :  { %512 = vmatprep.subr.mxu0 %v461_v54  ;;  %583 = vmatprep.subr.mxu1 %v463_v55  ;;  %9118 = vst [vmem:[#allocation16_spill] sm:$0xff] %v5476_v41  ;;  %v5480_v42 = vld [vmem:[#allocation11 + $0x168] sm:$0xff]  ;;  %v5482_v43 = vld [vmem:[#allocation11 + $0x178] sm:$0xff]  ;;  %v5486_v44 = vld [vmem:[#allocation11 + $0x160] sm:$0xff] }
  0x49   :  { %513 = vmatpush1.msra.mxu0 %v460_v56  ;;  %584 = vmatpush1.msra.mxu1 %v462_v57  ;;  %9119 = vst [vmem:[#allocation17_spill] sm:$0xff] %v5480_v42  ;;  %9120 = vst [vmem:[#allocation18_spill] sm:$0xff] %v5482_v43  ;;  %v5488_v45 = vld [vmem:[#allocation11 + $0x170] sm:$0xff]  ;;  %v5492_v46 = vld [vmem:[#allocation11 + $0x148] sm:$0xff] }
  0x4a   :  { %514 = vmatprep.subr.mxu0 %v457_v58  ;;  %585 = vmatprep.subr.mxu1 %v459_v59  ;;  %9121 = vst [vmem:[#allocation19_spill] sm:$0xff] %v5486_v44  ;;  %9122 = vst [vmem:[#allocation20_spill] sm:$0xff] %v5488_v45  ;;  %v5494_v47 = vld [vmem:[#allocation11 + $0x158] sm:$0xff]  ;;  %v5498_v48 = vld [vmem:[#allocation11 + $0x140] sm:$0xff] }
  0x4b   :  { %238 = vmatprep.mubr.f32.mxu0 %v8580_v0  ;;  %351 = vmatprep.mubr.f32.mxu1 %v8580_v0  ;;  %9123 = vst [vmem:[#allocation21_spill] sm:$0xff] %v5492_v46  ;;  %9124 = vst [vmem:[#allocation22_spill] sm:$0xff] %v5494_v47  ;;  %v5500_v49 = vld [vmem:[#allocation11 + $0x150] sm:$0xff]  ;;  %v5504_v50 = vld [vmem:[#allocation11 + $0x128] sm:$0xff] }
  0x4c   :  { %515 = vmatpush1.msra.mxu0 %v5327_v60  ;;  %586 = vmatpush1.msra.mxu1 %v5329_v61  ;;  %9125 = vst [vmem:[#allocation23_spill] sm:$0xff] %v5498_v48  ;;  %9126 = vst [vmem:[#allocation24_spill] sm:$0xff] %v5500_v49  ;;  %v5506_v51 = vld [vmem:[#allocation11 + $0x138] sm:$0xff]  ;;  %v5510_v52 = vld [vmem:[#allocation11 + $0x120] sm:$0xff] }
  0x4d   :  { %4821 = vmatmul.mubr.msk.f32.gmra.mxu0 %vm119_vm0, %v78_v62  ;;  %4829 = vmatmul.mubr.msk.f32.gmra.mxu1 %vm119_vm0, %v78_v62  ;;  %9127 = vst [vmem:[#allocation25_spill] sm:$0xff] %v5504_v50  ;;  %9128 = vst [vmem:[#allocation26_spill] sm:$0xff] %v5506_v51  ;;  %v5512_v53 = vld [vmem:[#allocation11 + $0x130] sm:$0xff]  ;;  %v5516_v54 = vld [vmem:[#allocation11 + $0x108] sm:$0xff] }
  0x4e   :  { %516 = vmatprep.subr.mxu0 %v5336_v63  ;;  %587 = vmatprep.subr.mxu1 %v5338_v1  ;;  %9129 = vst [vmem:[#allocation27_spill] sm:$0xff] %v5510_v52  ;;  %9130 = vst [vmem:[#allocation28_spill] sm:$0xff] %v5512_v53  ;;  %v5518_v55 = vld [vmem:[#allocation11 + $0x118] sm:$0xff]  ;;  %v5522_v56 = vld [vmem:[#allocation11 + $0x100] sm:$0xff] }
  0x4f   :  { %517 = vmatpush1.msra.mxu0 %v5342_v2  ;;  %588 = vmatpush1.msra.mxu1 %v5344_v3  ;;  %9131 = vst [vmem:[#allocation29_spill] sm:$0xff] %v5516_v54  ;;  %9132 = vst [vmem:[#allocation30_spill] sm:$0xff] %v5518_v55  ;;  %v5524_v57 = vld [vmem:[#allocation11 + $0x110] sm:$0xff]  ;;  %v5528_v58 = vld [vmem:[#allocation11 + $0xe8] sm:$0xff] }
  0x50   :  { %518 = vmatprep.subr.mxu0 %v5348_v4  ;;  %589 = vmatprep.subr.mxu1 %v5350_v5  ;;  %9133 = vst [vmem:[#allocation31_spill] sm:$0xff] %v5522_v56  ;;  %9134 = vst [vmem:[#allocation32_spill] sm:$0xff] %v5524_v57  ;;  %v5530_v59 = vld [vmem:[#allocation11 + $0xf8] sm:$0xff]  ;;  %v5534_v62 = vld [vmem:[#allocation11 + $0xe0] sm:$0xff] }
  0x51   :  { %244 = vmatprep.mubr.f32.mxu0 %v8580_v0  ;;  %357 = vmatprep.mubr.f32.mxu1 %v8580_v0  ;;  %9135 = vst [vmem:[#allocation33_spill] sm:$0xff] %v5528_v58  ;;  %9136 = vst [vmem:[#allocation34_spill] sm:$0xff] %v5530_v59 }
  0x52   :  { %519 = vmatpush1.msra.mxu0 %v5356_v6  ;;  %590 = vmatpush1.msra.mxu1 %v5358_v7  ;;  %9137 = vst [vmem:[#allocation35_spill] sm:$0xff] %v5534_v62 }
  0x53   :  { %4822 = vmatmul.mubr.msk.f32.gmra.mxu0 %vm119_vm0, %v79_v8  ;;  %4830 = vmatmul.mubr.msk.f32.gmra.mxu1 %vm119_vm0, %v79_v8  ;;  %v5536_v8 = vld [vmem:[#allocation11 + $0xf0] sm:$0xff] }
  0x54   :  { %520 = vmatprep.subr.mxu0 %v5367_v9  ;;  %591 = vmatprep.subr.mxu1 %v5369_v10  ;;  %9138 = vst [vmem:[#allocation36_spill] sm:$0xff] %v5536_v8 }
  0x55   :  { %521 = vmatpush1.msra.mxu0 %v5373_v11  ;;  %592 = vmatpush1.msra.mxu1 %v5375_v12 }
  0x56   :  { %522 = vmatprep.subr.mxu0 %v5379_v13  ;;  %593 = vmatprep.subr.mxu1 %v5381_v14 }
  0x57   :  { %250 = vmatprep.mubr.f32.mxu0 %v8580_v0  ;;  %363 = vmatprep.mubr.f32.mxu1 %v8580_v0 }
  0x58   :  { %523 = vmatpush1.msra.mxu0 %v5387_v15  ;;  %594 = vmatpush1.msra.mxu1 %v5389_v16 }
  0x59   :  { %4823 = vmatmul.mubr.msk.f32.gmra.mxu0 %vm119_vm0, %v80_v17  ;;  %4831 = vmatmul.mubr.msk.f32.gmra.mxu1 %vm119_vm0, %v80_v17  ;;  %v5540_v17 = vld [vmem:[#allocation11 + $0xc8] sm:$0xff] }
  0x5a   :  { %524 = vmatprep.subr.mxu0 %v5398_v18  ;;  %595 = vmatprep.subr.mxu1 %v5400_v19  ;;  %9139 = vst [vmem:[#allocation37_spill] sm:$0xff] %v5540_v17 }
  0x5b   :  { %525 = vmatpush1.msra.mxu0 %v5404_v20  ;;  %596 = vmatpush1.msra.mxu1 %v5406_v21 }
  0x5c   :  { %526 = vmatprep.subr.mxu0 %v5410_v22  ;;  %597 = vmatprep.subr.mxu1 %v5412_v23 }
  0x5d   :  { %527 = vmatpush1.msra.mxu0 %v5416_v24  ;;  %560 = vmatprep.mubr.f32.mxu0 %v8580_v0 }
  0x5e   :  { %598 = vmatpush1.msra.mxu1 %v5420_v25  ;;  %631 = vmatprep.mubr.f32.mxu1 %v8580_v0 }
  0x5f   :  { %561 = vmatmul.mubr.f32.vlgmr.msra.gmra.mxu0 %v8580_v0  ;;  %632 = vmatmul.mubr.f32.vlgmr.msra.gmra.mxu1 %v8580_v0 }
  0x60   :  { %863 = vmatprep.mubr.f32.mxu0 %v8580_v0  ;;  %934 = vmatprep.mubr.f32.mxu1 %v8580_v0  ;;  %v5542_v0 = vld [vmem:[#allocation11 + $0xd8] sm:$0xff] }
  0x61   :  { %799 = vmatprep.subr.mxu0 %v5432_v26  ;;  %870 = vmatprep.subr.mxu1 %v5434_v27  ;;  %9140 = vst [vmem:[#allocation38_spill] sm:$0xff] %v5542_v0 }
  0x62   :  { %800 = vmatpush1.msra.mxu0 %v5436_v28  ;;  %871 = vmatpush1.msra.mxu1 %v5440_v29 }
  0x63   :  { %801 = vmatprep.subr.mxu0 %v5444_v30  ;;  %872 = vmatprep.subr.mxu1 %v5446_v31 }
  0x64   :  { %802 = vmatpush1.msra.mxu0 %v5448_v32  ;;  %873 = vmatpush1.msra.mxu1 %v5452_v33 }
  0x65   :  { %803 = vmatprep.subr.mxu0 %v5456_v34  ;;  %874 = vmatprep.subr.mxu1 %v5458_v35 }
  0x66   :  { %804 = vmatpush1.msra.mxu0 %v5460_v36  ;;  %875 = vmatpush1.msra.mxu1 %v5464_v37 }
  0x67   :  { %805 = vmatprep.subr.mxu0 %v5468_v38  ;;  %876 = vmatprep.subr.mxu1 %v5470_v39 }
  0x68   :  { %806 = vmatpush1.msra.mxu0 %v5472_v40  ;;  %877 = vmatpush1.msra.mxu1 %v5476_v41 }
  0x69   :  { %807 = vmatprep.subr.mxu0 %v5480_v42  ;;  %878 = vmatprep.subr.mxu1 %v5482_v43 }
  0x6a   :  { %808 = vmatpush1.msra.mxu0 %v5486_v44  ;;  %879 = vmatpush1.msra.mxu1 %v5488_v45 }
  0x6b   :  { %809 = vmatprep.subr.mxu0 %v5492_v46  ;;  %880 = vmatprep.subr.mxu1 %v5494_v47 }
  0x6c   :  { %810 = vmatpush1.msra.mxu0 %v5498_v48  ;;  %881 = vmatpush1.msra.mxu1 %v5500_v49 }
  0x6d   :  { %811 = vmatprep.subr.mxu0 %v5504_v50  ;;  %882 = vmatprep.subr.mxu1 %v5506_v51 }
  0x6e   :  { %812 = vmatpush1.msra.mxu0 %v5510_v52  ;;  %883 = vmatpush1.msra.mxu1 %v5512_v53  ;;  %v5770_v53 = vld [vmem:[#allocation11 + $0x260] sm:$0xff] }
  0x6f   :  { %813 = vmatprep.subr.mxu0 %v5516_v54  ;;  %884 = vmatprep.subr.mxu1 %v5518_v55  ;;  %v5746_v55 = vld [vmem:[#allocation11 + $0x2a0] sm:$0xff]  ;;  %v5754_v54 = vld [vmem:[#allocation11 + $0x298] sm:$0xff]  ;;  %9217 = vst [vmem:[#allocation115_spill] sm:$0xff] %v5770_v53 }
  0x70   :  { %814 = vmatpush1.msra.mxu0 %v5522_v56  ;;  %885 = vmatpush1.msra.mxu1 %v5524_v57  ;;  %v5546_v57 = vld [vmem:[#allocation11 + $0xc0] sm:$0xff]  ;;  %v5738_v56 = vld [vmem:[#allocation11 + $0x2d0] sm:$0xff]  ;;  %9209 = vst [vmem:[#allocation107_spill] sm:$0xff] %v5746_v55  ;;  %9212 = vst [vmem:[#allocation110_spill] sm:$0xff] %v5754_v54 }
  0x71   :  { %815 = vmatprep.subr.mxu0 %v5528_v58  ;;  %886 = vmatprep.subr.mxu1 %v5530_v59  ;;  %9141 = vst [vmem:[#allocation39_spill] sm:$0xff] %v5546_v57  ;;  %v5548_v58 = vld [vmem:[#allocation11 + $0xd0] sm:$0xff]  ;;  %v5552_v59 = vld [vmem:[#allocation11 + $0xa8] sm:$0xff]  ;;  %9206 = vst [vmem:[#allocation104_spill] sm:$0xff] %v5738_v56 }
  0x72   :  { %816 = vmatpush1.msra.mxu0 %v5534_v62  ;;  %887 = vmatpush1.msra.mxu1 %v5536_v8  ;;  %9142 = vst [vmem:[#allocation40_spill] sm:$0xff] %v5548_v58  ;;  %9143 = vst [vmem:[#allocation41_spill] sm:$0xff] %v5552_v59  ;;  %v5554_v62 = vld [vmem:[#allocation11 + $0xb8] sm:$0xff]  ;;  %v5558_v8 = vld [vmem:[#allocation11 + $0xa0] sm:$0xff] }
  0x73   :  { %817 = vmatprep.subr.mxu0 %v5540_v17  ;;  %888 = vmatprep.subr.mxu1 %v5542_v0  ;;  %9144 = vst [vmem:[#allocation42_spill] sm:$0xff] %v5554_v62  ;;  %9145 = vst [vmem:[#allocation43_spill] sm:$0xff] %v5558_v8  ;;  %v5560_v17 = vld [vmem:[#allocation11 + $0xb0] sm:$0xff]  ;;  %v5564_v0 = vld [vmem:[#allocation11 + $0x88] sm:$0xff] }
  0x74   :  { %818 = vmatpush1.msra.mxu0 %v5546_v57  ;;  %889 = vmatpush1.msra.mxu1 %v5548_v58  ;;  %9146 = vst [vmem:[#allocation44_spill] sm:$0xff] %v5560_v17  ;;  %9147 = vst [vmem:[#allocation45_spill] sm:$0xff] %v5564_v0  ;;  %v5566_v57 = vld [vmem:[#allocation11 + $0x98] sm:$0xff]  ;;  %v5570_v58 = vld [vmem:[#allocation11 + $0x80] sm:$0xff] }
  0x75   :  { %819 = vmatprep.subr.mxu0 %v5552_v59  ;;  %890 = vmatprep.subr.mxu1 %v5554_v62  ;;  %9148 = vst [vmem:[#allocation46_spill] sm:$0xff] %v5566_v57  ;;  %9149 = vst [vmem:[#allocation47_spill] sm:$0xff] %v5570_v58  ;;  %v5572_v59 = vld [vmem:[#allocation11 + $0x90] sm:$0xff]  ;;  %v5576_v62 = vld [vmem:[#allocation11 + $0x68] sm:$0xff] }
  0x76   :  { %820 = vmatpush1.msra.mxu0 %v5558_v8  ;;  %891 = vmatpush1.msra.mxu1 %v5560_v17  ;;  %9150 = vst [vmem:[#allocation48_spill] sm:$0xff] %v5572_v59  ;;  %9151 = vst [vmem:[#allocation49_spill] sm:$0xff] %v5576_v62  ;;  %v5578_v8 = vld [vmem:[#allocation11 + $0x78] sm:$0xff]  ;;  %v5582_v17 = vld [vmem:[#allocation11 + $0x60] sm:$0xff] }
  0x77   :  { %821 = vmatprep.subr.mxu0 %v5564_v0  ;;  %892 = vmatprep.subr.mxu1 %v5566_v57  ;;  %9152 = vst [vmem:[#allocation50_spill] sm:$0xff] %v5578_v8  ;;  %9153 = vst [vmem:[#allocation51_spill] sm:$0xff] %v5582_v17  ;;  %v5584_v0 = vld [vmem:[#allocation11 + $0x70] sm:$0xff]  ;;  %v5588_v57 = vld [vmem:[#allocation11 + $0x48] sm:$0xff] }
  0x78   :  { %822 = vmatpush1.msra.mxu0 %v5570_v58  ;;  %893 = vmatpush1.msra.mxu1 %v5572_v59  ;;  %9154 = vst [vmem:[#allocation52_spill] sm:$0xff] %v5584_v0  ;;  %9155 = vst [vmem:[#allocation53_spill] sm:$0xff] %v5588_v57  ;;  %v5590_v58 = vld [vmem:[#allocation11 + $0x58] sm:$0xff]  ;;  %v5594_v59 = vld [vmem:[#allocation11 + $0x40] sm:$0xff] }
  0x79   :  { %823 = vmatprep.subr.mxu0 %v5576_v62  ;;  %894 = vmatprep.subr.mxu1 %v5578_v8  ;;  %9156 = vst [vmem:[#allocation54_spill] sm:$0xff] %v5590_v58  ;;  %9157 = vst [vmem:[#allocation55_spill] sm:$0xff] %v5594_v59  ;;  %v5596_v62 = vld [vmem:[#allocation11 + $0x50] sm:$0xff]  ;;  %v5600_v8 = vld [vmem:[#allocation11 + $0x28] sm:$0xff] }
  0x7a   :  { %824 = vmatpush1.msra.mxu0 %v5582_v17  ;;  %895 = vmatpush1.msra.mxu1 %v5584_v0  ;;  %9158 = vst [vmem:[#allocation56_spill] sm:$0xff] %v5596_v62  ;;  %9159 = vst [vmem:[#allocation57_spill] sm:$0xff] %v5600_v8  ;;  %v5602_v17 = vld [vmem:[#allocation11 + $0x38] sm:$0xff]  ;;  %v5606_v0 = vld [vmem:[#allocation11 + $0x20] sm:$0xff] }
  0x7b   :  { %825 = vmatprep.subr.mxu0 %v5588_v57  ;;  %896 = vmatprep.subr.mxu1 %v5590_v58  ;;  %9160 = vst [vmem:[#allocation58_spill] sm:$0xff] %v5602_v17  ;;  %9161 = vst [vmem:[#allocation59_spill] sm:$0xff] %v5606_v0  ;;  %v5608_v57 = vld [vmem:[#allocation11 + $0x30] sm:$0xff]  ;;  %v5612_v58 = vld [vmem:[#allocation11 + $0x8] sm:$0xff] }
  0x7c   :  { %826 = vmatpush1.msra.mxu0 %v5594_v59  ;;  %897 = vmatpush1.msra.mxu1 %v5596_v62  ;;  %9162 = vst [vmem:[#allocation60_spill] sm:$0xff] %v5608_v57  ;;  %9163 = vst [vmem:[#allocation61_spill] sm:$0xff] %v5612_v58  ;;  %v5614_v59 = vld [vmem:[#allocation11 + $0x18] sm:$0xff]  ;;  %v5618_v62 = vld [vmem:[#allocation11] sm:$0xff] }
  0x7d   :  { %827 = vmatprep.subr.mxu0 %v5600_v8  ;;  %898 = vmatprep.subr.mxu1 %v5602_v17  ;;  %9164 = vst [vmem:[#allocation62_spill] sm:$0xff] %v5614_v59  ;;  %9165 = vst [vmem:[#allocation63_spill] sm:$0xff] %v5618_v62  ;;  %v5620_v8 = vld [vmem:[#allocation11 + $0x10] sm:$0xff]  ;;  %v5624_v17 = vld [vmem:[#allocation11 + $0x3e8] sm:$0xff] }
  0x7e   :  { %828 = vmatpush1.msra.mxu0 %v5606_v0  ;;  %899 = vmatpush1.msra.mxu1 %v5608_v57  ;;  %9166 = vst [vmem:[#allocation64_spill] sm:$0xff] %v5620_v8  ;;  %9167 = vst [vmem:[#allocation65_spill] sm:$0xff] %v5624_v17  ;;  %v5626_v0 = vld [vmem:[#allocation11 + $0x3f8] sm:$0xff]  ;;  %v5630_v57 = vld [vmem:[#allocation11 + $0x3e0] sm:$0xff] }
  0x7f   :  { %829 = vmatprep.subr.mxu0 %v5612_v58  ;;  %900 = vmatprep.subr.mxu1 %v5614_v59  ;;  %9168 = vst [vmem:[#allocation66_spill] sm:$0xff] %v5626_v0  ;;  %9169 = vst [vmem:[#allocation67_spill] sm:$0xff] %v5630_v57  ;;  %v5632_v58 = vld [vmem:[#allocation11 + $0x3f0] sm:$0xff]  ;;  %v5636_v59 = vld [vmem:[#allocation11 + $0x3c8] sm:$0xff] }
  0x80   :  { %830 = vmatpush1.msra.mxu0 %v5618_v62  ;;  %901 = vmatpush1.msra.mxu1 %v5620_v8  ;;  %9170 = vst [vmem:[#allocation68_spill] sm:$0xff] %v5632_v58  ;;  %9171 = vst [vmem:[#allocation69_spill] sm:$0xff] %v5636_v59  ;;  %v5638_v62 = vld [vmem:[#allocation11 + $0x3d8] sm:$0xff]  ;;  %v5642_v8 = vld [vmem:[#allocation11 + $0x3c0] sm:$0xff] }
  0x81   :  { %831 = vmatprep.subr.mxu0 %v5624_v17  ;;  %902 = vmatprep.subr.mxu1 %v5626_v0  ;;  %9172 = vst [vmem:[#allocation70_spill] sm:$0xff] %v5638_v62  ;;  %9173 = vst [vmem:[#allocation71_spill] sm:$0xff] %v5642_v8  ;;  %v5644_v17 = vld [vmem:[#allocation11 + $0x3d0] sm:$0xff]  ;;  %v5648_v0 = vld [vmem:[#allocation11 + $0x3a8] sm:$0xff] }
  0x82   :  { %832 = vmatpush2.msra.mxu0 %v5630_v57  ;;  %903 = vmatpush2.msra.mxu1 %v5632_v58  ;;  %9174 = vst [vmem:[#allocation72_spill] sm:$0xff] %v5644_v17  ;;  %9175 = vst [vmem:[#allocation73_spill] sm:$0xff] %v5648_v0  ;;  %v5650_v57 = vld [vmem:[#allocation11 + $0x3b8] sm:$0xff]  ;;  %v5654_v58 = vld [vmem:[#allocation11 + $0x3a0] sm:$0xff] }
  0x83   :  { %833 = vmatprep.subr.mxu0 %v5636_v59  ;;  %904 = vmatprep.subr.mxu1 %v5638_v62  ;;  %9176 = vst [vmem:[#allocation74_spill] sm:$0xff] %v5650_v57  ;;  %9177 = vst [vmem:[#allocation75_spill] sm:$0xff] %v5654_v58  ;;  %v5656_v59 = vld [vmem:[#allocation11 + $0x3b0] sm:$0xff]  ;;  %v5660_v62 = vld [vmem:[#allocation11 + $0x388] sm:$0xff] }
  0x84   :  { %834 = vmatpush2.msra.mxu0 %v5642_v8  ;;  %905 = vmatpush2.msra.mxu1 %v5644_v17  ;;  %9178 = vst [vmem:[#allocation76_spill] sm:$0xff] %v5656_v59  ;;  %9179 = vst [vmem:[#allocation77_spill] sm:$0xff] %v5660_v62  ;;  %v5662_v8 = vld [vmem:[#allocation11 + $0x398] sm:$0xff]  ;;  %v5666_v17 = vld [vmem:[#allocation11 + $0x380] sm:$0xff] }
  0x85   :  { %835 = vmatprep.subr.mxu0 %v5648_v0  ;;  %906 = vmatprep.subr.mxu1 %v5650_v57  ;;  %9180 = vst [vmem:[#allocation78_spill] sm:$0xff] %v5662_v8  ;;  %9181 = vst [vmem:[#allocation79_spill] sm:$0xff] %v5666_v17  ;;  %v5668_v0 = vld [vmem:[#allocation11 + $0x390] sm:$0xff]  ;;  %v5672_v57 = vld [vmem:[#allocation11 + $0x368] sm:$0xff] }
  0x86   :  { %836 = vmatpush2.msra.mxu0 %v5654_v58  ;;  %907 = vmatpush2.msra.mxu1 %v5656_v59  ;;  %9182 = vst [vmem:[#allocation80_spill] sm:$0xff] %v5668_v0  ;;  %9183 = vst [vmem:[#allocation81_spill] sm:$0xff] %v5672_v57  ;;  %v5674_v58 = vld [vmem:[#allocation11 + $0x378] sm:$0xff]  ;;  %v5678_v59 = vld [vmem:[#allocation11 + $0x360] sm:$0xff] }
  0x87   :  { %837 = vmatprep.subr.mxu0 %v5660_v62  ;;  %908 = vmatprep.subr.mxu1 %v5662_v8  ;;  %9184 = vst [vmem:[#allocation82_spill] sm:$0xff] %v5674_v58  ;;  %9185 = vst [vmem:[#allocation83_spill] sm:$0xff] %v5678_v59  ;;  %v5680_v62 = vld [vmem:[#allocation11 + $0x370] sm:$0xff]  ;;  %v5684_v8 = vld [vmem:[#allocation11 + $0x348] sm:$0xff] }
  0x88   :  { %838 = vmatpush2.msra.mxu0 %v5666_v17  ;;  %909 = vmatpush2.msra.mxu1 %v5668_v0  ;;  %9186 = vst [vmem:[#allocation84_spill] sm:$0xff] %v5680_v62  ;;  %9187 = vst [vmem:[#allocation85_spill] sm:$0xff] %v5684_v8  ;;  %v5686_v17 = vld [vmem:[#allocation11 + $0x358] sm:$0xff]  ;;  %v5690_v0 = vld [vmem:[#allocation11 + $0x340] sm:$0xff] }
  0x89   :  { %839 = vmatprep.subr.mxu0 %v5672_v57  ;;  %910 = vmatprep.subr.mxu1 %v5674_v58  ;;  %9188 = vst [vmem:[#allocation86_spill] sm:$0xff] %v5686_v17  ;;  %9189 = vst [vmem:[#allocation87_spill] sm:$0xff] %v5690_v0  ;;  %v5692_v57 = vld [vmem:[#allocation11 + $0x350] sm:$0xff]  ;;  %v5696_v58 = vld [vmem:[#allocation11 + $0x328] sm:$0xff] }
  0x8a   :  { %840 = vmatpush2.msra.mxu0 %v5678_v59  ;;  %911 = vmatpush2.msra.mxu1 %v5680_v62  ;;  %9190 = vst [vmem:[#allocation88_spill] sm:$0xff] %v5692_v57  ;;  %9191 = vst [vmem:[#allocation89_spill] sm:$0xff] %v5696_v58  ;;  %v5698_v59 = vld [vmem:[#allocation11 + $0x338] sm:$0xff]  ;;  %v5702_v62 = vld [vmem:[#allocation11 + $0x320] sm:$0xff] }
  0x8b   :  { %841 = vmatprep.subr.mxu0 %v5684_v8  ;;  %912 = vmatprep.subr.mxu1 %v5686_v17  ;;  %9192 = vst [vmem:[#allocation90_spill] sm:$0xff] %v5698_v59  ;;  %9193 = vst [vmem:[#allocation91_spill] sm:$0xff] %v5702_v62  ;;  %v5704_v8 = vld [vmem:[#allocation11 + $0x330] sm:$0xff]  ;;  %v5708_v17 = vld [vmem:[#allocation11 + $0x308] sm:$0xff] }
  0x8c   :  { %842 = vmatpush2.msra.mxu0 %v5690_v0  ;;  %913 = vmatpush2.msra.mxu1 %v5692_v57  ;;  %9194 = vst [vmem:[#allocation92_spill] sm:$0xff] %v5704_v8  ;;  %9195 = vst [vmem:[#allocation93_spill] sm:$0xff] %v5708_v17  ;;  %v5710_v0 = vld [vmem:[#allocation11 + $0x318] sm:$0xff]  ;;  %v5714_v57 = vld [vmem:[#allocation11 + $0x300] sm:$0xff] }
  0x8d   :  { %843 = vmatprep.subr.mxu0 %v5696_v58  ;;  %914 = vmatprep.subr.mxu1 %v5698_v59  ;;  %9196 = vst [vmem:[#allocation94_spill] sm:$0xff] %v5710_v0  ;;  %9197 = vst [vmem:[#allocation95_spill] sm:$0xff] %v5714_v57  ;;  %v5716_v58 = vld [vmem:[#allocation11 + $0x310] sm:$0xff]  ;;  %v5720_v59 = vld [vmem:[#allocation11 + $0x2e8] sm:$0xff] }
  0x8e   :  { %844 = vmatpush2.msra.mxu0 %v5702_v62  ;;  %915 = vmatpush2.msra.mxu1 %v5704_v8  ;;  %9198 = vst [vmem:[#allocation96_spill] sm:$0xff] %v5716_v58  ;;  %9199 = vst [vmem:[#allocation97_spill] sm:$0xff] %v5720_v59  ;;  %v5722_v62 = vld [vmem:[#allocation11 + $0x2f8] sm:$0xff]  ;;  %v5726_v8 = vld [vmem:[#allocation11 + $0x2e0] sm:$0xff] }
  0x8f   :  { %845 = vmatprep.subr.mxu0 %v5708_v17  ;;  %916 = vmatprep.subr.mxu1 %v5710_v0  ;;  %9200 = vst [vmem:[#allocation98_spill] sm:$0xff] %v5722_v62  ;;  %9201 = vst [vmem:[#allocation99_spill] sm:$0xff] %v5726_v8  ;;  %v5728_v17 = vld [vmem:[#allocation11 + $0x2f0] sm:$0xff]  ;;  %v5730_v0 = vld [vmem:[#allocation11 + $0x2c8] sm:$0xff] }
  0x90   :  { %846 = vmatpush2.msra.mxu0 %v5714_v57  ;;  %917 = vmatpush2.msra.mxu1 %v5716_v58  ;;  %9202 = vst [vmem:[#allocation100_spill] sm:$0xff] %v5728_v17  ;;  %9203 = vst [vmem:[#allocation101_spill] sm:$0xff] %v5730_v0  ;;  %v5734_v57 = vld [vmem:[#allocation11 + $0x2d8] sm:$0xff]  ;;  %v5736_v58 = vld [vmem:[#allocation11 + $0x2c0] sm:$0xff] }
  0x91   :  { %847 = vmatprep.subr.mxu0 %v5720_v59  ;;  %918 = vmatprep.subr.mxu1 %v5722_v62  ;;  %9204 = vst [vmem:[#allocation102_spill] sm:$0xff] %v5734_v57  ;;  %9205 = vst [vmem:[#allocation103_spill] sm:$0xff] %v5736_v58  ;;  %v5742_v62 = vld [vmem:[#allocation11 + $0x2a8] sm:$0xff]  ;;  %v5744_v59 = vld [vmem:[#allocation11 + $0x2b8] sm:$0xff] }
  0x92   :  { %848 = vmatpush2.msra.mxu0 %v5726_v8  ;;  %919 = vmatpush2.msra.mxu1 %v5728_v17  ;;  %9207 = vst [vmem:[#allocation105_spill] sm:$0xff] %v5742_v62  ;;  %9208 = vst [vmem:[#allocation106_spill] sm:$0xff] %v5744_v59  ;;  %v5750_v17 = vld [vmem:[#allocation11 + $0x2b0] sm:$0xff]  ;;  %v5752_v8 = vld [vmem:[#allocation11 + $0x288] sm:$0xff] }
  0x93   :  { %849 = vmatprep.subr.mxu0 %v5730_v0  ;;  %920 = vmatprep.subr.mxu1 %v5734_v57  ;;  %9210 = vst [vmem:[#allocation108_spill] sm:$0xff] %v5750_v17  ;;  %9211 = vst [vmem:[#allocation109_spill] sm:$0xff] %v5752_v8  ;;  %v5758_v57 = vld [vmem:[#allocation11 + $0x280] sm:$0xff]  ;;  %v5760_v0 = vld [vmem:[#allocation11 + $0x290] sm:$0xff] }
  0x94   :  { %850 = vmatpush2.msra.mxu0 %v5736_v58  ;;  %921 = vmatpush2.msra.mxu1 %v5738_v56  ;;  %9213 = vst [vmem:[#allocation111_spill] sm:$0xff] %v5758_v57  ;;  %9214 = vst [vmem:[#allocation112_spill] sm:$0xff] %v5760_v0  ;;  %v5764_v58 = vld [vmem:[#allocation11 + $0x268] sm:$0xff]  ;;  %v5766_v56 = vld [vmem:[#allocation11 + $0x278] sm:$0xff] }
  0x95   :  { %851 = vmatprep.subr.mxu0 %v5742_v62  ;;  %922 = vmatprep.subr.mxu1 %v5744_v59  ;;  %9215 = vst [vmem:[#allocation113_spill] sm:$0xff] %v5764_v58  ;;  %9216 = vst [vmem:[#allocation114_spill] sm:$0xff] %v5766_v56  ;;  %v5772_v62 = vld [vmem:[#allocation11 + $0x270] sm:$0xff]  ;;  %v5776_v59 = vld [vmem:[#allocation11 + $0x248] sm:$0xff] }
  0x96   :  { %852 = vmatpush2.msra.mxu0 %v5746_v55  ;;  %923 = vmatpush2.msra.mxu1 %v5750_v17  ;;  %9218 = vst [vmem:[#allocation116_spill] sm:$0xff] %v5772_v62  ;;  %9219 = vst [vmem:[#allocation117_spill] sm:$0xff] %v5776_v59  ;;  %v5778_v55 = vld [vmem:[#allocation11 + $0x258] sm:$0xff]  ;;  %v5782_v17 = vld [vmem:[#allocation11 + $0x240] sm:$0xff] }
  0x97   :  { %853 = vmatprep.subr.mxu0 %v5752_v8  ;;  %924 = vmatprep.subr.mxu1 %v5754_v54  ;;  %9220 = vst [vmem:[#allocation118_spill] sm:$0xff] %v5778_v55  ;;  %9221 = vst [vmem:[#allocation119_spill] sm:$0xff] %v5782_v17  ;;  %v5784_v8 = vld [vmem:[#allocation11 + $0x250] sm:$0xff]  ;;  %v5788_v54 = vld [vmem:[#allocation11 + $0x228] sm:$0xff] }
  0x98   :  { %854 = vmatpush2.msra.mxu0 %v5758_v57  ;;  %925 = vmatpush2.msra.mxu1 %v5760_v0  ;;  %9222 = vst [vmem:[#allocation120_spill] sm:$0xff] %v5784_v8  ;;  %9223 = vst [vmem:[#allocation121_spill] sm:$0xff] %v5788_v54  ;;  %v5790_v57 = vld [vmem:[#allocation11 + $0x238] sm:$0xff]  ;;  %v5794_v0 = vld [vmem:[#allocation11 + $0x220] sm:$0xff] }
  0x99   :  { %855 = vmatprep.subr.mxu0 %v5764_v58  ;;  %926 = vmatprep.subr.mxu1 %v5766_v56  ;;  %9224 = vst [vmem:[#allocation122_spill] sm:$0xff] %v5790_v57  ;;  %9225 = vst [vmem:[#allocation123_spill] sm:$0xff] %v5794_v0  ;;  %v5796_v58 = vld [vmem:[#allocation11 + $0x230] sm:$0xff]  ;;  %v5800_v56 = vld [vmem:[#allocation11 + $0x208] sm:$0xff] }
  0x9a   :  { %856 = vmatpush2.msra.mxu0 %v5770_v53  ;;  %927 = vmatpush2.msra.mxu1 %v5772_v62  ;;  %9226 = vst [vmem:[#allocation124_spill] sm:$0xff] %v5796_v58  ;;  %9227 = vst [vmem:[#allocation125_spill] sm:$0xff] %v5800_v56  ;;  %v5802_v53 = vld [vmem:[#allocation11 + $0x218] sm:$0xff]  ;;  %v5806_v62 = vld [vmem:[#allocation11 + $0x200] sm:$0xff] }
  0x9b   :  { %857 = vmatprep.subr.mxu0 %v5776_v59  ;;  %928 = vmatprep.subr.mxu1 %v5778_v55  ;;  %9228 = vst [vmem:[#allocation126_spill] sm:$0xff] %v5802_v53  ;;  %9229 = vst [vmem:[#allocation127_spill] sm:$0xff] %v5806_v62  ;;  %v5808_v59 = vld [vmem:[#allocation11 + $0x210] sm:$0xff]  ;;  %v5812_v55 = vld [vmem:[#allocation9 + $0x1e8] sm:$0xff] }
  0x9c   :  { %858 = vmatpush2.msra.mxu0 %v5782_v17  ;;  %929 = vmatpush2.msra.mxu1 %v5784_v8  ;;  %9230 = vst [vmem:[#allocation128_spill] sm:$0xff] %v5808_v59  ;;  %9231 = vst [vmem:[#allocation129_spill] sm:$0xff] %v5812_v55  ;;  %v5814_v17 = vld [vmem:[#allocation9 + $0x1f8] sm:$0xff] }
  0x9d   :  { %859 = vmatprep.subr.mxu0 %v5788_v54  ;;  %930 = vmatprep.subr.mxu1 %v5790_v57  ;;  %9232 = vst [vmem:[#allocation130_spill] sm:$0xff] %v5814_v17  ;;  %v99_v57 = vlaneseq }
  0x9e   :  { %860 = vmatpush2.msra.mxu0 %v5794_v0  ;;  %931 = vmatpush2.msra.mxu1 %v5796_v58 }
  0x9f   :  { %861 = vmatprep.subr.mxu0 %v5800_v56  ;;  %932 = vmatprep.subr.mxu1 %v5802_v53  ;;  %v5822_v0 = vshrl.u32 %v99_v57, 7 }
  0xa0   :  { %862 = vmatpush2.msra.mxu0 %v5806_v62  ;;  %933 = vmatpush2.msra.mxu1 %v5808_v59  ;;  %v97_v62 = vld [vmem:[%s8575_s2] sm:$0xf] }
  0xa1   :  { %1041 = vmatprep.subr.mxu0 %v5812_v55  ;;  %1112 = vmatprep.subr.mxu1 %v5814_v17  ;;  %v8693_v8 = vsub.s32 0, %v5822_v0  ;;  %v8695_v56 = vsub.s32 2, %v5822_v0  ;;  %v8699_v17 = vsub.s32 1, %v5822_v0  ;;  %v8700_v57 = vsub.s32 3, %v5822_v0 }
  0xa3   :  { %v102_v53 = vrot.slane %v97_v62, %v8693_v8  ;;  %v5843_v52 = vrot.slane %v97_v62, %v8695_v56  ;;  %v106_v49 = vrot.slane %v97_v62, %v8699_v17  ;;  %v5849_v48 = vrot.slane %v97_v62, %v8700_v57 }
  0xef   :  { %v5824_v58 = vpop.f32.mrf.mxu0  ;;  %v5826_v54 = vpop.f32.mrf.mxu1 }
  0xf1   :  { %v5833_v59 = vpop.f32.mrf.mxu0  ;;  %v5835_v55 = vpop.f32.mrf.mxu1 }
  0xf5   :  { %v216_v51 = vpop.f32.mrf.mxu0  ;;  %v329_v50 = vpop.f32.mrf.mxu1 }
  0xf6   :  { %v5851_v47 = vadd.f32 %v216_v51, %v102_v53  ;;  %v5854_v46 = vadd.f32 %v329_v50, %v5843_v52 }
  0xf7   :  { %v218_v45 = vpop.f32.mrf.mxu0  ;;  %v331_v8 = vpop.f32.mrf.mxu1 }
  0xf8   :  { %9233 = vst [vmem:[#allocation131_spill] sm:$0xff] %v5851_v47  ;;  %9234 = vst [vmem:[#allocation132_spill] sm:$0xff] %v5854_v46  ;;  %v5856_v44 = vadd.f32 %v218_v45, %v106_v49  ;;  %v5859_v56 = vadd.f32 %v331_v8, %v5849_v48 }
  0xfa   :  { %9235 = vst [vmem:[#allocation133_spill] sm:$0xff] %v5856_v44  ;;  %9236 = vst [vmem:[#allocation134_spill] sm:$0xff] %v5859_v56 }
  0xfb   :  { %v222_v43 = vpop.f32.mrf.mxu0  ;;  %v335_v42 = vpop.f32.mrf.mxu1 }
  0xfc   :  { %v5861_v41 = vadd.f32 %v222_v43, %v102_v53  ;;  %v5864_v17 = vadd.f32 %v335_v42, %v5843_v52 }
  0xfd   :  { %v224_v62 = vpop.f32.mrf.mxu0  ;;  %v337_v51 = vpop.f32.mrf.mxu1 }
  0xfe   :  { %9237 = vst [vmem:[#allocation135_spill] sm:$0xff] %v5861_v41  ;;  %9238 = vst [vmem:[#allocation136_spill] sm:$0xff] %v5864_v17  ;;  %v5866_v57 = vadd.f32 %v224_v62, %v106_v49  ;;  %v5869_v50 = vadd.f32 %v337_v51, %v5849_v48 }
 0x100   :  { %9239 = vst [vmem:[#allocation137_spill] sm:$0xff] %v5866_v57  ;;  %9240 = vst [vmem:[#allocation138_spill] sm:$0xff] %v5869_v50 }
 0x101   :  { %v228_v46 = vpop.f32.mrf.mxu0  ;;  %v341_v45 = vpop.f32.mrf.mxu1 }
 0x102   :  { %v5871_v44 = vadd.f32 %v228_v46, %v102_v53  ;;  %v5874_v8 = vadd.f32 %v341_v45, %v5843_v52 }
 0x103   :  { %v230_v56 = vpop.f32.mrf.mxu0  ;;  %v343_v43 = vpop.f32.mrf.mxu1 }
 0x104   :  { %9241 = vst [vmem:[#allocation139_spill] sm:$0xff] %v5871_v44  ;;  %9242 = vst [vmem:[#allocation140_spill] sm:$0xff] %v5874_v8  ;;  %v5876_v41 = vadd.f32 %v230_v56, %v106_v49  ;;  %v5879_v42 = vadd.f32 %v343_v43, %v5849_v48 }
 0x106   :  { %9243 = vst [vmem:[#allocation141_spill] sm:$0xff] %v5876_v41  ;;  %9244 = vst [vmem:[#allocation142_spill] sm:$0xff] %v5879_v42 }
 0x107   :  { %v234_v17 = vpop.f32.mrf.mxu0  ;;  %v347_v62 = vpop.f32.mrf.mxu1 }
 0x108   :  { %v5881_v57 = vadd.f32 %v234_v17, %v102_v53  ;;  %v5884_v51 = vadd.f32 %v347_v62, %v5843_v52 }
 0x109   :  { %v236_v50 = vpop.f32.mrf.mxu0  ;;  %v349_v46 = vpop.f32.mrf.mxu1 }
 0x10a   :  { %9245 = vst [vmem:[#allocation143_spill] sm:$0xff] %v5881_v57  ;;  %9246 = vst [vmem:[#allocation144_spill] sm:$0xff] %v5884_v51  ;;  %v5886_v44 = vadd.f32 %v236_v50, %v106_v49  ;;  %v5889_v45 = vadd.f32 %v349_v46, %v5849_v48 }
 0x10c   :  { %9247 = vst [vmem:[#allocation145_spill] sm:$0xff] %v5886_v44  ;;  %9248 = vst [vmem:[#allocation146_spill] sm:$0xff] %v5889_v45 }
 0x10d   :  { %v240_v8 = vpop.f32.mrf.mxu0  ;;  %v353_v56 = vpop.f32.mrf.mxu1 }
 0x10e   :  { %v5891_v41 = vadd.f32 %v240_v8, %v102_v53  ;;  %v5894_v43 = vadd.f32 %v353_v56, %v5843_v52 }
 0x10f   :  { %v242_v42 = vpop.f32.mrf.mxu0  ;;  %v355_v17 = vpop.f32.mrf.mxu1 }
 0x110   :  { %9249 = vst [vmem:[#allocation147_spill] sm:$0xff] %v5891_v41  ;;  %9250 = vst [vmem:[#allocation148_spill] sm:$0xff] %v5894_v43  ;;  %v5896_v57 = vadd.f32 %v242_v42, %v106_v49  ;;  %v5899_v62 = vadd.f32 %v355_v17, %v5849_v48 }
 0x112   :  { %9251 = vst [vmem:[#allocation149_spill] sm:$0xff] %v5896_v57  ;;  %9252 = vst [vmem:[#allocation150_spill] sm:$0xff] %v5899_v62 }
 0x113   :  { %v246_v51 = vpop.f32.mrf.mxu0  ;;  %v359_v50 = vpop.f32.mrf.mxu1 }
 0x114   :  { %v5901_v44 = vadd.f32 %v246_v51, %v102_v53  ;;  %v5904_v46 = vadd.f32 %v359_v50, %v5843_v52 }
 0x115   :  { %v248_v45 = vpop.f32.mrf.mxu0  ;;  %v361_v8 = vpop.f32.mrf.mxu1 }
 0x116   :  { %9253 = vst [vmem:[#allocation151_spill] sm:$0xff] %v5901_v44  ;;  %9254 = vst [vmem:[#allocation152_spill] sm:$0xff] %v5904_v46  ;;  %v5906_v41 = vadd.f32 %v248_v45, %v106_v49  ;;  %v5909_v56 = vadd.f32 %v361_v8, %v5849_v48  ;;  %v211_v45 = vadd.f32 %v5824_v58, %v102_v53 }
 0x117   :  { %v213_v8 = vadd.f32 %v5833_v59, %v106_v49 }
 0x118   :  { %9255 = vst [vmem:[#allocation153_spill] sm:$0xff] %v5906_v41  ;;  %9256 = vst [vmem:[#allocation154_spill] sm:$0xff] %v5909_v56 }
 0x119   :  { %v252_v43 = vpop.f32.mrf.mxu0  ;;  %v365_v42 = vpop.f32.mrf.mxu1 }
 0x11a   :  { %v5911_v57 = vadd.f32 %v252_v43, %v102_v53  ;;  %v5914_v17 = vadd.f32 %v365_v42, %v5843_v52 }
 0x11b   :  { %v254_v62 = vpop.f32.mrf.mxu0  ;;  %v367_v51 = vpop.f32.mrf.mxu1 }
 0x11c   :  { %9257 = vst [vmem:[#allocation155_spill] sm:$0xff] %v5911_v57  ;;  %9258 = vst [vmem:[#allocation156_spill] sm:$0xff] %v5914_v17  ;;  %v5916_v44 = vadd.f32 %v254_v62, %v106_v49  ;;  %v5919_v50 = vadd.f32 %v367_v51, %v5849_v48  ;;  %v326_v62 = vadd.f32 %v5835_v55, %v5849_v48 }
 0x11d   :  { %v324_v51 = vadd.f32 %v5826_v54, %v5843_v52 }
 0x11e   :  { %9259 = vst [vmem:[#allocation157_spill] sm:$0xff] %v5916_v44  ;;  %9260 = vst [vmem:[#allocation158_spill] sm:$0xff] %v5919_v50 }
 0x11f   :  { %v562_v46 = vpop.f32.mrf.mxu0  ;;  %v633_v57 = vpop.f32.mrf.mxu1 }
 0x120   :  { %v638_v56 = vadd.f32 %v562_v46, %v211_v45  ;;  %v640_v50 = vadd.f32 %v633_v57, %v324_v51  ;;  %v5932_v57 = vld [vmem:[#allocation9 + $0x1e0] sm:$0xff]  ;;  %v5944_v51 = vld [vmem:[#allocation9 + $0x1d0] sm:$0xff] }
 0x121   :  { %v564_v41 = vpop.f32.mrf.mxu0  ;;  %v635_v17 = vpop.f32.mrf.mxu1 }
 0x122   :  { %v4832_v47 = vmul.f32 -1.442695, %v638_v56  ;;  %v639_v43 = vadd.f32 %v564_v41, %v213_v8  ;;  %v641_v44 = vadd.f32 %v635_v17, %v326_v62  ;;  %v5942_v62 = vld [vmem:[#allocation9 + $0x1c0] sm:$0xff] }
 0x124   :  { %4889 = vpow2.f32 %v4832_v47  ;;  %v4833_v42 = vmul.f32 -1.442695, %v639_v43  ;;  %v4834_v53 = vmul.f32 -1.442695, %v641_v44  ;;  %v5936_v43 = vld [vmem:[#allocation9 + $0x1c8] sm:$0xff] }
 0x126   :  { %4891 = vpow2.f32 %v4833_v42  ;;  %v5938_v42 = vld [vmem:[#allocation9 + $0x1d8] sm:$0xff] }
 0x127   :  { %4893 = vpow2.f32 %v4834_v53  ;;  %v5948_v53 = vld [vmem:[#allocation9 + $0x1a8] sm:$0xff] }
 0x131   :  { %v4890_v58 = vpop.eup %4889 }
 0x132   :  { %v646_v49 = vadd.f32 1.0, %v4890_v58  ;;  %v5950_v58 = vld [vmem:[#allocation9 + $0x1b8] sm:$0xff] }
 0x133   :  { %v4892_v59 = vpop.eup %4891 }
 0x134   :  { %4895 = vrcp.f32 %v646_v49  ;;  %v652_v41 = vadd.f32 1.0, %v4892_v59  ;;  %v4894_v47 = vpop.eup %4893  ;;  %v5954_v49 = vld [vmem:[#allocation9 + $0x1a0] sm:$0xff]  ;;  %v5956_v59 = vld [vmem:[#allocation9 + $0x1b0] sm:$0xff] }
 0x135   :  { %4897 = vtanh.f32 %v640_v50  ;;  %v659_v8 = vadd.f32 1.0, %v4894_v47  ;;  %v5934_v50 = vld [vmem:[#allocation9 + $0x1f0] sm:$0xff]  ;;  %9261 = vst [vmem:[#allocation159_spill] sm:$0xff] %v5956_v59  ;;  %v5962_v47 = vld [vmem:[#allocation9 + $0x198] sm:$0xff] }
 0x136   :  { %4899 = vrcp.f32 %v652_v41  ;;  %v5960_v41 = vld [vmem:[#allocation9 + $0x188] sm:$0xff]  ;;  %9263 = vst [vmem:[#allocation161_spill] sm:$0xff] %v5962_v47 }
 0x137   :  { %4901 = vrcp.f32 %v659_v8  ;;  %9262 = vst [vmem:[#allocation160_spill] sm:$0xff] %v5960_v41  ;;  %v5974_v8 = vld [vmem:[#allocation9 + $0x178] sm:$0xff] }
 0x138   :  { %9267 = vst [vmem:[#allocation165_spill] sm:$0xff] %v5974_v8 }
 0x141   :  { %v4896_v46 = vpop.eup %4895 }
 0x142   :  { %v4898_v56 = vpop.eup %4897 }
 0x143   :  { %v4900_v45 = vpop.eup %4899  ;;  %v663_v55 = vmul.f32 %v4898_v56, %v4896_v46  ;;  %v5966_v46 = vld [vmem:[#allocation9 + $0x180] sm:$0xff]  ;;  %v5968_v56 = vld [vmem:[#allocation9 + $0x190] sm:$0xff] }
 0x144   :  { %v662_v48 = vmul.f32 0.0, %v4900_v45  ;;  %v4902_v44 = vpop.eup %4901  ;;  %9264 = vst [vmem:[#allocation162_spill] sm:$0xff] %v5966_v46  ;;  %9265 = vst [vmem:[#allocation163_spill] sm:$0xff] %v5968_v56  ;;  %v5972_v45 = vld [vmem:[#allocation9 + $0x168] sm:$0xff] }
 0x145   :  { %9266 = vst [vmem:[#allocation164_spill] sm:$0xff] %v5972_v45 }
 0x146   :  { %v5927_v17 = vadd.f32 %v663_v55, %v662_v48  ;;  %v5978_v48 = vld [vmem:[#allocation9 + $0x160] sm:$0xff]  ;;  %v5980_v55 = vld [vmem:[#allocation9 + $0x170] sm:$0xff] }
 0x147   :  { %9268 = vst [vmem:[#allocation166_spill] sm:$0xff] %v5978_v48  ;;  %9269 = vst [vmem:[#allocation167_spill] sm:$0xff] %v5980_v55 }
 0x148   :  { %4903 = vtanh.f32 %v5927_v17 }
 0x155   :  { %v4904_v52 = vpop.eup %4903 }
 0x156   :  { %v5930_v54 = vmul.f32 %v4904_v52, %v4902_v44  ;;  %v5984_v44 = vld [vmem:[#allocation9 + $0x148] sm:$0xff]  ;;  %v5986_v52 = vld [vmem:[#allocation9 + $0x158] sm:$0xff] }
 0x157   :  { %9270 = vst [vmem:[#allocation168_spill] sm:$0xff] %v5984_v44  ;;  %9271 = vst [vmem:[#allocation169_spill] sm:$0xff] %v5986_v52 }
 0x158   :  { %864 = vmatmul.mubr.f32.vlgmr.msra.gmra.mxu0 %v5930_v54  ;;  %935 = vmatmul.mubr.f32.vlgmr.msra.gmra.mxu1 %v5930_v54 }
 0x159   :  { %1042 = vmatpush1.msra.mxu0 %v5932_v57  ;;  %1113 = vmatpush1.msra.mxu1 %v5934_v50 }
 0x15a   :  { %1043 = vmatprep.subr.mxu0 %v5936_v43  ;;  %1114 = vmatprep.subr.mxu1 %v5938_v42 }
 0x15b   :  { %1044 = vmatpush1.msra.mxu0 %v5942_v62  ;;  %1115 = vmatpush1.msra.mxu1 %v5944_v51 }
 0x15c   :  { %1045 = vmatprep.subr.mxu0 %v5948_v53  ;;  %1116 = vmatprep.subr.mxu1 %v5950_v58 }
 0x15d   :  { %1046 = vmatpush1.msra.mxu0 %v5954_v49  ;;  %1117 = vmatpush1.msra.mxu1 %v5956_v59  ;;  %v5990_v59 = vld [vmem:[#allocation9 + $0x140] sm:$0xff] }
 0x15e   :  { %1047 = vmatprep.subr.mxu0 %v5960_v41  ;;  %1118 = vmatprep.subr.mxu1 %v5962_v47  ;;  %9272 = vst [vmem:[#allocation170_spill] sm:$0xff] %v5990_v59  ;;  %v5992_v41 = vld [vmem:[#allocation9 + $0x150] sm:$0xff]  ;;  %v5996_v47 = vld [vmem:[#allocation9 + $0x128] sm:$0xff] }
 0x15f   :  { %1048 = vmatpush1.msra.mxu0 %v5966_v46  ;;  %1119 = vmatpush1.msra.mxu1 %v5968_v56  ;;  %9273 = vst [vmem:[#allocation171_spill] sm:$0xff] %v5992_v41  ;;  %9274 = vst [vmem:[#allocation172_spill] sm:$0xff] %v5996_v47  ;;  %v5998_v46 = vld [vmem:[#allocation9 + $0x138] sm:$0xff]  ;;  %v6002_v56 = vld [vmem:[#allocation9 + $0x120] sm:$0xff] }
 0x160   :  { %1049 = vmatprep.subr.mxu0 %v5972_v45  ;;  %1120 = vmatprep.subr.mxu1 %v5974_v8  ;;  %9275 = vst [vmem:[#allocation173_spill] sm:$0xff] %v5998_v46  ;;  %9276 = vst [vmem:[#allocation174_spill] sm:$0xff] %v6002_v56  ;;  %v6004_v45 = vld [vmem:[#allocation9 + $0x130] sm:$0xff]  ;;  %v6008_v8 = vld [vmem:[#allocation9 + $0x108] sm:$0xff] }
 0x161   :  { %1050 = vmatpush1.msra.mxu0 %v5978_v48  ;;  %1121 = vmatpush1.msra.mxu1 %v5980_v55  ;;  %v6010_v48 = vld [vmem:[#allocation9 + $0x118] sm:$0xff]  ;;  %v5149_v55 = vld [vmem:[#allocation9 + $0xe0] sm:$0xff] }
 0x162   :  { %1051 = vmatprep.subr.mxu0 %v5984_v44  ;;  %1122 = vmatprep.subr.mxu1 %v5986_v52  ;;  %v5145_v52 = vld [vmem:[#allocation9 + $0x100] sm:$0xff]  ;;  %v5148_v44 = vld [vmem:[#allocation9 + $0xf8] sm:$0xff] }
 0x163   :  { %1052 = vmatpush1.msra.mxu0 %v5990_v59  ;;  %1123 = vmatpush1.msra.mxu1 %v5992_v41  ;;  %v5146_v59 = vld [vmem:[#allocation9 + $0x110] sm:$0xff]  ;;  %v5147_v41 = vld [vmem:[#allocation9 + $0xe8] sm:$0xff] }
 0x164   :  { %1053 = vmatprep.subr.mxu0 %v5996_v47  ;;  %1124 = vmatprep.subr.mxu1 %v5998_v46  ;;  %v5150_v47 = vld [vmem:[#allocation9 + $0xf0] sm:$0xff]  ;;  %v5151_v46 = vld [vmem:[#allocation9 + $0xc8] sm:$0xff] }
 0x165   :  { %1054 = vmatpush1.msra.mxu0 %v6002_v56  ;;  %1125 = vmatpush1.msra.mxu1 %v6004_v45  ;;  %v5152_v56 = vld [vmem:[#allocation9 + $0xd8] sm:$0xff] }
 0x166   :  { %1055 = vmatprep.subr.mxu0 %v6008_v8  ;;  %1126 = vmatprep.subr.mxu1 %v6010_v48 }
 0x167   :  { %1056 = vmatpush1.msra.mxu0 %v5145_v52  ;;  %1127 = vmatpush1.msra.mxu1 %v5146_v59  ;;  %v9319_v59 = vld [vmem:[#allocation57_spill] sm:$0xff]  ;;  %v9326_v52 = vld [vmem:[#allocation64_spill] sm:$0xff] }
 0x168   :  { %1057 = vmatprep.subr.mxu0 %v5147_v41  ;;  %1128 = vmatprep.subr.mxu1 %v5148_v44  ;;  %v9320_v41 = vld [vmem:[#allocation58_spill] sm:$0xff]  ;;  %v9325_v44 = vld [vmem:[#allocation63_spill] sm:$0xff] }
 0x169   :  { %1058 = vmatpush1.msra.mxu0 %v5149_v55  ;;  %1129 = vmatpush1.msra.mxu1 %v5150_v47  ;;  %v9321_v47 = vld [vmem:[#allocation59_spill] sm:$0xff]  ;;  %v9324_v55 = vld [vmem:[#allocation62_spill] sm:$0xff] }
 0x16a   :  { %1059 = vmatprep.subr.mxu0 %v5151_v46  ;;  %1130 = vmatprep.subr.mxu1 %v5152_v56  ;;  %v9322_v46 = vld [vmem:[#allocation60_spill] sm:$0xff]  ;;  %v9323_v56 = vld [vmem:[#allocation61_spill] sm:$0xff] }
 0x16b   :  { %1060 = vmatpush1.msra.mxu0 %v5327_v60  ;;  %1131 = vmatpush1.msra.mxu1 %v5329_v61  ;;  %v9277_v60 = vmov 0.0   ;;  %v9278_v61 = vld [vmem:[#allocation16_spill] sm:$0xff] }
 0x16c   :  { %1061 = vmatprep.subr.mxu0 %v5336_v63  ;;  %1132 = vmatprep.subr.mxu1 %v5338_v1  ;;  %v9279_v63 = vld [vmem:[#allocation17_spill] sm:$0xff]  ;;  %v9280_v1 = vld [vmem:[#allocation18_spill] sm:$0xff] }
 0x16d   :  { %1062 = vmatpush1.msra.mxu0 %v5342_v2  ;;  %1133 = vmatpush1.msra.mxu1 %v5344_v3  ;;  %v9281_v2 = vld [vmem:[#allocation19_spill] sm:$0xff]  ;;  %v9282_v3 = vld [vmem:[#allocation20_spill] sm:$0xff] }
 0x16e   :  { %1063 = vmatprep.subr.mxu0 %v5348_v4  ;;  %1134 = vmatprep.subr.mxu1 %v5350_v5  ;;  %v9283_v4 = vld [vmem:[#allocation21_spill] sm:$0xff]  ;;  %v9284_v5 = vld [vmem:[#allocation22_spill] sm:$0xff] }
 0x16f   :  { %1064 = vmatpush1.msra.mxu0 %v5356_v6  ;;  %1135 = vmatpush1.msra.mxu1 %v5358_v7  ;;  %v9285_v6 = vld [vmem:[#allocation23_spill] sm:$0xff]  ;;  %v9286_v7 = vld [vmem:[#allocation24_spill] sm:$0xff] }
 0x170   :  { %1065 = vmatprep.subr.mxu0 %v5367_v9  ;;  %1136 = vmatprep.subr.mxu1 %v5369_v10  ;;  %v9287_v9 = vld [vmem:[#allocation25_spill] sm:$0xff]  ;;  %v9288_v10 = vld [vmem:[#allocation26_spill] sm:$0xff] }
 0x171   :  { %1066 = vmatpush1.msra.mxu0 %v5373_v11  ;;  %1137 = vmatpush1.msra.mxu1 %v5375_v12  ;;  %v9289_v11 = vld [vmem:[#allocation27_spill] sm:$0xff]  ;;  %v9290_v12 = vld [vmem:[#allocation28_spill] sm:$0xff] }
 0x172   :  { %1067 = vmatprep.subr.mxu0 %v5379_v13  ;;  %1138 = vmatprep.subr.mxu1 %v5381_v14  ;;  %v9291_v13 = vld [vmem:[#allocation29_spill] sm:$0xff]  ;;  %v9292_v14 = vld [vmem:[#allocation30_spill] sm:$0xff] }
 0x173   :  { %1068 = vmatpush1.msra.mxu0 %v5387_v15  ;;  %1139 = vmatpush1.msra.mxu1 %v5389_v16  ;;  %v9293_v15 = vld [vmem:[#allocation31_spill] sm:$0xff]  ;;  %v9294_v16 = vld [vmem:[#allocation32_spill] sm:$0xff] }
 0x174   :  { %1069 = vmatprep.subr.mxu0 %v5398_v18  ;;  %1140 = vmatprep.subr.mxu1 %v5400_v19  ;;  %v9295_v18 = vld [vmem:[#allocation33_spill] sm:$0xff]  ;;  %v9296_v19 = vld [vmem:[#allocation34_spill] sm:$0xff] }
 0x175   :  { %1070 = vmatpush1.msra.mxu0 %v5404_v20  ;;  %1141 = vmatpush1.msra.mxu1 %v5406_v21  ;;  %v9297_v20 = vld [vmem:[#allocation35_spill] sm:$0xff]  ;;  %v9298_v21 = vld [vmem:[#allocation36_spill] sm:$0xff] }
 0x176   :  { %1071 = vmatprep.subr.mxu0 %v5410_v22  ;;  %1142 = vmatprep.subr.mxu1 %v5412_v23  ;;  %v9299_v22 = vld [vmem:[#allocation37_spill] sm:$0xff]  ;;  %v9300_v23 = vld [vmem:[#allocation38_spill] sm:$0xff] }
 0x177   :  { %1072 = vmatpush1.msra.mxu0 %v5416_v24  ;;  %1105 = vmatprep.mubr.f32.mxu0 %v9277_v60  ;;  %v9301_v24 = vld [vmem:[#allocation39_spill] sm:$0xff] }
 0x178   :  { %1143 = vmatpush1.msra.mxu1 %v5420_v25  ;;  %1176 = vmatprep.mubr.f32.mxu1 %v9277_v60  ;;  %v9302_v25 = vld [vmem:[#allocation40_spill] sm:$0xff] }
 0x179   :  { %1106 = vmatmul.mubr.f32.vlgmr.msra.gmra.mxu0 %v5930_v54  ;;  %1177 = vmatmul.mubr.f32.vlgmr.msra.gmra.mxu1 %v5930_v54  ;;  %v9318_v54 = vld [vmem:[#allocation56_spill] sm:$0xff] }
 0x17a   :  { %1344 = vmatprep.subr.mxu0 %v5432_v26  ;;  %1415 = vmatprep.subr.mxu1 %v5434_v27  ;;  %v9303_v26 = vld [vmem:[#allocation41_spill] sm:$0xff]  ;;  %v9304_v27 = vld [vmem:[#allocation42_spill] sm:$0xff] }
 0x17b   :  { %1345 = vmatpush1.msra.mxu0 %v5436_v28  ;;  %1416 = vmatpush1.msra.mxu1 %v5440_v29  ;;  %v9305_v28 = vld [vmem:[#allocation43_spill] sm:$0xff]  ;;  %v9306_v29 = vld [vmem:[#allocation44_spill] sm:$0xff] }
 0x17c   :  { %1346 = vmatprep.subr.mxu0 %v5444_v30  ;;  %1417 = vmatprep.subr.mxu1 %v5446_v31  ;;  %v9307_v30 = vld [vmem:[#allocation45_spill] sm:$0xff]  ;;  %v9308_v31 = vld [vmem:[#allocation46_spill] sm:$0xff] }
 0x17d   :  { %1347 = vmatpush1.msra.mxu0 %v5448_v32  ;;  %1418 = vmatpush1.msra.mxu1 %v5452_v33  ;;  %v9309_v32 = vld [vmem:[#allocation47_spill] sm:$0xff]  ;;  %v9310_v33 = vld [vmem:[#allocation48_spill] sm:$0xff] }
 0x17e   :  { %1348 = vmatprep.subr.mxu0 %v5456_v34  ;;  %1419 = vmatprep.subr.mxu1 %v5458_v35  ;;  %v9311_v34 = vld [vmem:[#allocation49_spill] sm:$0xff]  ;;  %v9312_v35 = vld [vmem:[#allocation50_spill] sm:$0xff] }
 0x17f   :  { %1349 = vmatpush1.msra.mxu0 %v5460_v36  ;;  %1420 = vmatpush1.msra.mxu1 %v5464_v37  ;;  %v9313_v36 = vld [vmem:[#allocation51_spill] sm:$0xff]  ;;  %v9314_v37 = vld [vmem:[#allocation52_spill] sm:$0xff] }
 0x180   :  { %1350 = vmatprep.subr.mxu0 %v5468_v38  ;;  %1421 = vmatprep.subr.mxu1 %v5470_v39  ;;  %v9315_v38 = vld [vmem:[#allocation53_spill] sm:$0xff]  ;;  %v9316_v39 = vld [vmem:[#allocation54_spill] sm:$0xff] }
 0x181   :  { %1351 = vmatpush1.msra.mxu0 %v5472_v40  ;;  %1422 = vmatpush1.msra.mxu1 %v9278_v61  ;;  %v9317_v40 = vld [vmem:[#allocation55_spill] sm:$0xff]  ;;  %v9327_v61 = vld [vmem:[#allocation65_spill] sm:$0xff] }
 0x182   :  { %1352 = vmatprep.subr.mxu0 %v9279_v63  ;;  %1423 = vmatprep.subr.mxu1 %v9280_v1  ;;  %v9328_v63 = vld [vmem:[#allocation66_spill] sm:$0xff]  ;;  %v9329_v1 = vld [vmem:[#allocation67_spill] sm:$0xff] }
 0x183   :  { %1353 = vmatpush1.msra.mxu0 %v9281_v2  ;;  %1424 = vmatpush1.msra.mxu1 %v9282_v3  ;;  %v9330_v2 = vld [vmem:[#allocation68_spill] sm:$0xff]  ;;  %v9331_v3 = vld [vmem:[#allocation69_spill] sm:$0xff] }
 0x184   :  { %1354 = vmatprep.subr.mxu0 %v9283_v4  ;;  %1425 = vmatprep.subr.mxu1 %v9284_v5  ;;  %v9332_v4 = vld [vmem:[#allocation70_spill] sm:$0xff]  ;;  %v9333_v5 = vld [vmem:[#allocation71_spill] sm:$0xff] }
 0x185   :  { %1355 = vmatpush1.msra.mxu0 %v9285_v6  ;;  %1426 = vmatpush1.msra.mxu1 %v9286_v7  ;;  %v9334_v6 = vld [vmem:[#allocation72_spill] sm:$0xff]  ;;  %v9335_v7 = vld [vmem:[#allocation73_spill] sm:$0xff] }
 0x186   :  { %1356 = vmatprep.subr.mxu0 %v9287_v9  ;;  %1427 = vmatprep.subr.mxu1 %v9288_v10  ;;  %v9336_v9 = vld [vmem:[#allocation74_spill] sm:$0xff]  ;;  %v9337_v10 = vld [vmem:[#allocation75_spill] sm:$0xff] }
 0x187   :  { %1357 = vmatpush1.msra.mxu0 %v9289_v11  ;;  %1428 = vmatpush1.msra.mxu1 %v9290_v12  ;;  %v9338_v11 = vld [vmem:[#allocation76_spill] sm:$0xff]  ;;  %v9339_v12 = vld [vmem:[#allocation77_spill] sm:$0xff] }
 0x188   :  { %1358 = vmatprep.subr.mxu0 %v9291_v13  ;;  %1429 = vmatprep.subr.mxu1 %v9292_v14  ;;  %v9340_v13 = vld [vmem:[#allocation78_spill] sm:$0xff]  ;;  %v9341_v14 = vld [vmem:[#allocation79_spill] sm:$0xff] }
 0x189   :  { %1359 = vmatpush1.msra.mxu0 %v9293_v15  ;;  %1430 = vmatpush1.msra.mxu1 %v9294_v16  ;;  %v9342_v15 = vld [vmem:[#allocation80_spill] sm:$0xff]  ;;  %v9343_v16 = vld [vmem:[#allocation81_spill] sm:$0xff] }
 0x18a   :  { %1360 = vmatprep.subr.mxu0 %v9295_v18  ;;  %1431 = vmatprep.subr.mxu1 %v9296_v19  ;;  %v9344_v18 = vld [vmem:[#allocation82_spill] sm:$0xff]  ;;  %v9345_v19 = vld [vmem:[#allocation83_spill] sm:$0xff] }
 0x18b   :  { %1361 = vmatpush1.msra.mxu0 %v9297_v20  ;;  %1432 = vmatpush1.msra.mxu1 %v9298_v21  ;;  %v9346_v20 = vld [vmem:[#allocation84_spill] sm:$0xff]  ;;  %v9347_v21 = vld [vmem:[#allocation85_spill] sm:$0xff] }
 0x18c   :  { %1362 = vmatprep.subr.mxu0 %v9299_v22  ;;  %1433 = vmatprep.subr.mxu1 %v9300_v23  ;;  %v9348_v22 = vld [vmem:[#allocation86_spill] sm:$0xff]  ;;  %v9349_v23 = vld [vmem:[#allocation87_spill] sm:$0xff] }
 0x18d   :  { %1363 = vmatpush1.msra.mxu0 %v9301_v24  ;;  %1434 = vmatpush1.msra.mxu1 %v9302_v25  ;;  %v9350_v24 = vld [vmem:[#allocation88_spill] sm:$0xff]  ;;  %v9351_v25 = vld [vmem:[#allocation89_spill] sm:$0xff] }
 0x18e   :  { %1364 = vmatprep.subr.mxu0 %v9303_v26  ;;  %1435 = vmatprep.subr.mxu1 %v9304_v27  ;;  %v9352_v26 = vld [vmem:[#allocation90_spill] sm:$0xff]  ;;  %v9353_v27 = vld [vmem:[#allocation91_spill] sm:$0xff] }
 0x18f   :  { %1365 = vmatpush1.msra.mxu0 %v9305_v28  ;;  %1436 = vmatpush1.msra.mxu1 %v9306_v29  ;;  %v9354_v28 = vld [vmem:[#allocation92_spill] sm:$0xff]  ;;  %v9355_v29 = vld [vmem:[#allocation93_spill] sm:$0xff] }
 0x190   :  { %1366 = vmatprep.subr.mxu0 %v9307_v30  ;;  %1437 = vmatprep.subr.mxu1 %v9308_v31  ;;  %v9356_v30 = vld [vmem:[#allocation94_spill] sm:$0xff]  ;;  %v9357_v31 = vld [vmem:[#allocation95_spill] sm:$0xff] }
 0x191   :  { %1367 = vmatpush1.msra.mxu0 %v9309_v32  ;;  %1438 = vmatpush1.msra.mxu1 %v9310_v33  ;;  %v9358_v32 = vld [vmem:[#allocation96_spill] sm:$0xff]  ;;  %v9359_v33 = vld [vmem:[#allocation97_spill] sm:$0xff] }
 0x192   :  { %1368 = vmatprep.subr.mxu0 %v9311_v34  ;;  %1439 = vmatprep.subr.mxu1 %v9312_v35  ;;  %v9360_v34 = vld [vmem:[#allocation98_spill] sm:$0xff]  ;;  %v9361_v35 = vld [vmem:[#allocation99_spill] sm:$0xff] }
 0x193   :  { %1369 = vmatpush1.msra.mxu0 %v9313_v36  ;;  %1440 = vmatpush1.msra.mxu1 %v9314_v37  ;;  %v9362_v36 = vld [vmem:[#allocation100_spill] sm:$0xff]  ;;  %v9363_v37 = vld [vmem:[#allocation101_spill] sm:$0xff] }
 0x194   :  { %1370 = vmatprep.subr.mxu0 %v9315_v38  ;;  %1441 = vmatprep.subr.mxu1 %v9316_v39  ;;  %v9364_v38 = vld [vmem:[#allocation102_spill] sm:$0xff]  ;;  %v9365_v39 = vld [vmem:[#allocation103_spill] sm:$0xff] }
 0x195   :  { %1371 = vmatpush1.msra.mxu0 %v9317_v40  ;;  %1442 = vmatpush1.msra.mxu1 %v9318_v54  ;;  %v9366_v40 = vld [vmem:[#allocation104_spill] sm:$0xff]  ;;  %v9367_v54 = vld [vmem:[#allocation105_spill] sm:$0xff] }
 0x196   :  { %1372 = vmatprep.subr.mxu0 %v9319_v59  ;;  %1443 = vmatprep.subr.mxu1 %v9320_v41  ;;  %v9368_v59 = vld [vmem:[#allocation106_spill] sm:$0xff]  ;;  %v9369_v41 = vld [vmem:[#allocation107_spill] sm:$0xff] }
 0x197   :  { %1373 = vmatpush1.msra.mxu0 %v9321_v47  ;;  %1444 = vmatpush1.msra.mxu1 %v9322_v46  ;;  %v9370_v47 = vld [vmem:[#allocation108_spill] sm:$0xff]  ;;  %v9371_v46 = vld [vmem:[#allocation109_spill] sm:$0xff] }
 0x198   :  { %1374 = vmatprep.subr.mxu0 %v9323_v56  ;;  %1445 = vmatprep.subr.mxu1 %v9324_v55  ;;  %v9372_v56 = vld [vmem:[#allocation110_spill] sm:$0xff]  ;;  %v9373_v55 = vld [vmem:[#allocation111_spill] sm:$0xff] }
 0x199   :  { %1375 = vmatpush1.msra.mxu0 %v9325_v44  ;;  %1446 = vmatpush1.msra.mxu1 %v9326_v52  ;;  %v9374_v44 = vld [vmem:[#allocation112_spill] sm:$0xff]  ;;  %v9375_v52 = vld [vmem:[#allocation113_spill] sm:$0xff] }
 0x19a   :  { %1376 = vmatprep.subr.mxu0 %v9327_v61  ;;  %1447 = vmatprep.subr.mxu1 %v9328_v63  ;;  %v9376_v61 = vld [vmem:[#allocation114_spill] sm:$0xff]  ;;  %v9377_v63 = vld [vmem:[#allocation115_spill] sm:$0xff] }
 0x19b   :  { %1377 = vmatpush2.msra.mxu0 %v9329_v1  ;;  %1448 = vmatpush2.msra.mxu1 %v9330_v2  ;;  %v9378_v1 = vld [vmem:[#allocation116_spill] sm:$0xff]  ;;  %v9379_v2 = vld [vmem:[#allocation117_spill] sm:$0xff] }
 0x19c   :  { %1378 = vmatprep.subr.mxu0 %v9331_v3  ;;  %1449 = vmatprep.subr.mxu1 %v9332_v4  ;;  %v9380_v3 = vld [vmem:[#allocation118_spill] sm:$0xff]  ;;  %v9381_v4 = vld [vmem:[#allocation119_spill] sm:$0xff] }
 0x19d   :  { %1379 = vmatpush2.msra.mxu0 %v9333_v5  ;;  %1450 = vmatpush2.msra.mxu1 %v9334_v6  ;;  %v9382_v5 = vld [vmem:[#allocation120_spill] sm:$0xff]  ;;  %v9383_v6 = vld [vmem:[#allocation121_spill] sm:$0xff] }
 0x19e   :  { %1380 = vmatprep.subr.mxu0 %v9335_v7  ;;  %1451 = vmatprep.subr.mxu1 %v9336_v9  ;;  %v9384_v7 = vld [vmem:[#allocation122_spill] sm:$0xff]  ;;  %v9385_v9 = vld [vmem:[#allocation123_spill] sm:$0xff] }
 0x19f   :  { %1381 = vmatpush2.msra.mxu0 %v9337_v10  ;;  %1452 = vmatpush2.msra.mxu1 %v9338_v11  ;;  %v9386_v10 = vld [vmem:[#allocation124_spill] sm:$0xff]  ;;  %v9387_v11 = vld [vmem:[#allocation125_spill] sm:$0xff] }
 0x1a0   :  { %1382 = vmatprep.subr.mxu0 %v9339_v12  ;;  %1453 = vmatprep.subr.mxu1 %v9340_v13  ;;  %v9388_v12 = vld [vmem:[#allocation126_spill] sm:$0xff]  ;;  %v9389_v13 = vld [vmem:[#allocation127_spill] sm:$0xff] }
 0x1a1   :  { %1383 = vmatpush2.msra.mxu0 %v9341_v14  ;;  %1454 = vmatpush2.msra.mxu1 %v9342_v15  ;;  %v9390_v14 = vld [vmem:[#allocation128_spill] sm:$0xff]  ;;  %v9391_v15 = vld [vmem:[#allocation129_spill] sm:$0xff] }
 0x1a2   :  { %1384 = vmatprep.subr.mxu0 %v9343_v16  ;;  %1455 = vmatprep.subr.mxu1 %v9344_v18  ;;  %v9392_v16 = vld [vmem:[#allocation130_spill] sm:$0xff]  ;;  %v402_v18 = vld [vmem:[%s8578_s5] sm:$0xf]  ;;  %s5245_s5 = smov [#allocation12]  }
 0x1a3   :  { %1385 = vmatpush2.msra.mxu0 %v9345_v19  ;;  %1456 = vmatpush2.msra.mxu1 %v9346_v20  ;;  %v9393_v19 = vsub.s32 0, %v5822_v0  ;;  %s4796_s29 = sshll.u32 %s5245_s5, 4  ;;  %s4797_s29 = int_to_ptr.vmem [resolvable:$true] %s4796_s29 }
 0x1a4   :  { %1386 = vmatprep.subr.mxu0 %v9347_v21  ;;  %1457 = vmatprep.subr.mxu1 %v9348_v22  ;;  %v9395_v21 = vsub.s32 1, %v5822_v0  ;;  %s5213_s30 = scalar_lea.vmem %s4797_s29, 1024  ;;  %p5218_p2 = scmp.lt.s32.totalorder %s4797_s29, %s4797_s29 }
 0x1a5   :  { %1387 = vmatpush2.msra.mxu0 %v9349_v23  ;;  %1458 = vmatpush2.msra.mxu1 %v9350_v24  ;;  %v6183_v20 = vrot.slane %v402_v18, %v9393_v19  ;;  %p5214_p1 = scmp.ne.s32.totalorder %s4797_s29, %s5213_s30  ;;  %p5219_p3 = scmp.lt.s32.totalorder %s5213_s30, %s5213_s30 }
 0x1a6   :  { %1388 = vmatprep.subr.mxu0 %v9351_v25  ;;  %1459 = vmatprep.subr.mxu1 %v9352_v26  ;;  %v6187_v22 = vrot.slane %v402_v18, %v9395_v21 }
 0x1a7   :  { %1389 = vmatpush2.msra.mxu0 %v9353_v27  ;;  %1460 = vmatpush2.msra.mxu1 %v9354_v28  ;;  %9394 = vst [vmem:[#allocation16_spill] sm:$0xff] %v6183_v20  ;;  %p5220_p4 = por %p5219_p3, %p5218_p2 }
 0x1a8   :  { %1390 = vmatprep.subr.mxu0 %v9355_v29  ;;  %1461 = vmatprep.subr.mxu1 %v9356_v30  ;;  %9396 = vst [vmem:[#allocation17_spill] sm:$0xff] %v6187_v22  ;;  %v9397_v30 = vsub.s32 3, %v5822_v0 }
 0x1a9   :  { %1391 = vmatpush2.msra.mxu0 %v9357_v31  ;;  %1462 = vmatpush2.msra.mxu1 %v9358_v32  ;;  %p5221_p5 = pnand %p5220_p4, %p5214_p1 }
 0x1aa   :  { %1392 = vmatprep.subr.mxu0 %v9359_v33  ;;  %1463 = vmatprep.subr.mxu1 %v9360_v34  ;;  %v6193_v31 = vrot.slane %v402_v18, %v9397_v30  ;;  %v9399_v34 = vsub.s32 2, %v5822_v0 }
 0x1ab   :  { %1393 = vmatpush2.msra.mxu0 %v9361_v35  ;;  %1464 = vmatpush2.msra.mxu1 %v9362_v36 }
 0x1ac   :  { %1394 = vmatprep.subr.mxu0 %v9363_v37  ;;  %1465 = vmatprep.subr.mxu1 %v9364_v38  ;;  %9398 = vst [vmem:[#allocation18_spill] sm:$0xff] %v6193_v31  ;;  %v6198_v35 = vrot.slane %v402_v18, %v9399_v34 }
 0x1ad   :  { %1395 = vmatpush2.msra.mxu0 %v9365_v39  ;;  %1466 = vmatpush2.msra.mxu1 %v9366_v40 }
 0x1ae   :  { %1396 = vmatprep.subr.mxu0 %v9367_v54  ;;  %1467 = vmatprep.subr.mxu1 %v9368_v59  ;;  %9400 = vst [vmem:[#allocation19_spill] sm:$0xff] %v6198_v35 }
 0x1af   :  { %1397 = vmatpush2.msra.mxu0 %v9369_v41  ;;  %1468 = vmatpush2.msra.mxu1 %v9370_v47 }
 0x1b0   :  { %1398 = vmatprep.subr.mxu0 %v9371_v46  ;;  %1469 = vmatprep.subr.mxu1 %v9372_v56  ;;  %v9401_v46 = vld [vmem:[#allocation131_spill] sm:$0xff] }
 0x1b1   :  { %1399 = vmatpush2.msra.mxu0 %v9373_v55  ;;  %1470 = vmatpush2.msra.mxu1 %v9374_v44 }
 0x1b2   :  { %1400 = vmatprep.subr.mxu0 %v9375_v52  ;;  %1471 = vmatprep.subr.mxu1 %v9376_v61 }
 0x1b3   :  { %1401 = vmatpush2.msra.mxu0 %v9377_v63  ;;  %1472 = vmatpush2.msra.mxu1 %v9378_v1  ;;  %v9402_v63 = vld [vmem:[#allocation133_spill] sm:$0xff] }
 0x1b4   :  { %1402 = vmatprep.subr.mxu0 %v9379_v2  ;;  %1473 = vmatprep.subr.mxu1 %v9380_v3 }
 0x1b5   :  { %1403 = vmatpush2.msra.mxu0 %v9381_v4  ;;  %1474 = vmatpush2.msra.mxu1 %v9382_v5 }
 0x1b6   :  { %1404 = vmatprep.subr.mxu0 %v9383_v6  ;;  %1475 = vmatprep.subr.mxu1 %v9384_v7 }
 0x1b7   :  { %1405 = vmatpush2.msra.mxu0 %v9385_v9  ;;  %1476 = vmatpush2.msra.mxu1 %v9386_v10  ;;  %v9403_v9 = vld [vmem:[#allocation134_spill] sm:$0xff] }
 0x1b8   :  { %1406 = vmatprep.subr.mxu0 %v9387_v11  ;;  %1477 = vmatprep.subr.mxu1 %v9388_v12  ;;  %v9404_v11 = vld [vmem:[#allocation132_spill] sm:$0xff] }
 0x1b9   :  { %1407 = vmatpush2.msra.mxu0 %v9389_v13  ;;  %1478 = vmatpush2.msra.mxu1 %v9390_v14 }
 0x1ba   :  { %1587 = vmatprep.subr.mxu0 %v9391_v15  ;;  %1658 = vmatprep.subr.mxu1 %v9392_v16 }
 0x218   :  { %v865_v23 = vpop.f32.mrf.mxu0  ;;  %v936_v28 = vpop.f32.mrf.mxu1 }
 0x219   :  { %v866_v24 = vadd.f32 %v865_v23, %v6183_v20  ;;  %v937_v38 = vadd.f32 %v936_v28, %v6198_v35 }
 0x21a   :  { %v867_v25 = vpop.f32.mrf.mxu0  ;;  %v938_v32 = vpop.f32.mrf.mxu1 }
 0x21b   :  { %v4835_v26 = vmul.f32 -1.442695, %v866_v24  ;;  %v868_v27 = vadd.f32 %v867_v25, %v6187_v22  ;;  %v939_v33 = vadd.f32 %v938_v32, %v6193_v31 }
 0x21d   :  { %4905 = vpow2.f32 %v4835_v26  ;;  %v4836_v29 = vmul.f32 -1.442695, %v868_v27  ;;  %v4837_v36 = vmul.f32 -1.442695, %v939_v33 }
 0x21f   :  { %4907 = vpow2.f32 %v4836_v29 }
 0x220   :  { %4909 = vpow2.f32 %v4837_v36 }
 0x22a   :  { %v4906_v37 = vpop.eup %4905 }
 0x22b   :  { %v945_v39 = vadd.f32 1.0, %v4906_v37  ;;  %v9406_v37 = vld [vmem:[#allocation160_spill] sm:$0xff] }
 0x22c   :  { %v4908_v40 = vpop.eup %4907 }
 0x22d   :  { %4911 = vrcp.f32 %v945_v39  ;;  %v951_v54 = vadd.f32 1.0, %v4908_v40  ;;  %v4910_v59 = vpop.eup %4909  ;;  %v9417_v39 = vld [vmem:[#allocation171_spill] sm:$0xff]  ;;  %v9418_v40 = vld [vmem:[#allocation172_spill] sm:$0xff] }
 0x22e   :  { %4913 = vtanh.f32 %v937_v38  ;;  %v958_v0 = vadd.f32 1.0, %v4910_v59  ;;  %v9416_v38 = vld [vmem:[#allocation170_spill] sm:$0xff]  ;;  %v6240_v59 = vld [vmem:[#allocation9 + $0x100] sm:$0xff] }
 0x22f   :  { %4915 = vrcp.f32 %v951_v54  ;;  %v9419_v54 = vld [vmem:[#allocation173_spill] sm:$0xff] }
 0x239   :  { %v1107_v41 = vpop.f32.mrf.mxu0  ;;  %v1178_v4 = vpop.f32.mrf.mxu1 }
 0x23a   :  { %v4912_v47 = vpop.eup %4911  ;;  %v1183_v56 = vadd.f32 %v1107_v41, %v9401_v46  ;;  %v1185_v12 = vadd.f32 %v1178_v4, %v9404_v11  ;;  %v6242_v41 = vld [vmem:[#allocation9 + $0x110] sm:$0xff]  ;;  %v6246_v46 = vld [vmem:[#allocation9 + $0xe8] sm:$0xff]  ;;  %v6288_v4 = vld [vmem:[#allocation9 + $0x80] sm:$0xff] }
 0x23b   :  { %v4914_v55 = vpop.eup %4913  ;;  %v1109_v44 = vpop.f32.mrf.mxu0  ;;  %v6302_v11 = vld [vmem:[#allocation9 + $0x70] sm:$0xff] }
 0x23c   :  { %v4916_v52 = vpop.eup %4915  ;;  %v4838_v61 = vmul.f32 -1.442695, %v1183_v56  ;;  %v1184_v1 = vadd.f32 %v1109_v44, %v9402_v63  ;;  %v962_v3 = vmul.f32 %v4914_v55, %v4912_v47  ;;  %v1180_v7 = vpop.f32.mrf.mxu1  ;;  %v9420_v47 = vld [vmem:[#allocation174_spill] sm:$0xff]  ;;  %v6248_v56 = vld [vmem:[#allocation9 + $0xf8] sm:$0xff]  ;;  %v6252_v55 = vld [vmem:[#allocation9 + $0xe0] sm:$0xff] }
 0x23d   :  { %v961_v2 = vmul.f32 0.0, %v4916_v52  ;;  %v1186_v10 = vadd.f32 %v1180_v7, %v9403_v9  ;;  %v6258_v44 = vld [vmem:[#allocation9 + $0xc8] sm:$0xff]  ;;  %v6260_v52 = vld [vmem:[#allocation9 + $0xd8] sm:$0xff]  ;;  %v6276_v63 = vld [vmem:[#allocation9 + $0xa0] sm:$0xff] }
 0x23e   :  { %4917 = vpow2.f32 %v4838_v61  ;;  %v4839_v5 = vmul.f32 -1.442695, %v1184_v1  ;;  %v6272_v61 = vld [vmem:[#allocation9 + $0xb8] sm:$0xff]  ;;  %v6278_v1 = vld [vmem:[#allocation9 + $0xb0] sm:$0xff]  ;;  %v6294_v7 = vld [vmem:[#allocation9 + $0x68] sm:$0xff] }
 0x23f   :  { %v6203_v6 = vadd.f32 %v962_v3, %v961_v2  ;;  %4919 = vrcp.f32 %v958_v0  ;;  %v4840_v13 = vmul.f32 -1.442695, %v1186_v10  ;;  %v6254_v0 = vld [vmem:[#allocation9 + $0xf0] sm:$0xff]  ;;  %v6282_v2 = vld [vmem:[#allocation9 + $0x88] sm:$0xff]  ;;  %v6284_v3 = vld [vmem:[#allocation9 + $0x98] sm:$0xff] }
 0x240   :  { %4921 = vpow2.f32 %v4839_v5  ;;  %v6290_v5 = vld [vmem:[#allocation9 + $0x90] sm:$0xff]  ;;  %v6296_v9 = vld [vmem:[#allocation9 + $0x78] sm:$0xff]  ;;  %v6300_v10 = vld [vmem:[#allocation9 + $0x60] sm:$0xff] }
 0x241   :  { %4923 = vtanh.f32 %v6203_v6 }
 0x242   :  { %4925 = vtanh.f32 %v1185_v12  ;;  %v6306_v12 = vld [vmem:[#allocation9 + $0x48] sm:$0xff] }
 0x243   :  { %4927 = vpow2.f32 %v4840_v13  ;;  %v6308_v13 = vld [vmem:[#allocation9 + $0x58] sm:$0xff] }
 0x24b   :  { %v4918_v14 = vpop.eup %4917 }
 0x24c   :  { %v4920_v15 = vpop.eup %4919  ;;  %v1191_v16 = vadd.f32 1.0, %v4918_v14  ;;  %v6312_v14 = vld [vmem:[#allocation9 + $0x40] sm:$0xff] }
 0x24d   :  { %v4922_v18 = vpop.eup %4921 }
 0x24e   :  { %v4924_v19 = vpop.eup %4923  ;;  %4929 = vrcp.f32 %v1191_v16  ;;  %v1197_v21 = vadd.f32 1.0, %v4922_v18  ;;  %v6318_v16 = vld [vmem:[#allocation9 + $0x28] sm:$0xff]  ;;  %v6320_v18 = vld [vmem:[#allocation9 + $0x38] sm:$0xff] }
 0x24f   :  { %v965_v23 = vmul.f32 %v4924_v19, %v4920_v15  ;;  %v4926_v24 = vpop.eup %4925  ;;  %v6314_v15 = vld [vmem:[#allocation9 + $0x50] sm:$0xff]  ;;  %v6324_v19 = vld [vmem:[#allocation9 + $0x20] sm:$0xff] }
 0x250   :  { %4931 = vrcp.f32 %v1197_v21  ;;  %v4928_v25 = vpop.eup %4927  ;;  %v6326_v21 = vld [vmem:[#allocation9 + $0x30] sm:$0xff] }
 0x251   :  { %967 = vst [vmem:[#allocation12] sm:$0xff] %v965_v23  ;;  %1408 = vmatprep.mubr.f32.mxu0 %v965_v23  ;;  %1479 = vmatprep.mubr.f32.mxu1 %v965_v23  ;;  %v1204_v29 = vadd.f32 1.0, %v4928_v25  ;;  %v6330_v23 = vld [vmem:[#allocation9 + $0x8] sm:$0xff]  ;;  %v6336_v25 = vld [vmem:[#allocation9] sm:$0xff] }
 0x253   :  { %4933 = vrcp.f32 %v1204_v29  ;;  %v6356_v29 = vld [vmem:[#allocation11 + $0x1e0] sm:$0xff] }
 0x25b   :  { %v4930_v26 = vpop.eup %4929 }
 0x25c   :  { %v1208_v27 = vmul.f32 %v4930_v26, %v4926_v24  ;;  %v6332_v24 = vld [vmem:[#allocation9 + $0x18] sm:$0xff]  ;;  %v6340_v26 = vld [vmem:[#allocation9 + $0x10] sm:$0xff] }
 0x25d   :  { %v4932_v28 = vpop.eup %4931 }
 0x25e   :  { %v1207_v30 = vmul.f32 %v4932_v28, %v5927_v17  ;;  %v9405_v17 = vld [vmem:[#allocation159_spill] sm:$0xff] }
 0x25f   :  { %v6352_v28 = vld [vmem:[#allocation11 + $0x1f8] sm:$0xff] }
 0x260   :  { %v6209_v32 = vadd.f32 %v1208_v27, %v1207_v30  ;;  %v4934_v33 = vpop.eup %4933  ;;  %v6350_v27 = vld [vmem:[#allocation11 + $0x1e8] sm:$0xff]  ;;  %v6358_v30 = vld [vmem:[#allocation11 + $0x1f0] sm:$0xff] }
 0x262   :  { %4935 = vtanh.f32 %v6209_v32 }
 0x26f   :  { %v4936_v34 = vpop.eup %4935 }
 0x270   :  { %v6212_v36 = vmul.f32 %v4936_v34, %v4934_v33  ;;  %v6362_v33 = vld [vmem:[#allocation11 + $0x1c8] sm:$0xff]  ;;  %v6364_v34 = vld [vmem:[#allocation11 + $0x1d8] sm:$0xff] }
 0x272   :  { %1409 = vmatmul.mubr.f32.vlgmr.msra.gmra.mxu0 %v6212_v36  ;;  %1480 = vmatmul.mubr.f32.vlgmr.msra.gmra.mxu1 %v6212_v36 }
 0x273   :  { %1588 = vmatpush1.msra.mxu0 %v5932_v57  ;;  %1659 = vmatpush1.msra.mxu1 %v5934_v50  ;;  %v9407_v57 = vld [vmem:[#allocation161_spill] sm:$0xff]  ;;  %v9408_v50 = vld [vmem:[#allocation162_spill] sm:$0xff] }
 0x274   :  { %1589 = vmatprep.subr.mxu0 %v5936_v43  ;;  %1660 = vmatprep.subr.mxu1 %v5938_v42  ;;  %v9409_v43 = vld [vmem:[#allocation163_spill] sm:$0xff]  ;;  %v9410_v42 = vld [vmem:[#allocation164_spill] sm:$0xff] }
 0x275   :  { %1590 = vmatpush1.msra.mxu0 %v5942_v62  ;;  %1661 = vmatpush1.msra.mxu1 %v5944_v51  ;;  %v9411_v62 = vld [vmem:[#allocation165_spill] sm:$0xff]  ;;  %v9412_v51 = vld [vmem:[#allocation166_spill] sm:$0xff] }
 0x276   :  { %1591 = vmatprep.subr.mxu0 %v5948_v53  ;;  %1662 = vmatprep.subr.mxu1 %v5950_v58  ;;  %v9413_v53 = vld [vmem:[#allocation167_spill] sm:$0xff]  ;;  %v9414_v58 = vld [vmem:[#allocation168_spill] sm:$0xff] }
 0x277   :  { %1592 = vmatpush1.msra.mxu0 %v5954_v49  ;;  %1663 = vmatpush1.msra.mxu1 %v9405_v17  ;;  %v9415_v49 = vld [vmem:[#allocation169_spill] sm:$0xff]  ;;  %v6370_v17 = vld [vmem:[#allocation11 + $0x1d0] sm:$0xff] }
 0x278   :  { %1593 = vmatprep.subr.mxu0 %v9406_v37  ;;  %1664 = vmatprep.subr.mxu1 %v9407_v57  ;;  %9421 = vst [vmem:[#allocation20_spill] sm:$0xff] %v6370_v17  ;;  %v6374_v37 = vld [vmem:[#allocation11 + $0x1a8] sm:$0xff]  ;;  %v6376_v57 = vld [vmem:[#allocation11 + $0x1b8] sm:$0xff] }
 0x279   :  { %1594 = vmatpush1.msra.mxu0 %v9408_v50  ;;  %1665 = vmatpush1.msra.mxu1 %v9409_v43  ;;  %9422 = vst [vmem:[#allocation21_spill] sm:$0xff] %v6374_v37  ;;  %9423 = vst [vmem:[#allocation22_spill] sm:$0xff] %v6376_v57  ;;  %v6380_v50 = vld [vmem:[#allocation11 + $0x1a0] sm:$0xff]  ;;  %v6382_v43 = vld [vmem:[#allocation11 + $0x1b0] sm:$0xff] }
 0x27a   :  { %1595 = vmatprep.subr.mxu0 %v9410_v42  ;;  %1666 = vmatprep.subr.mxu1 %v9411_v62  ;;  %9424 = vst [vmem:[#allocation23_spill] sm:$0xff] %v6380_v50  ;;  %9425 = vst [vmem:[#allocation24_spill] sm:$0xff] %v6382_v43  ;;  %v6386_v42 = vld [vmem:[#allocation11 + $0x188] sm:$0xff]  ;;  %v6388_v62 = vld [vmem:[#allocation11 + $0x198] sm:$0xff] }
 0x27b   :  { %1596 = vmatpush1.msra.mxu0 %v9412_v51  ;;  %1667 = vmatpush1.msra.mxu1 %v9413_v53  ;;  %9426 = vst [vmem:[#allocation25_spill] sm:$0xff] %v6386_v42  ;;  %9427 = vst [vmem:[#allocation26_spill] sm:$0xff] %v6388_v62  ;;  %v6392_v51 = vld [vmem:[#allocation11 + $0x180] sm:$0xff]  ;;  %v6394_v53 = vld [vmem:[#allocation11 + $0x190] sm:$0xff] }
 0x27c   :  { %1597 = vmatprep.subr.mxu0 %v9414_v58  ;;  %1668 = vmatprep.subr.mxu1 %v9415_v49  ;;  %9428 = vst [vmem:[#allocation27_spill] sm:$0xff] %v6392_v51  ;;  %9429 = vst [vmem:[#allocation28_spill] sm:$0xff] %v6394_v53  ;;  %v6398_v58 = vld [vmem:[#allocation11 + $0x168] sm:$0xff]  ;;  %v6400_v49 = vld [vmem:[#allocation11 + $0x178] sm:$0xff] }
 0x27d   :  { %1598 = vmatpush1.msra.mxu0 %v9416_v38  ;;  %1669 = vmatpush1.msra.mxu1 %v9417_v39  ;;  %9430 = vst [vmem:[#allocation29_spill] sm:$0xff] %v6398_v58  ;;  %9431 = vst [vmem:[#allocation30_spill] sm:$0xff] %v6400_v49  ;;  %v6404_v38 = vld [vmem:[#allocation11 + $0x160] sm:$0xff]  ;;  %v6406_v39 = vld [vmem:[#allocation11 + $0x170] sm:$0xff] }
 0x27e   :  { %1599 = vmatprep.subr.mxu0 %v9418_v40  ;;  %1670 = vmatprep.subr.mxu1 %v9419_v54  ;;  %9432 = vst [vmem:[#allocation31_spill] sm:$0xff] %v6404_v38  ;;  %9433 = vst [vmem:[#allocation32_spill] sm:$0xff] %v6406_v39  ;;  %v6410_v40 = vld [vmem:[#allocation11 + $0x148] sm:$0xff]  ;;  %v6412_v54 = vld [vmem:[#allocation11 + $0x158] sm:$0xff] }
 0x27f   :  { %1600 = vmatpush1.msra.mxu0 %v9420_v47  ;;  %1671 = vmatpush1.msra.mxu1 %v6004_v45  ;;  %v6264_v45 = vld [vmem:[#allocation9 + $0xc0] sm:$0xff]  ;;  %9434 = vst [vmem:[#allocation33_spill] sm:$0xff] %v6410_v40  ;;  %9435 = vst [vmem:[#allocation34_spill] sm:$0xff] %v6412_v54 }
 0x280   :  { %1601 = vmatprep.subr.mxu0 %v6008_v8  ;;  %1672 = vmatprep.subr.mxu1 %v6010_v48  ;;  %v6266_v8 = vld [vmem:[#allocation9 + $0xd0] sm:$0xff]  ;;  %v6270_v48 = vld [vmem:[#allocation9 + $0xa8] sm:$0xff]  ;;  %v6416_v47 = vld [vmem:[#allocation11 + $0x140] sm:$0xff] }
 0x281   :  { %1602 = vmatpush1.msra.mxu0 %v6240_v59  ;;  %1673 = vmatpush1.msra.mxu1 %v6242_v41  ;;  %9436 = vst [vmem:[#allocation35_spill] sm:$0xff] %v6416_v47 }
 0x282   :  { %1603 = vmatprep.subr.mxu0 %v6246_v46  ;;  %1674 = vmatprep.subr.mxu1 %v6248_v56 }
 0x283   :  { %1604 = vmatpush1.msra.mxu0 %v6252_v55  ;;  %1675 = vmatpush1.msra.mxu1 %v6254_v0 }
 0x284   :  { %1605 = vmatprep.subr.mxu0 %v6258_v44  ;;  %1676 = vmatprep.subr.mxu1 %v6260_v52 }
 0x285   :  { %1606 = vmatpush1.msra.mxu0 %v6264_v45  ;;  %1677 = vmatpush1.msra.mxu1 %v6266_v8 }
 0x286   :  { %1607 = vmatprep.subr.mxu0 %v6270_v48  ;;  %1678 = vmatprep.subr.mxu1 %v6272_v61 }
 0x287   :  { %1608 = vmatpush1.msra.mxu0 %v6276_v63  ;;  %1679 = vmatpush1.msra.mxu1 %v6278_v1 }
 0x288   :  { %1609 = vmatprep.subr.mxu0 %v6282_v2  ;;  %1680 = vmatprep.subr.mxu1 %v6284_v3 }
 0x289   :  { %1610 = vmatpush1.msra.mxu0 %v6288_v4  ;;  %1681 = vmatpush1.msra.mxu1 %v6290_v5 }
 0x28a   :  { %1611 = vmatprep.subr.mxu0 %v6294_v7  ;;  %1682 = vmatprep.subr.mxu1 %v6296_v9 }
 0x28b   :  { %1612 = vmatpush1.msra.mxu0 %v6300_v10  ;;  %1683 = vmatpush1.msra.mxu1 %v6302_v11 }
 0x28c   :  { %1613 = vmatprep.subr.mxu0 %v6306_v12  ;;  %1684 = vmatprep.subr.mxu1 %v6308_v13 }
 0x28d   :  { %1614 = vmatpush1.msra.mxu0 %v6312_v14  ;;  %1685 = vmatpush1.msra.mxu1 %v6314_v15 }
 0x28e   :  { %1615 = vmatprep.subr.mxu0 %v6318_v16  ;;  %1686 = vmatprep.subr.mxu1 %v6320_v18 }
 0x28f   :  { %1616 = vmatpush1.msra.mxu0 %v6324_v19  ;;  %1687 = vmatpush1.msra.mxu1 %v6326_v21 }
 0x290   :  { %1617 = vmatprep.subr.mxu0 %v6330_v23  ;;  %1688 = vmatprep.subr.mxu1 %v6332_v24 }
 0x291   :  { %1618 = vmatpush1.msra.mxu0 %v6336_v25  ;;  %1651 = vmatprep.mubr.f32.mxu0 %v9277_v60 }
 0x292   :  { %1689 = vmatpush1.msra.mxu1 %v6340_v26  ;;  %1722 = vmatprep.mubr.f32.mxu1 %v9277_v60 }
 0x293   :  { %1652 = vmatmul.mubr.f32.vlgmr.msra.gmra.mxu0 %v6212_v36  ;;  %1723 = vmatmul.mubr.f32.vlgmr.msra.gmra.mxu1 %v6212_v36  ;;  %v6368_v36 = vld [vmem:[#allocation11 + $0x1c0] sm:$0xff] }
 0x294   :  { %1890 = vmatprep.subr.mxu0 %v6350_v27  ;;  %1961 = vmatprep.subr.mxu1 %v6352_v28 }
 0x295   :  { %1891 = vmatpush1.msra.mxu0 %v6356_v29  ;;  %1962 = vmatpush1.msra.mxu1 %v6358_v30 }
 0x296   :  { %1892 = vmatprep.subr.mxu0 %v6362_v33  ;;  %1963 = vmatprep.subr.mxu1 %v6364_v34 }
 0x297   :  { %1893 = vmatpush1.msra.mxu0 %v6368_v36  ;;  %1964 = vmatpush1.msra.mxu1 %v6370_v17 }
 0x298   :  { %1894 = vmatprep.subr.mxu0 %v6374_v37  ;;  %1965 = vmatprep.subr.mxu1 %v6376_v57 }
 0x299   :  { %1895 = vmatpush1.msra.mxu0 %v6380_v50  ;;  %1966 = vmatpush1.msra.mxu1 %v6382_v43 }
 0x29a   :  { %1896 = vmatprep.subr.mxu0 %v6386_v42  ;;  %1967 = vmatprep.subr.mxu1 %v6388_v62  ;;  %v6660_v62 = vld [vmem:[#allocation11 + $0x2b8] sm:$0xff]  ;;  %v6676_v42 = vld [vmem:[#allocation11 + $0x280] sm:$0xff] }
 0x29b   :  { %1897 = vmatpush1.msra.mxu0 %v6392_v51  ;;  %1968 = vmatpush1.msra.mxu1 %v6394_v53  ;;  %v6644_v53 = vld [vmem:[#allocation11 + $0x2f0] sm:$0xff]  ;;  %v6652_v51 = vld [vmem:[#allocation11 + $0x2c0] sm:$0xff]  ;;  %9519 = vst [vmem:[#allocation118_spill] sm:$0xff] %v6660_v62  ;;  %9524 = vst [vmem:[#allocation123_spill] sm:$0xff] %v6676_v42 }
 0x29c   :  { %1898 = vmatprep.subr.mxu0 %v6398_v58  ;;  %1969 = vmatprep.subr.mxu1 %v6400_v49  ;;  %v6418_v58 = vld [vmem:[#allocation11 + $0x150] sm:$0xff]  ;;  %v6422_v49 = vld [vmem:[#allocation11 + $0x128] sm:$0xff]  ;;  %9513 = vst [vmem:[#allocation112_spill] sm:$0xff] %v6644_v53  ;;  %9516 = vst [vmem:[#allocation115_spill] sm:$0xff] %v6652_v51 }
 0x29d   :  { %1899 = vmatpush1.msra.mxu0 %v6404_v38  ;;  %1970 = vmatpush1.msra.mxu1 %v6406_v39  ;;  %9437 = vst [vmem:[#allocation36_spill] sm:$0xff] %v6418_v58  ;;  %9438 = vst [vmem:[#allocation37_spill] sm:$0xff] %v6422_v49  ;;  %v6424_v38 = vld [vmem:[#allocation11 + $0x138] sm:$0xff]  ;;  %v6428_v39 = vld [vmem:[#allocation11 + $0x120] sm:$0xff] }
 0x29e   :  { %1900 = vmatprep.subr.mxu0 %v6410_v40  ;;  %1971 = vmatprep.subr.mxu1 %v6412_v54  ;;  %9439 = vst [vmem:[#allocation38_spill] sm:$0xff] %v6424_v38  ;;  %9440 = vst [vmem:[#allocation39_spill] sm:$0xff] %v6428_v39  ;;  %v6430_v40 = vld [vmem:[#allocation11 + $0x130] sm:$0xff]  ;;  %v6434_v54 = vld [vmem:[#allocation11 + $0x108] sm:$0xff] }
 0x29f   :  { %1901 = vmatpush1.msra.mxu0 %v6416_v47  ;;  %1972 = vmatpush1.msra.mxu1 %v6418_v58  ;;  %9441 = vst [vmem:[#allocation40_spill] sm:$0xff] %v6430_v40  ;;  %9442 = vst [vmem:[#allocation41_spill] sm:$0xff] %v6434_v54  ;;  %v6436_v47 = vld [vmem:[#allocation11 + $0x118] sm:$0xff]  ;;  %v6440_v58 = vld [vmem:[#allocation11 + $0x100] sm:$0xff] }
 0x2a0   :  { %1902 = vmatprep.subr.mxu0 %v6422_v49  ;;  %1973 = vmatprep.subr.mxu1 %v6424_v38  ;;  %9443 = vst [vmem:[#allocation42_spill] sm:$0xff] %v6436_v47  ;;  %9444 = vst [vmem:[#allocation43_spill] sm:$0xff] %v6440_v58  ;;  %v6442_v49 = vld [vmem:[#allocation11 + $0x110] sm:$0xff]  ;;  %v6446_v38 = vld [vmem:[#allocation11 + $0xe8] sm:$0xff] }
 0x2a1   :  { %1903 = vmatpush1.msra.mxu0 %v6428_v39  ;;  %1974 = vmatpush1.msra.mxu1 %v6430_v40  ;;  %9445 = vst [vmem:[#allocation44_spill] sm:$0xff] %v6442_v49  ;;  %9446 = vst [vmem:[#allocation45_spill] sm:$0xff] %v6446_v38  ;;  %v6448_v39 = vld [vmem:[#allocation11 + $0xf8] sm:$0xff]  ;;  %v6452_v40 = vld [vmem:[#allocation11 + $0xe0] sm:$0xff] }
 0x2a2   :  { %1904 = vmatprep.subr.mxu0 %v6434_v54  ;;  %1975 = vmatprep.subr.mxu1 %v6436_v47  ;;  %9447 = vst [vmem:[#allocation46_spill] sm:$0xff] %v6448_v39  ;;  %9448 = vst [vmem:[#allocation47_spill] sm:$0xff] %v6452_v40  ;;  %v6454_v54 = vld [vmem:[#allocation11 + $0xf0] sm:$0xff]  ;;  %v6458_v47 = vld [vmem:[#allocation11 + $0xc8] sm:$0xff] }
 0x2a3   :  { %1905 = vmatpush1.msra.mxu0 %v6440_v58  ;;  %1976 = vmatpush1.msra.mxu1 %v6442_v49  ;;  %9449 = vst [vmem:[#allocation48_spill] sm:$0xff] %v6454_v54  ;;  %9450 = vst [vmem:[#allocation49_spill] sm:$0xff] %v6458_v47  ;;  %v6460_v58 = vld [vmem:[#allocation11 + $0xd8] sm:$0xff]  ;;  %v6464_v49 = vld [vmem:[#allocation11 + $0xc0] sm:$0xff] }
 0x2a4   :  { %1906 = vmatprep.subr.mxu0 %v6446_v38  ;;  %1977 = vmatprep.subr.mxu1 %v6448_v39  ;;  %9451 = vst [vmem:[#allocation50_spill] sm:$0xff] %v6460_v58  ;;  %9452 = vst [vmem:[#allocation51_spill] sm:$0xff] %v6464_v49  ;;  %v6466_v38 = vld [vmem:[#allocation11 + $0xd0] sm:$0xff]  ;;  %v6470_v39 = vld [vmem:[#allocation11 + $0xa8] sm:$0xff] }
 0x2a5   :  { %1907 = vmatpush1.msra.mxu0 %v6452_v40  ;;  %1978 = vmatpush1.msra.mxu1 %v6454_v54  ;;  %9453 = vst [vmem:[#allocation52_spill] sm:$0xff] %v6466_v38  ;;  %9454 = vst [vmem:[#allocation53_spill] sm:$0xff] %v6470_v39  ;;  %v6472_v40 = vld [vmem:[#allocation11 + $0xb8] sm:$0xff]  ;;  %v6476_v54 = vld [vmem:[#allocation11 + $0xa0] sm:$0xff] }
 0x2a6   :  { %1908 = vmatprep.subr.mxu0 %v6458_v47  ;;  %1979 = vmatprep.subr.mxu1 %v6460_v58  ;;  %9455 = vst [vmem:[#allocation54_spill] sm:$0xff] %v6472_v40  ;;  %9456 = vst [vmem:[#allocation55_spill] sm:$0xff] %v6476_v54  ;;  %v6478_v47 = vld [vmem:[#allocation11 + $0xb0] sm:$0xff]  ;;  %v6482_v58 = vld [vmem:[#allocation11 + $0x88] sm:$0xff] }
 0x2a7   :  { %1909 = vmatpush1.msra.mxu0 %v6464_v49  ;;  %1980 = vmatpush1.msra.mxu1 %v6466_v38  ;;  %9457 = vst [vmem:[#allocation56_spill] sm:$0xff] %v6478_v47  ;;  %9458 = vst [vmem:[#allocation57_spill] sm:$0xff] %v6482_v58  ;;  %v6484_v49 = vld [vmem:[#allocation11 + $0x98] sm:$0xff]  ;;  %v6488_v38 = vld [vmem:[#allocation11 + $0x80] sm:$0xff] }
 0x2a8   :  { %1910 = vmatprep.subr.mxu0 %v6470_v39  ;;  %1981 = vmatprep.subr.mxu1 %v6472_v40  ;;  %9459 = vst [vmem:[#allocation58_spill] sm:$0xff] %v6484_v49  ;;  %9460 = vst [vmem:[#allocation59_spill] sm:$0xff] %v6488_v38  ;;  %v6490_v39 = vld [vmem:[#allocation11 + $0x90] sm:$0xff]  ;;  %v6494_v40 = vld [vmem:[#allocation11 + $0x68] sm:$0xff] }
 0x2a9   :  { %1911 = vmatpush1.msra.mxu0 %v6476_v54  ;;  %1982 = vmatpush1.msra.mxu1 %v6478_v47  ;;  %9461 = vst [vmem:[#allocation60_spill] sm:$0xff] %v6490_v39  ;;  %9462 = vst [vmem:[#allocation61_spill] sm:$0xff] %v6494_v40  ;;  %v6496_v54 = vld [vmem:[#allocation11 + $0x78] sm:$0xff]  ;;  %v6500_v47 = vld [vmem:[#allocation11 + $0x60] sm:$0xff] }
 0x2aa   :  { %1912 = vmatprep.subr.mxu0 %v6482_v58  ;;  %1983 = vmatprep.subr.mxu1 %v6484_v49  ;;  %9463 = vst [vmem:[#allocation62_spill] sm:$0xff] %v6496_v54  ;;  %9464 = vst [vmem:[#allocation63_spill] sm:$0xff] %v6500_v47  ;;  %v6502_v58 = vld [vmem:[#allocation11 + $0x70] sm:$0xff]  ;;  %v6506_v49 = vld [vmem:[#allocation11 + $0x48] sm:$0xff] }
 0x2ab   :  { %1913 = vmatpush1.msra.mxu0 %v6488_v38  ;;  %1984 = vmatpush1.msra.mxu1 %v6490_v39  ;;  %9465 = vst [vmem:[#allocation64_spill] sm:$0xff] %v6502_v58  ;;  %9466 = vst [vmem:[#allocation65_spill] sm:$0xff] %v6506_v49  ;;  %v6508_v38 = vld [vmem:[#allocation11 + $0x58] sm:$0xff]  ;;  %v6512_v39 = vld [vmem:[#allocation11 + $0x40] sm:$0xff] }
 0x2ac   :  { %1914 = vmatprep.subr.mxu0 %v6494_v40  ;;  %1985 = vmatprep.subr.mxu1 %v6496_v54  ;;  %9467 = vst [vmem:[#allocation66_spill] sm:$0xff] %v6508_v38  ;;  %9468 = vst [vmem:[#allocation67_spill] sm:$0xff] %v6512_v39  ;;  %v6514_v40 = vld [vmem:[#allocation11 + $0x50] sm:$0xff]  ;;  %v6518_v54 = vld [vmem:[#allocation11 + $0x28] sm:$0xff] }
 0x2ad   :  { %1915 = vmatpush1.msra.mxu0 %v6500_v47  ;;  %1986 = vmatpush1.msra.mxu1 %v6502_v58  ;;  %9469 = vst [vmem:[#allocation68_spill] sm:$0xff] %v6514_v40  ;;  %9470 = vst [vmem:[#allocation69_spill] sm:$0xff] %v6518_v54  ;;  %v6520_v47 = vld [vmem:[#allocation11 + $0x38] sm:$0xff]  ;;  %v6524_v58 = vld [vmem:[#allocation11 + $0x20] sm:$0xff] }
 0x2ae   :  { %1916 = vmatprep.subr.mxu0 %v6506_v49  ;;  %1987 = vmatprep.subr.mxu1 %v6508_v38  ;;  %9471 = vst [vmem:[#allocation70_spill] sm:$0xff] %v6520_v47  ;;  %9472 = vst [vmem:[#allocation71_spill] sm:$0xff] %v6524_v58  ;;  %v6526_v49 = vld [vmem:[#allocation11 + $0x30] sm:$0xff]  ;;  %v6530_v38 = vld [vmem:[#allocation11 + $0x8] sm:$0xff] }
 0x2af   :  { %1917 = vmatpush1.msra.mxu0 %v6512_v39  ;;  %1988 = vmatpush1.msra.mxu1 %v6514_v40  ;;  %9473 = vst [vmem:[#allocation72_spill] sm:$0xff] %v6526_v49  ;;  %9474 = vst [vmem:[#allocation73_spill] sm:$0xff] %v6530_v38  ;;  %v6532_v39 = vld [vmem:[#allocation11 + $0x18] sm:$0xff]  ;;  %v6536_v40 = vld [vmem:[#allocation11] sm:$0xff] }
 0x2b0   :  { %1918 = vmatprep.subr.mxu0 %v6518_v54  ;;  %1989 = vmatprep.subr.mxu1 %v6520_v47  ;;  %9475 = vst [vmem:[#allocation74_spill] sm:$0xff] %v6532_v39  ;;  %9476 = vst [vmem:[#allocation75_spill] sm:$0xff] %v6536_v40  ;;  %v6538_v54 = vld [vmem:[#allocation11 + $0x10] sm:$0xff]  ;;  %v6542_v47 = vld [vmem:[#allocation11 + $0x3e8] sm:$0xff] }
 0x2b1   :  { %1919 = vmatpush1.msra.mxu0 %v6524_v58  ;;  %1990 = vmatpush1.msra.mxu1 %v6526_v49  ;;  %9477 = vst [vmem:[#allocation76_spill] sm:$0xff] %v6538_v54  ;;  %9478 = vst [vmem:[#allocation77_spill] sm:$0xff] %v6542_v47  ;;  %v6544_v58 = vld [vmem:[#allocation11 + $0x3f8] sm:$0xff]  ;;  %v6548_v49 = vld [vmem:[#allocation11 + $0x3e0] sm:$0xff] }
 0x2b2   :  { %1920 = vmatprep.subr.mxu0 %v6530_v38  ;;  %1991 = vmatprep.subr.mxu1 %v6532_v39  ;;  %9479 = vst [vmem:[#allocation78_spill] sm:$0xff] %v6544_v58  ;;  %9480 = vst [vmem:[#allocation79_spill] sm:$0xff] %v6548_v49  ;;  %v6550_v38 = vld [vmem:[#allocation11 + $0x3f0] sm:$0xff]  ;;  %v6554_v39 = vld [vmem:[#allocation11 + $0x3c8] sm:$0xff] }
 0x2b3   :  { %1921 = vmatpush1.msra.mxu0 %v6536_v40  ;;  %1992 = vmatpush1.msra.mxu1 %v6538_v54  ;;  %9481 = vst [vmem:[#allocation80_spill] sm:$0xff] %v6550_v38  ;;  %9482 = vst [vmem:[#allocation81_spill] sm:$0xff] %v6554_v39  ;;  %v6556_v40 = vld [vmem:[#allocation11 + $0x3d8] sm:$0xff]  ;;  %v6560_v54 = vld [vmem:[#allocation11 + $0x3c0] sm:$0xff] }
 0x2b4   :  { %1922 = vmatprep.subr.mxu0 %v6542_v47  ;;  %1993 = vmatprep.subr.mxu1 %v6544_v58  ;;  %9483 = vst [vmem:[#allocation82_spill] sm:$0xff] %v6556_v40  ;;  %9484 = vst [vmem:[#allocation83_spill] sm:$0xff] %v6560_v54  ;;  %v6562_v47 = vld [vmem:[#allocation11 + $0x3d0] sm:$0xff]  ;;  %v6566_v58 = vld [vmem:[#allocation11 + $0x3a8] sm:$0xff] }
 0x2b5   :  { %1923 = vmatpush2.msra.mxu0 %v6548_v49  ;;  %1994 = vmatpush2.msra.mxu1 %v6550_v38  ;;  %9485 = vst [vmem:[#allocation84_spill] sm:$0xff] %v6562_v47  ;;  %9486 = vst [vmem:[#allocation85_spill] sm:$0xff] %v6566_v58  ;;  %v6568_v49 = vld [vmem:[#allocation11 + $0x3b8] sm:$0xff]  ;;  %v6572_v38 = vld [vmem:[#allocation11 + $0x3a0] sm:$0xff] }
 0x2b6   :  { %1924 = vmatprep.subr.mxu0 %v6554_v39  ;;  %1995 = vmatprep.subr.mxu1 %v6556_v40  ;;  %9487 = vst [vmem:[#allocation86_spill] sm:$0xff] %v6568_v49  ;;  %9488 = vst [vmem:[#allocation87_spill] sm:$0xff] %v6572_v38  ;;  %v6574_v39 = vld [vmem:[#allocation11 + $0x3b0] sm:$0xff]  ;;  %v6578_v40 = vld [vmem:[#allocation11 + $0x388] sm:$0xff] }
 0x2b7   :  { %1925 = vmatpush2.msra.mxu0 %v6560_v54  ;;  %1996 = vmatpush2.msra.mxu1 %v6562_v47  ;;  %9489 = vst [vmem:[#allocation88_spill] sm:$0xff] %v6574_v39  ;;  %9490 = vst [vmem:[#allocation89_spill] sm:$0xff] %v6578_v40  ;;  %v6580_v54 = vld [vmem:[#allocation11 + $0x398] sm:$0xff]  ;;  %v6584_v47 = vld [vmem:[#allocation11 + $0x380] sm:$0xff] }
 0x2b8   :  { %1926 = vmatprep.subr.mxu0 %v6566_v58  ;;  %1997 = vmatprep.subr.mxu1 %v6568_v49  ;;  %9491 = vst [vmem:[#allocation90_spill] sm:$0xff] %v6580_v54  ;;  %9492 = vst [vmem:[#allocation91_spill] sm:$0xff] %v6584_v47  ;;  %v6586_v58 = vld [vmem:[#allocation11 + $0x390] sm:$0xff]  ;;  %v6590_v49 = vld [vmem:[#allocation11 + $0x368] sm:$0xff] }
 0x2b9   :  { %1927 = vmatpush2.msra.mxu0 %v6572_v38  ;;  %1998 = vmatpush2.msra.mxu1 %v6574_v39  ;;  %9493 = vst [vmem:[#allocation92_spill] sm:$0xff] %v6586_v58  ;;  %9494 = vst [vmem:[#allocation93_spill] sm:$0xff] %v6590_v49  ;;  %v6592_v38 = vld [vmem:[#allocation11 + $0x378] sm:$0xff]  ;;  %v6596_v39 = vld [vmem:[#allocation11 + $0x360] sm:$0xff] }
 0x2ba   :  { %1928 = vmatprep.subr.mxu0 %v6578_v40  ;;  %1999 = vmatprep.subr.mxu1 %v6580_v54  ;;  %9495 = vst [vmem:[#allocation94_spill] sm:$0xff] %v6592_v38  ;;  %9496 = vst [vmem:[#allocation95_spill] sm:$0xff] %v6596_v39  ;;  %v6598_v40 = vld [vmem:[#allocation11 + $0x370] sm:$0xff]  ;;  %v6602_v54 = vld [vmem:[#allocation11 + $0x348] sm:$0xff] }
 0x2bb   :  { %1929 = vmatpush2.msra.mxu0 %v6584_v47  ;;  %2000 = vmatpush2.msra.mxu1 %v6586_v58  ;;  %9497 = vst [vmem:[#allocation96_spill] sm:$0xff] %v6598_v40  ;;  %9498 = vst [vmem:[#allocation97_spill] sm:$0xff] %v6602_v54  ;;  %v6604_v47 = vld [vmem:[#allocation11 + $0x358] sm:$0xff]  ;;  %v6608_v58 = vld [vmem:[#allocation11 + $0x340] sm:$0xff] }
 0x2bc   :  { %1930 = vmatprep.subr.mxu0 %v6590_v49  ;;  %2001 = vmatprep.subr.mxu1 %v6592_v38  ;;  %9499 = vst [vmem:[#allocation98_spill] sm:$0xff] %v6604_v47  ;;  %9500 = vst [vmem:[#allocation99_spill] sm:$0xff] %v6608_v58  ;;  %v6610_v49 = vld [vmem:[#allocation11 + $0x350] sm:$0xff]  ;;  %v6614_v38 = vld [vmem:[#allocation11 + $0x328] sm:$0xff] }
 0x2bd   :  { %1931 = vmatpush2.msra.mxu0 %v6596_v39  ;;  %2002 = vmatpush2.msra.mxu1 %v6598_v40  ;;  %9501 = vst [vmem:[#allocation100_spill] sm:$0xff] %v6610_v49  ;;  %9502 = vst [vmem:[#allocation101_spill] sm:$0xff] %v6614_v38  ;;  %v6616_v39 = vld [vmem:[#allocation11 + $0x338] sm:$0xff]  ;;  %v6620_v40 = vld [vmem:[#allocation11 + $0x320] sm:$0xff] }
 0x2be   :  { %1932 = vmatprep.subr.mxu0 %v6602_v54  ;;  %2003 = vmatprep.subr.mxu1 %v6604_v47  ;;  %9503 = vst [vmem:[#allocation102_spill] sm:$0xff] %v6616_v39  ;;  %9504 = vst [vmem:[#allocation103_spill] sm:$0xff] %v6620_v40  ;;  %v6622_v54 = vld [vmem:[#allocation11 + $0x330] sm:$0xff]  ;;  %v6626_v47 = vld [vmem:[#allocation11 + $0x308] sm:$0xff] }
 0x2bf   :  { %1933 = vmatpush2.msra.mxu0 %v6608_v58  ;;  %2004 = vmatpush2.msra.mxu1 %v6610_v49  ;;  %9505 = vst [vmem:[#allocation104_spill] sm:$0xff] %v6622_v54  ;;  %9506 = vst [vmem:[#allocation105_spill] sm:$0xff] %v6626_v47  ;;  %v6628_v58 = vld [vmem:[#allocation11 + $0x318] sm:$0xff]  ;;  %v6632_v49 = vld [vmem:[#allocation11 + $0x300] sm:$0xff] }
 0x2c0   :  { %1934 = vmatprep.subr.mxu0 %v6614_v38  ;;  %2005 = vmatprep.subr.mxu1 %v6616_v39  ;;  %9507 = vst [vmem:[#allocation106_spill] sm:$0xff] %v6628_v58  ;;  %9508 = vst [vmem:[#allocation107_spill] sm:$0xff] %v6632_v49  ;;  %v6634_v38 = vld [vmem:[#allocation11 + $0x310] sm:$0xff]  ;;  %v6636_v39 = vld [vmem:[#allocation11 + $0x2e8] sm:$0xff] }
 0x2c1   :  { %1935 = vmatpush2.msra.mxu0 %v6620_v40  ;;  %2006 = vmatpush2.msra.mxu1 %v6622_v54  ;;  %9509 = vst [vmem:[#allocation108_spill] sm:$0xff] %v6634_v38  ;;  %9510 = vst [vmem:[#allocation109_spill] sm:$0xff] %v6636_v39  ;;  %v6640_v40 = vld [vmem:[#allocation11 + $0x2f8] sm:$0xff]  ;;  %v6642_v54 = vld [vmem:[#allocation11 + $0x2e0] sm:$0xff] }
 0x2c2   :  { %1936 = vmatprep.subr.mxu0 %v6626_v47  ;;  %2007 = vmatprep.subr.mxu1 %v6628_v58  ;;  %9511 = vst [vmem:[#allocation110_spill] sm:$0xff] %v6640_v40  ;;  %9512 = vst [vmem:[#allocation111_spill] sm:$0xff] %v6642_v54  ;;  %v6648_v58 = vld [vmem:[#allocation11 + $0x2c8] sm:$0xff]  ;;  %v6650_v47 = vld [vmem:[#allocation11 + $0x2d8] sm:$0xff] }
 0x2c3   :  { %1937 = vmatpush2.msra.mxu0 %v6632_v49  ;;  %2008 = vmatpush2.msra.mxu1 %v6634_v38  ;;  %9514 = vst [vmem:[#allocation113_spill] sm:$0xff] %v6648_v58  ;;  %9515 = vst [vmem:[#allocation114_spill] sm:$0xff] %v6650_v47  ;;  %v6656_v38 = vld [vmem:[#allocation11 + $0x2d0] sm:$0xff]  ;;  %v6658_v49 = vld [vmem:[#allocation11 + $0x2a8] sm:$0xff] }
 0x2c4   :  { %1938 = vmatprep.subr.mxu0 %v6636_v39  ;;  %2009 = vmatprep.subr.mxu1 %v6640_v40  ;;  %9517 = vst [vmem:[#allocation116_spill] sm:$0xff] %v6656_v38  ;;  %9518 = vst [vmem:[#allocation117_spill] sm:$0xff] %v6658_v49  ;;  %v6664_v40 = vld [vmem:[#allocation11 + $0x2a0] sm:$0xff]  ;;  %v6666_v39 = vld [vmem:[#allocation11 + $0x2b0] sm:$0xff] }
 0x2c5   :  { %1939 = vmatpush2.msra.mxu0 %v6642_v54  ;;  %2010 = vmatpush2.msra.mxu1 %v6644_v53  ;;  %9520 = vst [vmem:[#allocation119_spill] sm:$0xff] %v6664_v40  ;;  %9521 = vst [vmem:[#allocation120_spill] sm:$0xff] %v6666_v39  ;;  %v6670_v54 = vld [vmem:[#allocation11 + $0x288] sm:$0xff]  ;;  %v6672_v53 = vld [vmem:[#allocation11 + $0x298] sm:$0xff] }
 0x2c6   :  { %1940 = vmatprep.subr.mxu0 %v6648_v58  ;;  %2011 = vmatprep.subr.mxu1 %v6650_v47  ;;  %9522 = vst [vmem:[#allocation121_spill] sm:$0xff] %v6670_v54  ;;  %9523 = vst [vmem:[#allocation122_spill] sm:$0xff] %v6672_v53  ;;  %v6678_v58 = vld [vmem:[#allocation11 + $0x290] sm:$0xff]  ;;  %v6682_v47 = vld [vmem:[#allocation11 + $0x268] sm:$0xff] }
 0x2c7   :  { %1941 = vmatpush2.msra.mxu0 %v6652_v51  ;;  %2012 = vmatpush2.msra.mxu1 %v6656_v38  ;;  %9525 = vst [vmem:[#allocation124_spill] sm:$0xff] %v6678_v58  ;;  %9526 = vst [vmem:[#allocation125_spill] sm:$0xff] %v6682_v47  ;;  %v6684_v51 = vld [vmem:[#allocation11 + $0x278] sm:$0xff]  ;;  %v6688_v38 = vld [vmem:[#allocation11 + $0x260] sm:$0xff] }
 0x2c8   :  { %1942 = vmatprep.subr.mxu0 %v6658_v49  ;;  %2013 = vmatprep.subr.mxu1 %v6660_v62  ;;  %9527 = vst [vmem:[#allocation126_spill] sm:$0xff] %v6684_v51  ;;  %9528 = vst [vmem:[#allocation127_spill] sm:$0xff] %v6688_v38  ;;  %v6690_v49 = vld [vmem:[#allocation11 + $0x270] sm:$0xff]  ;;  %v6694_v62 = vld [vmem:[#allocation11 + $0x248] sm:$0xff] }
 0x2c9   :  { %1943 = vmatpush2.msra.mxu0 %v6664_v40  ;;  %2014 = vmatpush2.msra.mxu1 %v6666_v39  ;;  %9529 = vst [vmem:[#allocation128_spill] sm:$0xff] %v6690_v49  ;;  %9530 = vst [vmem:[#allocation129_spill] sm:$0xff] %v6694_v62  ;;  %v6696_v40 = vld [vmem:[#allocation11 + $0x258] sm:$0xff]  ;;  %v6700_v39 = vld [vmem:[#allocation11 + $0x240] sm:$0xff] }
 0x2ca   :  { %1944 = vmatprep.subr.mxu0 %v6670_v54  ;;  %2015 = vmatprep.subr.mxu1 %v6672_v53  ;;  %9531 = vst [vmem:[#allocation130_spill] sm:$0xff] %v6696_v40  ;;  %9532 = vst [vmem:[#allocation131_spill] sm:$0xff] %v6700_v39  ;;  %v6702_v54 = vld [vmem:[#allocation11 + $0x250] sm:$0xff]  ;;  %v6706_v53 = vld [vmem:[#allocation11 + $0x228] sm:$0xff] }
 0x2cb   :  { %1945 = vmatpush2.msra.mxu0 %v6676_v42  ;;  %2016 = vmatpush2.msra.mxu1 %v6678_v58  ;;  %9533 = vst [vmem:[#allocation133_spill] sm:$0xff] %v6702_v54  ;;  %9534 = vst [vmem:[#allocation134_spill] sm:$0xff] %v6706_v53  ;;  %v6708_v42 = vld [vmem:[#allocation11 + $0x238] sm:$0xff]  ;;  %v6712_v58 = vld [vmem:[#allocation11 + $0x220] sm:$0xff] }
 0x2cc   :  { %1946 = vmatprep.subr.mxu0 %v6682_v47  ;;  %2017 = vmatprep.subr.mxu1 %v6684_v51  ;;  %9535 = vst [vmem:[#allocation132_spill] sm:$0xff] %v6708_v42  ;;  %9536 = vst [vmem:[#allocation159_spill] sm:$0xff] %v6712_v58  ;;  %v6714_v47 = vld [vmem:[#allocation11 + $0x230] sm:$0xff]  ;;  %v6718_v51 = vld [vmem:[#allocation11 + $0x208] sm:$0xff] }
 0x2cd   :  { %1947 = vmatpush2.msra.mxu0 %v6688_v38  ;;  %2018 = vmatpush2.msra.mxu1 %v6690_v49  ;;  %9537 = vst [vmem:[#allocation160_spill] sm:$0xff] %v6714_v47  ;;  %9538 = vst [vmem:[#allocation161_spill] sm:$0xff] %v6718_v51  ;;  %v6720_v38 = vld [vmem:[#allocation11 + $0x218] sm:$0xff]  ;;  %v6724_v49 = vld [vmem:[#allocation11 + $0x200] sm:$0xff] }
 0x2ce   :  { %1948 = vmatprep.subr.mxu0 %v6694_v62  ;;  %2019 = vmatprep.subr.mxu1 %v6696_v40  ;;  %9539 = vst [vmem:[#allocation162_spill] sm:$0xff] %v6720_v38  ;;  %9540 = vst [vmem:[#allocation163_spill] sm:$0xff] %v6724_v49  ;;  %v6726_v62 = vld [vmem:[#allocation11 + $0x210] sm:$0xff]  ;;  %v6730_v40 = vld [vmem:[#allocation9 + $0x1e8] sm:$0xff] }
 0x2cf   :  { %1949 = vmatpush2.msra.mxu0 %v6700_v39  ;;  %2020 = vmatpush2.msra.mxu1 %v6702_v54  ;;  %9541 = vst [vmem:[#allocation164_spill] sm:$0xff] %v6726_v62  ;;  %9542 = vst [vmem:[#allocation165_spill] sm:$0xff] %v6730_v40  ;;  %v6732_v39 = vld [vmem:[#allocation9 + $0x1f8] sm:$0xff] }
 0x2d0   :  { %1950 = vmatprep.subr.mxu0 %v6706_v53  ;;  %2021 = vmatprep.subr.mxu1 %v6708_v42  ;;  %9543 = vst [vmem:[#allocation166_spill] sm:$0xff] %v6732_v39 }
 0x2d1   :  { %1951 = vmatpush2.msra.mxu0 %v6712_v58  ;;  %2022 = vmatpush2.msra.mxu1 %v6714_v47 }
 0x2d2   :  { %1952 = vmatprep.subr.mxu0 %v6718_v51  ;;  %2023 = vmatprep.subr.mxu1 %v6720_v38 }
 0x2d3   :  { %1953 = vmatpush2.msra.mxu0 %v6724_v49  ;;  %2024 = vmatpush2.msra.mxu1 %v6726_v62 }
 0x2d4   :  { %2133 = vmatprep.subr.mxu0 %v6730_v40  ;;  %2204 = vmatprep.subr.mxu1 %v6732_v39 }
 0x332   :  { %v1410_v42 = vpop.f32.mrf.mxu0  ;;  %v1481_v43 = vpop.f32.mrf.mxu1 }
 0x333   :  { %v1411_v58 = vadd.f32 %v1410_v42, %v6183_v20  ;;  %v1482_v40 = vadd.f32 %v1481_v43, %v6198_v35 }
 0x334   :  { %v1412_v47 = vpop.f32.mrf.mxu0  ;;  %v1483_v38 = vpop.f32.mrf.mxu1 }
 0x335   :  { %v4841_v53 = vmul.f32 -1.442695, %v1411_v58  ;;  %v1413_v54 = vadd.f32 %v1412_v47, %v6187_v22  ;;  %v1484_v49 = vadd.f32 %v1483_v38, %v6193_v31  ;;  %v9544_v22 = vld [vmem:[#allocation135_spill] sm:$0xff] }
 0x337   :  { %4937 = vpow2.f32 %v4841_v53  ;;  %v4842_v51 = vmul.f32 -1.442695, %v1413_v54  ;;  %v4843_v50 = vmul.f32 -1.442695, %v1484_v49  ;;  %v9545_v49 = vld [vmem:[#allocation137_spill] sm:$0xff] }
 0x339   :  { %4939 = vpow2.f32 %v4842_v51 }
 0x33a   :  { %4941 = vpow2.f32 %v4843_v50 }
 0x344   :  { %v4938_v62 = vpop.eup %4937 }
 0x345   :  { %v1490_v57 = vadd.f32 1.0, %v4938_v62 }
 0x346   :  { %v4940_v39 = vpop.eup %4939 }
 0x347   :  { %4943 = vrcp.f32 %v1490_v57  ;;  %v1496_v42 = vadd.f32 1.0, %v4940_v39  ;;  %v4942_v58 = vpop.eup %4941 }
 0x348   :  { %4945 = vtanh.f32 %v1482_v40  ;;  %v1503_v62 = vadd.f32 1.0, %v4942_v58 }
 0x349   :  { %4947 = vrcp.f32 %v1496_v42 }
 0x353   :  { %v1653_v47 = vpop.f32.mrf.mxu0  ;;  %v1724_v57 = vpop.f32.mrf.mxu1 }
 0x354   :  { %v4944_v53 = vpop.eup %4943  ;;  %v1729_v54 = vadd.f32 %v1653_v47, %v9544_v22  ;;  %v9546_v22 = vld [vmem:[#allocation138_spill] sm:$0xff]  ;;  %v9547_v47 = vld [vmem:[#allocation136_spill] sm:$0xff] }
 0x355   :  { %v4946_v51 = vpop.eup %4945  ;;  %v1655_v20 = vpop.f32.mrf.mxu0 }
 0x356   :  { %v4948_v37 = vpop.eup %4947  ;;  %v4844_v38 = vmul.f32 -1.442695, %v1729_v54  ;;  %v1730_v31 = vadd.f32 %v1655_v20, %v9545_v49  ;;  %v1507_v17 = vmul.f32 %v4946_v51, %v4944_v53  ;;  %v1726_v40 = vpop.f32.mrf.mxu1  ;;  %v1731_v54 = vadd.f32 %v1724_v57, %v9547_v47  ;;  %v6758_v47 = vld [vmem:[#allocation9 + $0x1e0] sm:$0xff] }
 0x357   :  { %v1506_v43 = vmul.f32 %v4948_v37, %v6203_v6  ;;  %v1732_v42 = vadd.f32 %v1726_v40, %v9546_v22 }
 0x358   :  { %4949 = vpow2.f32 %v4844_v38  ;;  %v4845_v50 = vmul.f32 -1.442695, %v1730_v31 }
 0x359   :  { %v6747_v39 = vadd.f32 %v1507_v17, %v1506_v43  ;;  %v4846_v35 = vmul.f32 -1.442695, %v1732_v42 }
 0x35a   :  { %4951 = vpow2.f32 %v4845_v50 }
 0x35b   :  { %4953 = vrcp.f32 %v1503_v62 }
 0x35c   :  { %4955 = vtanh.f32 %v6747_v39 }
 0x35d   :  { %4957 = vtanh.f32 %v1731_v54  ;;  %v6760_v54 = vld [vmem:[#allocation9 + $0x1f0] sm:$0xff] }
 0x35e   :  { %4959 = vpow2.f32 %v4846_v35 }
 0x365   :  { %v4950_v20 = vpop.eup %4949 }
 0x366   :  { %v1737_v53 = vadd.f32 1.0, %v4950_v20  ;;  %v6762_v20 = vld [vmem:[#allocation9 + $0x1c8] sm:$0xff] }
 0x367   :  { %v4952_v6 = vpop.eup %4951 }
 0x368   :  { %v4954_v37 = vpop.eup %4953  ;;  %4961 = vrcp.f32 %v1737_v53  ;;  %v1743_v31 = vadd.f32 1.0, %v4952_v6  ;;  %v6764_v53 = vld [vmem:[#allocation9 + $0x1d8] sm:$0xff]  ;;  %v6770_v6 = vld [vmem:[#allocation9 + $0x1d0] sm:$0xff] }
 0x369   :  { %v4956_v17 = vpop.eup %4955 }
 0x36a   :  { %4963 = vrcp.f32 %v1743_v31  ;;  %v1510_v58 = vmul.f32 %v4956_v17, %v4954_v37  ;;  %v4958_v51 = vpop.eup %4957  ;;  %v6774_v37 = vld [vmem:[#allocation9 + $0x1a8] sm:$0xff]  ;;  %v6776_v31 = vld [vmem:[#allocation9 + $0x1b8] sm:$0xff]  ;;  %v6780_v17 = vld [vmem:[#allocation9 + $0x1a0] sm:$0xff] }
 0x36b   :  { %v4960_v38 = vpop.eup %4959  ;;  %9548 = vst [vmem:[#allocation167_spill] sm:$0xff] %v6780_v17 }
 0x36c   :  { %1513 = vst [vmem:[#allocation12 + $0x8] sm:$0xff] %v1510_v58  ;;  %1954 = vmatprep.mubr.f32.mxu0 %v1510_v58  ;;  %2025 = vmatprep.mubr.f32.mxu1 %v1510_v58  ;;  %v1750_v57 = vadd.f32 1.0, %v4960_v38  ;;  %v6782_v58 = vld [vmem:[#allocation9 + $0x1b0] sm:$0xff]  ;;  %v6788_v38 = vld [vmem:[#allocation9 + $0x198] sm:$0xff] }
 0x36d   :  { %9549 = vst [vmem:[#allocation168_spill] sm:$0xff] %v6782_v58  ;;  %9551 = vst [vmem:[#allocation170_spill] sm:$0xff] %v6788_v38 }
 0x36e   :  { %4965 = vrcp.f32 %v1750_v57  ;;  %v6800_v57 = vld [vmem:[#allocation9 + $0x178] sm:$0xff] }
 0x36f   :  { %9555 = vst [vmem:[#allocation174_spill] sm:$0xff] %v6800_v57 }
 0x375   :  { %v4962_v49 = vpop.eup %4961 }
 0x376   :  { %v1754_v43 = vmul.f32 %v4962_v49, %v4958_v51  ;;  %v6786_v51 = vld [vmem:[#allocation9 + $0x188] sm:$0xff]  ;;  %v6792_v49 = vld [vmem:[#allocation9 + $0x180] sm:$0xff] }
 0x377   :  { %v4964_v62 = vpop.eup %4963  ;;  %9550 = vst [vmem:[#allocation169_spill] sm:$0xff] %v6786_v51  ;;  %9552 = vst [vmem:[#allocation171_spill] sm:$0xff] %v6792_v49 }
 0x378   :  { %v1753_v50 = vmul.f32 %v4964_v62, %v6209_v32  ;;  %v6768_v32 = vld [vmem:[#allocation9 + $0x1c0] sm:$0xff]  ;;  %v6798_v62 = vld [vmem:[#allocation9 + $0x168] sm:$0xff] }
 0x379   :  { %9554 = vst [vmem:[#allocation173_spill] sm:$0xff] %v6798_v62 }
 0x37a   :  { %v6753_v40 = vadd.f32 %v1754_v43, %v1753_v50  ;;  %v6794_v43 = vld [vmem:[#allocation9 + $0x190] sm:$0xff]  ;;  %v6804_v50 = vld [vmem:[#allocation9 + $0x160] sm:$0xff] }
 0x37b   :  { %v4966_v35 = vpop.eup %4965  ;;  %9553 = vst [vmem:[#allocation172_spill] sm:$0xff] %v6794_v43  ;;  %9556 = vst [vmem:[#allocation135_spill] sm:$0xff] %v6804_v50 }
 0x37c   :  { %4967 = vtanh.f32 %v6753_v40 }
 0x389   :  { %v4968_v22 = vpop.eup %4967 }
 0x38a   :  { %v6756_v42 = vmul.f32 %v4968_v22, %v4966_v35  ;;  %v6806_v35 = vld [vmem:[#allocation9 + $0x170] sm:$0xff]  ;;  %v6810_v22 = vld [vmem:[#allocation9 + $0x148] sm:$0xff] }
 0x38c   :  { %1955 = vmatmul.mubr.f32.vlgmr.msra.gmra.mxu0 %v6756_v42  ;;  %2026 = vmatmul.mubr.f32.vlgmr.msra.gmra.mxu1 %v6756_v42 }
 0x38d   :  { %2134 = vmatpush1.msra.mxu0 %v6758_v47  ;;  %2205 = vmatpush1.msra.mxu1 %v6760_v54 }
 0x38e   :  { %2135 = vmatprep.subr.mxu0 %v6762_v20  ;;  %2206 = vmatprep.subr.mxu1 %v6764_v53 }
 0x38f   :  { %2136 = vmatpush1.msra.mxu0 %v6768_v32  ;;  %2207 = vmatpush1.msra.mxu1 %v6770_v6 }
 0x390   :  { %2137 = vmatprep.subr.mxu0 %v6774_v37  ;;  %2208 = vmatprep.subr.mxu1 %v6776_v31 }
 0x391   :  { %2138 = vmatpush1.msra.mxu0 %v6780_v17  ;;  %2209 = vmatpush1.msra.mxu1 %v6782_v58  ;;  %v6812_v17 = vld [vmem:[#allocation9 + $0x158] sm:$0xff]  ;;  %v6816_v58 = vld [vmem:[#allocation9 + $0x140] sm:$0xff] }
 0x392   :  { %2139 = vmatprep.subr.mxu0 %v6786_v51  ;;  %2210 = vmatprep.subr.mxu1 %v6788_v38  ;;  %v6818_v51 = vld [vmem:[#allocation9 + $0x150] sm:$0xff]  ;;  %v6822_v38 = vld [vmem:[#allocation9 + $0x128] sm:$0xff] }
 0x393   :  { %2140 = vmatpush1.msra.mxu0 %v6792_v49  ;;  %2211 = vmatpush1.msra.mxu1 %v6794_v43  ;;  %v6824_v49 = vld [vmem:[#allocation9 + $0x138] sm:$0xff]  ;;  %v6828_v43 = vld [vmem:[#allocation9 + $0x120] sm:$0xff] }
 0x394   :  { %2141 = vmatprep.subr.mxu0 %v6798_v62  ;;  %2212 = vmatprep.subr.mxu1 %v6800_v57  ;;  %v6830_v62 = vld [vmem:[#allocation9 + $0x130] sm:$0xff]  ;;  %v6834_v57 = vld [vmem:[#allocation9 + $0x108] sm:$0xff] }
 0x395   :  { %2142 = vmatpush1.msra.mxu0 %v6804_v50  ;;  %2213 = vmatpush1.msra.mxu1 %v6806_v35  ;;  %v6836_v50 = vld [vmem:[#allocation9 + $0x118] sm:$0xff] }
 0x396   :  { %2143 = vmatprep.subr.mxu0 %v6810_v22  ;;  %2214 = vmatprep.subr.mxu1 %v6812_v17 }
 0x397   :  { %2144 = vmatpush1.msra.mxu0 %v6816_v58  ;;  %2215 = vmatpush1.msra.mxu1 %v6818_v51 }
 0x398   :  { %2145 = vmatprep.subr.mxu0 %v6822_v38  ;;  %2216 = vmatprep.subr.mxu1 %v6824_v49 }
 0x399   :  { %2146 = vmatpush1.msra.mxu0 %v6828_v43  ;;  %2217 = vmatpush1.msra.mxu1 %v6830_v62 }
 0x39a   :  { %2147 = vmatprep.subr.mxu0 %v6834_v57  ;;  %2218 = vmatprep.subr.mxu1 %v6836_v50 }
 0x39b   :  { %2148 = vmatpush1.msra.mxu0 %v6240_v59  ;;  %2219 = vmatpush1.msra.mxu1 %v6242_v41  ;;  %v9557_v59 = vld [vmem:[#allocation20_spill] sm:$0xff]  ;;  %v9558_v41 = vld [vmem:[#allocation21_spill] sm:$0xff] }
 0x39c   :  { %2149 = vmatprep.subr.mxu0 %v6246_v46  ;;  %2220 = vmatprep.subr.mxu1 %v6248_v56  ;;  %v9559_v46 = vld [vmem:[#allocation22_spill] sm:$0xff]  ;;  %v9560_v56 = vld [vmem:[#allocation23_spill] sm:$0xff] }
 0x39d   :  { %2150 = vmatpush1.msra.mxu0 %v6252_v55  ;;  %2221 = vmatpush1.msra.mxu1 %v6254_v0  ;;  %v9561_v55 = vld [vmem:[#allocation24_spill] sm:$0xff]  ;;  %v9562_v0 = vld [vmem:[#allocation25_spill] sm:$0xff] }
 0x39e   :  { %2151 = vmatprep.subr.mxu0 %v6258_v44  ;;  %2222 = vmatprep.subr.mxu1 %v6260_v52  ;;  %v9563_v44 = vld [vmem:[#allocation26_spill] sm:$0xff]  ;;  %v9564_v52 = vld [vmem:[#allocation27_spill] sm:$0xff] }
 0x39f   :  { %2152 = vmatpush1.msra.mxu0 %v6264_v45  ;;  %2223 = vmatpush1.msra.mxu1 %v6266_v8  ;;  %v9565_v45 = vld [vmem:[#allocation28_spill] sm:$0xff]  ;;  %v9566_v8 = vld [vmem:[#allocation29_spill] sm:$0xff] }
 0x3a0   :  { %2153 = vmatprep.subr.mxu0 %v6270_v48  ;;  %2224 = vmatprep.subr.mxu1 %v6272_v61  ;;  %v9567_v48 = vld [vmem:[#allocation30_spill] sm:$0xff]  ;;  %v9568_v61 = vld [vmem:[#allocation31_spill] sm:$0xff] }
 0x3a1   :  { %2154 = vmatpush1.msra.mxu0 %v6276_v63  ;;  %2225 = vmatpush1.msra.mxu1 %v6278_v1  ;;  %v9569_v63 = vld [vmem:[#allocation32_spill] sm:$0xff]  ;;  %v9570_v1 = vld [vmem:[#allocation33_spill] sm:$0xff] }
 0x3a2   :  { %2155 = vmatprep.subr.mxu0 %v6282_v2  ;;  %2226 = vmatprep.subr.mxu1 %v6284_v3  ;;  %v9571_v2 = vld [vmem:[#allocation34_spill] sm:$0xff]  ;;  %v9572_v3 = vld [vmem:[#allocation35_spill] sm:$0xff] }
 0x3a3   :  { %2156 = vmatpush1.msra.mxu0 %v6288_v4  ;;  %2227 = vmatpush1.msra.mxu1 %v6290_v5  ;;  %v9573_v4 = vld [vmem:[#allocation36_spill] sm:$0xff]  ;;  %v9574_v5 = vld [vmem:[#allocation37_spill] sm:$0xff] }
 0x3a4   :  { %2157 = vmatprep.subr.mxu0 %v6294_v7  ;;  %2228 = vmatprep.subr.mxu1 %v6296_v9  ;;  %v9575_v7 = vld [vmem:[#allocation38_spill] sm:$0xff]  ;;  %v9576_v9 = vld [vmem:[#allocation39_spill] sm:$0xff] }
 0x3a5   :  { %2158 = vmatpush1.msra.mxu0 %v6300_v10  ;;  %2229 = vmatpush1.msra.mxu1 %v6302_v11  ;;  %v9577_v10 = vld [vmem:[#allocation40_spill] sm:$0xff]  ;;  %v9578_v11 = vld [vmem:[#allocation41_spill] sm:$0xff] }
 0x3a6   :  { %2159 = vmatprep.subr.mxu0 %v6306_v12  ;;  %2230 = vmatprep.subr.mxu1 %v6308_v13  ;;  %v9579_v12 = vld [vmem:[#allocation42_spill] sm:$0xff]  ;;  %v9580_v13 = vld [vmem:[#allocation43_spill] sm:$0xff] }
 0x3a7   :  { %2160 = vmatpush1.msra.mxu0 %v6312_v14  ;;  %2231 = vmatpush1.msra.mxu1 %v6314_v15  ;;  %v9581_v14 = vld [vmem:[#allocation44_spill] sm:$0xff]  ;;  %v9582_v15 = vld [vmem:[#allocation45_spill] sm:$0xff] }
 0x3a8   :  { %2161 = vmatprep.subr.mxu0 %v6318_v16  ;;  %2232 = vmatprep.subr.mxu1 %v6320_v18  ;;  %v9583_v16 = vld [vmem:[#allocation46_spill] sm:$0xff]  ;;  %v9584_v18 = vld [vmem:[#allocation47_spill] sm:$0xff] }
 0x3a9   :  { %2162 = vmatpush1.msra.mxu0 %v6324_v19  ;;  %2233 = vmatpush1.msra.mxu1 %v6326_v21  ;;  %v9585_v19 = vld [vmem:[#allocation48_spill] sm:$0xff]  ;;  %v9586_v21 = vld [vmem:[#allocation49_spill] sm:$0xff] }
 0x3aa   :  { %2163 = vmatprep.subr.mxu0 %v6330_v23  ;;  %2234 = vmatprep.subr.mxu1 %v6332_v24  ;;  %v9587_v23 = vld [vmem:[#allocation50_spill] sm:$0xff]  ;;  %v9588_v24 = vld [vmem:[#allocation51_spill] sm:$0xff] }
 0x3ab   :  { %2164 = vmatpush1.msra.mxu0 %v6336_v25  ;;  %2197 = vmatprep.mubr.f32.mxu0 %v9277_v60  ;;  %v9589_v25 = vld [vmem:[#allocation52_spill] sm:$0xff] }
 0x3ac   :  { %2235 = vmatpush1.msra.mxu1 %v6340_v26  ;;  %2268 = vmatprep.mubr.f32.mxu1 %v9277_v60  ;;  %v9590_v26 = vld [vmem:[#allocation53_spill] sm:$0xff] }
 0x3ad   :  { %2198 = vmatmul.mubr.f32.vlgmr.msra.gmra.mxu0 %v6756_v42  ;;  %2269 = vmatmul.mubr.f32.vlgmr.msra.gmra.mxu1 %v6756_v42  ;;  %v9598_v42 = vld [vmem:[#allocation61_spill] sm:$0xff] }
 0x3ae   :  { %2436 = vmatprep.subr.mxu0 %v6350_v27  ;;  %2507 = vmatprep.subr.mxu1 %v6352_v28  ;;  %v9591_v27 = vld [vmem:[#allocation54_spill] sm:$0xff]  ;;  %v9592_v28 = vld [vmem:[#allocation55_spill] sm:$0xff] }
 0x3af   :  { %2437 = vmatpush1.msra.mxu0 %v6356_v29  ;;  %2508 = vmatpush1.msra.mxu1 %v6358_v30  ;;  %v9593_v29 = vld [vmem:[#allocation56_spill] sm:$0xff]  ;;  %v9594_v30 = vld [vmem:[#allocation57_spill] sm:$0xff] }
 0x3b0   :  { %2438 = vmatprep.subr.mxu0 %v6362_v33  ;;  %2509 = vmatprep.subr.mxu1 %v6364_v34  ;;  %v9595_v33 = vld [vmem:[#allocation58_spill] sm:$0xff]  ;;  %v9596_v34 = vld [vmem:[#allocation59_spill] sm:$0xff] }
 0x3b1   :  { %2439 = vmatpush1.msra.mxu0 %v6368_v36  ;;  %2510 = vmatpush1.msra.mxu1 %v9557_v59  ;;  %v9597_v36 = vld [vmem:[#allocation60_spill] sm:$0xff]  ;;  %v9599_v59 = vld [vmem:[#allocation62_spill] sm:$0xff] }
 0x3b2   :  { %2440 = vmatprep.subr.mxu0 %v9558_v41  ;;  %2511 = vmatprep.subr.mxu1 %v9559_v46  ;;  %v9600_v41 = vld [vmem:[#allocation63_spill] sm:$0xff]  ;;  %v9601_v46 = vld [vmem:[#allocation64_spill] sm:$0xff] }
 0x3b3   :  { %2441 = vmatpush1.msra.mxu0 %v9560_v56  ;;  %2512 = vmatpush1.msra.mxu1 %v9561_v55  ;;  %v9602_v56 = vld [vmem:[#allocation65_spill] sm:$0xff]  ;;  %v9603_v55 = vld [vmem:[#allocation66_spill] sm:$0xff] }
 0x3b4   :  { %2442 = vmatprep.subr.mxu0 %v9562_v0  ;;  %2513 = vmatprep.subr.mxu1 %v9563_v44  ;;  %v9604_v0 = vld [vmem:[#allocation67_spill] sm:$0xff]  ;;  %v9605_v44 = vld [vmem:[#allocation68_spill] sm:$0xff] }
 0x3b5   :  { %2443 = vmatpush1.msra.mxu0 %v9564_v52  ;;  %2514 = vmatpush1.msra.mxu1 %v9565_v45  ;;  %v9606_v52 = vld [vmem:[#allocation69_spill] sm:$0xff]  ;;  %v9607_v45 = vld [vmem:[#allocation70_spill] sm:$0xff] }
 0x3b6   :  { %2444 = vmatprep.subr.mxu0 %v9566_v8  ;;  %2515 = vmatprep.subr.mxu1 %v9567_v48  ;;  %v9608_v8 = vld [vmem:[#allocation71_spill] sm:$0xff]  ;;  %v9609_v48 = vld [vmem:[#allocation72_spill] sm:$0xff] }
 0x3b7   :  { %2445 = vmatpush1.msra.mxu0 %v9568_v61  ;;  %2516 = vmatpush1.msra.mxu1 %v9569_v63  ;;  %v9610_v61 = vld [vmem:[#allocation73_spill] sm:$0xff]  ;;  %v9611_v63 = vld [vmem:[#allocation74_spill] sm:$0xff] }
 0x3b8   :  { %2446 = vmatprep.subr.mxu0 %v9570_v1  ;;  %2517 = vmatprep.subr.mxu1 %v9571_v2  ;;  %v9612_v1 = vld [vmem:[#allocation75_spill] sm:$0xff]  ;;  %v9613_v2 = vld [vmem:[#allocation76_spill] sm:$0xff] }
 0x3b9   :  { %2447 = vmatpush1.msra.mxu0 %v9572_v3  ;;  %2518 = vmatpush1.msra.mxu1 %v9573_v4  ;;  %v9614_v3 = vld [vmem:[#allocation77_spill] sm:$0xff]  ;;  %v9615_v4 = vld [vmem:[#allocation78_spill] sm:$0xff] }
 0x3ba   :  { %2448 = vmatprep.subr.mxu0 %v9574_v5  ;;  %2519 = vmatprep.subr.mxu1 %v9575_v7  ;;  %v9616_v5 = vld [vmem:[#allocation79_spill] sm:$0xff]  ;;  %v9617_v7 = vld [vmem:[#allocation80_spill] sm:$0xff] }
 0x3bb   :  { %2449 = vmatpush1.msra.mxu0 %v9576_v9  ;;  %2520 = vmatpush1.msra.mxu1 %v9577_v10  ;;  %v9618_v9 = vld [vmem:[#allocation81_spill] sm:$0xff]  ;;  %v9619_v10 = vld [vmem:[#allocation82_spill] sm:$0xff] }
 0x3bc   :  { %2450 = vmatprep.subr.mxu0 %v9578_v11  ;;  %2521 = vmatprep.subr.mxu1 %v9579_v12  ;;  %v9620_v11 = vld [vmem:[#allocation83_spill] sm:$0xff]  ;;  %v9621_v12 = vld [vmem:[#allocation84_spill] sm:$0xff] }
 0x3bd   :  { %2451 = vmatpush1.msra.mxu0 %v9580_v13  ;;  %2522 = vmatpush1.msra.mxu1 %v9581_v14  ;;  %v9622_v13 = vld [vmem:[#allocation85_spill] sm:$0xff]  ;;  %v9623_v14 = vld [vmem:[#allocation86_spill] sm:$0xff] }
 0x3be   :  { %2452 = vmatprep.subr.mxu0 %v9582_v15  ;;  %2523 = vmatprep.subr.mxu1 %v9583_v16  ;;  %v9624_v15 = vld [vmem:[#allocation87_spill] sm:$0xff]  ;;  %v9625_v16 = vld [vmem:[#allocation88_spill] sm:$0xff] }
 0x3bf   :  { %2453 = vmatpush1.msra.mxu0 %v9584_v18  ;;  %2524 = vmatpush1.msra.mxu1 %v9585_v19  ;;  %v9626_v18 = vld [vmem:[#allocation89_spill] sm:$0xff]  ;;  %v9627_v19 = vld [vmem:[#allocation90_spill] sm:$0xff] }
 0x3c0   :  { %2454 = vmatprep.subr.mxu0 %v9586_v21  ;;  %2525 = vmatprep.subr.mxu1 %v9587_v23  ;;  %v9628_v21 = vld [vmem:[#allocation91_spill] sm:$0xff]  ;;  %v9629_v23 = vld [vmem:[#allocation92_spill] sm:$0xff] }
 0x3c1   :  { %2455 = vmatpush1.msra.mxu0 %v9588_v24  ;;  %2526 = vmatpush1.msra.mxu1 %v9589_v25  ;;  %v9630_v24 = vld [vmem:[#allocation93_spill] sm:$0xff]  ;;  %v9631_v25 = vld [vmem:[#allocation94_spill] sm:$0xff] }
 0x3c2   :  { %2456 = vmatprep.subr.mxu0 %v9590_v26  ;;  %2527 = vmatprep.subr.mxu1 %v9591_v27  ;;  %v9632_v26 = vld [vmem:[#allocation95_spill] sm:$0xff]  ;;  %v9633_v27 = vld [vmem:[#allocation96_spill] sm:$0xff] }
 0x3c3   :  { %2457 = vmatpush1.msra.mxu0 %v9592_v28  ;;  %2528 = vmatpush1.msra.mxu1 %v9593_v29  ;;  %v9634_v28 = vld [vmem:[#allocation97_spill] sm:$0xff]  ;;  %v9635_v29 = vld [vmem:[#allocation98_spill] sm:$0xff] }
 0x3c4   :  { %2458 = vmatprep.subr.mxu0 %v9594_v30  ;;  %2529 = vmatprep.subr.mxu1 %v9595_v33  ;;  %v9636_v30 = vld [vmem:[#allocation99_spill] sm:$0xff]  ;;  %v9637_v33 = vld [vmem:[#allocation100_spill] sm:$0xff] }
 0x3c5   :  { %2459 = vmatpush1.msra.mxu0 %v9596_v34  ;;  %2530 = vmatpush1.msra.mxu1 %v9597_v36  ;;  %v9638_v34 = vld [vmem:[#allocation101_spill] sm:$0xff]  ;;  %v9639_v36 = vld [vmem:[#allocation102_spill] sm:$0xff] }
 0x3c6   :  { %2460 = vmatprep.subr.mxu0 %v9598_v42  ;;  %2531 = vmatprep.subr.mxu1 %v9599_v59  ;;  %v9640_v42 = vld [vmem:[#allocation103_spill] sm:$0xff]  ;;  %v9641_v59 = vld [vmem:[#allocation104_spill] sm:$0xff] }
 0x3c7   :  { %2461 = vmatpush1.msra.mxu0 %v9600_v41  ;;  %2532 = vmatpush1.msra.mxu1 %v9601_v46  ;;  %v9642_v41 = vld [vmem:[#allocation105_spill] sm:$0xff]  ;;  %v9643_v46 = vld [vmem:[#allocation106_spill] sm:$0xff] }
 0x3c8   :  { %2462 = vmatprep.subr.mxu0 %v9602_v56  ;;  %2533 = vmatprep.subr.mxu1 %v9603_v55  ;;  %v9644_v56 = vld [vmem:[#allocation107_spill] sm:$0xff]  ;;  %v9645_v55 = vld [vmem:[#allocation108_spill] sm:$0xff] }
 0x3c9   :  { %2463 = vmatpush1.msra.mxu0 %v9604_v0  ;;  %2534 = vmatpush1.msra.mxu1 %v9605_v44  ;;  %v9646_v0 = vld [vmem:[#allocation109_spill] sm:$0xff]  ;;  %v9647_v44 = vld [vmem:[#allocation110_spill] sm:$0xff] }
 0x3ca   :  { %2464 = vmatprep.subr.mxu0 %v9606_v52  ;;  %2535 = vmatprep.subr.mxu1 %v9607_v45  ;;  %v9648_v52 = vld [vmem:[#allocation111_spill] sm:$0xff]  ;;  %v9649_v45 = vld [vmem:[#allocation112_spill] sm:$0xff] }
 0x3cb   :  { %2465 = vmatpush1.msra.mxu0 %v9608_v8  ;;  %2536 = vmatpush1.msra.mxu1 %v9609_v48  ;;  %v9650_v8 = vld [vmem:[#allocation113_spill] sm:$0xff]  ;;  %v9651_v48 = vld [vmem:[#allocation114_spill] sm:$0xff] }
 0x3cc   :  { %2466 = vmatprep.subr.mxu0 %v9610_v61  ;;  %2537 = vmatprep.subr.mxu1 %v9611_v63  ;;  %v9652_v61 = vld [vmem:[#allocation115_spill] sm:$0xff]  ;;  %v9653_v63 = vld [vmem:[#allocation116_spill] sm:$0xff] }
 0x3cd   :  { %2467 = vmatpush1.msra.mxu0 %v9612_v1  ;;  %2538 = vmatpush1.msra.mxu1 %v9613_v2  ;;  %v9654_v1 = vld [vmem:[#allocation117_spill] sm:$0xff]  ;;  %v9655_v2 = vld [vmem:[#allocation118_spill] sm:$0xff] }
 0x3ce   :  { %2468 = vmatprep.subr.mxu0 %v9614_v3  ;;  %2539 = vmatprep.subr.mxu1 %v9615_v4  ;;  %v9656_v3 = vld [vmem:[#allocation119_spill] sm:$0xff]  ;;  %v9657_v4 = vld [vmem:[#allocation120_spill] sm:$0xff] }
 0x3cf   :  { %2469 = vmatpush2.msra.mxu0 %v9616_v5  ;;  %2540 = vmatpush2.msra.mxu1 %v9617_v7  ;;  %v9658_v5 = vld [vmem:[#allocation121_spill] sm:$0xff]  ;;  %v9659_v7 = vld [vmem:[#allocation122_spill] sm:$0xff] }
 0x3d0   :  { %2470 = vmatprep.subr.mxu0 %v9618_v9  ;;  %2541 = vmatprep.subr.mxu1 %v9619_v10  ;;  %v9660_v9 = vld [vmem:[#allocation123_spill] sm:$0xff]  ;;  %v9661_v10 = vld [vmem:[#allocation124_spill] sm:$0xff] }
 0x3d1   :  { %2471 = vmatpush2.msra.mxu0 %v9620_v11  ;;  %2542 = vmatpush2.msra.mxu1 %v9621_v12  ;;  %v9662_v11 = vld [vmem:[#allocation125_spill] sm:$0xff]  ;;  %v9663_v12 = vld [vmem:[#allocation126_spill] sm:$0xff] }
 0x3d2   :  { %2472 = vmatprep.subr.mxu0 %v9622_v13  ;;  %2543 = vmatprep.subr.mxu1 %v9623_v14  ;;  %v9664_v13 = vld [vmem:[#allocation127_spill] sm:$0xff]  ;;  %v9665_v14 = vld [vmem:[#allocation128_spill] sm:$0xff] }
 0x3d3   :  { %2473 = vmatpush2.msra.mxu0 %v9624_v15  ;;  %2544 = vmatpush2.msra.mxu1 %v9625_v16  ;;  %v9666_v15 = vld [vmem:[#allocation129_spill] sm:$0xff]  ;;  %v9667_v16 = vld [vmem:[#allocation130_spill] sm:$0xff] }
 0x3d4   :  { %2474 = vmatprep.subr.mxu0 %v9626_v18  ;;  %2545 = vmatprep.subr.mxu1 %v9627_v19  ;;  %v9668_v18 = vld [vmem:[#allocation131_spill] sm:$0xff]  ;;  %v9669_v19 = vld [vmem:[#allocation133_spill] sm:$0xff] }
 0x3d5   :  { %2475 = vmatpush2.msra.mxu0 %v9628_v21  ;;  %2546 = vmatpush2.msra.mxu1 %v9629_v23  ;;  %v9670_v21 = vld [vmem:[#allocation134_spill] sm:$0xff]  ;;  %v9671_v23 = vld [vmem:[#allocation132_spill] sm:$0xff] }
 0x3d6   :  { %2476 = vmatprep.subr.mxu0 %v9630_v24  ;;  %2547 = vmatprep.subr.mxu1 %v9631_v25  ;;  %v9672_v24 = vld [vmem:[#allocation159_spill] sm:$0xff]  ;;  %v9673_v25 = vld [vmem:[#allocation160_spill] sm:$0xff] }
 0x3d7   :  { %2477 = vmatpush2.msra.mxu0 %v9632_v26  ;;  %2548 = vmatpush2.msra.mxu1 %v9633_v27  ;;  %v9674_v26 = vld [vmem:[#allocation161_spill] sm:$0xff]  ;;  %v9675_v27 = vld [vmem:[#allocation162_spill] sm:$0xff] }
 0x3d8   :  { %2478 = vmatprep.subr.mxu0 %v9634_v28  ;;  %2549 = vmatprep.subr.mxu1 %v9635_v29  ;;  %v9676_v28 = vld [vmem:[#allocation163_spill] sm:$0xff]  ;;  %v9677_v29 = vld [vmem:[#allocation164_spill] sm:$0xff] }
 0x3d9   :  { %2479 = vmatpush2.msra.mxu0 %v9636_v30  ;;  %2550 = vmatpush2.msra.mxu1 %v9637_v33  ;;  %v9678_v30 = vld [vmem:[#allocation165_spill] sm:$0xff]  ;;  %v9679_v33 = vld [vmem:[#allocation166_spill] sm:$0xff] }
 0x3da   :  { %2480 = vmatprep.subr.mxu0 %v9638_v34  ;;  %2551 = vmatprep.subr.mxu1 %v9639_v36  ;;  %v9680_v36 = vld [vmem:[#allocation16_spill] sm:$0xff] }
 0x3db   :  { %2481 = vmatpush2.msra.mxu0 %v9640_v42  ;;  %2552 = vmatpush2.msra.mxu1 %v9641_v59 }
 0x3dc   :  { %2482 = vmatprep.subr.mxu0 %v9642_v41  ;;  %2553 = vmatprep.subr.mxu1 %v9643_v46  ;;  %v9681_v46 = vld [vmem:[#allocation17_spill] sm:$0xff] }
 0x3dd   :  { %2483 = vmatpush2.msra.mxu0 %v9644_v56  ;;  %2554 = vmatpush2.msra.mxu1 %v9645_v55 }
 0x3de   :  { %2484 = vmatprep.subr.mxu0 %v9646_v0  ;;  %2555 = vmatprep.subr.mxu1 %v9647_v44 }
 0x3df   :  { %2485 = vmatpush2.msra.mxu0 %v9648_v52  ;;  %2556 = vmatpush2.msra.mxu1 %v9649_v45  ;;  %v9682_v52 = vld [vmem:[#allocation18_spill] sm:$0xff] }
 0x3e0   :  { %2486 = vmatprep.subr.mxu0 %v9650_v8  ;;  %2557 = vmatprep.subr.mxu1 %v9651_v48 }
 0x3e1   :  { %2487 = vmatpush2.msra.mxu0 %v9652_v61  ;;  %2558 = vmatpush2.msra.mxu1 %v9653_v63  ;;  %v9683_v61 = vld [vmem:[#allocation19_spill] sm:$0xff] }
 0x3e2   :  { %2488 = vmatprep.subr.mxu0 %v9654_v1  ;;  %2559 = vmatprep.subr.mxu1 %v9655_v2 }
 0x3e3   :  { %2489 = vmatpush2.msra.mxu0 %v9656_v3  ;;  %2560 = vmatpush2.msra.mxu1 %v9657_v4 }
 0x3e4   :  { %2490 = vmatprep.subr.mxu0 %v9658_v5  ;;  %2561 = vmatprep.subr.mxu1 %v9659_v7 }
 0x3e5   :  { %2491 = vmatpush2.msra.mxu0 %v9660_v9  ;;  %2562 = vmatpush2.msra.mxu1 %v9661_v10  ;;  %v9684_v9 = vld [vmem:[#allocation139_spill] sm:$0xff] }
 0x3e6   :  { %2492 = vmatprep.subr.mxu0 %v9662_v11  ;;  %2563 = vmatprep.subr.mxu1 %v9663_v12 }
 0x3e7   :  { %2493 = vmatpush2.msra.mxu0 %v9664_v13  ;;  %2564 = vmatpush2.msra.mxu1 %v9665_v14 }
 0x3e8   :  { %2494 = vmatprep.subr.mxu0 %v9666_v15  ;;  %2565 = vmatprep.subr.mxu1 %v9667_v16  ;;  %v9685_v15 = vld [vmem:[#allocation141_spill] sm:$0xff] }
 0x3e9   :  { %2495 = vmatpush2.msra.mxu0 %v9668_v18  ;;  %2566 = vmatpush2.msra.mxu1 %v9669_v19 }
 0x3ea   :  { %2496 = vmatprep.subr.mxu0 %v9670_v21  ;;  %2567 = vmatprep.subr.mxu1 %v9671_v23 }
 0x3eb   :  { %2497 = vmatpush2.msra.mxu0 %v9672_v24  ;;  %2568 = vmatpush2.msra.mxu1 %v9673_v25 }
 0x3ec   :  { %2498 = vmatprep.subr.mxu0 %v9674_v26  ;;  %2569 = vmatprep.subr.mxu1 %v9675_v27  ;;  %v9686_v27 = vld [vmem:[#allocation142_spill] sm:$0xff] }
 0x3ed   :  { %2499 = vmatpush2.msra.mxu0 %v9676_v28  ;;  %2570 = vmatpush2.msra.mxu1 %v9677_v29  ;;  %v9687_v29 = vld [vmem:[#allocation140_spill] sm:$0xff] }
 0x3ee   :  { %2679 = vmatprep.subr.mxu0 %v9678_v30  ;;  %2750 = vmatprep.subr.mxu1 %v9679_v33 }
 0x44c   :  { %v1956_v34 = vpop.f32.mrf.mxu0  ;;  %v2027_v55 = vpop.f32.mrf.mxu1 }
 0x44d   :  { %v1957_v42 = vadd.f32 %v1956_v34, %v9680_v36  ;;  %v2028_v63 = vadd.f32 %v2027_v55, %v9683_v61 }
 0x44e   :  { %v1958_v59 = vpop.f32.mrf.mxu0  ;;  %v2029_v44 = vpop.f32.mrf.mxu1 }
 0x44f   :  { %v4847_v41 = vmul.f32 -1.442695, %v1957_v42  ;;  %v1959_v56 = vadd.f32 %v1958_v59, %v9681_v46  ;;  %v2030_v45 = vadd.f32 %v2029_v44, %v9682_v52 }
 0x451   :  { %4969 = vpow2.f32 %v4847_v41  ;;  %v4848_v0 = vmul.f32 -1.442695, %v1959_v56  ;;  %v4849_v8 = vmul.f32 -1.442695, %v2030_v45 }
 0x453   :  { %4971 = vpow2.f32 %v4848_v0 }
 0x454   :  { %4973 = vpow2.f32 %v4849_v8 }
 0x45e   :  { %v4970_v48 = vpop.eup %4969 }
 0x45f   :  { %v2036_v1 = vadd.f32 1.0, %v4970_v48 }
 0x460   :  { %v4972_v2 = vpop.eup %4971 }
 0x461   :  { %4975 = vrcp.f32 %v2036_v1  ;;  %v2042_v3 = vadd.f32 1.0, %v4972_v2  ;;  %v4974_v4 = vpop.eup %4973 }
 0x462   :  { %4977 = vtanh.f32 %v2028_v63  ;;  %v2049_v21 = vadd.f32 1.0, %v4974_v4 }
 0x463   :  { %4979 = vrcp.f32 %v2042_v3 }
 0x46d   :  { %v2199_v5 = vpop.f32.mrf.mxu0  ;;  %v2270_v23 = vpop.f32.mrf.mxu1 }
 0x46e   :  { %v4976_v7 = vpop.eup %4975  ;;  %v2275_v10 = vadd.f32 %v2199_v5, %v9684_v9  ;;  %v2277_v30 = vadd.f32 %v2270_v23, %v9687_v29  ;;  %v9690_v9 = vld [vmem:[#allocation169_spill] sm:$0xff]  ;;  %v7124_v23 = vld [vmem:[#allocation9 + $0x58] sm:$0xff]  ;;  %v7140_v29 = vld [vmem:[#allocation9 + $0x20] sm:$0xff] }
 0x46f   :  { %v4978_v11 = vpop.eup %4977  ;;  %v2201_v12 = vpop.f32.mrf.mxu0 }
 0x470   :  { %v4980_v13 = vpop.eup %4979  ;;  %v4850_v14 = vmul.f32 -1.442695, %v2275_v10  ;;  %v2276_v16 = vadd.f32 %v2201_v12, %v9685_v15  ;;  %v2053_v18 = vmul.f32 %v4978_v11, %v4976_v7  ;;  %v2272_v26 = vpop.f32.mrf.mxu1  ;;  %v9689_v7 = vld [vmem:[#allocation168_spill] sm:$0xff]  ;;  %v7094_v10 = vld [vmem:[#allocation9 + $0xb0] sm:$0xff]  ;;  %v7098_v11 = vld [vmem:[#allocation9 + $0x88] sm:$0xff] }
 0x471   :  { %v2052_v19 = vmul.f32 %v4980_v13, %v6747_v39  ;;  %v2278_v28 = vadd.f32 %v2272_v26, %v9686_v27  ;;  %v7100_v12 = vld [vmem:[#allocation9 + $0x98] sm:$0xff]  ;;  %v7104_v13 = vld [vmem:[#allocation9 + $0x80] sm:$0xff]  ;;  %v7110_v15 = vld [vmem:[#allocation9 + $0x68] sm:$0xff] }
 0x472   :  { %4981 = vpow2.f32 %v4850_v14  ;;  %v4851_v24 = vmul.f32 -1.442695, %v2276_v16  ;;  %v7106_v14 = vld [vmem:[#allocation9 + $0x90] sm:$0xff]  ;;  %v7112_v16 = vld [vmem:[#allocation9 + $0x78] sm:$0xff]  ;;  %v7134_v27 = vld [vmem:[#allocation9 + $0x28] sm:$0xff] }
 0x473   :  { %v7019_v25 = vadd.f32 %v2053_v18, %v2052_v19  ;;  %v4852_v33 = vmul.f32 -1.442695, %v2278_v28  ;;  %v7116_v18 = vld [vmem:[#allocation9 + $0x60] sm:$0xff]  ;;  %v7118_v19 = vld [vmem:[#allocation9 + $0x70] sm:$0xff]  ;;  %v7136_v28 = vld [vmem:[#allocation9 + $0x38] sm:$0xff] }
 0x474   :  { %4983 = vpow2.f32 %v4851_v24  ;;  %v7128_v24 = vld [vmem:[#allocation9 + $0x40] sm:$0xff]  ;;  %v7130_v26 = vld [vmem:[#allocation9 + $0x50] sm:$0xff] }
 0x475   :  { %4985 = vrcp.f32 %v2049_v21  ;;  %v7122_v21 = vld [vmem:[#allocation9 + $0x48] sm:$0xff] }
 0x476   :  { %4987 = vtanh.f32 %v7019_v25 }
 0x477   :  { %4989 = vtanh.f32 %v2277_v30  ;;  %v7142_v30 = vld [vmem:[#allocation9 + $0x30] sm:$0xff] }
 0x478   :  { %4991 = vpow2.f32 %v4852_v33  ;;  %v7146_v33 = vld [vmem:[#allocation9 + $0x8] sm:$0xff] }
 0x47f   :  { %v4982_v34 = vpop.eup %4981 }
 0x480   :  { %v2283_v42 = vadd.f32 1.0, %v4982_v34  ;;  %v7148_v34 = vld [vmem:[#allocation9 + $0x18] sm:$0xff] }
 0x481   :  { %v4984_v39 = vpop.eup %4983 }
 0x482   :  { %v4986_v59 = vpop.eup %4985  ;;  %4993 = vrcp.f32 %v2283_v42  ;;  %v2289_v41 = vadd.f32 1.0, %v4984_v39  ;;  %v7152_v42 = vld [vmem:[#allocation9] sm:$0xff]  ;;  %v7156_v39 = vld [vmem:[#allocation9 + $0x10] sm:$0xff] }
 0x483   :  { %v4988_v56 = vpop.eup %4987 }
 0x484   :  { %4995 = vrcp.f32 %v2289_v41  ;;  %v2056_v55 = vmul.f32 %v4988_v56, %v4986_v59  ;;  %v4990_v0 = vpop.eup %4989  ;;  %v7166_v59 = vld [vmem:[#allocation11 + $0x1e8] sm:$0xff]  ;;  %v7168_v41 = vld [vmem:[#allocation11 + $0x1f8] sm:$0xff]  ;;  %v7172_v56 = vld [vmem:[#allocation11 + $0x1e0] sm:$0xff] }
 0x485   :  { %v4992_v44 = vpop.eup %4991 }
 0x486   :  { %2059 = vst [vmem:[#allocation12 + $0x10] sm:$0xff] %v2056_v55  ;;  %2500 = vmatprep.mubr.f32.mxu0 %v2056_v55  ;;  %2571 = vmatprep.mubr.f32.mxu1 %v2056_v55  ;;  %v2296_v63 = vadd.f32 1.0, %v4992_v44  ;;  %v7174_v55 = vld [vmem:[#allocation11 + $0x1f0] sm:$0xff]  ;;  %v7180_v44 = vld [vmem:[#allocation11 + $0x1d8] sm:$0xff] }
 0x488   :  { %4997 = vrcp.f32 %v2296_v63  ;;  %v7192_v63 = vld [vmem:[#allocation11 + $0x1b8] sm:$0xff] }
 0x489   :  { %9699 = vst [vmem:[#allocation136_spill] sm:$0xff] %v7192_v63 }
 0x48f   :  { %v4994_v45 = vpop.eup %4993 }
 0x490   :  { %v2300_v8 = vmul.f32 %v4994_v45, %v4990_v0  ;;  %v7178_v0 = vld [vmem:[#allocation11 + $0x1c8] sm:$0xff]  ;;  %v7184_v45 = vld [vmem:[#allocation11 + $0x1c0] sm:$0xff] }
 0x491   :  { %v4996_v48 = vpop.eup %4995 }
 0x492   :  { %v2299_v1 = vmul.f32 %v4996_v48, %v6753_v40  ;;  %v9688_v40 = vld [vmem:[#allocation167_spill] sm:$0xff]  ;;  %v7190_v48 = vld [vmem:[#allocation11 + $0x1a8] sm:$0xff] }
 0x493   :  { %9698 = vst [vmem:[#allocation138_spill] sm:$0xff] %v7190_v48 }
 0x494   :  { %v7025_v2 = vadd.f32 %v2300_v8, %v2299_v1  ;;  %v7186_v8 = vld [vmem:[#allocation11 + $0x1d0] sm:$0xff]  ;;  %v7196_v1 = vld [vmem:[#allocation11 + $0x1a0] sm:$0xff] }
 0x495   :  { %v4998_v3 = vpop.eup %4997  ;;  %9697 = vst [vmem:[#allocation137_spill] sm:$0xff] %v7186_v8  ;;  %9700 = vst [vmem:[#allocation20_spill] sm:$0xff] %v7196_v1 }
 0x496   :  { %4999 = vtanh.f32 %v7025_v2 }
 0x4a3   :  { %v5000_v4 = vpop.eup %4999 }
 0x4a4   :  { %v7028_v5 = vmul.f32 %v5000_v4, %v4998_v3  ;;  %v7198_v3 = vld [vmem:[#allocation11 + $0x1b0] sm:$0xff]  ;;  %v7202_v4 = vld [vmem:[#allocation11 + $0x188] sm:$0xff] }
 0x4a5   :  { %9701 = vst [vmem:[#allocation21_spill] sm:$0xff] %v7198_v3  ;;  %9702 = vst [vmem:[#allocation22_spill] sm:$0xff] %v7202_v4 }
 0x4a6   :  { %2501 = vmatmul.mubr.f32.vlgmr.msra.gmra.mxu0 %v7028_v5  ;;  %2572 = vmatmul.mubr.f32.vlgmr.msra.gmra.mxu1 %v7028_v5 }
 0x4a7   :  { %2680 = vmatpush1.msra.mxu0 %v6758_v47  ;;  %2751 = vmatpush1.msra.mxu1 %v6760_v54  ;;  %v9691_v47 = vld [vmem:[#allocation170_spill] sm:$0xff]  ;;  %v9692_v54 = vld [vmem:[#allocation171_spill] sm:$0xff] }
 0x4a8   :  { %2681 = vmatprep.subr.mxu0 %v6762_v20  ;;  %2752 = vmatprep.subr.mxu1 %v6764_v53  ;;  %v9693_v20 = vld [vmem:[#allocation172_spill] sm:$0xff]  ;;  %v9694_v53 = vld [vmem:[#allocation173_spill] sm:$0xff] }
 0x4a9   :  { %2682 = vmatpush1.msra.mxu0 %v6768_v32  ;;  %2753 = vmatpush1.msra.mxu1 %v6770_v6  ;;  %v9695_v32 = vld [vmem:[#allocation174_spill] sm:$0xff]  ;;  %v9696_v6 = vld [vmem:[#allocation135_spill] sm:$0xff] }
 0x4aa   :  { %2683 = vmatprep.subr.mxu0 %v6774_v37  ;;  %2754 = vmatprep.subr.mxu1 %v6776_v31  ;;  %v7056_v37 = vld [vmem:[#allocation9 + $0x100] sm:$0xff]  ;;  %v7058_v31 = vld [vmem:[#allocation9 + $0x110] sm:$0xff] }
 0x4ab   :  { %2684 = vmatpush1.msra.mxu0 %v9688_v40  ;;  %2755 = vmatpush1.msra.mxu1 %v9689_v7  ;;  %v7208_v40 = vld [vmem:[#allocation11 + $0x180] sm:$0xff]  ;;  %v7210_v7 = vld [vmem:[#allocation11 + $0x190] sm:$0xff] }
 0x4ac   :  { %2685 = vmatprep.subr.mxu0 %v9690_v9  ;;  %2756 = vmatprep.subr.mxu1 %v9691_v47  ;;  %9704 = vst [vmem:[#allocation24_spill] sm:$0xff] %v7208_v40  ;;  %9705 = vst [vmem:[#allocation25_spill] sm:$0xff] %v7210_v7  ;;  %v7214_v9 = vld [vmem:[#allocation11 + $0x168] sm:$0xff]  ;;  %v7216_v47 = vld [vmem:[#allocation11 + $0x178] sm:$0xff] }
 0x4ad   :  { %2686 = vmatpush1.msra.mxu0 %v9692_v54  ;;  %2757 = vmatpush1.msra.mxu1 %v9693_v20  ;;  %9706 = vst [vmem:[#allocation26_spill] sm:$0xff] %v7214_v9  ;;  %9707 = vst [vmem:[#allocation27_spill] sm:$0xff] %v7216_v47  ;;  %v7220_v54 = vld [vmem:[#allocation11 + $0x160] sm:$0xff]  ;;  %v7222_v20 = vld [vmem:[#allocation11 + $0x170] sm:$0xff] }
 0x4ae   :  { %2687 = vmatprep.subr.mxu0 %v9694_v53  ;;  %2758 = vmatprep.subr.mxu1 %v9695_v32  ;;  %9708 = vst [vmem:[#allocation28_spill] sm:$0xff] %v7220_v54  ;;  %9709 = vst [vmem:[#allocation29_spill] sm:$0xff] %v7222_v20  ;;  %v7226_v53 = vld [vmem:[#allocation11 + $0x148] sm:$0xff]  ;;  %v7228_v32 = vld [vmem:[#allocation11 + $0x158] sm:$0xff] }
 0x4af   :  { %2688 = vmatpush1.msra.mxu0 %v9696_v6  ;;  %2759 = vmatpush1.msra.mxu1 %v6806_v35  ;;  %v7062_v35 = vld [vmem:[#allocation9 + $0xe8] sm:$0xff]  ;;  %9710 = vst [vmem:[#allocation30_spill] sm:$0xff] %v7226_v53  ;;  %9711 = vst [vmem:[#allocation31_spill] sm:$0xff] %v7228_v32  ;;  %v7232_v6 = vld [vmem:[#allocation11 + $0x140] sm:$0xff] }
 0x4b0   :  { %2689 = vmatprep.subr.mxu0 %v6810_v22  ;;  %2760 = vmatprep.subr.mxu1 %v6812_v17  ;;  %v7064_v22 = vld [vmem:[#allocation9 + $0xf8] sm:$0xff]  ;;  %v7068_v17 = vld [vmem:[#allocation9 + $0xe0] sm:$0xff]  ;;  %9712 = vst [vmem:[#allocation32_spill] sm:$0xff] %v7232_v6 }
 0x4b1   :  { %2690 = vmatpush1.msra.mxu0 %v6816_v58  ;;  %2761 = vmatpush1.msra.mxu1 %v6818_v51  ;;  %v7070_v58 = vld [vmem:[#allocation9 + $0xf0] sm:$0xff]  ;;  %v7074_v51 = vld [vmem:[#allocation9 + $0xc8] sm:$0xff] }
 0x4b2   :  { %2691 = vmatprep.subr.mxu0 %v6822_v38  ;;  %2762 = vmatprep.subr.mxu1 %v6824_v49  ;;  %v7076_v38 = vld [vmem:[#allocation9 + $0xd8] sm:$0xff]  ;;  %v7080_v49 = vld [vmem:[#allocation9 + $0xc0] sm:$0xff] }
 0x4b3   :  { %2692 = vmatpush1.msra.mxu0 %v6828_v43  ;;  %2763 = vmatpush1.msra.mxu1 %v6830_v62  ;;  %v7082_v43 = vld [vmem:[#allocation9 + $0xd0] sm:$0xff]  ;;  %v7086_v62 = vld [vmem:[#allocation9 + $0xa8] sm:$0xff] }
 0x4b4   :  { %2693 = vmatprep.subr.mxu0 %v6834_v57  ;;  %2764 = vmatprep.subr.mxu1 %v6836_v50  ;;  %v7088_v57 = vld [vmem:[#allocation9 + $0xb8] sm:$0xff]  ;;  %v7092_v50 = vld [vmem:[#allocation9 + $0xa0] sm:$0xff] }
 0x4b5   :  { %2694 = vmatpush1.msra.mxu0 %v7056_v37  ;;  %2765 = vmatpush1.msra.mxu1 %v7058_v31 }
 0x4b6   :  { %2695 = vmatprep.subr.mxu0 %v7062_v35  ;;  %2766 = vmatprep.subr.mxu1 %v7064_v22 }
 0x4b7   :  { %2696 = vmatpush1.msra.mxu0 %v7068_v17  ;;  %2767 = vmatpush1.msra.mxu1 %v7070_v58 }
 0x4b8   :  { %2697 = vmatprep.subr.mxu0 %v7074_v51  ;;  %2768 = vmatprep.subr.mxu1 %v7076_v38 }
 0x4b9   :  { %2698 = vmatpush1.msra.mxu0 %v7080_v49  ;;  %2769 = vmatpush1.msra.mxu1 %v7082_v43 }
 0x4ba   :  { %2699 = vmatprep.subr.mxu0 %v7086_v62  ;;  %2770 = vmatprep.subr.mxu1 %v7088_v57 }
 0x4bb   :  { %2700 = vmatpush1.msra.mxu0 %v7092_v50  ;;  %2771 = vmatpush1.msra.mxu1 %v7094_v10 }
 0x4bc   :  { %2701 = vmatprep.subr.mxu0 %v7098_v11  ;;  %2772 = vmatprep.subr.mxu1 %v7100_v12 }
 0x4bd   :  { %2702 = vmatpush1.msra.mxu0 %v7104_v13  ;;  %2773 = vmatpush1.msra.mxu1 %v7106_v14 }
 0x4be   :  { %2703 = vmatprep.subr.mxu0 %v7110_v15  ;;  %2774 = vmatprep.subr.mxu1 %v7112_v16 }
 0x4bf   :  { %2704 = vmatpush1.msra.mxu0 %v7116_v18  ;;  %2775 = vmatpush1.msra.mxu1 %v7118_v19 }
 0x4c0   :  { %2705 = vmatprep.subr.mxu0 %v7122_v21  ;;  %2776 = vmatprep.subr.mxu1 %v7124_v23 }
 0x4c1   :  { %2706 = vmatpush1.msra.mxu0 %v7128_v24  ;;  %2777 = vmatpush1.msra.mxu1 %v7130_v26 }
 0x4c2   :  { %2707 = vmatprep.subr.mxu0 %v7134_v27  ;;  %2778 = vmatprep.subr.mxu1 %v7136_v28 }
 0x4c3   :  { %2708 = vmatpush1.msra.mxu0 %v7140_v29  ;;  %2779 = vmatpush1.msra.mxu1 %v7142_v30 }
 0x4c4   :  { %2709 = vmatprep.subr.mxu0 %v7146_v33  ;;  %2780 = vmatprep.subr.mxu1 %v7148_v34 }
 0x4c5   :  { %2710 = vmatpush1.msra.mxu0 %v7152_v42  ;;  %2743 = vmatprep.mubr.f32.mxu0 %v9277_v60 }
 0x4c6   :  { %2781 = vmatpush1.msra.mxu1 %v7156_v39  ;;  %2814 = vmatprep.mubr.f32.mxu1 %v9277_v60 }
 0x4c7   :  { %2744 = vmatmul.mubr.f32.vlgmr.msra.gmra.mxu0 %v7028_v5  ;;  %2815 = vmatmul.mubr.f32.vlgmr.msra.gmra.mxu1 %v7028_v5  ;;  %v7204_v5 = vld [vmem:[#allocation11 + $0x198] sm:$0xff] }
 0x4c8   :  { %2982 = vmatprep.subr.mxu0 %v7166_v59  ;;  %3053 = vmatprep.subr.mxu1 %v7168_v41  ;;  %9703 = vst [vmem:[#allocation23_spill] sm:$0xff] %v7204_v5 }
 0x4c9   :  { %2983 = vmatpush1.msra.mxu0 %v7172_v56  ;;  %3054 = vmatpush1.msra.mxu1 %v7174_v55 }
 0x4ca   :  { %2984 = vmatprep.subr.mxu0 %v7178_v0  ;;  %3055 = vmatprep.subr.mxu1 %v7180_v44 }
 0x4cb   :  { %2985 = vmatpush1.msra.mxu0 %v7184_v45  ;;  %3056 = vmatpush1.msra.mxu1 %v7186_v8 }
 0x4cc   :  { %2986 = vmatprep.subr.mxu0 %v7190_v48  ;;  %3057 = vmatprep.subr.mxu1 %v7192_v63 }
 0x4cd   :  { %2987 = vmatpush1.msra.mxu0 %v7196_v1  ;;  %3058 = vmatpush1.msra.mxu1 %v7198_v3 }
 0x4ce   :  { %2988 = vmatprep.subr.mxu0 %v7202_v4  ;;  %3059 = vmatprep.subr.mxu1 %v7204_v5  ;;  %v7476_v5 = vld [vmem:[#allocation11 + $0x2b8] sm:$0xff]  ;;  %v7492_v4 = vld [vmem:[#allocation11 + $0x280] sm:$0xff] }
 0x4cf   :  { %2989 = vmatpush1.msra.mxu0 %v7208_v40  ;;  %3060 = vmatpush1.msra.mxu1 %v7210_v7  ;;  %v7460_v7 = vld [vmem:[#allocation11 + $0x2f0] sm:$0xff]  ;;  %v7468_v40 = vld [vmem:[#allocation11 + $0x2c0] sm:$0xff]  ;;  %9795 = vst [vmem:[#allocation115_spill] sm:$0xff] %v7476_v5  ;;  %9800 = vst [vmem:[#allocation120_spill] sm:$0xff] %v7492_v4 }
 0x4d0   :  { %2990 = vmatprep.subr.mxu0 %v7214_v9  ;;  %3061 = vmatprep.subr.mxu1 %v7216_v47  ;;  %v7234_v9 = vld [vmem:[#allocation11 + $0x150] sm:$0xff]  ;;  %v7238_v47 = vld [vmem:[#allocation11 + $0x128] sm:$0xff]  ;;  %9789 = vst [vmem:[#allocation109_spill] sm:$0xff] %v7460_v7  ;;  %9792 = vst [vmem:[#allocation112_spill] sm:$0xff] %v7468_v40 }
 0x4d1   :  { %2991 = vmatpush1.msra.mxu0 %v7220_v54  ;;  %3062 = vmatpush1.msra.mxu1 %v7222_v20  ;;  %9713 = vst [vmem:[#allocation33_spill] sm:$0xff] %v7234_v9  ;;  %9714 = vst [vmem:[#allocation34_spill] sm:$0xff] %v7238_v47  ;;  %v7240_v54 = vld [vmem:[#allocation11 + $0x138] sm:$0xff]  ;;  %v7244_v20 = vld [vmem:[#allocation11 + $0x120] sm:$0xff] }
 0x4d2   :  { %2992 = vmatprep.subr.mxu0 %v7226_v53  ;;  %3063 = vmatprep.subr.mxu1 %v7228_v32  ;;  %9715 = vst [vmem:[#allocation35_spill] sm:$0xff] %v7240_v54  ;;  %9716 = vst [vmem:[#allocation36_spill] sm:$0xff] %v7244_v20  ;;  %v7246_v53 = vld [vmem:[#allocation11 + $0x130] sm:$0xff]  ;;  %v7250_v32 = vld [vmem:[#allocation11 + $0x108] sm:$0xff] }
 0x4d3   :  { %2993 = vmatpush1.msra.mxu0 %v7232_v6  ;;  %3064 = vmatpush1.msra.mxu1 %v7234_v9  ;;  %9717 = vst [vmem:[#allocation37_spill] sm:$0xff] %v7246_v53  ;;  %9718 = vst [vmem:[#allocation38_spill] sm:$0xff] %v7250_v32  ;;  %v7252_v6 = vld [vmem:[#allocation11 + $0x118] sm:$0xff]  ;;  %v7256_v9 = vld [vmem:[#allocation11 + $0x100] sm:$0xff] }
 0x4d4   :  { %2994 = vmatprep.subr.mxu0 %v7238_v47  ;;  %3065 = vmatprep.subr.mxu1 %v7240_v54  ;;  %9719 = vst [vmem:[#allocation39_spill] sm:$0xff] %v7252_v6  ;;  %9720 = vst [vmem:[#allocation40_spill] sm:$0xff] %v7256_v9  ;;  %v7258_v47 = vld [vmem:[#allocation11 + $0x110] sm:$0xff]  ;;  %v7262_v54 = vld [vmem:[#allocation11 + $0xe8] sm:$0xff] }
 0x4d5   :  { %2995 = vmatpush1.msra.mxu0 %v7244_v20  ;;  %3066 = vmatpush1.msra.mxu1 %v7246_v53  ;;  %9721 = vst [vmem:[#allocation41_spill] sm:$0xff] %v7258_v47  ;;  %9722 = vst [vmem:[#allocation42_spill] sm:$0xff] %v7262_v54  ;;  %v7264_v20 = vld [vmem:[#allocation11 + $0xf8] sm:$0xff]  ;;  %v7268_v53 = vld [vmem:[#allocation11 + $0xe0] sm:$0xff] }
 0x4d6   :  { %2996 = vmatprep.subr.mxu0 %v7250_v32  ;;  %3067 = vmatprep.subr.mxu1 %v7252_v6  ;;  %9723 = vst [vmem:[#allocation43_spill] sm:$0xff] %v7264_v20  ;;  %9724 = vst [vmem:[#allocation44_spill] sm:$0xff] %v7268_v53  ;;  %v7270_v32 = vld [vmem:[#allocation11 + $0xf0] sm:$0xff]  ;;  %v7274_v6 = vld [vmem:[#allocation11 + $0xc8] sm:$0xff] }
 0x4d7   :  { %2997 = vmatpush1.msra.mxu0 %v7256_v9  ;;  %3068 = vmatpush1.msra.mxu1 %v7258_v47  ;;  %9725 = vst [vmem:[#allocation45_spill] sm:$0xff] %v7270_v32  ;;  %9726 = vst [vmem:[#allocation46_spill] sm:$0xff] %v7274_v6  ;;  %v7276_v9 = vld [vmem:[#allocation11 + $0xd8] sm:$0xff]  ;;  %v7280_v47 = vld [vmem:[#allocation11 + $0xc0] sm:$0xff] }
 0x4d8   :  { %2998 = vmatprep.subr.mxu0 %v7262_v54  ;;  %3069 = vmatprep.subr.mxu1 %v7264_v20  ;;  %9727 = vst [vmem:[#allocation47_spill] sm:$0xff] %v7276_v9  ;;  %9728 = vst [vmem:[#allocation48_spill] sm:$0xff] %v7280_v47  ;;  %v7282_v54 = vld [vmem:[#allocation11 + $0xd0] sm:$0xff]  ;;  %v7286_v20 = vld [vmem:[#allocation11 + $0xa8] sm:$0xff] }
 0x4d9   :  { %2999 = vmatpush1.msra.mxu0 %v7268_v53  ;;  %3070 = vmatpush1.msra.mxu1 %v7270_v32  ;;  %9729 = vst [vmem:[#allocation49_spill] sm:$0xff] %v7282_v54  ;;  %9730 = vst [vmem:[#allocation50_spill] sm:$0xff] %v7286_v20  ;;  %v7288_v53 = vld [vmem:[#allocation11 + $0xb8] sm:$0xff]  ;;  %v7292_v32 = vld [vmem:[#allocation11 + $0xa0] sm:$0xff] }
 0x4da   :  { %3000 = vmatprep.subr.mxu0 %v7274_v6  ;;  %3071 = vmatprep.subr.mxu1 %v7276_v9  ;;  %9731 = vst [vmem:[#allocation51_spill] sm:$0xff] %v7288_v53  ;;  %9732 = vst [vmem:[#allocation52_spill] sm:$0xff] %v7292_v32  ;;  %v7294_v6 = vld [vmem:[#allocation11 + $0xb0] sm:$0xff]  ;;  %v7298_v9 = vld [vmem:[#allocation11 + $0x88] sm:$0xff] }
 0x4db   :  { %3001 = vmatpush1.msra.mxu0 %v7280_v47  ;;  %3072 = vmatpush1.msra.mxu1 %v7282_v54  ;;  %9733 = vst [vmem:[#allocation53_spill] sm:$0xff] %v7294_v6  ;;  %9734 = vst [vmem:[#allocation54_spill] sm:$0xff] %v7298_v9  ;;  %v7300_v47 = vld [vmem:[#allocation11 + $0x98] sm:$0xff]  ;;  %v7304_v54 = vld [vmem:[#allocation11 + $0x80] sm:$0xff] }
 0x4dc   :  { %3002 = vmatprep.subr.mxu0 %v7286_v20  ;;  %3073 = vmatprep.subr.mxu1 %v7288_v53  ;;  %9735 = vst [vmem:[#allocation55_spill] sm:$0xff] %v7300_v47  ;;  %9736 = vst [vmem:[#allocation56_spill] sm:$0xff] %v7304_v54  ;;  %v7306_v20 = vld [vmem:[#allocation11 + $0x90] sm:$0xff]  ;;  %v7310_v53 = vld [vmem:[#allocation11 + $0x68] sm:$0xff] }
 0x4dd   :  { %3003 = vmatpush1.msra.mxu0 %v7292_v32  ;;  %3074 = vmatpush1.msra.mxu1 %v7294_v6  ;;  %9737 = vst [vmem:[#allocation57_spill] sm:$0xff] %v7306_v20  ;;  %9738 = vst [vmem:[#allocation58_spill] sm:$0xff] %v7310_v53  ;;  %v7312_v32 = vld [vmem:[#allocation11 + $0x78] sm:$0xff]  ;;  %v7316_v6 = vld [vmem:[#allocation11 + $0x60] sm:$0xff] }
 0x4de   :  { %3004 = vmatprep.subr.mxu0 %v7298_v9  ;;  %3075 = vmatprep.subr.mxu1 %v7300_v47  ;;  %9739 = vst [vmem:[#allocation59_spill] sm:$0xff] %v7312_v32  ;;  %9740 = vst [vmem:[#allocation60_spill] sm:$0xff] %v7316_v6  ;;  %v7318_v9 = vld [vmem:[#allocation11 + $0x70] sm:$0xff]  ;;  %v7322_v47 = vld [vmem:[#allocation11 + $0x48] sm:$0xff] }
 0x4df   :  { %3005 = vmatpush1.msra.mxu0 %v7304_v54  ;;  %3076 = vmatpush1.msra.mxu1 %v7306_v20  ;;  %9741 = vst [vmem:[#allocation61_spill] sm:$0xff] %v7318_v9  ;;  %9742 = vst [vmem:[#allocation62_spill] sm:$0xff] %v7322_v47  ;;  %v7324_v54 = vld [vmem:[#allocation11 + $0x58] sm:$0xff]  ;;  %v7328_v20 = vld [vmem:[#allocation11 + $0x40] sm:$0xff] }
 0x4e0   :  { %3006 = vmatprep.subr.mxu0 %v7310_v53  ;;  %3077 = vmatprep.subr.mxu1 %v7312_v32  ;;  %9743 = vst [vmem:[#allocation63_spill] sm:$0xff] %v7324_v54  ;;  %9744 = vst [vmem:[#allocation64_spill] sm:$0xff] %v7328_v20  ;;  %v7330_v53 = vld [vmem:[#allocation11 + $0x50] sm:$0xff]  ;;  %v7334_v32 = vld [vmem:[#allocation11 + $0x28] sm:$0xff] }
 0x4e1   :  { %3007 = vmatpush1.msra.mxu0 %v7316_v6  ;;  %3078 = vmatpush1.msra.mxu1 %v7318_v9  ;;  %9745 = vst [vmem:[#allocation65_spill] sm:$0xff] %v7330_v53  ;;  %9746 = vst [vmem:[#allocation66_spill] sm:$0xff] %v7334_v32  ;;  %v7336_v6 = vld [vmem:[#allocation11 + $0x38] sm:$0xff]  ;;  %v7340_v9 = vld [vmem:[#allocation11 + $0x20] sm:$0xff] }
 0x4e2   :  { %3008 = vmatprep.subr.mxu0 %v7322_v47  ;;  %3079 = vmatprep.subr.mxu1 %v7324_v54  ;;  %9747 = vst [vmem:[#allocation67_spill] sm:$0xff] %v7336_v6  ;;  %9748 = vst [vmem:[#allocation68_spill] sm:$0xff] %v7340_v9  ;;  %v7342_v47 = vld [vmem:[#allocation11 + $0x30] sm:$0xff]  ;;  %v7346_v54 = vld [vmem:[#allocation11 + $0x8] sm:$0xff] }
 0x4e3   :  { %3009 = vmatpush1.msra.mxu0 %v7328_v20  ;;  %3080 = vmatpush1.msra.mxu1 %v7330_v53  ;;  %9749 = vst [vmem:[#allocation69_spill] sm:$0xff] %v7342_v47  ;;  %9750 = vst [vmem:[#allocation70_spill] sm:$0xff] %v7346_v54  ;;  %v7348_v20 = vld [vmem:[#allocation11 + $0x18] sm:$0xff]  ;;  %v7352_v53 = vld [vmem:[#allocation11] sm:$0xff] }
 0x4e4   :  { %3010 = vmatprep.subr.mxu0 %v7334_v32  ;;  %3081 = vmatprep.subr.mxu1 %v7336_v6  ;;  %9751 = vst [vmem:[#allocation71_spill] sm:$0xff] %v7348_v20  ;;  %9752 = vst [vmem:[#allocation72_spill] sm:$0xff] %v7352_v53  ;;  %v7354_v32 = vld [vmem:[#allocation11 + $0x10] sm:$0xff]  ;;  %v7358_v6 = vld [vmem:[#allocation11 + $0x3e8] sm:$0xff] }
 0x4e5   :  { %3011 = vmatpush1.msra.mxu0 %v7340_v9  ;;  %3082 = vmatpush1.msra.mxu1 %v7342_v47  ;;  %9753 = vst [vmem:[#allocation73_spill] sm:$0xff] %v7354_v32  ;;  %9754 = vst [vmem:[#allocation74_spill] sm:$0xff] %v7358_v6  ;;  %v7360_v9 = vld [vmem:[#allocation11 + $0x3f8] sm:$0xff]  ;;  %v7364_v47 = vld [vmem:[#allocation11 + $0x3e0] sm:$0xff] }
 0x4e6   :  { %3012 = vmatprep.subr.mxu0 %v7346_v54  ;;  %3083 = vmatprep.subr.mxu1 %v7348_v20  ;;  %9755 = vst [vmem:[#allocation75_spill] sm:$0xff] %v7360_v9  ;;  %9756 = vst [vmem:[#allocation76_spill] sm:$0xff] %v7364_v47  ;;  %v7366_v54 = vld [vmem:[#allocation11 + $0x3f0] sm:$0xff]  ;;  %v7370_v20 = vld [vmem:[#allocation11 + $0x3c8] sm:$0xff] }
 0x4e7   :  { %3013 = vmatpush1.msra.mxu0 %v7352_v53  ;;  %3084 = vmatpush1.msra.mxu1 %v7354_v32  ;;  %9757 = vst [vmem:[#allocation77_spill] sm:$0xff] %v7366_v54  ;;  %9758 = vst [vmem:[#allocation78_spill] sm:$0xff] %v7370_v20  ;;  %v7372_v53 = vld [vmem:[#allocation11 + $0x3d8] sm:$0xff]  ;;  %v7376_v32 = vld [vmem:[#allocation11 + $0x3c0] sm:$0xff] }
 0x4e8   :  { %3014 = vmatprep.subr.mxu0 %v7358_v6  ;;  %3085 = vmatprep.subr.mxu1 %v7360_v9  ;;  %9759 = vst [vmem:[#allocation79_spill] sm:$0xff] %v7372_v53  ;;  %9760 = vst [vmem:[#allocation80_spill] sm:$0xff] %v7376_v32  ;;  %v7378_v6 = vld [vmem:[#allocation11 + $0x3d0] sm:$0xff]  ;;  %v7382_v9 = vld [vmem:[#allocation11 + $0x3a8] sm:$0xff] }
 0x4e9   :  { %3015 = vmatpush2.msra.mxu0 %v7364_v47  ;;  %3086 = vmatpush2.msra.mxu1 %v7366_v54  ;;  %9761 = vst [vmem:[#allocation81_spill] sm:$0xff] %v7378_v6  ;;  %9762 = vst [vmem:[#allocation82_spill] sm:$0xff] %v7382_v9  ;;  %v7384_v47 = vld [vmem:[#allocation11 + $0x3b8] sm:$0xff]  ;;  %v7388_v54 = vld [vmem:[#allocation11 + $0x3a0] sm:$0xff] }
 0x4ea   :  { %3016 = vmatprep.subr.mxu0 %v7370_v20  ;;  %3087 = vmatprep.subr.mxu1 %v7372_v53  ;;  %9763 = vst [vmem:[#allocation83_spill] sm:$0xff] %v7384_v47  ;;  %9764 = vst [vmem:[#allocation84_spill] sm:$0xff] %v7388_v54  ;;  %v7390_v20 = vld [vmem:[#allocation11 + $0x3b0] sm:$0xff]  ;;  %v7394_v53 = vld [vmem:[#allocation11 + $0x388] sm:$0xff] }
 0x4eb   :  { %3017 = vmatpush2.msra.mxu0 %v7376_v32  ;;  %3088 = vmatpush2.msra.mxu1 %v7378_v6  ;;  %9765 = vst [vmem:[#allocation85_spill] sm:$0xff] %v7390_v20  ;;  %9766 = vst [vmem:[#allocation86_spill] sm:$0xff] %v7394_v53  ;;  %v7396_v32 = vld [vmem:[#allocation11 + $0x398] sm:$0xff]  ;;  %v7400_v6 = vld [vmem:[#allocation11 + $0x380] sm:$0xff] }
 0x4ec   :  { %3018 = vmatprep.subr.mxu0 %v7382_v9  ;;  %3089 = vmatprep.subr.mxu1 %v7384_v47  ;;  %9767 = vst [vmem:[#allocation87_spill] sm:$0xff] %v7396_v32  ;;  %9768 = vst [vmem:[#allocation88_spill] sm:$0xff] %v7400_v6  ;;  %v7402_v9 = vld [vmem:[#allocation11 + $0x390] sm:$0xff]  ;;  %v7406_v47 = vld [vmem:[#allocation11 + $0x368] sm:$0xff] }
 0x4ed   :  { %3019 = vmatpush2.msra.mxu0 %v7388_v54  ;;  %3090 = vmatpush2.msra.mxu1 %v7390_v20  ;;  %9769 = vst [vmem:[#allocation89_spill] sm:$0xff] %v7402_v9  ;;  %9770 = vst [vmem:[#allocation90_spill] sm:$0xff] %v7406_v47  ;;  %v7408_v54 = vld [vmem:[#allocation11 + $0x378] sm:$0xff]  ;;  %v7412_v20 = vld [vmem:[#allocation11 + $0x360] sm:$0xff] }
 0x4ee   :  { %3020 = vmatprep.subr.mxu0 %v7394_v53  ;;  %3091 = vmatprep.subr.mxu1 %v7396_v32  ;;  %9771 = vst [vmem:[#allocation91_spill] sm:$0xff] %v7408_v54  ;;  %9772 = vst [vmem:[#allocation92_spill] sm:$0xff] %v7412_v20  ;;  %v7414_v53 = vld [vmem:[#allocation11 + $0x370] sm:$0xff]  ;;  %v7418_v32 = vld [vmem:[#allocation11 + $0x348] sm:$0xff] }
 0x4ef   :  { %3021 = vmatpush2.msra.mxu0 %v7400_v6  ;;  %3092 = vmatpush2.msra.mxu1 %v7402_v9  ;;  %9773 = vst [vmem:[#allocation93_spill] sm:$0xff] %v7414_v53  ;;  %9774 = vst [vmem:[#allocation94_spill] sm:$0xff] %v7418_v32  ;;  %v7420_v6 = vld [vmem:[#allocation11 + $0x358] sm:$0xff]  ;;  %v7424_v9 = vld [vmem:[#allocation11 + $0x340] sm:$0xff] }
 0x4f0   :  { %3022 = vmatprep.subr.mxu0 %v7406_v47  ;;  %3093 = vmatprep.subr.mxu1 %v7408_v54  ;;  %9775 = vst [vmem:[#allocation95_spill] sm:$0xff] %v7420_v6  ;;  %9776 = vst [vmem:[#allocation96_spill] sm:$0xff] %v7424_v9  ;;  %v7426_v47 = vld [vmem:[#allocation11 + $0x350] sm:$0xff]  ;;  %v7430_v54 = vld [vmem:[#allocation11 + $0x328] sm:$0xff] }
 0x4f1   :  { %3023 = vmatpush2.msra.mxu0 %v7412_v20  ;;  %3094 = vmatpush2.msra.mxu1 %v7414_v53  ;;  %9777 = vst [vmem:[#allocation97_spill] sm:$0xff] %v7426_v47  ;;  %9778 = vst [vmem:[#allocation98_spill] sm:$0xff] %v7430_v54  ;;  %v7432_v20 = vld [vmem:[#allocation11 + $0x338] sm:$0xff]  ;;  %v7436_v53 = vld [vmem:[#allocation11 + $0x320] sm:$0xff] }
 0x4f2   :  { %3024 = vmatprep.subr.mxu0 %v7418_v32  ;;  %3095 = vmatprep.subr.mxu1 %v7420_v6  ;;  %9779 = vst [vmem:[#allocation99_spill] sm:$0xff] %v7432_v20  ;;  %9780 = vst [vmem:[#allocation100_spill] sm:$0xff] %v7436_v53  ;;  %v7438_v32 = vld [vmem:[#allocation11 + $0x330] sm:$0xff]  ;;  %v7442_v6 = vld [vmem:[#allocation11 + $0x308] sm:$0xff] }
 0x4f3   :  { %3025 = vmatpush2.msra.mxu0 %v7424_v9  ;;  %3096 = vmatpush2.msra.mxu1 %v7426_v47  ;;  %9781 = vst [vmem:[#allocation101_spill] sm:$0xff] %v7438_v32  ;;  %9782 = vst [vmem:[#allocation102_spill] sm:$0xff] %v7442_v6  ;;  %v7444_v9 = vld [vmem:[#allocation11 + $0x318] sm:$0xff]  ;;  %v7448_v47 = vld [vmem:[#allocation11 + $0x300] sm:$0xff] }
 0x4f4   :  { %3026 = vmatprep.subr.mxu0 %v7430_v54  ;;  %3097 = vmatprep.subr.mxu1 %v7432_v20  ;;  %9783 = vst [vmem:[#allocation103_spill] sm:$0xff] %v7444_v9  ;;  %9784 = vst [vmem:[#allocation104_spill] sm:$0xff] %v7448_v47  ;;  %v7450_v54 = vld [vmem:[#allocation11 + $0x310] sm:$0xff]  ;;  %v7452_v20 = vld [vmem:[#allocation11 + $0x2e8] sm:$0xff] }
 0x4f5   :  { %3027 = vmatpush2.msra.mxu0 %v7436_v53  ;;  %3098 = vmatpush2.msra.mxu1 %v7438_v32  ;;  %9785 = vst [vmem:[#allocation105_spill] sm:$0xff] %v7450_v54  ;;  %9786 = vst [vmem:[#allocation106_spill] sm:$0xff] %v7452_v20  ;;  %v7456_v53 = vld [vmem:[#allocation11 + $0x2f8] sm:$0xff]  ;;  %v7458_v32 = vld [vmem:[#allocation11 + $0x2e0] sm:$0xff] }
 0x4f6   :  { %3028 = vmatprep.subr.mxu0 %v7442_v6  ;;  %3099 = vmatprep.subr.mxu1 %v7444_v9  ;;  %9787 = vst [vmem:[#allocation107_spill] sm:$0xff] %v7456_v53  ;;  %9788 = vst [vmem:[#allocation108_spill] sm:$0xff] %v7458_v32  ;;  %v7464_v9 = vld [vmem:[#allocation11 + $0x2c8] sm:$0xff]  ;;  %v7466_v6 = vld [vmem:[#allocation11 + $0x2d8] sm:$0xff] }
 0x4f7   :  { %3029 = vmatpush2.msra.mxu0 %v7448_v47  ;;  %3100 = vmatpush2.msra.mxu1 %v7450_v54  ;;  %9790 = vst [vmem:[#allocation110_spill] sm:$0xff] %v7464_v9  ;;  %9791 = vst [vmem:[#allocation111_spill] sm:$0xff] %v7466_v6  ;;  %v7472_v54 = vld [vmem:[#allocation11 + $0x2d0] sm:$0xff]  ;;  %v7474_v47 = vld [vmem:[#allocation11 + $0x2a8] sm:$0xff] }
 0x4f8   :  { %3030 = vmatprep.subr.mxu0 %v7452_v20  ;;  %3101 = vmatprep.subr.mxu1 %v7456_v53  ;;  %9793 = vst [vmem:[#allocation113_spill] sm:$0xff] %v7472_v54  ;;  %9794 = vst [vmem:[#allocation114_spill] sm:$0xff] %v7474_v47  ;;  %v7480_v53 = vld [vmem:[#allocation11 + $0x2a0] sm:$0xff]  ;;  %v7482_v20 = vld [vmem:[#allocation11 + $0x2b0] sm:$0xff] }
 0x4f9   :  { %3031 = vmatpush2.msra.mxu0 %v7458_v32  ;;  %3102 = vmatpush2.msra.mxu1 %v7460_v7  ;;  %9796 = vst [vmem:[#allocation116_spill] sm:$0xff] %v7480_v53  ;;  %9797 = vst [vmem:[#allocation117_spill] sm:$0xff] %v7482_v20  ;;  %v7486_v32 = vld [vmem:[#allocation11 + $0x288] sm:$0xff]  ;;  %v7488_v7 = vld [vmem:[#allocation11 + $0x298] sm:$0xff] }
 0x4fa   :  { %3032 = vmatprep.subr.mxu0 %v7464_v9  ;;  %3103 = vmatprep.subr.mxu1 %v7466_v6  ;;  %9798 = vst [vmem:[#allocation118_spill] sm:$0xff] %v7486_v32  ;;  %9799 = vst [vmem:[#allocation119_spill] sm:$0xff] %v7488_v7  ;;  %v7494_v9 = vld [vmem:[#allocation11 + $0x290] sm:$0xff]  ;;  %v7498_v6 = vld [vmem:[#allocation11 + $0x268] sm:$0xff] }
 0x4fb   :  { %3033 = vmatpush2.msra.mxu0 %v7468_v40  ;;  %3104 = vmatpush2.msra.mxu1 %v7472_v54  ;;  %9801 = vst [vmem:[#allocation121_spill] sm:$0xff] %v7494_v9  ;;  %9802 = vst [vmem:[#allocation122_spill] sm:$0xff] %v7498_v6  ;;  %v7500_v40 = vld [vmem:[#allocation11 + $0x278] sm:$0xff]  ;;  %v7504_v54 = vld [vmem:[#allocation11 + $0x260] sm:$0xff] }
 0x4fc   :  { %3034 = vmatprep.subr.mxu0 %v7474_v47  ;;  %3105 = vmatprep.subr.mxu1 %v7476_v5  ;;  %9803 = vst [vmem:[#allocation123_spill] sm:$0xff] %v7500_v40  ;;  %9804 = vst [vmem:[#allocation124_spill] sm:$0xff] %v7504_v54  ;;  %v7506_v47 = vld [vmem:[#allocation11 + $0x270] sm:$0xff]  ;;  %v7510_v5 = vld [vmem:[#allocation11 + $0x248] sm:$0xff] }
 0x4fd   :  { %3035 = vmatpush2.msra.mxu0 %v7480_v53  ;;  %3106 = vmatpush2.msra.mxu1 %v7482_v20  ;;  %9805 = vst [vmem:[#allocation125_spill] sm:$0xff] %v7506_v47  ;;  %9806 = vst [vmem:[#allocation126_spill] sm:$0xff] %v7510_v5  ;;  %v7512_v53 = vld [vmem:[#allocation11 + $0x258] sm:$0xff]  ;;  %v7516_v20 = vld [vmem:[#allocation11 + $0x240] sm:$0xff] }
 0x4fe   :  { %3036 = vmatprep.subr.mxu0 %v7486_v32  ;;  %3107 = vmatprep.subr.mxu1 %v7488_v7  ;;  %9807 = vst [vmem:[#allocation127_spill] sm:$0xff] %v7512_v53  ;;  %9808 = vst [vmem:[#allocation128_spill] sm:$0xff] %v7516_v20  ;;  %v7518_v32 = vld [vmem:[#allocation11 + $0x250] sm:$0xff]  ;;  %v7522_v7 = vld [vmem:[#allocation11 + $0x228] sm:$0xff] }
 0x4ff   :  { %3037 = vmatpush2.msra.mxu0 %v7492_v4  ;;  %3108 = vmatpush2.msra.mxu1 %v7494_v9  ;;  %9809 = vst [vmem:[#allocation129_spill] sm:$0xff] %v7518_v32  ;;  %9810 = vst [vmem:[#allocation130_spill] sm:$0xff] %v7522_v7  ;;  %v7524_v4 = vld [vmem:[#allocation11 + $0x238] sm:$0xff]  ;;  %v7528_v9 = vld [vmem:[#allocation11 + $0x220] sm:$0xff] }
 0x500   :  { %3038 = vmatprep.subr.mxu0 %v7498_v6  ;;  %3109 = vmatprep.subr.mxu1 %v7500_v40  ;;  %9811 = vst [vmem:[#allocation131_spill] sm:$0xff] %v7524_v4  ;;  %9812 = vst [vmem:[#allocation133_spill] sm:$0xff] %v7528_v9  ;;  %v7530_v6 = vld [vmem:[#allocation11 + $0x230] sm:$0xff]  ;;  %v7534_v40 = vld [vmem:[#allocation11 + $0x208] sm:$0xff] }
 0x501   :  { %3039 = vmatpush2.msra.mxu0 %v7504_v54  ;;  %3110 = vmatpush2.msra.mxu1 %v7506_v47  ;;  %9813 = vst [vmem:[#allocation134_spill] sm:$0xff] %v7530_v6  ;;  %9814 = vst [vmem:[#allocation132_spill] sm:$0xff] %v7534_v40  ;;  %v7536_v54 = vld [vmem:[#allocation11 + $0x218] sm:$0xff]  ;;  %v7540_v47 = vld [vmem:[#allocation11 + $0x200] sm:$0xff] }
 0x502   :  { %3040 = vmatprep.subr.mxu0 %v7510_v5  ;;  %3111 = vmatprep.subr.mxu1 %v7512_v53  ;;  %9815 = vst [vmem:[#allocation159_spill] sm:$0xff] %v7536_v54  ;;  %9816 = vst [vmem:[#allocation160_spill] sm:$0xff] %v7540_v47  ;;  %v7542_v5 = vld [vmem:[#allocation11 + $0x210] sm:$0xff]  ;;  %v7546_v53 = vld [vmem:[#allocation9 + $0x1e8] sm:$0xff] }
 0x503   :  { %3041 = vmatpush2.msra.mxu0 %v7516_v20  ;;  %3112 = vmatpush2.msra.mxu1 %v7518_v32  ;;  %9817 = vst [vmem:[#allocation161_spill] sm:$0xff] %v7542_v5  ;;  %9818 = vst [vmem:[#allocation162_spill] sm:$0xff] %v7546_v53  ;;  %v7548_v20 = vld [vmem:[#allocation9 + $0x1f8] sm:$0xff] }
 0x504   :  { %3042 = vmatprep.subr.mxu0 %v7522_v7  ;;  %3113 = vmatprep.subr.mxu1 %v7524_v4  ;;  %9819 = vst [vmem:[#allocation163_spill] sm:$0xff] %v7548_v20 }
 0x505   :  { %3043 = vmatpush2.msra.mxu0 %v7528_v9  ;;  %3114 = vmatpush2.msra.mxu1 %v7530_v6 }
 0x506   :  { %3044 = vmatprep.subr.mxu0 %v7534_v40  ;;  %3115 = vmatprep.subr.mxu1 %v7536_v54 }
 0x507   :  { %3045 = vmatpush2.msra.mxu0 %v7540_v47  ;;  %3116 = vmatpush2.msra.mxu1 %v7542_v5 }
 0x508   :  { %3225 = vmatprep.subr.mxu0 %v7546_v53  ;;  %3296 = vmatprep.subr.mxu1 %v7548_v20 }
 0x566   :  { %v2502_v4 = vpop.f32.mrf.mxu0  ;;  %v2573_v3 = vpop.f32.mrf.mxu1 }
 0x567   :  { %v2503_v9 = vadd.f32 %v2502_v4, %v9680_v36  ;;  %v2574_v53 = vadd.f32 %v2573_v3, %v9683_v61 }
 0x568   :  { %v2504_v6 = vpop.f32.mrf.mxu0  ;;  %v2575_v54 = vpop.f32.mrf.mxu1 }
 0x569   :  { %v4853_v7 = vmul.f32 -1.442695, %v2503_v9  ;;  %v2505_v32 = vadd.f32 %v2504_v6, %v9681_v46  ;;  %v2576_v47 = vadd.f32 %v2575_v54, %v9682_v52  ;;  %v9820_v46 = vld [vmem:[#allocation143_spill] sm:$0xff] }
 0x56b   :  { %5001 = vpow2.f32 %v4853_v7  ;;  %v4854_v40 = vmul.f32 -1.442695, %v2505_v32  ;;  %v4855_v1 = vmul.f32 -1.442695, %v2576_v47  ;;  %v9821_v47 = vld [vmem:[#allocation145_spill] sm:$0xff] }
 0x56d   :  { %5003 = vpow2.f32 %v4854_v40 }
 0x56e   :  { %5005 = vpow2.f32 %v4855_v1 }
 0x578   :  { %v5002_v5 = vpop.eup %5001 }
 0x579   :  { %v2582_v63 = vadd.f32 1.0, %v5002_v5 }
 0x57a   :  { %v5004_v20 = vpop.eup %5003 }
 0x57b   :  { %5007 = vrcp.f32 %v2582_v63  ;;  %v2588_v4 = vadd.f32 1.0, %v5004_v20  ;;  %v5006_v9 = vpop.eup %5005 }
 0x57c   :  { %5009 = vtanh.f32 %v2574_v53  ;;  %v2595_v5 = vadd.f32 1.0, %v5006_v9 }
 0x57d   :  { %5011 = vrcp.f32 %v2588_v4 }
 0x587   :  { %v2745_v6 = vpop.f32.mrf.mxu0  ;;  %v2816_v63 = vpop.f32.mrf.mxu1 }
 0x588   :  { %v5008_v7 = vpop.eup %5007  ;;  %v2821_v32 = vadd.f32 %v2745_v6, %v9820_v46  ;;  %v9822_v46 = vld [vmem:[#allocation146_spill] sm:$0xff]  ;;  %v9823_v6 = vld [vmem:[#allocation144_spill] sm:$0xff] }
 0x589   :  { %v5010_v40 = vpop.eup %5009  ;;  %v2747_v36 = vpop.f32.mrf.mxu0 }
 0x58a   :  { %v5012_v48 = vpop.eup %5011  ;;  %v4856_v54 = vmul.f32 -1.442695, %v2821_v32  ;;  %v2822_v52 = vadd.f32 %v2747_v36, %v9821_v47  ;;  %v2599_v8 = vmul.f32 %v5010_v40, %v5008_v7  ;;  %v2818_v53 = vpop.f32.mrf.mxu1  ;;  %v2823_v32 = vadd.f32 %v2816_v63, %v9823_v6  ;;  %v7574_v6 = vld [vmem:[#allocation9 + $0x1e0] sm:$0xff] }
 0x58b   :  { %v2598_v3 = vmul.f32 %v5012_v48, %v7019_v25  ;;  %v2824_v4 = vadd.f32 %v2818_v53, %v9822_v46 }
 0x58c   :  { %5013 = vpow2.f32 %v4856_v54  ;;  %v4857_v1 = vmul.f32 -1.442695, %v2822_v52 }
 0x58d   :  { %v7563_v20 = vadd.f32 %v2599_v8, %v2598_v3  ;;  %v4858_v61 = vmul.f32 -1.442695, %v2824_v4 }
 0x58e   :  { %5015 = vpow2.f32 %v4857_v1 }
 0x58f   :  { %5017 = vrcp.f32 %v2595_v5 }
 0x590   :  { %5019 = vtanh.f32 %v7563_v20 }
 0x591   :  { %5021 = vtanh.f32 %v2823_v32  ;;  %v7576_v32 = vld [vmem:[#allocation9 + $0x1f0] sm:$0xff] }
 0x592   :  { %5023 = vpow2.f32 %v4858_v61 }
 0x599   :  { %v5014_v36 = vpop.eup %5013 }
 0x59a   :  { %v2829_v7 = vadd.f32 1.0, %v5014_v36  ;;  %v7578_v36 = vld [vmem:[#allocation9 + $0x1c8] sm:$0xff] }
 0x59b   :  { %v5016_v25 = vpop.eup %5015 }
 0x59c   :  { %v5018_v48 = vpop.eup %5017  ;;  %5025 = vrcp.f32 %v2829_v7  ;;  %v2835_v52 = vadd.f32 1.0, %v5016_v25  ;;  %v7580_v7 = vld [vmem:[#allocation9 + $0x1d8] sm:$0xff]  ;;  %v7586_v25 = vld [vmem:[#allocation9 + $0x1d0] sm:$0xff] }
 0x59d   :  { %v5020_v8 = vpop.eup %5019 }
 0x59e   :  { %5027 = vrcp.f32 %v2835_v52  ;;  %v2602_v9 = vmul.f32 %v5020_v8, %v5018_v48  ;;  %v5022_v40 = vpop.eup %5021  ;;  %v7590_v48 = vld [vmem:[#allocation9 + $0x1a8] sm:$0xff]  ;;  %v7592_v52 = vld [vmem:[#allocation9 + $0x1b8] sm:$0xff]  ;;  %v7596_v8 = vld [vmem:[#allocation9 + $0x1a0] sm:$0xff] }
 0x59f   :  { %v5024_v54 = vpop.eup %5023  ;;  %9824 = vst [vmem:[#allocation164_spill] sm:$0xff] %v7596_v8 }
 0x5a0   :  { %2605 = vst [vmem:[#allocation12 + $0x18] sm:$0xff] %v2602_v9  ;;  %3046 = vmatprep.mubr.f32.mxu0 %v2602_v9  ;;  %3117 = vmatprep.mubr.f32.mxu1 %v2602_v9  ;;  %v2842_v63 = vadd.f32 1.0, %v5024_v54  ;;  %v7598_v9 = vld [vmem:[#allocation9 + $0x1b0] sm:$0xff]  ;;  %v7604_v54 = vld [vmem:[#allocation9 + $0x198] sm:$0xff] }
 0x5a1   :  { %9825 = vst [vmem:[#allocation165_spill] sm:$0xff] %v7598_v9  ;;  %9827 = vst [vmem:[#allocation139_spill] sm:$0xff] %v7604_v54 }
 0x5a2   :  { %5029 = vrcp.f32 %v2842_v63  ;;  %v7616_v63 = vld [vmem:[#allocation9 + $0x178] sm:$0xff] }
 0x5a3   :  { %9831 = vst [vmem:[#allocation167_spill] sm:$0xff] %v7616_v63 }
 0x5a9   :  { %v5026_v47 = vpop.eup %5025 }
 0x5aa   :  { %v2846_v3 = vmul.f32 %v5026_v47, %v5022_v40  ;;  %v7602_v40 = vld [vmem:[#allocation9 + $0x188] sm:$0xff]  ;;  %v7608_v47 = vld [vmem:[#allocation9 + $0x180] sm:$0xff] }
 0x5ab   :  { %v5028_v5 = vpop.eup %5027  ;;  %9826 = vst [vmem:[#allocation166_spill] sm:$0xff] %v7602_v40  ;;  %9828 = vst [vmem:[#allocation141_spill] sm:$0xff] %v7608_v47 }
 0x5ac   :  { %v2845_v1 = vmul.f32 %v5028_v5, %v7025_v2  ;;  %v7584_v2 = vld [vmem:[#allocation9 + $0x1c0] sm:$0xff]  ;;  %v7614_v5 = vld [vmem:[#allocation9 + $0x168] sm:$0xff] }
 0x5ad   :  { %9830 = vst [vmem:[#allocation140_spill] sm:$0xff] %v7614_v5 }
 0x5ae   :  { %v7569_v53 = vadd.f32 %v2846_v3, %v2845_v1  ;;  %v7610_v3 = vld [vmem:[#allocation9 + $0x190] sm:$0xff]  ;;  %v7620_v1 = vld [vmem:[#allocation9 + $0x160] sm:$0xff] }
 0x5af   :  { %v5030_v61 = vpop.eup %5029  ;;  %9829 = vst [vmem:[#allocation142_spill] sm:$0xff] %v7610_v3  ;;  %9832 = vst [vmem:[#allocation168_spill] sm:$0xff] %v7620_v1 }
 0x5b0   :  { %5031 = vtanh.f32 %v7569_v53 }
 0x5bd   :  { %v5032_v46 = vpop.eup %5031 }
 0x5be   :  { %v7572_v4 = vmul.f32 %v5032_v46, %v5030_v61  ;;  %v7622_v61 = vld [vmem:[#allocation9 + $0x170] sm:$0xff]  ;;  %v7626_v46 = vld [vmem:[#allocation9 + $0x148] sm:$0xff] }
 0x5c0   :  { %3047 = vmatmul.mubr.f32.vlgmr.msra.gmra.mxu0 %v7572_v4  ;;  %3118 = vmatmul.mubr.f32.vlgmr.msra.gmra.mxu1 %v7572_v4 }
 0x5c1   :  { %3226 = vmatpush1.msra.mxu0 %v7574_v6  ;;  %3297 = vmatpush1.msra.mxu1 %v7576_v32 }
 0x5c2   :  { %3227 = vmatprep.subr.mxu0 %v7578_v36  ;;  %3298 = vmatprep.subr.mxu1 %v7580_v7 }
 0x5c3   :  { %3228 = vmatpush1.msra.mxu0 %v7584_v2  ;;  %3299 = vmatpush1.msra.mxu1 %v7586_v25 }
 0x5c4   :  { %3229 = vmatprep.subr.mxu0 %v7590_v48  ;;  %3300 = vmatprep.subr.mxu1 %v7592_v52 }
 0x5c5   :  { %3230 = vmatpush1.msra.mxu0 %v7596_v8  ;;  %3301 = vmatpush1.msra.mxu1 %v7598_v9  ;;  %v7628_v8 = vld [vmem:[#allocation9 + $0x158] sm:$0xff]  ;;  %v7632_v9 = vld [vmem:[#allocation9 + $0x140] sm:$0xff] }
 0x5c6   :  { %3231 = vmatprep.subr.mxu0 %v7602_v40  ;;  %3302 = vmatprep.subr.mxu1 %v7604_v54  ;;  %v7634_v40 = vld [vmem:[#allocation9 + $0x150] sm:$0xff]  ;;  %v7638_v54 = vld [vmem:[#allocation9 + $0x128] sm:$0xff] }
 0x5c7   :  { %3232 = vmatpush1.msra.mxu0 %v7608_v47  ;;  %3303 = vmatpush1.msra.mxu1 %v7610_v3  ;;  %v7640_v47 = vld [vmem:[#allocation9 + $0x138] sm:$0xff]  ;;  %v7644_v3 = vld [vmem:[#allocation9 + $0x120] sm:$0xff] }
 0x5c8   :  { %3233 = vmatprep.subr.mxu0 %v7614_v5  ;;  %3304 = vmatprep.subr.mxu1 %v7616_v63  ;;  %v7646_v5 = vld [vmem:[#allocation9 + $0x130] sm:$0xff]  ;;  %v7650_v63 = vld [vmem:[#allocation9 + $0x108] sm:$0xff] }
 0x5c9   :  { %3234 = vmatpush1.msra.mxu0 %v7620_v1  ;;  %3305 = vmatpush1.msra.mxu1 %v7622_v61  ;;  %v7652_v1 = vld [vmem:[#allocation9 + $0x118] sm:$0xff] }
 0x5ca   :  { %3235 = vmatprep.subr.mxu0 %v7626_v46  ;;  %3306 = vmatprep.subr.mxu1 %v7628_v8 }
 0x5cb   :  { %3236 = vmatpush1.msra.mxu0 %v7632_v9  ;;  %3307 = vmatpush1.msra.mxu1 %v7634_v40 }
 0x5cc   :  { %3237 = vmatprep.subr.mxu0 %v7638_v54  ;;  %3308 = vmatprep.subr.mxu1 %v7640_v47 }
 0x5cd   :  { %3238 = vmatpush1.msra.mxu0 %v7644_v3  ;;  %3309 = vmatpush1.msra.mxu1 %v7646_v5 }
 0x5ce   :  { %3239 = vmatprep.subr.mxu0 %v7650_v63  ;;  %3310 = vmatprep.subr.mxu1 %v7652_v1 }
 0x5cf   :  { %3240 = vmatpush1.msra.mxu0 %v7056_v37  ;;  %3311 = vmatpush1.msra.mxu1 %v7058_v31  ;;  %v9833_v37 = vld [vmem:[#allocation137_spill] sm:$0xff]  ;;  %v9834_v31 = vld [vmem:[#allocation138_spill] sm:$0xff] }
 0x5d0   :  { %3241 = vmatprep.subr.mxu0 %v7062_v35  ;;  %3312 = vmatprep.subr.mxu1 %v7064_v22  ;;  %v9835_v35 = vld [vmem:[#allocation136_spill] sm:$0xff] }
 0x5d1   :  { %3242 = vmatpush1.msra.mxu0 %v7068_v17  ;;  %3313 = vmatpush1.msra.mxu1 %v7070_v58  ;;  %v9836_v22 = vld [vmem:[#allocation20_spill] sm:$0xff]  ;;  %v9837_v17 = vld [vmem:[#allocation21_spill] sm:$0xff]  ;;  %v9838_v58 = vld [vmem:[#allocation22_spill] sm:$0xff] }
 0x5d2   :  { %3243 = vmatprep.subr.mxu0 %v7074_v51  ;;  %3314 = vmatprep.subr.mxu1 %v7076_v38  ;;  %v9839_v51 = vld [vmem:[#allocation23_spill] sm:$0xff]  ;;  %v9840_v38 = vld [vmem:[#allocation24_spill] sm:$0xff] }
 0x5d3   :  { %3244 = vmatpush1.msra.mxu0 %v7080_v49  ;;  %3315 = vmatpush1.msra.mxu1 %v7082_v43  ;;  %v9841_v49 = vld [vmem:[#allocation25_spill] sm:$0xff]  ;;  %v9842_v43 = vld [vmem:[#allocation26_spill] sm:$0xff] }
 0x5d4   :  { %3245 = vmatprep.subr.mxu0 %v7086_v62  ;;  %3316 = vmatprep.subr.mxu1 %v7088_v57  ;;  %v9843_v62 = vld [vmem:[#allocation27_spill] sm:$0xff]  ;;  %v9844_v57 = vld [vmem:[#allocation28_spill] sm:$0xff] }
 0x5d5   :  { %3246 = vmatpush1.msra.mxu0 %v7092_v50  ;;  %3317 = vmatpush1.msra.mxu1 %v7094_v10  ;;  %v9845_v50 = vld [vmem:[#allocation29_spill] sm:$0xff]  ;;  %v9846_v10 = vld [vmem:[#allocation30_spill] sm:$0xff] }
 0x5d6   :  { %3247 = vmatprep.subr.mxu0 %v7098_v11  ;;  %3318 = vmatprep.subr.mxu1 %v7100_v12  ;;  %v9847_v11 = vld [vmem:[#allocation31_spill] sm:$0xff]  ;;  %v9848_v12 = vld [vmem:[#allocation32_spill] sm:$0xff] }
 0x5d7   :  { %3248 = vmatpush1.msra.mxu0 %v7104_v13  ;;  %3319 = vmatpush1.msra.mxu1 %v7106_v14  ;;  %v9849_v13 = vld [vmem:[#allocation33_spill] sm:$0xff]  ;;  %v9850_v14 = vld [vmem:[#allocation34_spill] sm:$0xff] }
 0x5d8   :  { %3249 = vmatprep.subr.mxu0 %v7110_v15  ;;  %3320 = vmatprep.subr.mxu1 %v7112_v16  ;;  %v9851_v15 = vld [vmem:[#allocation35_spill] sm:$0xff]  ;;  %v9852_v16 = vld [vmem:[#allocation36_spill] sm:$0xff] }
 0x5d9   :  { %3250 = vmatpush1.msra.mxu0 %v7116_v18  ;;  %3321 = vmatpush1.msra.mxu1 %v7118_v19  ;;  %v9853_v18 = vld [vmem:[#allocation37_spill] sm:$0xff]  ;;  %v9854_v19 = vld [vmem:[#allocation38_spill] sm:$0xff] }
 0x5da   :  { %3251 = vmatprep.subr.mxu0 %v7122_v21  ;;  %3322 = vmatprep.subr.mxu1 %v7124_v23  ;;  %v9855_v21 = vld [vmem:[#allocation39_spill] sm:$0xff]  ;;  %v9856_v23 = vld [vmem:[#allocation40_spill] sm:$0xff] }
 0x5db   :  { %3252 = vmatpush1.msra.mxu0 %v7128_v24  ;;  %3323 = vmatpush1.msra.mxu1 %v7130_v26  ;;  %v9857_v24 = vld [vmem:[#allocation41_spill] sm:$0xff]  ;;  %v9858_v26 = vld [vmem:[#allocation42_spill] sm:$0xff] }
 0x5dc   :  { %3253 = vmatprep.subr.mxu0 %v7134_v27  ;;  %3324 = vmatprep.subr.mxu1 %v7136_v28  ;;  %v9859_v27 = vld [vmem:[#allocation43_spill] sm:$0xff]  ;;  %v9860_v28 = vld [vmem:[#allocation44_spill] sm:$0xff] }
 0x5dd   :  { %3254 = vmatpush1.msra.mxu0 %v7140_v29  ;;  %3325 = vmatpush1.msra.mxu1 %v7142_v30  ;;  %v9861_v29 = vld [vmem:[#allocation45_spill] sm:$0xff]  ;;  %v9862_v30 = vld [vmem:[#allocation46_spill] sm:$0xff] }
 0x5de   :  { %3255 = vmatprep.subr.mxu0 %v7146_v33  ;;  %3326 = vmatprep.subr.mxu1 %v7148_v34  ;;  %v9863_v33 = vld [vmem:[#allocation47_spill] sm:$0xff]  ;;  %v9864_v34 = vld [vmem:[#allocation48_spill] sm:$0xff] }
 0x5df   :  { %3256 = vmatpush1.msra.mxu0 %v7152_v42  ;;  %3289 = vmatprep.mubr.f32.mxu0 %v9277_v60  ;;  %v9865_v42 = vld [vmem:[#allocation49_spill] sm:$0xff] }
 0x5e0   :  { %3327 = vmatpush1.msra.mxu1 %v7156_v39  ;;  %3360 = vmatprep.mubr.f32.mxu1 %v9277_v60  ;;  %v9866_v39 = vld [vmem:[#allocation50_spill] sm:$0xff] }
 0x5e1   :  { %3290 = vmatmul.mubr.f32.vlgmr.msra.gmra.mxu0 %v7572_v4  ;;  %3361 = vmatmul.mubr.f32.vlgmr.msra.gmra.mxu1 %v7572_v4  ;;  %v9874_v4 = vld [vmem:[#allocation58_spill] sm:$0xff] }
 0x5e2   :  { %3528 = vmatprep.subr.mxu0 %v7166_v59  ;;  %3599 = vmatprep.subr.mxu1 %v7168_v41  ;;  %v9867_v59 = vld [vmem:[#allocation51_spill] sm:$0xff]  ;;  %v9868_v41 = vld [vmem:[#allocation52_spill] sm:$0xff] }
 0x5e3   :  { %3529 = vmatpush1.msra.mxu0 %v7172_v56  ;;  %3600 = vmatpush1.msra.mxu1 %v7174_v55  ;;  %v9869_v56 = vld [vmem:[#allocation53_spill] sm:$0xff]  ;;  %v9870_v55 = vld [vmem:[#allocation54_spill] sm:$0xff] }
 0x5e4   :  { %3530 = vmatprep.subr.mxu0 %v7178_v0  ;;  %3601 = vmatprep.subr.mxu1 %v7180_v44  ;;  %v9871_v0 = vld [vmem:[#allocation55_spill] sm:$0xff]  ;;  %v9872_v44 = vld [vmem:[#allocation56_spill] sm:$0xff] }
 0x5e5   :  { %3531 = vmatpush1.msra.mxu0 %v7184_v45  ;;  %3602 = vmatpush1.msra.mxu1 %v9833_v37  ;;  %v9873_v45 = vld [vmem:[#allocation57_spill] sm:$0xff]  ;;  %v9875_v37 = vld [vmem:[#allocation59_spill] sm:$0xff] }
 0x5e6   :  { %3532 = vmatprep.subr.mxu0 %v9834_v31  ;;  %3603 = vmatprep.subr.mxu1 %v9835_v35  ;;  %v9876_v31 = vld [vmem:[#allocation60_spill] sm:$0xff]  ;;  %v9877_v35 = vld [vmem:[#allocation61_spill] sm:$0xff] }
 0x5e7   :  { %3533 = vmatpush1.msra.mxu0 %v9836_v22  ;;  %3604 = vmatpush1.msra.mxu1 %v9837_v17  ;;  %v9878_v22 = vld [vmem:[#allocation62_spill] sm:$0xff]  ;;  %v9879_v17 = vld [vmem:[#allocation63_spill] sm:$0xff] }
 0x5e8   :  { %3534 = vmatprep.subr.mxu0 %v9838_v58  ;;  %3605 = vmatprep.subr.mxu1 %v9839_v51  ;;  %v9880_v58 = vld [vmem:[#allocation64_spill] sm:$0xff]  ;;  %v9881_v51 = vld [vmem:[#allocation65_spill] sm:$0xff] }
 0x5e9   :  { %3535 = vmatpush1.msra.mxu0 %v9840_v38  ;;  %3606 = vmatpush1.msra.mxu1 %v9841_v49  ;;  %v9882_v38 = vld [vmem:[#allocation66_spill] sm:$0xff]  ;;  %v9883_v49 = vld [vmem:[#allocation67_spill] sm:$0xff] }
 0x5ea   :  { %3536 = vmatprep.subr.mxu0 %v9842_v43  ;;  %3607 = vmatprep.subr.mxu1 %v9843_v62  ;;  %v9884_v43 = vld [vmem:[#allocation68_spill] sm:$0xff]  ;;  %v9885_v62 = vld [vmem:[#allocation69_spill] sm:$0xff] }
 0x5eb   :  { %3537 = vmatpush1.msra.mxu0 %v9844_v57  ;;  %3608 = vmatpush1.msra.mxu1 %v9845_v50  ;;  %v9886_v57 = vld [vmem:[#allocation70_spill] sm:$0xff]  ;;  %v9887_v50 = vld [vmem:[#allocation71_spill] sm:$0xff] }
 0x5ec   :  { %3538 = vmatprep.subr.mxu0 %v9846_v10  ;;  %3609 = vmatprep.subr.mxu1 %v9847_v11  ;;  %v9888_v10 = vld [vmem:[#allocation72_spill] sm:$0xff]  ;;  %v9889_v11 = vld [vmem:[#allocation73_spill] sm:$0xff] }
 0x5ed   :  { %3539 = vmatpush1.msra.mxu0 %v9848_v12  ;;  %3610 = vmatpush1.msra.mxu1 %v9849_v13  ;;  %v9890_v12 = vld [vmem:[#allocation74_spill] sm:$0xff]  ;;  %v9891_v13 = vld [vmem:[#allocation75_spill] sm:$0xff] }
 0x5ee   :  { %3540 = vmatprep.subr.mxu0 %v9850_v14  ;;  %3611 = vmatprep.subr.mxu1 %v9851_v15  ;;  %v9892_v14 = vld [vmem:[#allocation76_spill] sm:$0xff]  ;;  %v9893_v15 = vld [vmem:[#allocation77_spill] sm:$0xff] }
 0x5ef   :  { %3541 = vmatpush1.msra.mxu0 %v9852_v16  ;;  %3612 = vmatpush1.msra.mxu1 %v9853_v18  ;;  %v9894_v16 = vld [vmem:[#allocation78_spill] sm:$0xff]  ;;  %v9895_v18 = vld [vmem:[#allocation79_spill] sm:$0xff] }
 0x5f0   :  { %3542 = vmatprep.subr.mxu0 %v9854_v19  ;;  %3613 = vmatprep.subr.mxu1 %v9855_v21  ;;  %v9896_v19 = vld [vmem:[#allocation80_spill] sm:$0xff]  ;;  %v9897_v21 = vld [vmem:[#allocation81_spill] sm:$0xff] }
 0x5f1   :  { %3543 = vmatpush1.msra.mxu0 %v9856_v23  ;;  %3614 = vmatpush1.msra.mxu1 %v9857_v24  ;;  %v9898_v23 = vld [vmem:[#allocation82_spill] sm:$0xff]  ;;  %v9899_v24 = vld [vmem:[#allocation83_spill] sm:$0xff] }
 0x5f2   :  { %3544 = vmatprep.subr.mxu0 %v9858_v26  ;;  %3615 = vmatprep.subr.mxu1 %v9859_v27  ;;  %v9900_v26 = vld [vmem:[#allocation84_spill] sm:$0xff]  ;;  %v9901_v27 = vld [vmem:[#allocation85_spill] sm:$0xff] }
 0x5f3   :  { %3545 = vmatpush1.msra.mxu0 %v9860_v28  ;;  %3616 = vmatpush1.msra.mxu1 %v9861_v29  ;;  %v9902_v28 = vld [vmem:[#allocation86_spill] sm:$0xff]  ;;  %v9903_v29 = vld [vmem:[#allocation87_spill] sm:$0xff] }
 0x5f4   :  { %3546 = vmatprep.subr.mxu0 %v9862_v30  ;;  %3617 = vmatprep.subr.mxu1 %v9863_v33  ;;  %v9904_v30 = vld [vmem:[#allocation88_spill] sm:$0xff]  ;;  %v9905_v33 = vld [vmem:[#allocation89_spill] sm:$0xff] }
 0x5f5   :  { %3547 = vmatpush1.msra.mxu0 %v9864_v34  ;;  %3618 = vmatpush1.msra.mxu1 %v9865_v42  ;;  %v9906_v34 = vld [vmem:[#allocation90_spill] sm:$0xff]  ;;  %v9907_v42 = vld [vmem:[#allocation91_spill] sm:$0xff] }
 0x5f6   :  { %3548 = vmatprep.subr.mxu0 %v9866_v39  ;;  %3619 = vmatprep.subr.mxu1 %v9867_v59  ;;  %v9908_v39 = vld [vmem:[#allocation92_spill] sm:$0xff]  ;;  %v9909_v59 = vld [vmem:[#allocation93_spill] sm:$0xff] }
 0x5f7   :  { %3549 = vmatpush1.msra.mxu0 %v9868_v41  ;;  %3620 = vmatpush1.msra.mxu1 %v9869_v56  ;;  %v9910_v41 = vld [vmem:[#allocation94_spill] sm:$0xff]  ;;  %v9911_v56 = vld [vmem:[#allocation95_spill] sm:$0xff] }
 0x5f8   :  { %3550 = vmatprep.subr.mxu0 %v9870_v55  ;;  %3621 = vmatprep.subr.mxu1 %v9871_v0  ;;  %v9912_v55 = vld [vmem:[#allocation96_spill] sm:$0xff]  ;;  %v9913_v0 = vld [vmem:[#allocation97_spill] sm:$0xff] }
 0x5f9   :  { %3551 = vmatpush1.msra.mxu0 %v9872_v44  ;;  %3622 = vmatpush1.msra.mxu1 %v9873_v45  ;;  %v9914_v44 = vld [vmem:[#allocation98_spill] sm:$0xff]  ;;  %v9915_v45 = vld [vmem:[#allocation99_spill] sm:$0xff] }
 0x5fa   :  { %3552 = vmatprep.subr.mxu0 %v9874_v4  ;;  %3623 = vmatprep.subr.mxu1 %v9875_v37  ;;  %v9916_v4 = vld [vmem:[#allocation100_spill] sm:$0xff]  ;;  %v9917_v37 = vld [vmem:[#allocation101_spill] sm:$0xff] }
 0x5fb   :  { %3553 = vmatpush1.msra.mxu0 %v9876_v31  ;;  %3624 = vmatpush1.msra.mxu1 %v9877_v35  ;;  %v9918_v31 = vld [vmem:[#allocation102_spill] sm:$0xff]  ;;  %v9919_v35 = vld [vmem:[#allocation103_spill] sm:$0xff] }
 0x5fc   :  { %3554 = vmatprep.subr.mxu0 %v9878_v22  ;;  %3625 = vmatprep.subr.mxu1 %v9879_v17  ;;  %v9920_v22 = vld [vmem:[#allocation104_spill] sm:$0xff]  ;;  %v9921_v17 = vld [vmem:[#allocation105_spill] sm:$0xff] }
 0x5fd   :  { %3555 = vmatpush1.msra.mxu0 %v9880_v58  ;;  %3626 = vmatpush1.msra.mxu1 %v9881_v51  ;;  %v9922_v58 = vld [vmem:[#allocation106_spill] sm:$0xff]  ;;  %v9923_v51 = vld [vmem:[#allocation107_spill] sm:$0xff] }
 0x5fe   :  { %3556 = vmatprep.subr.mxu0 %v9882_v38  ;;  %3627 = vmatprep.subr.mxu1 %v9883_v49  ;;  %v9924_v38 = vld [vmem:[#allocation108_spill] sm:$0xff]  ;;  %v9925_v49 = vld [vmem:[#allocation109_spill] sm:$0xff] }
 0x5ff   :  { %3557 = vmatpush1.msra.mxu0 %v9884_v43  ;;  %3628 = vmatpush1.msra.mxu1 %v9885_v62  ;;  %v9926_v43 = vld [vmem:[#allocation110_spill] sm:$0xff]  ;;  %v9927_v62 = vld [vmem:[#allocation111_spill] sm:$0xff] }
 0x600   :  { %3558 = vmatprep.subr.mxu0 %v9886_v57  ;;  %3629 = vmatprep.subr.mxu1 %v9887_v50  ;;  %v9928_v57 = vld [vmem:[#allocation112_spill] sm:$0xff]  ;;  %v9929_v50 = vld [vmem:[#allocation113_spill] sm:$0xff] }
 0x601   :  { %3559 = vmatpush1.msra.mxu0 %v9888_v10  ;;  %3630 = vmatpush1.msra.mxu1 %v9889_v11  ;;  %v9930_v10 = vld [vmem:[#allocation114_spill] sm:$0xff]  ;;  %v9931_v11 = vld [vmem:[#allocation115_spill] sm:$0xff] }
 0x602   :  { %3560 = vmatprep.subr.mxu0 %v9890_v12  ;;  %3631 = vmatprep.subr.mxu1 %v9891_v13  ;;  %v9932_v12 = vld [vmem:[#allocation116_spill] sm:$0xff]  ;;  %v9933_v13 = vld [vmem:[#allocation117_spill] sm:$0xff] }
 0x603   :  { %3561 = vmatpush2.msra.mxu0 %v9892_v14  ;;  %3632 = vmatpush2.msra.mxu1 %v9893_v15  ;;  %v9934_v14 = vld [vmem:[#allocation118_spill] sm:$0xff]  ;;  %v9935_v15 = vld [vmem:[#allocation119_spill] sm:$0xff] }
 0x604   :  { %3562 = vmatprep.subr.mxu0 %v9894_v16  ;;  %3633 = vmatprep.subr.mxu1 %v9895_v18  ;;  %v9936_v16 = vld [vmem:[#allocation120_spill] sm:$0xff]  ;;  %v9937_v18 = vld [vmem:[#allocation121_spill] sm:$0xff] }
 0x605   :  { %3563 = vmatpush2.msra.mxu0 %v9896_v19  ;;  %3634 = vmatpush2.msra.mxu1 %v9897_v21  ;;  %v9938_v19 = vld [vmem:[#allocation122_spill] sm:$0xff]  ;;  %v9939_v21 = vld [vmem:[#allocation123_spill] sm:$0xff] }
 0x606   :  { %3564 = vmatprep.subr.mxu0 %v9898_v23  ;;  %3635 = vmatprep.subr.mxu1 %v9899_v24  ;;  %v9940_v23 = vld [vmem:[#allocation124_spill] sm:$0xff]  ;;  %v9941_v24 = vld [vmem:[#allocation125_spill] sm:$0xff] }
 0x607   :  { %3565 = vmatpush2.msra.mxu0 %v9900_v26  ;;  %3636 = vmatpush2.msra.mxu1 %v9901_v27  ;;  %v9942_v26 = vld [vmem:[#allocation126_spill] sm:$0xff]  ;;  %v9943_v27 = vld [vmem:[#allocation127_spill] sm:$0xff] }
 0x608   :  { %3566 = vmatprep.subr.mxu0 %v9902_v28  ;;  %3637 = vmatprep.subr.mxu1 %v9903_v29  ;;  %v9944_v28 = vld [vmem:[#allocation128_spill] sm:$0xff]  ;;  %v9945_v29 = vld [vmem:[#allocation129_spill] sm:$0xff] }
 0x609   :  { %3567 = vmatpush2.msra.mxu0 %v9904_v30  ;;  %3638 = vmatpush2.msra.mxu1 %v9905_v33  ;;  %v9946_v30 = vld [vmem:[#allocation130_spill] sm:$0xff]  ;;  %v9947_v33 = vld [vmem:[#allocation131_spill] sm:$0xff] }
 0x60a   :  { %3568 = vmatprep.subr.mxu0 %v9906_v34  ;;  %3639 = vmatprep.subr.mxu1 %v9907_v42  ;;  %v9948_v34 = vld [vmem:[#allocation133_spill] sm:$0xff]  ;;  %v9949_v42 = vld [vmem:[#allocation134_spill] sm:$0xff] }
 0x60b   :  { %3569 = vmatpush2.msra.mxu0 %v9908_v39  ;;  %3640 = vmatpush2.msra.mxu1 %v9909_v59  ;;  %v9950_v39 = vld [vmem:[#allocation132_spill] sm:$0xff]  ;;  %v9951_v59 = vld [vmem:[#allocation159_spill] sm:$0xff] }
 0x60c   :  { %3570 = vmatprep.subr.mxu0 %v9910_v41  ;;  %3641 = vmatprep.subr.mxu1 %v9911_v56  ;;  %v9952_v41 = vld [vmem:[#allocation160_spill] sm:$0xff]  ;;  %v9953_v56 = vld [vmem:[#allocation161_spill] sm:$0xff] }
 0x60d   :  { %3571 = vmatpush2.msra.mxu0 %v9912_v55  ;;  %3642 = vmatpush2.msra.mxu1 %v9913_v0  ;;  %v9954_v55 = vld [vmem:[#allocation162_spill] sm:$0xff]  ;;  %v9955_v0 = vld [vmem:[#allocation163_spill] sm:$0xff] }
 0x60e   :  { %3572 = vmatprep.subr.mxu0 %v9914_v44  ;;  %3643 = vmatprep.subr.mxu1 %v9915_v45  ;;  %v9956_v45 = vld [vmem:[#allocation16_spill] sm:$0xff] }
 0x60f   :  { %3573 = vmatpush2.msra.mxu0 %v9916_v4  ;;  %3644 = vmatpush2.msra.mxu1 %v9917_v37 }
 0x610   :  { %3574 = vmatprep.subr.mxu0 %v9918_v31  ;;  %3645 = vmatprep.subr.mxu1 %v9919_v35  ;;  %v9957_v35 = vld [vmem:[#allocation17_spill] sm:$0xff] }
 0x611   :  { %3575 = vmatpush2.msra.mxu0 %v9920_v22  ;;  %3646 = vmatpush2.msra.mxu1 %v9921_v17 }
 0x612   :  { %3576 = vmatprep.subr.mxu0 %v9922_v58  ;;  %3647 = vmatprep.subr.mxu1 %v9923_v51 }
 0x613   :  { %3577 = vmatpush2.msra.mxu0 %v9924_v38  ;;  %3648 = vmatpush2.msra.mxu1 %v9925_v49  ;;  %v9958_v38 = vld [vmem:[#allocation18_spill] sm:$0xff] }
 0x614   :  { %3578 = vmatprep.subr.mxu0 %v9926_v43  ;;  %3649 = vmatprep.subr.mxu1 %v9927_v62 }
 0x615   :  { %3579 = vmatpush2.msra.mxu0 %v9928_v57  ;;  %3650 = vmatpush2.msra.mxu1 %v9929_v50  ;;  %v9959_v57 = vld [vmem:[#allocation19_spill] sm:$0xff] }
 0x616   :  { %3580 = vmatprep.subr.mxu0 %v9930_v10  ;;  %3651 = vmatprep.subr.mxu1 %v9931_v11 }
 0x617   :  { %3581 = vmatpush2.msra.mxu0 %v9932_v12  ;;  %3652 = vmatpush2.msra.mxu1 %v9933_v13 }
 0x618   :  { %3582 = vmatprep.subr.mxu0 %v9934_v14  ;;  %3653 = vmatprep.subr.mxu1 %v9935_v15 }
 0x619   :  { %3583 = vmatpush2.msra.mxu0 %v9936_v16  ;;  %3654 = vmatpush2.msra.mxu1 %v9937_v18  ;;  %v9960_v16 = vld [vmem:[#allocation147_spill] sm:$0xff] }
 0x61a   :  { %3584 = vmatprep.subr.mxu0 %v9938_v19  ;;  %3655 = vmatprep.subr.mxu1 %v9939_v21 }
 0x61b   :  { %3585 = vmatpush2.msra.mxu0 %v9940_v23  ;;  %3656 = vmatpush2.msra.mxu1 %v9941_v24 }
 0x61c   :  { %3586 = vmatprep.subr.mxu0 %v9942_v26  ;;  %3657 = vmatprep.subr.mxu1 %v9943_v27  ;;  %v9961_v26 = vld [vmem:[#allocation149_spill] sm:$0xff] }
 0x61d   :  { %3587 = vmatpush2.msra.mxu0 %v9944_v28  ;;  %3658 = vmatpush2.msra.mxu1 %v9945_v29 }
 0x61e   :  { %3588 = vmatprep.subr.mxu0 %v9946_v30  ;;  %3659 = vmatprep.subr.mxu1 %v9947_v33 }
 0x61f   :  { %3589 = vmatpush2.msra.mxu0 %v9948_v34  ;;  %3660 = vmatpush2.msra.mxu1 %v9949_v42 }
 0x620   :  { %3590 = vmatprep.subr.mxu0 %v9950_v39  ;;  %3661 = vmatprep.subr.mxu1 %v9951_v59  ;;  %v9962_v59 = vld [vmem:[#allocation150_spill] sm:$0xff] }
 0x621   :  { %3591 = vmatpush2.msra.mxu0 %v9952_v41  ;;  %3662 = vmatpush2.msra.mxu1 %v9953_v56  ;;  %v9963_v56 = vld [vmem:[#allocation148_spill] sm:$0xff] }
 0x622   :  { %3771 = vmatprep.subr.mxu0 %v9954_v55  ;;  %3842 = vmatprep.subr.mxu1 %v9955_v0 }
 0x680   :  { %v3048_v44 = vpop.f32.mrf.mxu0  ;;  %v3119_v17 = vpop.f32.mrf.mxu1 }
 0x681   :  { %v3049_v4 = vadd.f32 %v3048_v44, %v9956_v45  ;;  %v3120_v50 = vadd.f32 %v3119_v17, %v9959_v57 }
 0x682   :  { %v3050_v37 = vpop.f32.mrf.mxu0  ;;  %v3121_v51 = vpop.f32.mrf.mxu1 }
 0x683   :  { %v4859_v31 = vmul.f32 -1.442695, %v3049_v4  ;;  %v3051_v22 = vadd.f32 %v3050_v37, %v9957_v35  ;;  %v3122_v49 = vadd.f32 %v3121_v51, %v9958_v38 }
 0x685   :  { %5033 = vpow2.f32 %v4859_v31  ;;  %v4860_v58 = vmul.f32 -1.442695, %v3051_v22  ;;  %v4861_v43 = vmul.f32 -1.442695, %v3122_v49 }
 0x687   :  { %5035 = vpow2.f32 %v4860_v58 }
 0x688   :  { %5037 = vpow2.f32 %v4861_v43 }
 0x692   :  { %v5034_v62 = vpop.eup %5033 }
 0x693   :  { %v3128_v10 = vadd.f32 1.0, %v5034_v62 }
 0x694   :  { %v5036_v11 = vpop.eup %5035 }
 0x695   :  { %5039 = vrcp.f32 %v3128_v10  ;;  %v3134_v12 = vadd.f32 1.0, %v5036_v11  ;;  %v5038_v13 = vpop.eup %5037 }
 0x696   :  { %5041 = vtanh.f32 %v3120_v50  ;;  %v3141_v30 = vadd.f32 1.0, %v5038_v13 }
 0x697   :  { %5043 = vrcp.f32 %v3134_v12 }
 0x6a1   :  { %v3291_v14 = vpop.f32.mrf.mxu0  ;;  %v3362_v33 = vpop.f32.mrf.mxu1 }
 0x6a2   :  { %v5040_v15 = vpop.eup %5039  ;;  %v3367_v18 = vadd.f32 %v3291_v14, %v9960_v16  ;;  %v3369_v55 = vadd.f32 %v3362_v33, %v9963_v56  ;;  %v9966_v16 = vld [vmem:[#allocation166_spill] sm:$0xff]  ;;  %v7940_v33 = vld [vmem:[#allocation9 + $0x58] sm:$0xff]  ;;  %v7956_v56 = vld [vmem:[#allocation9 + $0x20] sm:$0xff] }
 0x6a3   :  { %v5042_v19 = vpop.eup %5041  ;;  %v3293_v21 = vpop.f32.mrf.mxu0 }
 0x6a4   :  { %v5044_v23 = vpop.eup %5043  ;;  %v4862_v24 = vmul.f32 -1.442695, %v3367_v18  ;;  %v3368_v27 = vadd.f32 %v3293_v21, %v9961_v26  ;;  %v3145_v28 = vmul.f32 %v5042_v19, %v5040_v15  ;;  %v3364_v39 = vpop.f32.mrf.mxu1  ;;  %v9965_v15 = vld [vmem:[#allocation165_spill] sm:$0xff]  ;;  %v7910_v18 = vld [vmem:[#allocation9 + $0xb0] sm:$0xff]  ;;  %v7916_v21 = vld [vmem:[#allocation9 + $0x98] sm:$0xff] }
 0x6a5   :  { %v3144_v29 = vmul.f32 %v5044_v23, %v7563_v20  ;;  %v3370_v41 = vadd.f32 %v3364_v39, %v9962_v59  ;;  %v7914_v19 = vld [vmem:[#allocation9 + $0x88] sm:$0xff]  ;;  %v7920_v23 = vld [vmem:[#allocation9 + $0x80] sm:$0xff]  ;;  %v7946_v39 = vld [vmem:[#allocation9 + $0x50] sm:$0xff] }
 0x6a6   :  { %5045 = vpow2.f32 %v4862_v24  ;;  %v4863_v34 = vmul.f32 -1.442695, %v3368_v27  ;;  %v7922_v24 = vld [vmem:[#allocation9 + $0x90] sm:$0xff]  ;;  %v7926_v26 = vld [vmem:[#allocation9 + $0x68] sm:$0xff]  ;;  %v7928_v27 = vld [vmem:[#allocation9 + $0x78] sm:$0xff] }
 0x6a7   :  { %v7835_v42 = vadd.f32 %v3145_v28, %v3144_v29  ;;  %v4864_v0 = vmul.f32 -1.442695, %v3370_v41  ;;  %v7932_v28 = vld [vmem:[#allocation9 + $0x60] sm:$0xff]  ;;  %v7934_v29 = vld [vmem:[#allocation9 + $0x70] sm:$0xff]  ;;  %v7950_v59 = vld [vmem:[#allocation9 + $0x28] sm:$0xff] }
 0x6a8   :  { %5047 = vpow2.f32 %v4863_v34  ;;  %v7944_v34 = vld [vmem:[#allocation9 + $0x40] sm:$0xff]  ;;  %v7952_v41 = vld [vmem:[#allocation9 + $0x38] sm:$0xff] }
 0x6a9   :  { %5049 = vrcp.f32 %v3141_v30  ;;  %v7938_v30 = vld [vmem:[#allocation9 + $0x48] sm:$0xff] }
 0x6aa   :  { %5051 = vtanh.f32 %v7835_v42 }
 0x6ab   :  { %5053 = vtanh.f32 %v3369_v55  ;;  %v7958_v55 = vld [vmem:[#allocation9 + $0x30] sm:$0xff] }
 0x6ac   :  { %5055 = vpow2.f32 %v4864_v0  ;;  %v7962_v0 = vld [vmem:[#allocation9 + $0x8] sm:$0xff] }
 0x6b3   :  { %v5046_v44 = vpop.eup %5045 }
 0x6b4   :  { %v3375_v4 = vadd.f32 1.0, %v5046_v44  ;;  %v7964_v44 = vld [vmem:[#allocation9 + $0x18] sm:$0xff] }
 0x6b5   :  { %v5048_v20 = vpop.eup %5047 }
 0x6b6   :  { %v5050_v37 = vpop.eup %5049  ;;  %5057 = vrcp.f32 %v3375_v4  ;;  %v3381_v31 = vadd.f32 1.0, %v5048_v20  ;;  %v7968_v4 = vld [vmem:[#allocation9] sm:$0xff]  ;;  %v7972_v20 = vld [vmem:[#allocation9 + $0x10] sm:$0xff] }
 0x6b7   :  { %v5052_v22 = vpop.eup %5051 }
 0x6b8   :  { %5059 = vrcp.f32 %v3381_v31  ;;  %v3148_v17 = vmul.f32 %v5052_v22, %v5050_v37  ;;  %v5054_v58 = vpop.eup %5053  ;;  %v7982_v37 = vld [vmem:[#allocation11 + $0x1e8] sm:$0xff]  ;;  %v7984_v31 = vld [vmem:[#allocation11 + $0x1f8] sm:$0xff]  ;;  %v7988_v22 = vld [vmem:[#allocation11 + $0x1e0] sm:$0xff] }
 0x6b9   :  { %v5056_v51 = vpop.eup %5055 }
 0x6ba   :  { %3151 = vst [vmem:[#allocation12 + $0x20] sm:$0xff] %v3148_v17  ;;  %3592 = vmatprep.mubr.f32.mxu0 %v3148_v17  ;;  %3663 = vmatprep.mubr.f32.mxu1 %v3148_v17  ;;  %v3388_v50 = vadd.f32 1.0, %v5056_v51  ;;  %v7990_v17 = vld [vmem:[#allocation11 + $0x1f0] sm:$0xff]  ;;  %v7996_v51 = vld [vmem:[#allocation11 + $0x1d8] sm:$0xff] }
 0x6bc   :  { %5061 = vrcp.f32 %v3388_v50  ;;  %v8008_v50 = vld [vmem:[#allocation11 + $0x1b8] sm:$0xff] }
 0x6bd   :  { %9975 = vst [vmem:[#allocation171_spill] sm:$0xff] %v8008_v50 }
 0x6c3   :  { %v5058_v49 = vpop.eup %5057 }
 0x6c4   :  { %v3392_v43 = vmul.f32 %v5058_v49, %v5054_v58  ;;  %v7994_v58 = vld [vmem:[#allocation11 + $0x1c8] sm:$0xff]  ;;  %v8000_v49 = vld [vmem:[#allocation11 + $0x1c0] sm:$0xff] }
 0x6c5   :  { %v5060_v62 = vpop.eup %5059 }
 0x6c6   :  { %v3391_v10 = vmul.f32 %v5060_v62, %v7569_v53  ;;  %v9964_v53 = vld [vmem:[#allocation164_spill] sm:$0xff]  ;;  %v8006_v62 = vld [vmem:[#allocation11 + $0x1a8] sm:$0xff] }
 0x6c7   :  { %9974 = vst [vmem:[#allocation170_spill] sm:$0xff] %v8006_v62 }
 0x6c8   :  { %v7841_v11 = vadd.f32 %v3392_v43, %v3391_v10  ;;  %v8002_v43 = vld [vmem:[#allocation11 + $0x1d0] sm:$0xff]  ;;  %v8012_v10 = vld [vmem:[#allocation11 + $0x1a0] sm:$0xff] }
 0x6c9   :  { %v5062_v12 = vpop.eup %5061  ;;  %9973 = vst [vmem:[#allocation169_spill] sm:$0xff] %v8002_v43  ;;  %9976 = vst [vmem:[#allocation172_spill] sm:$0xff] %v8012_v10 }
 0x6ca   :  { %5063 = vtanh.f32 %v7841_v11 }
 0x6d7   :  { %v5064_v13 = vpop.eup %5063 }
 0x6d8   :  { %v7844_v14 = vmul.f32 %v5064_v13, %v5062_v12  ;;  %v8014_v12 = vld [vmem:[#allocation11 + $0x1b0] sm:$0xff]  ;;  %v8018_v13 = vld [vmem:[#allocation11 + $0x188] sm:$0xff] }
 0x6d9   :  { %9977 = vst [vmem:[#allocation173_spill] sm:$0xff] %v8014_v12  ;;  %9978 = vst [vmem:[#allocation174_spill] sm:$0xff] %v8018_v13 }
 0x6da   :  { %3593 = vmatmul.mubr.f32.vlgmr.msra.gmra.mxu0 %v7844_v14  ;;  %3664 = vmatmul.mubr.f32.vlgmr.msra.gmra.mxu1 %v7844_v14 }
 0x6db   :  { %3772 = vmatpush1.msra.mxu0 %v7574_v6  ;;  %3843 = vmatpush1.msra.mxu1 %v7576_v32  ;;  %v9967_v6 = vld [vmem:[#allocation139_spill] sm:$0xff]  ;;  %v9968_v32 = vld [vmem:[#allocation141_spill] sm:$0xff] }
 0x6dc   :  { %3773 = vmatprep.subr.mxu0 %v7578_v36  ;;  %3844 = vmatprep.subr.mxu1 %v7580_v7  ;;  %v9969_v36 = vld [vmem:[#allocation142_spill] sm:$0xff]  ;;  %v9970_v7 = vld [vmem:[#allocation140_spill] sm:$0xff] }
 0x6dd   :  { %3774 = vmatpush1.msra.mxu0 %v7584_v2  ;;  %3845 = vmatpush1.msra.mxu1 %v7586_v25  ;;  %v9971_v2 = vld [vmem:[#allocation167_spill] sm:$0xff]  ;;  %v9972_v25 = vld [vmem:[#allocation168_spill] sm:$0xff] }
 0x6de   :  { %3775 = vmatprep.subr.mxu0 %v7590_v48  ;;  %3846 = vmatprep.subr.mxu1 %v7592_v52  ;;  %v7872_v48 = vld [vmem:[#allocation9 + $0x100] sm:$0xff]  ;;  %v7874_v52 = vld [vmem:[#allocation9 + $0x110] sm:$0xff] }
 0x6df   :  { %3776 = vmatpush1.msra.mxu0 %v9964_v53  ;;  %3847 = vmatpush1.msra.mxu1 %v9965_v15  ;;  %v8024_v53 = vld [vmem:[#allocation11 + $0x180] sm:$0xff]  ;;  %v8026_v15 = vld [vmem:[#allocation11 + $0x190] sm:$0xff] }
 0x6e0   :  { %3777 = vmatprep.subr.mxu0 %v9966_v16  ;;  %3848 = vmatprep.subr.mxu1 %v9967_v6  ;;  %9980 = vst [vmem:[#allocation143_spill] sm:$0xff] %v8024_v53  ;;  %9981 = vst [vmem:[#allocation145_spill] sm:$0xff] %v8026_v15  ;;  %v8030_v16 = vld [vmem:[#allocation11 + $0x168] sm:$0xff]  ;;  %v8032_v6 = vld [vmem:[#allocation11 + $0x178] sm:$0xff] }
 0x6e1   :  { %3778 = vmatpush1.msra.mxu0 %v9968_v32  ;;  %3849 = vmatpush1.msra.mxu1 %v9969_v36  ;;  %9982 = vst [vmem:[#allocation146_spill] sm:$0xff] %v8030_v16  ;;  %9983 = vst [vmem:[#allocation144_spill] sm:$0xff] %v8032_v6  ;;  %v8036_v32 = vld [vmem:[#allocation11 + $0x160] sm:$0xff]  ;;  %v8038_v36 = vld [vmem:[#allocation11 + $0x170] sm:$0xff] }
 0x6e2   :  { %3779 = vmatprep.subr.mxu0 %v9970_v7  ;;  %3850 = vmatprep.subr.mxu1 %v9971_v2  ;;  %9984 = vst [vmem:[#allocation137_spill] sm:$0xff] %v8036_v32  ;;  %9985 = vst [vmem:[#allocation138_spill] sm:$0xff] %v8038_v36  ;;  %v8042_v7 = vld [vmem:[#allocation11 + $0x148] sm:$0xff]  ;;  %v8044_v2 = vld [vmem:[#allocation11 + $0x158] sm:$0xff] }
 0x6e3   :  { %3780 = vmatpush1.msra.mxu0 %v9972_v25  ;;  %3851 = vmatpush1.msra.mxu1 %v7622_v61  ;;  %v7878_v61 = vld [vmem:[#allocation9 + $0xe8] sm:$0xff]  ;;  %9986 = vst [vmem:[#allocation136_spill] sm:$0xff] %v8042_v7  ;;  %9987 = vst [vmem:[#allocation20_spill] sm:$0xff] %v8044_v2  ;;  %v8048_v25 = vld [vmem:[#allocation11 + $0x140] sm:$0xff] }
 0x6e4   :  { %3781 = vmatprep.subr.mxu0 %v7626_v46  ;;  %3852 = vmatprep.subr.mxu1 %v7628_v8  ;;  %v7880_v46 = vld [vmem:[#allocation9 + $0xf8] sm:$0xff]  ;;  %v7884_v8 = vld [vmem:[#allocation9 + $0xe0] sm:$0xff]  ;;  %9988 = vst [vmem:[#allocation21_spill] sm:$0xff] %v8048_v25 }
 0x6e5   :  { %3782 = vmatpush1.msra.mxu0 %v7632_v9  ;;  %3853 = vmatpush1.msra.mxu1 %v7634_v40  ;;  %v7886_v9 = vld [vmem:[#allocation9 + $0xf0] sm:$0xff]  ;;  %v7890_v40 = vld [vmem:[#allocation9 + $0xc8] sm:$0xff] }
 0x6e6   :  { %3783 = vmatprep.subr.mxu0 %v7638_v54  ;;  %3854 = vmatprep.subr.mxu1 %v7640_v47  ;;  %v7892_v54 = vld [vmem:[#allocation9 + $0xd8] sm:$0xff]  ;;  %v7896_v47 = vld [vmem:[#allocation9 + $0xc0] sm:$0xff] }
 0x6e7   :  { %3784 = vmatpush1.msra.mxu0 %v7644_v3  ;;  %3855 = vmatpush1.msra.mxu1 %v7646_v5  ;;  %v7898_v3 = vld [vmem:[#allocation9 + $0xd0] sm:$0xff]  ;;  %v7902_v5 = vld [vmem:[#allocation9 + $0xa8] sm:$0xff] }
 0x6e8   :  { %3785 = vmatprep.subr.mxu0 %v7650_v63  ;;  %3856 = vmatprep.subr.mxu1 %v7652_v1  ;;  %v7904_v63 = vld [vmem:[#allocation9 + $0xb8] sm:$0xff]  ;;  %v7908_v1 = vld [vmem:[#allocation9 + $0xa0] sm:$0xff] }
 0x6e9   :  { %3786 = vmatpush1.msra.mxu0 %v7872_v48  ;;  %3857 = vmatpush1.msra.mxu1 %v7874_v52 }
 0x6ea   :  { %3787 = vmatprep.subr.mxu0 %v7878_v61  ;;  %3858 = vmatprep.subr.mxu1 %v7880_v46 }
 0x6eb   :  { %3788 = vmatpush1.msra.mxu0 %v7884_v8  ;;  %3859 = vmatpush1.msra.mxu1 %v7886_v9 }
 0x6ec   :  { %3789 = vmatprep.subr.mxu0 %v7890_v40  ;;  %3860 = vmatprep.subr.mxu1 %v7892_v54 }
 0x6ed   :  { %3790 = vmatpush1.msra.mxu0 %v7896_v47  ;;  %3861 = vmatpush1.msra.mxu1 %v7898_v3 }
 0x6ee   :  { %3791 = vmatprep.subr.mxu0 %v7902_v5  ;;  %3862 = vmatprep.subr.mxu1 %v7904_v63 }
 0x6ef   :  { %3792 = vmatpush1.msra.mxu0 %v7908_v1  ;;  %3863 = vmatpush1.msra.mxu1 %v7910_v18 }
 0x6f0   :  { %3793 = vmatprep.subr.mxu0 %v7914_v19  ;;  %3864 = vmatprep.subr.mxu1 %v7916_v21 }
 0x6f1   :  { %3794 = vmatpush1.msra.mxu0 %v7920_v23  ;;  %3865 = vmatpush1.msra.mxu1 %v7922_v24 }
 0x6f2   :  { %3795 = vmatprep.subr.mxu0 %v7926_v26  ;;  %3866 = vmatprep.subr.mxu1 %v7928_v27 }
 0x6f3   :  { %3796 = vmatpush1.msra.mxu0 %v7932_v28  ;;  %3867 = vmatpush1.msra.mxu1 %v7934_v29 }
 0x6f4   :  { %3797 = vmatprep.subr.mxu0 %v7938_v30  ;;  %3868 = vmatprep.subr.mxu1 %v7940_v33 }
 0x6f5   :  { %3798 = vmatpush1.msra.mxu0 %v7944_v34  ;;  %3869 = vmatpush1.msra.mxu1 %v7946_v39 }
 0x6f6   :  { %3799 = vmatprep.subr.mxu0 %v7950_v59  ;;  %3870 = vmatprep.subr.mxu1 %v7952_v41 }
 0x6f7   :  { %3800 = vmatpush1.msra.mxu0 %v7956_v56  ;;  %3871 = vmatpush1.msra.mxu1 %v7958_v55 }
 0x6f8   :  { %3801 = vmatprep.subr.mxu0 %v7962_v0  ;;  %3872 = vmatprep.subr.mxu1 %v7964_v44 }
 0x6f9   :  { %3802 = vmatpush1.msra.mxu0 %v7968_v4  ;;  %3835 = vmatprep.mubr.f32.mxu0 %v9277_v60 }
 0x6fa   :  { %3873 = vmatpush1.msra.mxu1 %v7972_v20  ;;  %3906 = vmatprep.mubr.f32.mxu1 %v9277_v60 }
 0x6fb   :  { %3836 = vmatmul.mubr.f32.vlgmr.msra.gmra.mxu0 %v7844_v14  ;;  %3907 = vmatmul.mubr.f32.vlgmr.msra.gmra.mxu1 %v7844_v14  ;;  %v8020_v14 = vld [vmem:[#allocation11 + $0x198] sm:$0xff] }
 0x6fc   :  { %4074 = vmatprep.subr.mxu0 %v7982_v37  ;;  %4145 = vmatprep.subr.mxu1 %v7984_v31  ;;  %9979 = vst [vmem:[#allocation135_spill] sm:$0xff] %v8020_v14 }
 0x6fd   :  { %4075 = vmatpush1.msra.mxu0 %v7988_v22  ;;  %4146 = vmatpush1.msra.mxu1 %v7990_v17 }
 0x6fe   :  { %4076 = vmatprep.subr.mxu0 %v7994_v58  ;;  %4147 = vmatprep.subr.mxu1 %v7996_v51 }
 0x6ff   :  { %4077 = vmatpush1.msra.mxu0 %v8000_v49  ;;  %4148 = vmatpush1.msra.mxu1 %v8002_v43 }
 0x700   :  { %4078 = vmatprep.subr.mxu0 %v8006_v62  ;;  %4149 = vmatprep.subr.mxu1 %v8008_v50 }
 0x701   :  { %4079 = vmatpush1.msra.mxu0 %v8012_v10  ;;  %4150 = vmatpush1.msra.mxu1 %v8014_v12 }
 0x702   :  { %4080 = vmatprep.subr.mxu0 %v8018_v13  ;;  %4151 = vmatprep.subr.mxu1 %v8020_v14  ;;  %v8292_v14 = vld [vmem:[#allocation11 + $0x2b8] sm:$0xff]  ;;  %v8308_v13 = vld [vmem:[#allocation11 + $0x280] sm:$0xff] }
 0x703   :  { %4081 = vmatpush1.msra.mxu0 %v8024_v53  ;;  %4152 = vmatpush1.msra.mxu1 %v8026_v15  ;;  %v8276_v15 = vld [vmem:[#allocation11 + $0x2f0] sm:$0xff]  ;;  %v8284_v53 = vld [vmem:[#allocation11 + $0x2c0] sm:$0xff]  ;;  %10071 = vst [vmem:[#allocation104_spill] sm:$0xff] %v8292_v14  ;;  %10076 = vst [vmem:[#allocation109_spill] sm:$0xff] %v8308_v13 }
 0x704   :  { %4082 = vmatprep.subr.mxu0 %v8030_v16  ;;  %4153 = vmatprep.subr.mxu1 %v8032_v6  ;;  %v8050_v16 = vld [vmem:[#allocation11 + $0x150] sm:$0xff]  ;;  %v8054_v6 = vld [vmem:[#allocation11 + $0x128] sm:$0xff]  ;;  %10065 = vst [vmem:[#allocation98_spill] sm:$0xff] %v8276_v15  ;;  %10068 = vst [vmem:[#allocation101_spill] sm:$0xff] %v8284_v53 }
 0x705   :  { %4083 = vmatpush1.msra.mxu0 %v8036_v32  ;;  %4154 = vmatpush1.msra.mxu1 %v8038_v36  ;;  %9989 = vst [vmem:[#allocation22_spill] sm:$0xff] %v8050_v16  ;;  %9990 = vst [vmem:[#allocation23_spill] sm:$0xff] %v8054_v6  ;;  %v8056_v32 = vld [vmem:[#allocation11 + $0x138] sm:$0xff]  ;;  %v8060_v36 = vld [vmem:[#allocation11 + $0x120] sm:$0xff] }
 0x706   :  { %4084 = vmatprep.subr.mxu0 %v8042_v7  ;;  %4155 = vmatprep.subr.mxu1 %v8044_v2  ;;  %9991 = vst [vmem:[#allocation24_spill] sm:$0xff] %v8056_v32  ;;  %9992 = vst [vmem:[#allocation25_spill] sm:$0xff] %v8060_v36  ;;  %v8062_v7 = vld [vmem:[#allocation11 + $0x130] sm:$0xff]  ;;  %v8066_v2 = vld [vmem:[#allocation11 + $0x108] sm:$0xff] }
 0x707   :  { %4085 = vmatpush1.msra.mxu0 %v8048_v25  ;;  %4156 = vmatpush1.msra.mxu1 %v8050_v16  ;;  %9993 = vst [vmem:[#allocation26_spill] sm:$0xff] %v8062_v7  ;;  %9994 = vst [vmem:[#allocation27_spill] sm:$0xff] %v8066_v2  ;;  %v8068_v25 = vld [vmem:[#allocation11 + $0x118] sm:$0xff]  ;;  %v8072_v16 = vld [vmem:[#allocation11 + $0x100] sm:$0xff] }
 0x708   :  { %4086 = vmatprep.subr.mxu0 %v8054_v6  ;;  %4157 = vmatprep.subr.mxu1 %v8056_v32  ;;  %9995 = vst [vmem:[#allocation28_spill] sm:$0xff] %v8068_v25  ;;  %9996 = vst [vmem:[#allocation29_spill] sm:$0xff] %v8072_v16  ;;  %v8074_v6 = vld [vmem:[#allocation11 + $0x110] sm:$0xff]  ;;  %v8078_v32 = vld [vmem:[#allocation11 + $0xe8] sm:$0xff] }
 0x709   :  { %4087 = vmatpush1.msra.mxu0 %v8060_v36  ;;  %4158 = vmatpush1.msra.mxu1 %v8062_v7  ;;  %9997 = vst [vmem:[#allocation30_spill] sm:$0xff] %v8074_v6  ;;  %9998 = vst [vmem:[#allocation31_spill] sm:$0xff] %v8078_v32  ;;  %v8080_v36 = vld [vmem:[#allocation11 + $0xf8] sm:$0xff]  ;;  %v8084_v7 = vld [vmem:[#allocation11 + $0xe0] sm:$0xff] }
 0x70a   :  { %4088 = vmatprep.subr.mxu0 %v8066_v2  ;;  %4159 = vmatprep.subr.mxu1 %v8068_v25  ;;  %9999 = vst [vmem:[#allocation32_spill] sm:$0xff] %v8080_v36  ;;  %10000 = vst [vmem:[#allocation33_spill] sm:$0xff] %v8084_v7  ;;  %v8086_v2 = vld [vmem:[#allocation11 + $0xf0] sm:$0xff]  ;;  %v8090_v25 = vld [vmem:[#allocation11 + $0xc8] sm:$0xff] }
 0x70b   :  { %4089 = vmatpush1.msra.mxu0 %v8072_v16  ;;  %4160 = vmatpush1.msra.mxu1 %v8074_v6  ;;  %10001 = vst [vmem:[#allocation34_spill] sm:$0xff] %v8086_v2  ;;  %10002 = vst [vmem:[#allocation35_spill] sm:$0xff] %v8090_v25  ;;  %v8092_v16 = vld [vmem:[#allocation11 + $0xd8] sm:$0xff]  ;;  %v8096_v6 = vld [vmem:[#allocation11 + $0xc0] sm:$0xff] }
 0x70c   :  { %4090 = vmatprep.subr.mxu0 %v8078_v32  ;;  %4161 = vmatprep.subr.mxu1 %v8080_v36  ;;  %10003 = vst [vmem:[#allocation36_spill] sm:$0xff] %v8092_v16  ;;  %10004 = vst [vmem:[#allocation37_spill] sm:$0xff] %v8096_v6  ;;  %v8098_v32 = vld [vmem:[#allocation11 + $0xd0] sm:$0xff]  ;;  %v8102_v36 = vld [vmem:[#allocation11 + $0xa8] sm:$0xff] }
 0x70d   :  { %4091 = vmatpush1.msra.mxu0 %v8084_v7  ;;  %4162 = vmatpush1.msra.mxu1 %v8086_v2  ;;  %10005 = vst [vmem:[#allocation38_spill] sm:$0xff] %v8098_v32  ;;  %10006 = vst [vmem:[#allocation39_spill] sm:$0xff] %v8102_v36  ;;  %v8104_v7 = vld [vmem:[#allocation11 + $0xb8] sm:$0xff]  ;;  %v8108_v2 = vld [vmem:[#allocation11 + $0xa0] sm:$0xff] }
 0x70e   :  { %4092 = vmatprep.subr.mxu0 %v8090_v25  ;;  %4163 = vmatprep.subr.mxu1 %v8092_v16  ;;  %10007 = vst [vmem:[#allocation40_spill] sm:$0xff] %v8104_v7  ;;  %10008 = vst [vmem:[#allocation41_spill] sm:$0xff] %v8108_v2  ;;  %v8110_v25 = vld [vmem:[#allocation11 + $0xb0] sm:$0xff]  ;;  %v8114_v16 = vld [vmem:[#allocation11 + $0x88] sm:$0xff] }
 0x70f   :  { %4093 = vmatpush1.msra.mxu0 %v8096_v6  ;;  %4164 = vmatpush1.msra.mxu1 %v8098_v32  ;;  %10009 = vst [vmem:[#allocation42_spill] sm:$0xff] %v8110_v25  ;;  %10010 = vst [vmem:[#allocation43_spill] sm:$0xff] %v8114_v16  ;;  %v8116_v6 = vld [vmem:[#allocation11 + $0x98] sm:$0xff]  ;;  %v8120_v32 = vld [vmem:[#allocation11 + $0x80] sm:$0xff] }
 0x710   :  { %4094 = vmatprep.subr.mxu0 %v8102_v36  ;;  %4165 = vmatprep.subr.mxu1 %v8104_v7  ;;  %10011 = vst [vmem:[#allocation44_spill] sm:$0xff] %v8116_v6  ;;  %10012 = vst [vmem:[#allocation45_spill] sm:$0xff] %v8120_v32  ;;  %v8122_v36 = vld [vmem:[#allocation11 + $0x90] sm:$0xff]  ;;  %v8126_v7 = vld [vmem:[#allocation11 + $0x68] sm:$0xff] }
 0x711   :  { %4095 = vmatpush1.msra.mxu0 %v8108_v2  ;;  %4166 = vmatpush1.msra.mxu1 %v8110_v25  ;;  %10013 = vst [vmem:[#allocation46_spill] sm:$0xff] %v8122_v36  ;;  %10014 = vst [vmem:[#allocation47_spill] sm:$0xff] %v8126_v7  ;;  %v8128_v2 = vld [vmem:[#allocation11 + $0x78] sm:$0xff]  ;;  %v8132_v25 = vld [vmem:[#allocation11 + $0x60] sm:$0xff] }
 0x712   :  { %4096 = vmatprep.subr.mxu0 %v8114_v16  ;;  %4167 = vmatprep.subr.mxu1 %v8116_v6  ;;  %10015 = vst [vmem:[#allocation48_spill] sm:$0xff] %v8128_v2  ;;  %10016 = vst [vmem:[#allocation49_spill] sm:$0xff] %v8132_v25  ;;  %v8134_v16 = vld [vmem:[#allocation11 + $0x70] sm:$0xff]  ;;  %v8138_v6 = vld [vmem:[#allocation11 + $0x48] sm:$0xff] }
 0x713   :  { %4097 = vmatpush1.msra.mxu0 %v8120_v32  ;;  %4168 = vmatpush1.msra.mxu1 %v8122_v36  ;;  %10017 = vst [vmem:[#allocation50_spill] sm:$0xff] %v8134_v16  ;;  %10018 = vst [vmem:[#allocation51_spill] sm:$0xff] %v8138_v6  ;;  %v8140_v32 = vld [vmem:[#allocation11 + $0x58] sm:$0xff]  ;;  %v8144_v36 = vld [vmem:[#allocation11 + $0x40] sm:$0xff] }
 0x714   :  { %4098 = vmatprep.subr.mxu0 %v8126_v7  ;;  %4169 = vmatprep.subr.mxu1 %v8128_v2  ;;  %10019 = vst [vmem:[#allocation52_spill] sm:$0xff] %v8140_v32  ;;  %10020 = vst [vmem:[#allocation53_spill] sm:$0xff] %v8144_v36  ;;  %v8146_v7 = vld [vmem:[#allocation11 + $0x50] sm:$0xff]  ;;  %v8150_v2 = vld [vmem:[#allocation11 + $0x28] sm:$0xff] }
 0x715   :  { %4099 = vmatpush1.msra.mxu0 %v8132_v25  ;;  %4170 = vmatpush1.msra.mxu1 %v8134_v16  ;;  %10021 = vst [vmem:[#allocation54_spill] sm:$0xff] %v8146_v7  ;;  %10022 = vst [vmem:[#allocation55_spill] sm:$0xff] %v8150_v2  ;;  %v8152_v25 = vld [vmem:[#allocation11 + $0x38] sm:$0xff]  ;;  %v8156_v16 = vld [vmem:[#allocation11 + $0x20] sm:$0xff] }
 0x716   :  { %4100 = vmatprep.subr.mxu0 %v8138_v6  ;;  %4171 = vmatprep.subr.mxu1 %v8140_v32  ;;  %10023 = vst [vmem:[#allocation56_spill] sm:$0xff] %v8152_v25  ;;  %10024 = vst [vmem:[#allocation57_spill] sm:$0xff] %v8156_v16  ;;  %v8158_v6 = vld [vmem:[#allocation11 + $0x30] sm:$0xff]  ;;  %v8162_v32 = vld [vmem:[#allocation11 + $0x8] sm:$0xff] }
 0x717   :  { %4101 = vmatpush1.msra.mxu0 %v8144_v36  ;;  %4172 = vmatpush1.msra.mxu1 %v8146_v7  ;;  %10025 = vst [vmem:[#allocation58_spill] sm:$0xff] %v8158_v6  ;;  %10026 = vst [vmem:[#allocation59_spill] sm:$0xff] %v8162_v32  ;;  %v8164_v36 = vld [vmem:[#allocation11 + $0x18] sm:$0xff]  ;;  %v8168_v7 = vld [vmem:[#allocation11] sm:$0xff] }
 0x718   :  { %4102 = vmatprep.subr.mxu0 %v8150_v2  ;;  %4173 = vmatprep.subr.mxu1 %v8152_v25  ;;  %10027 = vst [vmem:[#allocation60_spill] sm:$0xff] %v8164_v36  ;;  %10028 = vst [vmem:[#allocation61_spill] sm:$0xff] %v8168_v7  ;;  %v8170_v2 = vld [vmem:[#allocation11 + $0x10] sm:$0xff]  ;;  %v8174_v25 = vld [vmem:[#allocation11 + $0x3e8] sm:$0xff] }
 0x719   :  { %4103 = vmatpush1.msra.mxu0 %v8156_v16  ;;  %4174 = vmatpush1.msra.mxu1 %v8158_v6  ;;  %10029 = vst [vmem:[#allocation62_spill] sm:$0xff] %v8170_v2  ;;  %10030 = vst [vmem:[#allocation63_spill] sm:$0xff] %v8174_v25  ;;  %v8176_v16 = vld [vmem:[#allocation11 + $0x3f8] sm:$0xff]  ;;  %v8180_v6 = vld [vmem:[#allocation11 + $0x3e0] sm:$0xff] }
 0x71a   :  { %4104 = vmatprep.subr.mxu0 %v8162_v32  ;;  %4175 = vmatprep.subr.mxu1 %v8164_v36  ;;  %10031 = vst [vmem:[#allocation64_spill] sm:$0xff] %v8176_v16  ;;  %10032 = vst [vmem:[#allocation65_spill] sm:$0xff] %v8180_v6  ;;  %v8182_v32 = vld [vmem:[#allocation11 + $0x3f0] sm:$0xff]  ;;  %v8186_v36 = vld [vmem:[#allocation11 + $0x3c8] sm:$0xff] }
 0x71b   :  { %4105 = vmatpush1.msra.mxu0 %v8168_v7  ;;  %4176 = vmatpush1.msra.mxu1 %v8170_v2  ;;  %10033 = vst [vmem:[#allocation66_spill] sm:$0xff] %v8182_v32  ;;  %10034 = vst [vmem:[#allocation67_spill] sm:$0xff] %v8186_v36  ;;  %v8188_v7 = vld [vmem:[#allocation11 + $0x3d8] sm:$0xff]  ;;  %v8192_v2 = vld [vmem:[#allocation11 + $0x3c0] sm:$0xff] }
 0x71c   :  { %4106 = vmatprep.subr.mxu0 %v8174_v25  ;;  %4177 = vmatprep.subr.mxu1 %v8176_v16  ;;  %10035 = vst [vmem:[#allocation68_spill] sm:$0xff] %v8188_v7  ;;  %10036 = vst [vmem:[#allocation69_spill] sm:$0xff] %v8192_v2  ;;  %v8194_v25 = vld [vmem:[#allocation11 + $0x3d0] sm:$0xff]  ;;  %v8198_v16 = vld [vmem:[#allocation11 + $0x3a8] sm:$0xff] }
 0x71d   :  { %4107 = vmatpush2.msra.mxu0 %v8180_v6  ;;  %4178 = vmatpush2.msra.mxu1 %v8182_v32  ;;  %10037 = vst [vmem:[#allocation70_spill] sm:$0xff] %v8194_v25  ;;  %10038 = vst [vmem:[#allocation71_spill] sm:$0xff] %v8198_v16  ;;  %v8200_v6 = vld [vmem:[#allocation11 + $0x3b8] sm:$0xff]  ;;  %v8204_v32 = vld [vmem:[#allocation11 + $0x3a0] sm:$0xff] }
 0x71e   :  { %4108 = vmatprep.subr.mxu0 %v8186_v36  ;;  %4179 = vmatprep.subr.mxu1 %v8188_v7  ;;  %10039 = vst [vmem:[#allocation72_spill] sm:$0xff] %v8200_v6  ;;  %10040 = vst [vmem:[#allocation73_spill] sm:$0xff] %v8204_v32  ;;  %v8206_v36 = vld [vmem:[#allocation11 + $0x3b0] sm:$0xff]  ;;  %v8210_v7 = vld [vmem:[#allocation11 + $0x388] sm:$0xff] }
 0x71f   :  { %4109 = vmatpush2.msra.mxu0 %v8192_v2  ;;  %4180 = vmatpush2.msra.mxu1 %v8194_v25  ;;  %10041 = vst [vmem:[#allocation74_spill] sm:$0xff] %v8206_v36  ;;  %10042 = vst [vmem:[#allocation75_spill] sm:$0xff] %v8210_v7  ;;  %v8212_v2 = vld [vmem:[#allocation11 + $0x398] sm:$0xff]  ;;  %v8216_v25 = vld [vmem:[#allocation11 + $0x380] sm:$0xff] }
 0x720   :  { %4110 = vmatprep.subr.mxu0 %v8198_v16  ;;  %4181 = vmatprep.subr.mxu1 %v8200_v6  ;;  %10043 = vst [vmem:[#allocation76_spill] sm:$0xff] %v8212_v2  ;;  %10044 = vst [vmem:[#allocation77_spill] sm:$0xff] %v8216_v25  ;;  %v8218_v16 = vld [vmem:[#allocation11 + $0x390] sm:$0xff]  ;;  %v8222_v6 = vld [vmem:[#allocation11 + $0x368] sm:$0xff] }
 0x721   :  { %4111 = vmatpush2.msra.mxu0 %v8204_v32  ;;  %4182 = vmatpush2.msra.mxu1 %v8206_v36  ;;  %10045 = vst [vmem:[#allocation78_spill] sm:$0xff] %v8218_v16  ;;  %10046 = vst [vmem:[#allocation79_spill] sm:$0xff] %v8222_v6  ;;  %v8224_v32 = vld [vmem:[#allocation11 + $0x378] sm:$0xff]  ;;  %v8228_v36 = vld [vmem:[#allocation11 + $0x360] sm:$0xff] }
 0x722   :  { %4112 = vmatprep.subr.mxu0 %v8210_v7  ;;  %4183 = vmatprep.subr.mxu1 %v8212_v2  ;;  %10047 = vst [vmem:[#allocation80_spill] sm:$0xff] %v8224_v32  ;;  %10048 = vst [vmem:[#allocation81_spill] sm:$0xff] %v8228_v36  ;;  %v8230_v7 = vld [vmem:[#allocation11 + $0x370] sm:$0xff]  ;;  %v8234_v2 = vld [vmem:[#allocation11 + $0x348] sm:$0xff] }
 0x723   :  { %4113 = vmatpush2.msra.mxu0 %v8216_v25  ;;  %4184 = vmatpush2.msra.mxu1 %v8218_v16  ;;  %10049 = vst [vmem:[#allocation82_spill] sm:$0xff] %v8230_v7  ;;  %10050 = vst [vmem:[#allocation83_spill] sm:$0xff] %v8234_v2  ;;  %v8236_v25 = vld [vmem:[#allocation11 + $0x358] sm:$0xff]  ;;  %v8240_v16 = vld [vmem:[#allocation11 + $0x340] sm:$0xff] }
 0x724   :  { %4114 = vmatprep.subr.mxu0 %v8222_v6  ;;  %4185 = vmatprep.subr.mxu1 %v8224_v32  ;;  %10051 = vst [vmem:[#allocation84_spill] sm:$0xff] %v8236_v25  ;;  %10052 = vst [vmem:[#allocation85_spill] sm:$0xff] %v8240_v16  ;;  %v8242_v6 = vld [vmem:[#allocation11 + $0x350] sm:$0xff]  ;;  %v8246_v32 = vld [vmem:[#allocation11 + $0x328] sm:$0xff] }
 0x725   :  { %4115 = vmatpush2.msra.mxu0 %v8228_v36  ;;  %4186 = vmatpush2.msra.mxu1 %v8230_v7  ;;  %10053 = vst [vmem:[#allocation86_spill] sm:$0xff] %v8242_v6  ;;  %10054 = vst [vmem:[#allocation87_spill] sm:$0xff] %v8246_v32  ;;  %v8248_v36 = vld [vmem:[#allocation11 + $0x338] sm:$0xff]  ;;  %v8252_v7 = vld [vmem:[#allocation11 + $0x320] sm:$0xff] }
 0x726   :  { %4116 = vmatprep.subr.mxu0 %v8234_v2  ;;  %4187 = vmatprep.subr.mxu1 %v8236_v25  ;;  %10055 = vst [vmem:[#allocation88_spill] sm:$0xff] %v8248_v36  ;;  %10056 = vst [vmem:[#allocation89_spill] sm:$0xff] %v8252_v7  ;;  %v8254_v2 = vld [vmem:[#allocation11 + $0x330] sm:$0xff]  ;;  %v8258_v25 = vld [vmem:[#allocation11 + $0x308] sm:$0xff] }
 0x727   :  { %4117 = vmatpush2.msra.mxu0 %v8240_v16  ;;  %4188 = vmatpush2.msra.mxu1 %v8242_v6  ;;  %10057 = vst [vmem:[#allocation90_spill] sm:$0xff] %v8254_v2  ;;  %10058 = vst [vmem:[#allocation91_spill] sm:$0xff] %v8258_v25  ;;  %v8260_v16 = vld [vmem:[#allocation11 + $0x318] sm:$0xff]  ;;  %v8264_v6 = vld [vmem:[#allocation11 + $0x300] sm:$0xff] }
 0x728   :  { %4118 = vmatprep.subr.mxu0 %v8246_v32  ;;  %4189 = vmatprep.subr.mxu1 %v8248_v36  ;;  %10059 = vst [vmem:[#allocation92_spill] sm:$0xff] %v8260_v16  ;;  %10060 = vst [vmem:[#allocation93_spill] sm:$0xff] %v8264_v6  ;;  %v8266_v32 = vld [vmem:[#allocation11 + $0x310] sm:$0xff]  ;;  %v8268_v36 = vld [vmem:[#allocation11 + $0x2e8] sm:$0xff] }
 0x729   :  { %4119 = vmatpush2.msra.mxu0 %v8252_v7  ;;  %4190 = vmatpush2.msra.mxu1 %v8254_v2  ;;  %10061 = vst [vmem:[#allocation94_spill] sm:$0xff] %v8266_v32  ;;  %10062 = vst [vmem:[#allocation95_spill] sm:$0xff] %v8268_v36  ;;  %v8272_v7 = vld [vmem:[#allocation11 + $0x2f8] sm:$0xff]  ;;  %v8274_v2 = vld [vmem:[#allocation11 + $0x2e0] sm:$0xff] }
 0x72a   :  { %4120 = vmatprep.subr.mxu0 %v8258_v25  ;;  %4191 = vmatprep.subr.mxu1 %v8260_v16  ;;  %10063 = vst [vmem:[#allocation96_spill] sm:$0xff] %v8272_v7  ;;  %10064 = vst [vmem:[#allocation97_spill] sm:$0xff] %v8274_v2  ;;  %v8280_v16 = vld [vmem:[#allocation11 + $0x2c8] sm:$0xff]  ;;  %v8282_v25 = vld [vmem:[#allocation11 + $0x2d8] sm:$0xff] }
 0x72b   :  { %4121 = vmatpush2.msra.mxu0 %v8264_v6  ;;  %4192 = vmatpush2.msra.mxu1 %v8266_v32  ;;  %10066 = vst [vmem:[#allocation99_spill] sm:$0xff] %v8280_v16  ;;  %10067 = vst [vmem:[#allocation100_spill] sm:$0xff] %v8282_v25  ;;  %v8288_v32 = vld [vmem:[#allocation11 + $0x2d0] sm:$0xff]  ;;  %v8290_v6 = vld [vmem:[#allocation11 + $0x2a8] sm:$0xff] }
 0x72c   :  { %4122 = vmatprep.subr.mxu0 %v8268_v36  ;;  %4193 = vmatprep.subr.mxu1 %v8272_v7  ;;  %10069 = vst [vmem:[#allocation102_spill] sm:$0xff] %v8288_v32  ;;  %10070 = vst [vmem:[#allocation103_spill] sm:$0xff] %v8290_v6  ;;  %v8296_v7 = vld [vmem:[#allocation11 + $0x2a0] sm:$0xff]  ;;  %v8298_v36 = vld [vmem:[#allocation11 + $0x2b0] sm:$0xff] }
 0x72d   :  { %4123 = vmatpush2.msra.mxu0 %v8274_v2  ;;  %4194 = vmatpush2.msra.mxu1 %v8276_v15  ;;  %10072 = vst [vmem:[#allocation105_spill] sm:$0xff] %v8296_v7  ;;  %10073 = vst [vmem:[#allocation106_spill] sm:$0xff] %v8298_v36  ;;  %v8302_v2 = vld [vmem:[#allocation11 + $0x288] sm:$0xff]  ;;  %v8304_v15 = vld [vmem:[#allocation11 + $0x298] sm:$0xff] }
 0x72e   :  { %4124 = vmatprep.subr.mxu0 %v8280_v16  ;;  %4195 = vmatprep.subr.mxu1 %v8282_v25  ;;  %10074 = vst [vmem:[#allocation107_spill] sm:$0xff] %v8302_v2  ;;  %10075 = vst [vmem:[#allocation108_spill] sm:$0xff] %v8304_v15  ;;  %v8310_v16 = vld [vmem:[#allocation11 + $0x290] sm:$0xff]  ;;  %v8314_v25 = vld [vmem:[#allocation11 + $0x268] sm:$0xff] }
 0x72f   :  { %4125 = vmatpush2.msra.mxu0 %v8284_v53  ;;  %4196 = vmatpush2.msra.mxu1 %v8288_v32  ;;  %10077 = vst [vmem:[#allocation110_spill] sm:$0xff] %v8310_v16  ;;  %10078 = vst [vmem:[#allocation111_spill] sm:$0xff] %v8314_v25  ;;  %v8316_v53 = vld [vmem:[#allocation11 + $0x278] sm:$0xff]  ;;  %v8320_v32 = vld [vmem:[#allocation11 + $0x260] sm:$0xff] }
 0x730   :  { %4126 = vmatprep.subr.mxu0 %v8290_v6  ;;  %4197 = vmatprep.subr.mxu1 %v8292_v14  ;;  %10079 = vst [vmem:[#allocation112_spill] sm:$0xff] %v8316_v53  ;;  %10080 = vst [vmem:[#allocation113_spill] sm:$0xff] %v8320_v32  ;;  %v8322_v6 = vld [vmem:[#allocation11 + $0x270] sm:$0xff]  ;;  %v8326_v14 = vld [vmem:[#allocation11 + $0x248] sm:$0xff] }
 0x731   :  { %4127 = vmatpush2.msra.mxu0 %v8296_v7  ;;  %4198 = vmatpush2.msra.mxu1 %v8298_v36  ;;  %10081 = vst [vmem:[#allocation114_spill] sm:$0xff] %v8322_v6  ;;  %10082 = vst [vmem:[#allocation115_spill] sm:$0xff] %v8326_v14  ;;  %v8328_v7 = vld [vmem:[#allocation11 + $0x258] sm:$0xff]  ;;  %v8332_v36 = vld [vmem:[#allocation11 + $0x240] sm:$0xff] }
 0x732   :  { %4128 = vmatprep.subr.mxu0 %v8302_v2  ;;  %4199 = vmatprep.subr.mxu1 %v8304_v15  ;;  %10083 = vst [vmem:[#allocation116_spill] sm:$0xff] %v8328_v7  ;;  %10084 = vst [vmem:[#allocation117_spill] sm:$0xff] %v8332_v36  ;;  %v8334_v2 = vld [vmem:[#allocation11 + $0x250] sm:$0xff]  ;;  %v8338_v15 = vld [vmem:[#allocation11 + $0x228] sm:$0xff] }
 0x733   :  { %4129 = vmatpush2.msra.mxu0 %v8308_v13  ;;  %4200 = vmatpush2.msra.mxu1 %v8310_v16  ;;  %10085 = vst [vmem:[#allocation118_spill] sm:$0xff] %v8334_v2  ;;  %10086 = vst [vmem:[#allocation119_spill] sm:$0xff] %v8338_v15  ;;  %v8340_v13 = vld [vmem:[#allocation11 + $0x238] sm:$0xff]  ;;  %v8344_v16 = vld [vmem:[#allocation11 + $0x220] sm:$0xff] }
 0x734   :  { %4130 = vmatprep.subr.mxu0 %v8314_v25  ;;  %4201 = vmatprep.subr.mxu1 %v8316_v53  ;;  %10087 = vst [vmem:[#allocation120_spill] sm:$0xff] %v8340_v13  ;;  %10088 = vst [vmem:[#allocation121_spill] sm:$0xff] %v8344_v16  ;;  %v8346_v25 = vld [vmem:[#allocation11 + $0x230] sm:$0xff]  ;;  %v8350_v53 = vld [vmem:[#allocation11 + $0x208] sm:$0xff] }
 0x735   :  { %4131 = vmatpush2.msra.mxu0 %v8320_v32  ;;  %4202 = vmatpush2.msra.mxu1 %v8322_v6  ;;  %10089 = vst [vmem:[#allocation122_spill] sm:$0xff] %v8346_v25  ;;  %10090 = vst [vmem:[#allocation123_spill] sm:$0xff] %v8350_v53  ;;  %v8352_v32 = vld [vmem:[#allocation11 + $0x218] sm:$0xff]  ;;  %v8356_v6 = vld [vmem:[#allocation11 + $0x200] sm:$0xff] }
 0x736   :  { %4132 = vmatprep.subr.mxu0 %v8326_v14  ;;  %4203 = vmatprep.subr.mxu1 %v8328_v7  ;;  %10091 = vst [vmem:[#allocation124_spill] sm:$0xff] %v8352_v32  ;;  %10092 = vst [vmem:[#allocation125_spill] sm:$0xff] %v8356_v6  ;;  %v8358_v14 = vld [vmem:[#allocation11 + $0x210] sm:$0xff]  ;;  %v4314_v7 = vld [vmem:[#allocation9 + $0x1e8] sm:$0xff] }
 0x737   :  { %4133 = vmatpush2.msra.mxu0 %v8332_v36  ;;  %4204 = vmatpush2.msra.mxu1 %v8334_v2  ;;  %10093 = vst [vmem:[#allocation126_spill] sm:$0xff] %v8358_v14  ;;  %v4316_v36 = vld [vmem:[#allocation9 + $0x1f8] sm:$0xff] }
 0x738   :  { %4134 = vmatprep.subr.mxu0 %v8338_v15  ;;  %4205 = vmatprep.subr.mxu1 %v8340_v13 }
 0x739   :  { %4135 = vmatpush2.msra.mxu0 %v8344_v16  ;;  %4206 = vmatpush2.msra.mxu1 %v8346_v25 }
 0x73a   :  { %4136 = vmatprep.subr.mxu0 %v8350_v53  ;;  %4207 = vmatprep.subr.mxu1 %v8352_v32 }
 0x73b   :  { %4137 = vmatpush2.msra.mxu0 %v8356_v6  ;;  %4208 = vmatpush2.msra.mxu1 %v8358_v14 }
 0x73c   :  { %4317 = vmatprep.subr.mxu0 %v4314_v7  ;;  %4388 = vmatprep.subr.mxu1 %v4316_v36 }
 0x79a   :  { %v3594_v13 = vpop.f32.mrf.mxu0  ;;  %v3665_v25 = vpop.f32.mrf.mxu1 }
 0x79b   :  { %v3595_v15 = vadd.f32 %v3594_v13, %v9956_v45  ;;  %v3666_v14 = vadd.f32 %v3665_v25, %v9959_v57 }
 0x79c   :  { %v3596_v2 = vpop.f32.mrf.mxu0  ;;  %v3667_v53 = vpop.f32.mrf.mxu1 }
 0x79d   :  { %v4865_v12 = vmul.f32 -1.442695, %v3595_v15  ;;  %v3597_v16 = vadd.f32 %v3596_v2, %v9957_v35  ;;  %v3668_v32 = vadd.f32 %v3667_v53, %v9958_v38  ;;  %v10094_v35 = vld [vmem:[#allocation151_spill] sm:$0xff] }
 0x79f   :  { %5065 = vpow2.f32 %v4865_v12  ;;  %v4866_v10 = vmul.f32 -1.442695, %v3597_v16  ;;  %v4867_v50 = vmul.f32 -1.442695, %v3668_v32  ;;  %v10095_v32 = vld [vmem:[#allocation153_spill] sm:$0xff] }
 0x7a1   :  { %5067 = vpow2.f32 %v4866_v10 }
 0x7a2   :  { %5069 = vpow2.f32 %v4867_v50 }
 0x7ac   :  { %v5066_v6 = vpop.eup %5065 }
 0x7ad   :  { %v3674_v7 = vadd.f32 1.0, %v5066_v6 }
 0x7ae   :  { %v5068_v36 = vpop.eup %5067 }
 0x7af   :  { %5071 = vrcp.f32 %v3674_v7  ;;  %v3680_v13 = vadd.f32 1.0, %v5068_v36  ;;  %v5070_v15 = vpop.eup %5069 }
 0x7b0   :  { %5073 = vtanh.f32 %v3666_v14  ;;  %v3687_v25 = vadd.f32 1.0, %v5070_v15 }
 0x7b1   :  { %5075 = vrcp.f32 %v3680_v13 }
 0x7bb   :  { %v3837_v2 = vpop.f32.mrf.mxu0  ;;  %v3908_v50 = vpop.f32.mrf.mxu1 }
 0x7bc   :  { %v5072_v12 = vpop.eup %5071  ;;  %v3913_v16 = vadd.f32 %v3837_v2, %v10094_v35  ;;  %v10096_v35 = vld [vmem:[#allocation154_spill] sm:$0xff]  ;;  %v10097_v2 = vld [vmem:[#allocation152_spill] sm:$0xff] }
 0x7bd   :  { %v5074_v10 = vpop.eup %5073  ;;  %v3839_v45 = vpop.f32.mrf.mxu0 }
 0x7be   :  { %v5076_v62 = vpop.eup %5075  ;;  %v4868_v53 = vmul.f32 -1.442695, %v3913_v16  ;;  %v3914_v38 = vadd.f32 %v3839_v45, %v10095_v32  ;;  %v3691_v43 = vmul.f32 %v5074_v10, %v5072_v12  ;;  %v3910_v36 = vpop.f32.mrf.mxu1  ;;  %v3915_v16 = vadd.f32 %v3908_v50, %v10097_v2  ;;  %v4313_v2 = vld [vmem:[#allocation9 + $0x1e0] sm:$0xff] }
 0x7bf   :  { %v3690_v6 = vmul.f32 %v5076_v62, %v7835_v42  ;;  %v3916_v13 = vadd.f32 %v3910_v36, %v10096_v35 }
 0x7c0   :  { %5077 = vpow2.f32 %v4868_v53  ;;  %v4869_v7 = vmul.f32 -1.442695, %v3914_v38 }
 0x7c1   :  { %v8373_v14 = vadd.f32 %v3691_v43, %v3690_v6  ;;  %v4870_v57 = vmul.f32 -1.442695, %v3916_v13 }
 0x7c2   :  { %5079 = vpow2.f32 %v4869_v7 }
 0x7c3   :  { %5081 = vrcp.f32 %v3687_v25 }
 0x7c4   :  { %5083 = vtanh.f32 %v8373_v14 }
 0x7c5   :  { %5085 = vtanh.f32 %v3915_v16  ;;  %v4315_v16 = vld [vmem:[#allocation9 + $0x1f0] sm:$0xff] }
 0x7c6   :  { %5087 = vpow2.f32 %v4870_v57 }
 0x7cd   :  { %v5078_v45 = vpop.eup %5077 }
 0x7ce   :  { %v3921_v12 = vadd.f32 1.0, %v5078_v45  ;;  %v4310_v45 = vld [vmem:[#allocation9 + $0x1c8] sm:$0xff] }
 0x7cf   :  { %v5080_v42 = vpop.eup %5079 }
 0x7d0   :  { %v5082_v62 = vpop.eup %5081  ;;  %5089 = vrcp.f32 %v3921_v12  ;;  %v3927_v38 = vadd.f32 1.0, %v5080_v42  ;;  %v4312_v12 = vld [vmem:[#allocation9 + $0x1d8] sm:$0xff]  ;;  %v4309_v42 = vld [vmem:[#allocation9 + $0x1c0] sm:$0xff] }
 0x7d1   :  { %v5084_v43 = vpop.eup %5083 }
 0x7d2   :  { %5091 = vrcp.f32 %v3927_v38  ;;  %v3694_v15 = vmul.f32 %v5084_v43, %v5082_v62  ;;  %v5086_v10 = vpop.eup %5085  ;;  %v4311_v62 = vld [vmem:[#allocation9 + $0x1d0] sm:$0xff]  ;;  %v4308_v38 = vld [vmem:[#allocation9 + $0x1b8] sm:$0xff]  ;;  %v4305_v43 = vld [vmem:[#allocation9 + $0x1a0] sm:$0xff] }
 0x7d3   :  { %v5088_v53 = vpop.eup %5087 }
 0x7d4   :  { %3697 = vst [vmem:[#allocation12 + $0x28] sm:$0xff] %v3694_v15  ;;  %4138 = vmatprep.mubr.f32.mxu0 %v3694_v15  ;;  %4209 = vmatprep.mubr.f32.mxu1 %v3694_v15  ;;  %v3934_v50 = vadd.f32 1.0, %v5088_v53  ;;  %v4307_v15 = vld [vmem:[#allocation9 + $0x1b0] sm:$0xff]  ;;  %v4304_v53 = vld [vmem:[#allocation9 + $0x198] sm:$0xff] }
 0x7d6   :  { %5093 = vrcp.f32 %v3934_v50  ;;  %v4300_v50 = vld [vmem:[#allocation9 + $0x178] sm:$0xff] }
 0x7dd   :  { %v5090_v32 = vpop.eup %5089 }
 0x7de   :  { %v3938_v6 = vmul.f32 %v5090_v32, %v5086_v10  ;;  %v4302_v10 = vld [vmem:[#allocation9 + $0x188] sm:$0xff]  ;;  %v4301_v32 = vld [vmem:[#allocation9 + $0x180] sm:$0xff] }
 0x7df   :  { %v5092_v25 = vpop.eup %5091 }
 0x7e0   :  { %v3937_v7 = vmul.f32 %v5092_v25, %v7841_v11  ;;  %v4306_v11 = vld [vmem:[#allocation9 + $0x1a8] sm:$0xff] }
 0x7e1   :  { %v4298_v25 = vld [vmem:[#allocation9 + $0x168] sm:$0xff] }
 0x7e2   :  { %v8379_v36 = vadd.f32 %v3938_v6, %v3937_v7  ;;  %v4303_v6 = vld [vmem:[#allocation9 + $0x190] sm:$0xff]  ;;  %v4297_v7 = vld [vmem:[#allocation9 + $0x160] sm:$0xff] }
 0x7e3   :  { %v5094_v57 = vpop.eup %5093 }
 0x7e4   :  { %5095 = vtanh.f32 %v8379_v36 }
 0x7f1   :  { %v5096_v35 = vpop.eup %5095 }
 0x7f2   :  { %v8382_v13 = vmul.f32 %v5096_v35, %v5094_v57  ;;  %v4299_v57 = vld [vmem:[#allocation9 + $0x170] sm:$0xff]  ;;  %v4294_v35 = vld [vmem:[#allocation9 + $0x148] sm:$0xff] }
 0x7f4   :  { %4139 = vmatmul.mubr.f32.vlgmr.msra.gmra.mxu0 %v8382_v13  ;;  %4210 = vmatmul.mubr.f32.vlgmr.msra.gmra.mxu1 %v8382_v13 }
 0x7f5   :  { %4318 = vmatpush1.msra.mxu0 %v4313_v2  ;;  %4389 = vmatpush1.msra.mxu1 %v4315_v16  ;;  %v4296_v2 = vld [vmem:[#allocation9 + $0x158] sm:$0xff]  ;;  %v4293_v16 = vld [vmem:[#allocation9 + $0x140] sm:$0xff] }
 0x7f6   :  { %4319 = vmatprep.subr.mxu0 %v4310_v45  ;;  %4390 = vmatprep.subr.mxu1 %v4312_v12  ;;  %v4295_v45 = vld [vmem:[#allocation9 + $0x150] sm:$0xff]  ;;  %v4290_v12 = vld [vmem:[#allocation9 + $0x128] sm:$0xff] }
 0x7f7   :  { %4320 = vmatpush1.msra.mxu0 %v4309_v42  ;;  %4391 = vmatpush1.msra.mxu1 %v4311_v62  ;;  %v4292_v42 = vld [vmem:[#allocation9 + $0x138] sm:$0xff]  ;;  %v4289_v62 = vld [vmem:[#allocation9 + $0x120] sm:$0xff] }
 0x7f8   :  { %4321 = vmatprep.subr.mxu0 %v4306_v11  ;;  %4392 = vmatprep.subr.mxu1 %v4308_v38  ;;  %v4291_v11 = vld [vmem:[#allocation9 + $0x130] sm:$0xff]  ;;  %v4286_v38 = vld [vmem:[#allocation9 + $0x108] sm:$0xff] }
 0x7f9   :  { %4322 = vmatpush1.msra.mxu0 %v4305_v43  ;;  %4393 = vmatpush1.msra.mxu1 %v4307_v15  ;;  %v4288_v43 = vld [vmem:[#allocation9 + $0x118] sm:$0xff]  ;;  %v10141_v15 = vld [vmem:[#allocation49_spill] sm:$0xff] }
 0x7fa   :  { %4323 = vmatprep.subr.mxu0 %v4302_v10  ;;  %4394 = vmatprep.subr.mxu1 %v4304_v53  ;;  %v10142_v10 = vld [vmem:[#allocation50_spill] sm:$0xff]  ;;  %v10143_v53 = vld [vmem:[#allocation51_spill] sm:$0xff] }
 0x7fb   :  { %4324 = vmatpush1.msra.mxu0 %v4301_v32  ;;  %4395 = vmatpush1.msra.mxu1 %v4303_v6  ;;  %v10144_v32 = vld [vmem:[#allocation52_spill] sm:$0xff]  ;;  %v10145_v6 = vld [vmem:[#allocation53_spill] sm:$0xff] }
 0x7fc   :  { %4325 = vmatprep.subr.mxu0 %v4298_v25  ;;  %4396 = vmatprep.subr.mxu1 %v4300_v50  ;;  %v10146_v25 = vld [vmem:[#allocation54_spill] sm:$0xff]  ;;  %v10147_v50 = vld [vmem:[#allocation55_spill] sm:$0xff] }
 0x7fd   :  { %4326 = vmatpush1.msra.mxu0 %v4297_v7  ;;  %4397 = vmatpush1.msra.mxu1 %v4299_v57  ;;  %v10148_v7 = vld [vmem:[#allocation56_spill] sm:$0xff]  ;;  %v10149_v57 = vld [vmem:[#allocation57_spill] sm:$0xff] }
 0x7fe   :  { %4327 = vmatprep.subr.mxu0 %v4294_v35  ;;  %4398 = vmatprep.subr.mxu1 %v4296_v2  ;;  %v10150_v35 = vld [vmem:[#allocation58_spill] sm:$0xff]  ;;  %v10151_v2 = vld [vmem:[#allocation59_spill] sm:$0xff] }
 0x7ff   :  { %4328 = vmatpush1.msra.mxu0 %v4293_v16  ;;  %4399 = vmatpush1.msra.mxu1 %v4295_v45  ;;  %v10152_v16 = vld [vmem:[#allocation60_spill] sm:$0xff]  ;;  %v10153_v45 = vld [vmem:[#allocation61_spill] sm:$0xff] }
 0x800   :  { %4329 = vmatprep.subr.mxu0 %v4290_v12  ;;  %4400 = vmatprep.subr.mxu1 %v4292_v42  ;;  %v10154_v12 = vld [vmem:[#allocation62_spill] sm:$0xff]  ;;  %v10155_v42 = vld [vmem:[#allocation63_spill] sm:$0xff] }
 0x801   :  { %4330 = vmatpush1.msra.mxu0 %v4289_v62  ;;  %4401 = vmatpush1.msra.mxu1 %v4291_v11  ;;  %v10156_v62 = vld [vmem:[#allocation64_spill] sm:$0xff]  ;;  %v10157_v11 = vld [vmem:[#allocation65_spill] sm:$0xff] }
 0x802   :  { %4331 = vmatprep.subr.mxu0 %v4286_v38  ;;  %4402 = vmatprep.subr.mxu1 %v4288_v43  ;;  %v10158_v38 = vld [vmem:[#allocation66_spill] sm:$0xff]  ;;  %v10159_v43 = vld [vmem:[#allocation67_spill] sm:$0xff] }
 0x803   :  { %4332 = vmatpush1.msra.mxu0 %v7872_v48  ;;  %4403 = vmatpush1.msra.mxu1 %v7874_v52  ;;  %v10098_v48 = vld [vmem:[#allocation169_spill] sm:$0xff]  ;;  %v10100_v52 = vld [vmem:[#allocation171_spill] sm:$0xff] }
 0x804   :  { %4333 = vmatprep.subr.mxu0 %v7878_v61  ;;  %4404 = vmatprep.subr.mxu1 %v7880_v46  ;;  %v10101_v61 = vld [vmem:[#allocation172_spill] sm:$0xff]  ;;  %v10102_v46 = vld [vmem:[#allocation173_spill] sm:$0xff] }
 0x805   :  { %4334 = vmatpush1.msra.mxu0 %v7884_v8  ;;  %4405 = vmatpush1.msra.mxu1 %v7886_v9  ;;  %v10103_v8 = vld [vmem:[#allocation174_spill] sm:$0xff]  ;;  %v10104_v9 = vld [vmem:[#allocation135_spill] sm:$0xff] }
 0x806   :  { %4335 = vmatprep.subr.mxu0 %v7890_v40  ;;  %4406 = vmatprep.subr.mxu1 %v7892_v54  ;;  %v10105_v40 = vld [vmem:[#allocation143_spill] sm:$0xff]  ;;  %v10106_v54 = vld [vmem:[#allocation145_spill] sm:$0xff] }
 0x807   :  { %4336 = vmatpush1.msra.mxu0 %v7896_v47  ;;  %4407 = vmatpush1.msra.mxu1 %v7898_v3  ;;  %v10107_v47 = vld [vmem:[#allocation146_spill] sm:$0xff]  ;;  %v10108_v3 = vld [vmem:[#allocation144_spill] sm:$0xff] }
 0x808   :  { %4337 = vmatprep.subr.mxu0 %v7902_v5  ;;  %4408 = vmatprep.subr.mxu1 %v7904_v63  ;;  %v10109_v5 = vld [vmem:[#allocation137_spill] sm:$0xff]  ;;  %v10110_v63 = vld [vmem:[#allocation138_spill] sm:$0xff] }
 0x809   :  { %4338 = vmatpush1.msra.mxu0 %v7908_v1  ;;  %4409 = vmatpush1.msra.mxu1 %v7910_v18  ;;  %v10111_v1 = vld [vmem:[#allocation136_spill] sm:$0xff] }
 0x80a   :  { %4339 = vmatprep.subr.mxu0 %v7914_v19  ;;  %4410 = vmatprep.subr.mxu1 %v7916_v21  ;;  %v10112_v18 = vld [vmem:[#allocation20_spill] sm:$0xff]  ;;  %v10113_v19 = vld [vmem:[#allocation21_spill] sm:$0xff]  ;;  %v10114_v21 = vld [vmem:[#allocation22_spill] sm:$0xff] }
 0x80b   :  { %4340 = vmatpush1.msra.mxu0 %v7920_v23  ;;  %4411 = vmatpush1.msra.mxu1 %v7922_v24  ;;  %v10115_v23 = vld [vmem:[#allocation23_spill] sm:$0xff]  ;;  %v10116_v24 = vld [vmem:[#allocation24_spill] sm:$0xff] }
 0x80c   :  { %4341 = vmatprep.subr.mxu0 %v7926_v26  ;;  %4412 = vmatprep.subr.mxu1 %v7928_v27  ;;  %v10117_v26 = vld [vmem:[#allocation25_spill] sm:$0xff]  ;;  %v10118_v27 = vld [vmem:[#allocation26_spill] sm:$0xff] }
 0x80d   :  { %4342 = vmatpush1.msra.mxu0 %v7932_v28  ;;  %4413 = vmatpush1.msra.mxu1 %v7934_v29  ;;  %v10119_v28 = vld [vmem:[#allocation27_spill] sm:$0xff]  ;;  %v10120_v29 = vld [vmem:[#allocation28_spill] sm:$0xff] }
 0x80e   :  { %4343 = vmatprep.subr.mxu0 %v7938_v30  ;;  %4414 = vmatprep.subr.mxu1 %v7940_v33  ;;  %v10121_v30 = vld [vmem:[#allocation29_spill] sm:$0xff]  ;;  %v10122_v33 = vld [vmem:[#allocation30_spill] sm:$0xff] }
 0x80f   :  { %4344 = vmatpush1.msra.mxu0 %v7944_v34  ;;  %4415 = vmatpush1.msra.mxu1 %v7946_v39  ;;  %v10123_v34 = vld [vmem:[#allocation31_spill] sm:$0xff]  ;;  %v10124_v39 = vld [vmem:[#allocation32_spill] sm:$0xff] }
 0x810   :  { %4345 = vmatprep.subr.mxu0 %v7950_v59  ;;  %4416 = vmatprep.subr.mxu1 %v7952_v41  ;;  %v10125_v59 = vld [vmem:[#allocation33_spill] sm:$0xff]  ;;  %v10126_v41 = vld [vmem:[#allocation34_spill] sm:$0xff] }
 0x811   :  { %4346 = vmatpush1.msra.mxu0 %v7956_v56  ;;  %4417 = vmatpush1.msra.mxu1 %v7958_v55  ;;  %v10127_v56 = vld [vmem:[#allocation35_spill] sm:$0xff]  ;;  %v10128_v55 = vld [vmem:[#allocation36_spill] sm:$0xff] }
 0x812   :  { %4347 = vmatprep.subr.mxu0 %v7962_v0  ;;  %4418 = vmatprep.subr.mxu1 %v7964_v44  ;;  %v10129_v0 = vld [vmem:[#allocation37_spill] sm:$0xff]  ;;  %v10130_v44 = vld [vmem:[#allocation38_spill] sm:$0xff] }
 0x813   :  { %4348 = vmatpush1.msra.mxu0 %v7968_v4  ;;  %4381 = vmatprep.mubr.f32.mxu0 %v9277_v60  ;;  %v10131_v4 = vld [vmem:[#allocation39_spill] sm:$0xff] }
 0x814   :  { %4419 = vmatpush1.msra.mxu1 %v7972_v20  ;;  %4452 = vmatprep.mubr.f32.mxu1 %v9277_v60  ;;  %v10099_v60 = vld [vmem:[#allocation170_spill] sm:$0xff]  ;;  %v10132_v20 = vld [vmem:[#allocation40_spill] sm:$0xff] }
 0x815   :  { %4382 = vmatmul.mubr.f32.vlgmr.msra.gmra.mxu0 %v8382_v13  ;;  %4453 = vmatmul.mubr.f32.vlgmr.msra.gmra.mxu1 %v8382_v13  ;;  %v10140_v13 = vld [vmem:[#allocation48_spill] sm:$0xff] }
 0x816   :  { %4620 = vmatprep.subr.mxu0 %v7982_v37  ;;  %4691 = vmatprep.subr.mxu1 %v7984_v31  ;;  %v10133_v37 = vld [vmem:[#allocation41_spill] sm:$0xff]  ;;  %v10134_v31 = vld [vmem:[#allocation42_spill] sm:$0xff] }
 0x817   :  { %4621 = vmatpush1.msra.mxu0 %v7988_v22  ;;  %4692 = vmatpush1.msra.mxu1 %v7990_v17  ;;  %v10135_v22 = vld [vmem:[#allocation43_spill] sm:$0xff]  ;;  %v10136_v17 = vld [vmem:[#allocation44_spill] sm:$0xff] }
 0x818   :  { %4622 = vmatprep.subr.mxu0 %v7994_v58  ;;  %4693 = vmatprep.subr.mxu1 %v7996_v51  ;;  %v10137_v58 = vld [vmem:[#allocation45_spill] sm:$0xff]  ;;  %v10138_v51 = vld [vmem:[#allocation46_spill] sm:$0xff] }
 0x819   :  { %4623 = vmatpush1.msra.mxu0 %v8000_v49  ;;  %4694 = vmatpush1.msra.mxu1 %v10098_v48  ;;  %v10139_v49 = vld [vmem:[#allocation47_spill] sm:$0xff]  ;;  %v10160_v48 = vld [vmem:[#allocation68_spill] sm:$0xff] }
 0x81a   :  { %4624 = vmatprep.subr.mxu0 %v10099_v60  ;;  %4695 = vmatprep.subr.mxu1 %v10100_v52  ;;  %v10161_v60 = vld [vmem:[#allocation69_spill] sm:$0xff]  ;;  %v10162_v52 = vld [vmem:[#allocation70_spill] sm:$0xff] }
 0x81b   :  { %4625 = vmatpush1.msra.mxu0 %v10101_v61  ;;  %4696 = vmatpush1.msra.mxu1 %v10102_v46  ;;  %v10163_v61 = vld [vmem:[#allocation71_spill] sm:$0xff]  ;;  %v10164_v46 = vld [vmem:[#allocation72_spill] sm:$0xff] }
 0x81c   :  { %4626 = vmatprep.subr.mxu0 %v10103_v8  ;;  %4697 = vmatprep.subr.mxu1 %v10104_v9  ;;  %v10165_v8 = vld [vmem:[#allocation73_spill] sm:$0xff]  ;;  %v10166_v9 = vld [vmem:[#allocation74_spill] sm:$0xff] }
 0x81d   :  { %4627 = vmatpush1.msra.mxu0 %v10105_v40  ;;  %4698 = vmatpush1.msra.mxu1 %v10106_v54  ;;  %v10167_v40 = vld [vmem:[#allocation75_spill] sm:$0xff]  ;;  %v10168_v54 = vld [vmem:[#allocation76_spill] sm:$0xff] }
 0x81e   :  { %4628 = vmatprep.subr.mxu0 %v10107_v47  ;;  %4699 = vmatprep.subr.mxu1 %v10108_v3  ;;  %v10169_v47 = vld [vmem:[#allocation77_spill] sm:$0xff]  ;;  %v10170_v3 = vld [vmem:[#allocation78_spill] sm:$0xff] }
 0x81f   :  { %4629 = vmatpush1.msra.mxu0 %v10109_v5  ;;  %4700 = vmatpush1.msra.mxu1 %v10110_v63  ;;  %v10171_v5 = vld [vmem:[#allocation79_spill] sm:$0xff]  ;;  %v10172_v63 = vld [vmem:[#allocation80_spill] sm:$0xff] }
 0x820   :  { %4630 = vmatprep.subr.mxu0 %v10111_v1  ;;  %4701 = vmatprep.subr.mxu1 %v10112_v18  ;;  %v10173_v1 = vld [vmem:[#allocation81_spill] sm:$0xff]  ;;  %v10174_v18 = vld [vmem:[#allocation82_spill] sm:$0xff] }
 0x821   :  { %4631 = vmatpush1.msra.mxu0 %v10113_v19  ;;  %4702 = vmatpush1.msra.mxu1 %v10114_v21  ;;  %v10175_v19 = vld [vmem:[#allocation83_spill] sm:$0xff]  ;;  %v10176_v21 = vld [vmem:[#allocation84_spill] sm:$0xff] }
 0x822   :  { %4632 = vmatprep.subr.mxu0 %v10115_v23  ;;  %4703 = vmatprep.subr.mxu1 %v10116_v24  ;;  %v10177_v23 = vld [vmem:[#allocation85_spill] sm:$0xff]  ;;  %v10178_v24 = vld [vmem:[#allocation86_spill] sm:$0xff] }
 0x823   :  { %4633 = vmatpush1.msra.mxu0 %v10117_v26  ;;  %4704 = vmatpush1.msra.mxu1 %v10118_v27  ;;  %v10179_v26 = vld [vmem:[#allocation87_spill] sm:$0xff]  ;;  %v10180_v27 = vld [vmem:[#allocation88_spill] sm:$0xff] }
 0x824   :  { %4634 = vmatprep.subr.mxu0 %v10119_v28  ;;  %4705 = vmatprep.subr.mxu1 %v10120_v29  ;;  %v10181_v28 = vld [vmem:[#allocation89_spill] sm:$0xff]  ;;  %v10182_v29 = vld [vmem:[#allocation90_spill] sm:$0xff] }
 0x825   :  { %4635 = vmatpush1.msra.mxu0 %v10121_v30  ;;  %4706 = vmatpush1.msra.mxu1 %v10122_v33  ;;  %v10183_v30 = vld [vmem:[#allocation91_spill] sm:$0xff]  ;;  %v10184_v33 = vld [vmem:[#allocation92_spill] sm:$0xff] }
 0x826   :  { %4636 = vmatprep.subr.mxu0 %v10123_v34  ;;  %4707 = vmatprep.subr.mxu1 %v10124_v39  ;;  %v10185_v34 = vld [vmem:[#allocation93_spill] sm:$0xff]  ;;  %v10186_v39 = vld [vmem:[#allocation94_spill] sm:$0xff] }
 0x827   :  { %4637 = vmatpush1.msra.mxu0 %v10125_v59  ;;  %4708 = vmatpush1.msra.mxu1 %v10126_v41  ;;  %v10187_v59 = vld [vmem:[#allocation95_spill] sm:$0xff]  ;;  %v10188_v41 = vld [vmem:[#allocation96_spill] sm:$0xff] }
 0x828   :  { %4638 = vmatprep.subr.mxu0 %v10127_v56  ;;  %4709 = vmatprep.subr.mxu1 %v10128_v55  ;;  %v10189_v56 = vld [vmem:[#allocation97_spill] sm:$0xff]  ;;  %v10190_v55 = vld [vmem:[#allocation98_spill] sm:$0xff] }
 0x829   :  { %4639 = vmatpush1.msra.mxu0 %v10129_v0  ;;  %4710 = vmatpush1.msra.mxu1 %v10130_v44  ;;  %v10191_v0 = vld [vmem:[#allocation99_spill] sm:$0xff]  ;;  %v10192_v44 = vld [vmem:[#allocation100_spill] sm:$0xff] }
 0x82a   :  { %4640 = vmatprep.subr.mxu0 %v10131_v4  ;;  %4711 = vmatprep.subr.mxu1 %v10132_v20  ;;  %v10193_v4 = vld [vmem:[#allocation101_spill] sm:$0xff]  ;;  %v10194_v20 = vld [vmem:[#allocation102_spill] sm:$0xff] }
 0x82b   :  { %4641 = vmatpush1.msra.mxu0 %v10133_v37  ;;  %4712 = vmatpush1.msra.mxu1 %v10134_v31  ;;  %v10195_v37 = vld [vmem:[#allocation103_spill] sm:$0xff]  ;;  %v10196_v31 = vld [vmem:[#allocation104_spill] sm:$0xff] }
 0x82c   :  { %4642 = vmatprep.subr.mxu0 %v10135_v22  ;;  %4713 = vmatprep.subr.mxu1 %v10136_v17  ;;  %v10197_v22 = vld [vmem:[#allocation105_spill] sm:$0xff]  ;;  %v10198_v17 = vld [vmem:[#allocation106_spill] sm:$0xff] }
 0x82d   :  { %4643 = vmatpush1.msra.mxu0 %v10137_v58  ;;  %4714 = vmatpush1.msra.mxu1 %v10138_v51  ;;  %v10199_v58 = vld [vmem:[#allocation107_spill] sm:$0xff]  ;;  %v10200_v51 = vld [vmem:[#allocation108_spill] sm:$0xff] }
 0x82e   :  { %4644 = vmatprep.subr.mxu0 %v10139_v49  ;;  %4715 = vmatprep.subr.mxu1 %v10140_v13  ;;  %v10201_v49 = vld [vmem:[#allocation109_spill] sm:$0xff]  ;;  %v10202_v13 = vld [vmem:[#allocation110_spill] sm:$0xff] }
 0x82f   :  { %4645 = vmatpush1.msra.mxu0 %v10141_v15  ;;  %4716 = vmatpush1.msra.mxu1 %v10142_v10  ;;  %v10203_v15 = vld [vmem:[#allocation111_spill] sm:$0xff]  ;;  %v10204_v10 = vld [vmem:[#allocation112_spill] sm:$0xff] }
 0x830   :  { %4646 = vmatprep.subr.mxu0 %v10143_v53  ;;  %4717 = vmatprep.subr.mxu1 %v10144_v32  ;;  %v10205_v53 = vld [vmem:[#allocation113_spill] sm:$0xff]  ;;  %v10206_v32 = vld [vmem:[#allocation114_spill] sm:$0xff] }
 0x831   :  { %4647 = vmatpush1.msra.mxu0 %v10145_v6  ;;  %4718 = vmatpush1.msra.mxu1 %v10146_v25  ;;  %v10207_v6 = vld [vmem:[#allocation115_spill] sm:$0xff]  ;;  %v10208_v25 = vld [vmem:[#allocation116_spill] sm:$0xff] }
 0x832   :  { %4648 = vmatprep.subr.mxu0 %v10147_v50  ;;  %4719 = vmatprep.subr.mxu1 %v10148_v7  ;;  %v10209_v50 = vld [vmem:[#allocation117_spill] sm:$0xff]  ;;  %v10210_v7 = vld [vmem:[#allocation118_spill] sm:$0xff] }
 0x833   :  { %4649 = vmatpush1.msra.mxu0 %v10149_v57  ;;  %4720 = vmatpush1.msra.mxu1 %v10150_v35  ;;  %v10211_v57 = vld [vmem:[#allocation119_spill] sm:$0xff]  ;;  %v10212_v35 = vld [vmem:[#allocation120_spill] sm:$0xff] }
 0x834   :  { %4650 = vmatprep.subr.mxu0 %v10151_v2  ;;  %4721 = vmatprep.subr.mxu1 %v10152_v16  ;;  %v10213_v2 = vld [vmem:[#allocation121_spill] sm:$0xff]  ;;  %v10214_v16 = vld [vmem:[#allocation122_spill] sm:$0xff] }
 0x835   :  { %4651 = vmatpush1.msra.mxu0 %v10153_v45  ;;  %4722 = vmatpush1.msra.mxu1 %v10154_v12  ;;  %v10215_v45 = vld [vmem:[#allocation123_spill] sm:$0xff]  ;;  %v10216_v12 = vld [vmem:[#allocation124_spill] sm:$0xff] }
 0x836   :  { %4652 = vmatprep.subr.mxu0 %v10155_v42  ;;  %4723 = vmatprep.subr.mxu1 %v10156_v62  ;;  %v10217_v42 = vld [vmem:[#allocation125_spill] sm:$0xff]  ;;  %v10218_v62 = vld [vmem:[#allocation126_spill] sm:$0xff] }
 0x837   :  { %4653 = vmatpush2.msra.mxu0 %v10157_v11  ;;  %4724 = vmatpush2.msra.mxu1 %v10158_v38  ;;  %v10219_v38 = vld [vmem:[#allocation16_spill] sm:$0xff] }
 0x838   :  { %4654 = vmatprep.subr.mxu0 %v10159_v43  ;;  %4725 = vmatprep.subr.mxu1 %v10160_v48 }
 0x839   :  { %4655 = vmatpush2.msra.mxu0 %v10161_v60  ;;  %4726 = vmatpush2.msra.mxu1 %v10162_v52  ;;  %v10220_v52 = vld [vmem:[#allocation17_spill] sm:$0xff] }
 0x83a   :  { %4656 = vmatprep.subr.mxu0 %v10163_v61  ;;  %4727 = vmatprep.subr.mxu1 %v10164_v46 }
 0x83b   :  { %4657 = vmatpush2.msra.mxu0 %v10165_v8  ;;  %4728 = vmatpush2.msra.mxu1 %v10166_v9 }
 0x83c   :  { %4658 = vmatprep.subr.mxu0 %v10167_v40  ;;  %4729 = vmatprep.subr.mxu1 %v10168_v54  ;;  %v10221_v40 = vld [vmem:[#allocation18_spill] sm:$0xff] }
 0x83d   :  { %4659 = vmatpush2.msra.mxu0 %v10169_v47  ;;  %4730 = vmatpush2.msra.mxu1 %v10170_v3 }
 0x83e   :  { %4660 = vmatprep.subr.mxu0 %v10171_v5  ;;  %4731 = vmatprep.subr.mxu1 %v10172_v63  ;;  %v10222_v5 = vld [vmem:[#allocation19_spill] sm:$0xff] }
 0x83f   :  { %4661 = vmatpush2.msra.mxu0 %v10173_v1  ;;  %4732 = vmatpush2.msra.mxu1 %v10174_v18 }
 0x840   :  { %4662 = vmatprep.subr.mxu0 %v10175_v19  ;;  %4733 = vmatprep.subr.mxu1 %v10176_v21 }
 0x841   :  { %4663 = vmatpush2.msra.mxu0 %v10177_v23  ;;  %4734 = vmatpush2.msra.mxu1 %v10178_v24 }
 0x842   :  { %4664 = vmatprep.subr.mxu0 %v10179_v26  ;;  %4735 = vmatprep.subr.mxu1 %v10180_v27  ;;  %v10223_v26 = vld [vmem:[#allocation155_spill] sm:$0xff] }
 0x843   :  { %4665 = vmatpush2.msra.mxu0 %v10181_v28  ;;  %4736 = vmatpush2.msra.mxu1 %v10182_v29 }
 0x844   :  { %4666 = vmatprep.subr.mxu0 %v10183_v30  ;;  %4737 = vmatprep.subr.mxu1 %v10184_v33 }
 0x845   :  { %4667 = vmatpush2.msra.mxu0 %v10185_v34  ;;  %4738 = vmatpush2.msra.mxu1 %v10186_v39  ;;  %v10224_v34 = vld [vmem:[#allocation157_spill] sm:$0xff] }
 0x846   :  { %4668 = vmatprep.subr.mxu0 %v10187_v59  ;;  %4739 = vmatprep.subr.mxu1 %v10188_v41 }
 0x847   :  { %4669 = vmatpush2.msra.mxu0 %v10189_v56  ;;  %4740 = vmatpush2.msra.mxu1 %v10190_v55 }
 0x848   :  { %4670 = vmatprep.subr.mxu0 %v10191_v0  ;;  %4741 = vmatprep.subr.mxu1 %v10192_v44 }
 0x849   :  { %4671 = vmatpush2.msra.mxu0 %v10193_v4  ;;  %4742 = vmatpush2.msra.mxu1 %v10194_v20  ;;  %v10225_v20 = vld [vmem:[#allocation158_spill] sm:$0xff] }
 0x84a   :  { %4672 = vmatprep.subr.mxu0 %v10195_v37  ;;  %4743 = vmatprep.subr.mxu1 %v10196_v31  ;;  %v10226_v31 = vld [vmem:[#allocation156_spill] sm:$0xff] }
 0x84b   :  { %4673 = vmatpush2.msra.mxu0 %v10197_v22  ;;  %4744 = vmatpush2.msra.mxu1 %v10198_v17 }
 0x84c   :  { %4674 = vmatprep.subr.mxu0 %v10199_v58  ;;  %4745 = vmatprep.subr.mxu1 %v10200_v51 }
 0x84d   :  { %4675 = vmatpush2.msra.mxu0 %v10201_v49  ;;  %4746 = vmatpush2.msra.mxu1 %v10202_v13 }
 0x84e   :  { %4676 = vmatprep.subr.mxu0 %v10203_v15  ;;  %4747 = vmatprep.subr.mxu1 %v10204_v10 }
 0x84f   :  { %4677 = vmatpush2.msra.mxu0 %v10205_v53  ;;  %4748 = vmatpush2.msra.mxu1 %v10206_v32 }
 0x850   :  { %4678 = vmatprep.subr.mxu0 %v10207_v6  ;;  %4749 = vmatprep.subr.mxu1 %v10208_v25 }
 0x851   :  { %4679 = vmatpush2.msra.mxu0 %v10209_v50  ;;  %4750 = vmatpush2.msra.mxu1 %v10210_v7 }
 0x852   :  { %4680 = vmatprep.subr.mxu0 %v10211_v57  ;;  %4751 = vmatprep.subr.mxu1 %v10212_v35 }
 0x853   :  { %4681 = vmatpush2.msra.mxu0 %v10213_v2  ;;  %4752 = vmatpush2.msra.mxu1 %v10214_v16 }
 0x854   :  { %4682 = vmatprep.subr.mxu0 %v10215_v45  ;;  %4753 = vmatprep.subr.mxu1 %v10216_v12 }
 0x855   :  { %4683 = vmatpush2.msra.mxu0 %v10217_v42  ;;  %4754 = vmatpush2.msra.mxu1 %v10218_v62 }
 0x8b4   :  { %v4140_v11 = vpop.f32.mrf.mxu0  ;;  %v4211_v46 = vpop.f32.mrf.mxu1 }
 0x8b5   :  { %v4141_v43 = vadd.f32 %v4140_v11, %v10219_v38  ;;  %v4212_v63 = vadd.f32 %v4211_v46, %v10222_v5 }
 0x8b6   :  { %v4142_v48 = vpop.f32.mrf.mxu0  ;;  %v4213_v9 = vpop.f32.mrf.mxu1 }
 0x8b7   :  { %v4871_v60 = vmul.f32 -1.442695, %v4141_v43  ;;  %v4143_v61 = vadd.f32 %v4142_v48, %v10220_v52  ;;  %v4214_v54 = vadd.f32 %v4213_v9, %v10221_v40 }
 0x8b9   :  { %5097 = vpow2.f32 %v4871_v60  ;;  %v4872_v8 = vmul.f32 -1.442695, %v4143_v61  ;;  %v4873_v47 = vmul.f32 -1.442695, %v4214_v54 }
 0x8bb   :  { %5099 = vpow2.f32 %v4872_v8 }
 0x8bc   :  { %5101 = vpow2.f32 %v4873_v47 }
 0x8c6   :  { %v5098_v3 = vpop.eup %5097 }
 0x8c7   :  { %v4220_v1 = vadd.f32 1.0, %v5098_v3 }
 0x8c8   :  { %v5100_v18 = vpop.eup %5099 }
 0x8c9   :  { %5103 = vrcp.f32 %v4220_v1  ;;  %v4226_v19 = vadd.f32 1.0, %v5100_v18  ;;  %v5102_v21 = vpop.eup %5101 }
 0x8ca   :  { %5105 = vtanh.f32 %v4212_v63  ;;  %v4233_v56 = vadd.f32 1.0, %v5102_v21 }
 0x8cb   :  { %5107 = vrcp.f32 %v4226_v19 }
 0x8d5   :  { %v4383_v23 = vpop.f32.mrf.mxu0  ;;  %v4454_v55 = vpop.f32.mrf.mxu1 }
 0x8d6   :  { %v5104_v24 = vpop.eup %5103  ;;  %v4459_v27 = vadd.f32 %v4383_v23, %v10223_v26  ;;  %v4461_v22 = vadd.f32 %v4454_v55, %v10226_v31 }
 0x8d7   :  { %v5106_v28 = vpop.eup %5105  ;;  %v4385_v29 = vpop.f32.mrf.mxu0 }
 0x8d8   :  { %v5108_v30 = vpop.eup %5107  ;;  %v4874_v33 = vmul.f32 -1.442695, %v4459_v27  ;;  %v4460_v39 = vadd.f32 %v4385_v29, %v10224_v34  ;;  %v4237_v59 = vmul.f32 %v5106_v28, %v5104_v24  ;;  %v4456_v4 = vpop.f32.mrf.mxu1 }
 0x8d9   :  { %v4236_v41 = vmul.f32 %v5108_v30, %v8373_v14  ;;  %v4462_v37 = vadd.f32 %v4456_v4, %v10225_v20 }
 0x8da   :  { %5109 = vpow2.f32 %v4874_v33  ;;  %v4875_v0 = vmul.f32 -1.442695, %v4460_v39 }
 0x8db   :  { %v8559_v44 = vadd.f32 %v4237_v59, %v4236_v41  ;;  %v4876_v17 = vmul.f32 -1.442695, %v4462_v37 }
 0x8dc   :  { %5111 = vpow2.f32 %v4875_v0 }
 0x8dd   :  { %5113 = vrcp.f32 %v4233_v56 }
 0x8de   :  { %5115 = vtanh.f32 %v8559_v44 }
 0x8df   :  { %5117 = vtanh.f32 %v4461_v22 }
 0x8e0   :  { %5119 = vpow2.f32 %v4876_v17 }
 0x8e7   :  { %v5110_v58 = vpop.eup %5109 }
 0x8e8   :  { %v4467_v51 = vadd.f32 1.0, %v5110_v58 }
 0x8e9   :  { %v5112_v14 = vpop.eup %5111 }
 0x8ea   :  { %v5114_v49 = vpop.eup %5113  ;;  %5121 = vrcp.f32 %v4467_v51  ;;  %v4473_v13 = vadd.f32 1.0, %v5112_v14 }
 0x8eb   :  { %v5116_v15 = vpop.eup %5115 }
 0x8ec   :  { %5123 = vrcp.f32 %v4473_v13  ;;  %v4240_v10 = vmul.f32 %v5116_v15, %v5114_v49  ;;  %v5118_v53 = vpop.eup %5117 }
 0x8ed   :  { %v5120_v32 = vpop.eup %5119 }
 0x8ee   :  { %4243 = vst [vmem:[#allocation12 + $0x30] sm:$0xff] %v4240_v10  ;;  %4684 = vmatprep.mubr.f32.mxu0 %v4240_v10  ;;  %4755 = vmatprep.mubr.f32.mxu1 %v4240_v10  ;;  %v4480_v7 = vadd.f32 1.0, %v5120_v32 }
 0x8f0   :  { %5125 = vrcp.f32 %v4480_v7 }
 0x8f7   :  { %v5122_v6 = vpop.eup %5121 }
 0x8f8   :  { %v4484_v25 = vmul.f32 %v5122_v6, %v5118_v53 }
 0x8f9   :  { %v5124_v50 = vpop.eup %5123 }
 0x8fa   :  { %v4483_v57 = vmul.f32 %v5124_v50, %v8379_v36 }
 0x8fc   :  { %v4485_v35 = vadd.f32 %v4484_v25, %v4483_v57 }
 0x8fd   :  { %v5126_v2 = vpop.eup %5125 }
 0x8fe   :  { %5127 = vtanh.f32 %v4485_v35 }
 0x90b   :  { %v5128_v16 = vpop.eup %5127 }
 0x90c   :  { %v4487_v45 = vmul.f32 %v5128_v16, %v5126_v2 }
 0x90e   :  { %4685 = vmatmul.mubr.f32.vlgmr.msra.gmra.mxu0 %v4487_v45  ;;  %4756 = vmatmul.mubr.f32.vlgmr.msra.gmra.mxu1 %v4487_v45 }
 0x9ce   :  { %v4686_v12 = vpop.f32.mrf.mxu0  ;;  %v4757_v48 = vpop.f32.mrf.mxu1 }
 0x9cf   :  { %v4687_v42 = vadd.f32 %v4686_v12, %v10219_v38  ;;  %v4758_v9 = vadd.f32 %v4757_v48, %v10222_v5 }
 0x9d0   :  { %v4688_v62 = vpop.f32.mrf.mxu0  ;;  %v4759_v36 = vpop.f32.mrf.mxu1 }
 0x9d1   :  { %v4877_v11 = vmul.f32 -1.442695, %v4687_v42  ;;  %v4689_v43 = vadd.f32 %v4688_v62, %v10220_v52  ;;  %v4760_v61 = vadd.f32 %v4759_v36, %v10221_v40 }
 0x9d3   :  { %5129 = vpow2.f32 %v4877_v11  ;;  %v4878_v60 = vmul.f32 -1.442695, %v4689_v43  ;;  %v4879_v46 = vmul.f32 -1.442695, %v4760_v61 }
 0x9d5   :  { %5131 = vpow2.f32 %v4878_v60 }
 0x9d6   :  { %5133 = vpow2.f32 %v4879_v46 }
 0x9e0   :  { %v5130_v8 = vpop.eup %5129 }
 0x9e1   :  { %v4766_v54 = vadd.f32 1.0, %v5130_v8 }
 0x9e2   :  { %v5132_v47 = vpop.eup %5131 }
 0x9e3   :  { %5135 = vrcp.f32 %v4766_v54  ;;  %v4772_v38 = vadd.f32 1.0, %v5132_v47  ;;  %v5134_v3 = vpop.eup %5133 }
 0x9e4   :  { %5137 = vtanh.f32 %v4758_v9  ;;  %v4779_v18 = vadd.f32 1.0, %v5134_v3 }
 0x9e5   :  { %5139 = vrcp.f32 %v4772_v38 }
 0x9e6   :  { %5141 = vrcp.f32 %v4779_v18 }
 0x9f0   :  { %v5136_v52 = vpop.eup %5135 }
 0x9f1   :  { %v5138_v63 = vpop.eup %5137 }
 0x9f2   :  { %v5140_v1 = vpop.eup %5139  ;;  %v4783_v19 = vmul.f32 %v5138_v63, %v5136_v52 }
 0x9f3   :  { %v4782_v21 = vmul.f32 %v5140_v1, %v8559_v44  ;;  %v5142_v5 = vpop.eup %5141 }
 0x9f5   :  { %v4784_v40 = vadd.f32 %v4783_v19, %v4782_v21 }
 0x9f7   :  { %5143 = vtanh.f32 %v4784_v40 }
 0xa04   :  { %v5144_v23 = vpop.eup %5143 }
 0xa05   :  { %v4786_v24 = vmul.f32 %v5144_v23, %v5142_v5 }
 0xa07   :  { %4789 = vst [vmem:[#allocation12 + $0x38] sm:$0xff] %v4786_v24 }
 0xa08   :  { %5224 = shalt.err (!%p5221_p5)
}
 0xa09   :  { %s5246_s7 = smov 128   ;;  %s5247_s8 = smov 8  }
 0xa0a   :  { %4802 = dma.vmem_to_hbm [thread:$0]  %s4797_s29, 1024, %s8579_s6, [#allocation8], %s5246_s7, %s5246_s7, %s5247_s8  }
 0xa0b   :  { %5237 = dma.done.wait [#allocation8], 1024  }
 0xa0c   :  { %5238 = vsyncadd [#allocation8], 4294966272 }
 0xa0d   :  { %4806 = vsyncpa [#allocation7], 1 }
 0xa0e   :  { %4807 = vsyncpa [#allocation10], 1 }
 0xa0f   :  { %4808 = vsyncpa [#allocation8], 1 }

</bundles_post_ra>
